<compile_context>
chip_gen: v5e
topology: v5e:2x2
jax: 0.10.0
libtpu: 0.0.40
codegen_flags: <defaults>
</compile_context>

<pallas_src>
import functools
import math

import jax
import jax.numpy as jnp
from jax.experimental import pallas as pl
from jax.experimental.pallas import tpu as pltpu

_LOG_EPS = math.log(1e-10)  # frac >= 1e-10  <=>  log(frac) >= log(1e-10)


def _block_index(idx, n):
    """idx // n for non-negative int32 iotas, without vector integer division."""
    if n & (n - 1) == 0:  # power of two -> plain shift on the VPU
        return jnp.right_shift(idx, int(n).bit_length() - 1)
    # Exact for idx << 2^22: (idx + 0.5)/n is never within f32 rounding of an integer.
    return jnp.floor((idx.astype(jnp.float32) + 0.5) * (1.0 / n)).astype(jnp.int32)


def _supcon_packed_kernel(pred_ref, lab_ref, out_ref, *, n, inv_temperature,
                          neg_inv_batch_size):
    pred = pred_ref[...].astype(jnp.float32)                 # (N, d), N = TB*n
    N = pred.shape[0]
    tb = N // n                                               # batch elements per step

    # --- cosine similarity: normalize rows once, one MXU Gram.  HIGHEST precision
    #     so bf16 passes don't get amplified ~10x by exp(p_norm / T). ---
    sumsq = jnp.sum(pred * pred, axis=-1, keepdims=True)      # (N, 1)
    inv_norm = 1.0 / jnp.sqrt(jnp.maximum(sumsq, 1e-8))       # norm clamp ~ cosine eps
    pred_n = pred * inv_norm
    p_norm = jax.lax.dot_general(                             # (N, N), no transpose
        pred_n, pred_n, (((1,), (1,)), ((), ())),
        preferred_element_type=jnp.float32,
        precision=jax.lax.Precision.HIGHEST)
    p_norm = jnp.maximum(p_norm, 1e-10)                       # p_norm[p_norm<1e-10]=1e-10
    s = p_norm * inv_temperature                              # p_norm / T

    # --- masks: labels arrive once as a column; row orientation derived in-kernel
    #     via lane broadcast + square transpose (idle XLU, no second DMA). ---
    lab = lab_ref[...].astype(jnp.float32)                    # (N, 1) small ints, exact
    lab_b = jnp.broadcast_to(lab, (N, N))
    same_label = lab_b == lab_b.T

    row = jax.lax.broadcasted_iota(jnp.int32, (N, N), 0)
    col = jax.lax.broadcasted_iota(jnp.int32, (N, N), 1)
    same_block = _block_index(row, n) == _block_index(col, n)  # block-diagonal mask
    not_diag = row != col

    pos = same_label & same_block & not_diag
    neg = (~same_label) & same_block

    # --- denominators: per-COLUMN sums over negatives (torch.sum(..., axis=0)),
    #     computed as a (1,N)x(N,N) matmul on the otherwise-idle MXU. ---
    dist = jnp.exp(s)                                          # (N, N)
    ones_row = jnp.ones((1, N), jnp.float32)
    denom = jax.lax.dot_general(
        ones_row, jnp.where(neg, dist, 0.0), (((1,), (0,)), ((), ())),
        preferred_element_type=jnp.float32,
        precision=jax.lax.Precision.HIGHEST)                   # (1, N)
    log_denom = jnp.log(jnp.maximum(denom, 1e-10))             # only N logs

    # log(frac[i,j]) = s[i,j] - log(denom[j]); keep positives with frac >= 1e-10.
    log_frac = s - log_denom
    sel = pos & (log_frac >= _LOG_EPS)
    contrib = jnp.where(sel, log_frac, 0.0)

    # --- per-batch-element (per block) sums -> lane-dense (1, TB) output row. ---
    col_sum = jax.lax.dot_general(
        ones_row, contrib, (((1,), (0,)), ((), ())),
        preferred_element_type=jnp.float32,
        precision=jax.lax.Precision.HIGHEST)                   # (1, N)
    rows_nt = jax.lax.broadcasted_iota(jnp.int32, (N, tb), 0)
    cols_nt = jax.lax.broadcasted_iota(jnp.int32, (N, tb), 1)
    onehot = (_block_index(rows_nt, n) == cols_nt).astype(jnp.float32)   # (N, tb)
    per_b = jax.lax.dot_general(
        col_sum, onehot, (((1,), (0,)), ((), ())),
        preferred_element_type=jnp.float32,
        precision=jax.lax.Precision.HIGHEST)                   # (1, tb)
    out_ref[...] = per_b * neg_inv_batch_size


def supervised_contrastive_loss_batched(pred, target, *, temperature, batch_size,
                                         pack_rows=256):
    """pred: (B, n, d) float, target: (B, n) int labels.  Returns (B,) losses.

    pack_rows: target packed-row count per grid step (256 fills the v6e/v7x MXU
    tile; 128 is enough on v5e).
    """
    B, n, d = pred.shape
    tb = max(1, pack_rows // n)                    # batch elements packed per step
    if B > tb:
        # Multi-step grid: packed row count must be sublane (8) aligned.
        while tb > 1 and (tb * n) % 8 != 0:
            tb -= 1
        if (tb * n) % 8 != 0:
            tb = B                                  # single full-extent block fallback
    num_blocks = -(-B // tb)
    b_pad = num_blocks * tb

    target = target.astype(jnp.int32)
    if b_pad > B:
        pred = jnp.concatenate(
            [pred, jnp.zeros((b_pad - B, n, d), pred.dtype)], axis=0)
        # Unique labels per padded row -> padded blocks have no positives (zero loss);
        # their output lanes are sliced off below anyway.
        pad_lab = jnp.broadcast_to(-1 - jnp.arange(n, dtype=jnp.int32),
                                   (b_pad - B, n))
        target = jnp.concatenate([target, pad_lab], axis=0)

    pred_flat = pred.reshape(b_pad * n, d)          # no dtype cast here (cast in-kernel)
    lab_col = target.reshape(b_pad * n, 1)

    kernel = functools.partial(
        _supcon_packed_kernel, n=n,
        inv_temperature=1.0 / float(temperature),
        neg_inv_batch_size=-1.0 / float(batch_size))

    out = pl.pallas_call(
        kernel,
        out_shape=jax.ShapeDtypeStruct((num_blocks, 1, tb), jnp.float32),
        grid=(num_blocks,),
        in_specs=[
            pl.BlockSpec((tb * n, d), lambda g: (g, 0)),      # packed activations
            pl.BlockSpec((tb * n, 1), lambda g: (g, 0)),      # labels (single aux DMA)
        ],
        out_specs=pl.BlockSpec((None, 1, tb), lambda g: (g, 0, 0)),  # lane-dense losses
        compiler_params=pltpu.CompilerParams(
            dimension_semantics=("parallel",)),               # 2-TC split on v7x (grid>=2)
    )(pred_flat, lab_col)
    return out.reshape(b_pad)[:B]


def supervised_contrastive_loss(pred, target, *, temperature, batch_size):
    """Single evaluation, matching SupervisedContrastiveLoss.forward(pred, target)."""
    out = supervised_contrastive_loss_batched(
        pred[None], target[None], temperature=temperature, batch_size=batch_size)
    return out[0]


def _reference_loss(pred, target, temperature, batch_size):
    """Pure-JAX port of the PyTorch reference (for self-validation)."""
    pred = pred.astype(jnp.float32)
    n, _ = pred.shape
    norms = jnp.sqrt(jnp.sum(pred * pred, axis=-1, keepdims=True))
    dots = jnp.dot(pred, pred.T, precision=jax.lax.Precision.HIGHEST)
    p_norm = dots / jnp.maximum(norms * norms.T, 1e-8)
    p_norm = jnp.where(p_norm < 1e-10, 1e-10, p_norm)
    dist = jnp.exp(p_norm / temperature)
    same = target[:, None] == target[None, :]
    eye = jnp.eye(n, dtype=jnp.float32)
    positives = same.astype(jnp.float32) - eye
    negatives = (~same).astype(jnp.float32)
    denom = jnp.sum(dist * negatives, axis=0)
    denom = jnp.where(denom < 1e-10, 1e-10, denom)
    frac = (dist * positives) / denom[None, :]
    sel = frac >= 1e-10
    return -jnp.sum(jnp.where(sel, jnp.log(jnp.where(sel, frac, 1.0)), 0.0)) / batch_size


if __name__ == "__main__":
    # Module config: classes=4, temperature=0.1, batch_size=8 (n == batch_size).
    classes = 4
    temperature = 0.1
    batch_size = 8
    n, d = 8, 32

    key = jax.random.PRNGKey(0)
    kp, kt = jax.random.split(key)
    pred = jax.random.normal(kp, (n, d), dtype=jnp.float32)
    target = jax.random.randint(kt, (n,), 0, classes, dtype=jnp.int32)

    loss = supervised_contrastive_loss(
        pred, target, temperature=temperature, batch_size=batch_size)
    jax.block_until_ready(loss)

    # HIGHEST-precision Gram -> tolerance tightened from 1e-1 to 1e-3.
    ref = _reference_loss(pred, target, temperature, batch_size)
    assert jnp.allclose(loss, ref, rtol=1e-3, atol=1e-3), (float(loss), float(ref))

    # Packed/batched path: B=50 -> TB=32 elements per step (grid of 2 steps on the
    # parallel axis, so v7x's two TensorCores both get work), with a padded tail.
    B = 50
    kb1, kb2 = jax.random.split(jax.random.PRNGKey(1))
    pred_b = jax.random.normal(kb1, (B, n, d), dtype=jnp.float32)
    tgt_b = jax.random.randint(kb2, (B, n), 0, classes, dtype=jnp.int32)
    losses = supervised_contrastive_loss_batched(
        pred_b, tgt_b, temperature=temperature, batch_size=batch_size)
    jax.block_until_ready(losses)

    refs = jax.vmap(lambda p, t: _reference_loss(p, t, temperature, batch_size))(
        pred_b, tgt_b)
    assert jnp.allclose(losses, refs, rtol=1e-3, atol=1e-3), (losses, refs)

    print("KERNEL_OK")
</pallas_src>

<mosaic_0001>
module attributes {stable_mosaic.version = 11 : i64} {
  func.func @_supcon_packed_kernel(%arg0: i32, %arg1: memref<256x32xf32, #tpu.memory_space<vmem>>, %arg2: memref<256x1xi32, #tpu.memory_space<vmem>>, %arg3: memref<1x1x32xf32, #tpu.memory_space<vmem>>) attributes {dimension_semantics = [#tpu.dimension_semantics<parallel>], iteration_bounds = array<i64: 1>, scalar_prefetch = 0 : i64, scratch_operands = 0 : i64, tpu.core_type = #tpu.core_type<tc>, window_params = [{transform_indices = @transform_0, window_bounds = array<i64: 256, 32>}, {transform_indices = @transform_1, window_bounds = array<i64: 256, 1>}, {transform_indices = @transform_2, window_bounds = array<i64: 1, 1, 32>}]} {
    %c0 = arith.constant 0 : index
    %c0_0 = arith.constant 0 : index
    %0 = vector.load %arg1[%c0, %c0_0] : memref<256x32xf32, #tpu.memory_space<vmem>>, vector<256x32xf32>
    %1 = arith.mulf %0, %0 : vector<256x32xf32>
    %cst = arith.constant dense<0.000000e+00> : vector<256xf32>
    %2 = vector.multi_reduction <add>, %1, %cst [1] : vector<256x32xf32> to vector<256xf32>
    %3 = vector.shape_cast %2 : vector<256xf32> to vector<256x1xf32>
    %cst_1 = arith.constant 9.99999993E-9 : f32
    %4 = vector.broadcast %cst_1 : f32 to vector<256x1xf32>
    %5 = arith.maximumf %3, %4 : vector<256x1xf32>
    %6 = math.sqrt %5 : vector<256x1xf32>
    %cst_2 = arith.constant 1.000000e+00 : f32
    %7 = vector.broadcast %cst_2 : f32 to vector<256x1xf32>
    %8 = arith.divf %7, %6 : vector<256x1xf32>
    %9 = vector.broadcast %8 : vector<256x1xf32> to vector<256x32xf32>
    %10 = arith.mulf %0, %9 : vector<256x32xf32>
    %cst_3 = arith.constant dense<0.000000e+00> : vector<256x256xf32>
    %11 = tpu.matmul %10, %10, %cst_3 {dimension_numbers = #tpu.dot_dimension_numbers<[1], [1], [0], [0], [0, 0, 1, 0], [], []>, precision = #tpu.contract_precision<fp32>} : vector<256x32xf32>, vector<256x32xf32>, vector<256x256xf32> -> vector<256x256xf32>
    %cst_4 = arith.constant 1.000000e-10 : f32
    %12 = vector.broadcast %cst_4 : f32 to vector<256x256xf32>
    %13 = arith.maximumf %11, %12 : vector<256x256xf32>
    %cst_5 = arith.constant 1.000000e+01 : f32
    %14 = vector.broadcast %cst_5 : f32 to vector<256x256xf32>
    %15 = arith.mulf %13, %14 : vector<256x256xf32>
    %c0_6 = arith.constant 0 : index
    %c0_7 = arith.constant 0 : index
    %16 = vector.load %arg2[%c0_6, %c0_7] : memref<256x1xi32, #tpu.memory_space<vmem>>, vector<256x1xi32>
    %17 = arith.sitofp %16 : vector<256x1xi32> to vector<256x1xf32>
    %18 = vector.shape_cast %17 : vector<256x1xf32> to vector<256x1xf32>
    %19 = vector.broadcast %18 : vector<256x1xf32> to vector<256x256xf32>
    %20 = tpu.transpose %19, [1, 0] : vector<256x256xf32> -> vector<256x256xf32>
    %21 = arith.cmpf oeq, %19, %20 : vector<256x256xf32>
    %22 = tpu.iota {dimensions = array<i32: 0>} : vector<256x256xi32>
    %23 = tpu.iota {dimensions = array<i32: 1>} : vector<256x256xi32>
    %c3_i32 = arith.constant 3 : i32
    %24 = vector.broadcast %c3_i32 : i32 to vector<256x256xi32>
    %25 = arith.shrsi %22, %24 : vector<256x256xi32>
    %c3_i32_8 = arith.constant 3 : i32
    %26 = vector.broadcast %c3_i32_8 : i32 to vector<256x256xi32>
    %27 = arith.shrsi %23, %26 : vector<256x256xi32>
    %28 = arith.cmpi eq, %25, %27 : vector<256x256xi32>
    %29 = arith.cmpi ne, %22, %23 : vector<256x256xi32>
    %30 = arith.andi %21, %28 : vector<256x256xi1>
    %31 = arith.andi %30, %29 : vector<256x256xi1>
    %cst_9 = arith.constant dense<true> : vector<256x256xi1>
    %32 = arith.xori %21, %cst_9 : vector<256x256xi1>
    %33 = arith.andi %32, %28 : vector<256x256xi1>
    %34 = math.exp %15 : vector<256x256xf32>
    %cst_10 = arith.constant 1.000000e+00 : f32
    %35 = vector.broadcast %cst_10 : f32 to vector<1x256xf32>
    %cst_11 = arith.constant 0.000000e+00 : f32
    %36 = vector.broadcast %cst_11 : f32 to vector<256x256xf32>
    %37 = arith.select %33, %34, %36 : vector<256x256xi1>, vector<256x256xf32>
    %cst_12 = arith.constant dense<0.000000e+00> : vector<1x256xf32>
    %38 = tpu.matmul %35, %37, %cst_12 {dimension_numbers = #tpu.dot_dimension_numbers<[1], [0], [0], [1], [0, 0, 1, 1], [], []>, precision = #tpu.contract_precision<fp32>} : vector<1x256xf32>, vector<256x256xf32>, vector<1x256xf32> -> vector<1x256xf32>
    %cst_13 = arith.constant 1.000000e-10 : f32
    %39 = vector.broadcast %cst_13 : f32 to vector<1x256xf32>
    %40 = arith.maximumf %38, %39 : vector<1x256xf32>
    %41 = math.log %40 : vector<1x256xf32>
    %42 = vector.broadcast %41 : vector<1x256xf32> to vector<256x256xf32>
    %43 = arith.subf %15, %42 : vector<256x256xf32>
    %cst_14 = arith.constant -23.0258503 : f32
    %44 = vector.broadcast %cst_14 : f32 to vector<256x256xf32>
    %45 = arith.cmpf oge, %43, %44 : vector<256x256xf32>
    %46 = arith.andi %31, %45 : vector<256x256xi1>
    %cst_15 = arith.constant 0.000000e+00 : f32
    %47 = vector.broadcast %cst_15 : f32 to vector<256x256xf32>
    %48 = arith.select %46, %43, %47 : vector<256x256xi1>, vector<256x256xf32>
    %cst_16 = arith.constant dense<0.000000e+00> : vector<1x256xf32>
    %49 = tpu.matmul %35, %48, %cst_16 {dimension_numbers = #tpu.dot_dimension_numbers<[1], [0], [0], [1], [0, 0, 1, 1], [], []>, precision = #tpu.contract_precision<fp32>} : vector<1x256xf32>, vector<256x256xf32>, vector<1x256xf32> -> vector<1x256xf32>
    %50 = tpu.iota {dimensions = array<i32: 0>} : vector<256x32xi32>
    %51 = tpu.iota {dimensions = array<i32: 1>} : vector<256x32xi32>
    %c3_i32_17 = arith.constant 3 : i32
    %52 = vector.broadcast %c3_i32_17 : i32 to vector<256x32xi32>
    %53 = arith.shrsi %50, %52 : vector<256x32xi32>
    %54 = arith.cmpi eq, %53, %51 : vector<256x32xi32>
    %55 = arith.extui %54 : vector<256x32xi1> to vector<256x32xi32>
    %56 = arith.sitofp %55 : vector<256x32xi32> to vector<256x32xf32>
    %cst_18 = arith.constant dense<0.000000e+00> : vector<1x32xf32>
    %57 = tpu.matmul %49, %56, %cst_18 {dimension_numbers = #tpu.dot_dimension_numbers<[1], [0], [0], [1], [0, 0, 1, 1], [], []>, precision = #tpu.contract_precision<fp32>} : vector<1x256xf32>, vector<256x32xf32>, vector<1x32xf32> -> vector<1x32xf32>
    %cst_19 = arith.constant -1.250000e-01 : f32
    %58 = vector.broadcast %cst_19 : f32 to vector<1x32xf32>
    %59 = arith.mulf %57, %58 : vector<1x32xf32>
    %c0_20 = arith.constant 0 : index
    %c0_21 = arith.constant 0 : index
    %c0_22 = arith.constant 0 : index
    %60 = vector.load %arg3[%c0_20, %c0_21, %c0_22] : memref<1x1x32xf32, #tpu.memory_space<vmem>>, vector<1x1x32xf32>
    %61 = vector.shape_cast %60 : vector<1x1x32xf32> to vector<1x32xf32>
    %62 = vector.shape_cast %59 : vector<1x32xf32> to vector<1x1x32xf32>
    tpu.vector_store %arg3[%c0_20, %c0_21, %c0_22], %62 {strides = array<i32>} : memref<1x1x32xf32, #tpu.memory_space<vmem>>, vector<1x1x32xf32>,
    return
  }
  func.func @transform_0(%arg0: i32) -> (i32, i32) {
    %c0_i32 = arith.constant 0 : i32
    %c0_i32_0 = arith.constant 0 : i32
    return %arg0, %c0_i32 : i32, i32
  }
  func.func @transform_1(%arg0: i32) -> (i32, i32) {
    %c0_i32 = arith.constant 0 : i32
    %c0_i32_0 = arith.constant 0 : i32
    return %arg0, %c0_i32 : i32, i32
  }
  func.func @transform_2(%arg0: i32) -> (i32, i32, i32) {
    %c0_i32 = arith.constant 0 : i32
    %c0_i32_0 = arith.constant 0 : i32
    %c0_i32_1 = arith.constant 0 : i32
    return %arg0, %c0_i32, %c0_i32_0 : i32, i32, i32
  }
}

</mosaic_0001>

<bundles_post_ra>
// kernel: tpu_custom_call.1
= control target key start
LH: loop header
LB: loop body
LE: loop exit
PB: predicated region body
PF: predicated region fallthrough
CT: control target
= control target key end

     0   :  { %vm76_vm0 = vcmask 261120   ;;  %s18091_s0 = inlined_call_operand.vmem [shape: f32[256,32], index: 0, kind: input, shape index: {}]   ;;  %s18092_s1 = inlined_call_operand.vmem [shape: s32[256,1], index: 1, kind: input, shape index: {}]   ;;  %s18093_s2 = inlined_call_operand.hbm [shape: f32[1,1,32], index: 2, kind: output, shape index: {}]  }
   0x1   :  { %v9080_v0 = vld [vmem:[%s18091_s0 + $0x78] sm:$0xff]  ;;  %v9085_v1 = vld [vmem:[%s18091_s0 + $0x68] sm:$0xff]  ;;  %v9101_v6 = vld [vmem:[%s18091_s0 + $0x70] sm:$0xff] }
   0x2   :  { %v9090_v2 = vld [vmem:[%s18091_s0 + $0x58] sm:$0xff]  ;;  %v59_v3 = vmul.f32 %v9080_v0, %v9080_v0  ;;  %v57_v4 = vmul.f32 %v9085_v1, %v9085_v1  ;;  %v9106_v7 = vld [vmem:[%s18091_s0 + $0x60] sm:$0xff]  ;;  %v9114_v11 = vld [vmem:[%s18091_s0 + $0x50] sm:$0xff]  ;;  %v58_v12 = vmul.f32 %v9101_v6, %v9101_v6 }
   0x3   :  { %v55_v5 = vmul.f32 %v9090_v2, %v9090_v2  ;;  %v56_v13 = vmul.f32 %v9106_v7, %v9106_v7 }
   0x4   :  { %v122_v8 = vsel %vm76_vm0, %v59_v3, 0.0  ;;  %v116_v9 = vsel %vm76_vm0, %v57_v4, 0.0 }
   0x5   :  { %v110_v10 = vsel %vm76_vm0, %v55_v5, 0.0  ;;  %123 = vadd.xlane.f32.xlu0 %v122_v8  ;;  %117 = vadd.xlane.f32.xlu1 %v116_v9 }
   0x6   :  { %111 = vadd.xlane.f32.xlu2 %v110_v10 }
   0x7   :  { %7 = vsyncpa [#allocation3], 0  ;;  %v54_v14 = vmul.f32 %v9114_v11, %v9114_v11  ;;  %v119_v15 = vsel %vm76_vm0, %v58_v12, 0.0  ;;  %v113_v16 = vsel %vm76_vm0, %v56_v13, 0.0  ;;  %v9128_v18 = vld [vmem:[%s18091_s0 + $0x48] sm:$0xff]  ;;  %v9133_v19 = vld [vmem:[%s18091_s0 + $0x40] sm:$0xff] }
   0x8   :  { %v9138_v20 = vld [vmem:[%s18091_s0 + $0x38] sm:$0xff]  ;;  %v53_v21 = vmul.f32 %v9128_v18, %v9128_v18  ;;  %v52_v22 = vmul.f32 %v9133_v19, %v9133_v19  ;;  %v18_v27 = vld [vmem:[%s18091_s0 + $0x30] sm:$0xff]  ;;  %v17_v28 = vld [vmem:[%s18091_s0 + $0x28] sm:$0xff]  ;;  %s8603_s17 = sshll.u32 %s18093_s2, 4  ;;  %s8604_s17 = int_to_ptr.hbm [resolvable:$true] %s8603_s17 }
   0x9   :  { %v107_v17 = vsel %vm76_vm0, %v54_v14, 0.0  ;;  %v51_v23 = vmul.f32 %v9138_v20, %v9138_v20  ;;  %v16_v29 = vld [vmem:[%s18091_s0 + $0x20] sm:$0xff]  ;;  %v50_v30 = vmul.f32 %v18_v27, %v18_v27  ;;  %v49_v31 = vmul.f32 %v17_v28, %v17_v28  ;;  %v15_v36 = vld [vmem:[%s18091_s0 + $0x18] sm:$0xff]  ;;  %v14_v37 = vld [vmem:[%s18091_s0 + $0x10] sm:$0xff] }
   0xa   :  { %v104_v24 = vsel %vm76_vm0, %v53_v21, 0.0  ;;  %v101_v25 = vsel %vm76_vm0, %v52_v22, 0.0  ;;  %v48_v32 = vmul.f32 %v16_v29, %v16_v29  ;;  %v13_v38 = vld [vmem:[%s18091_s0 + $0x8] sm:$0xff]  ;;  %v47_v39 = vmul.f32 %v15_v36, %v15_v36  ;;  %v28_v45 = vld [vmem:[%s18091_s0 + $0x80] sm:$0xff]  ;;  %v31_v54 = vld [vmem:[%s18091_s0 + $0x98] sm:$0xff] }
   0xb   :  { %v98_v26 = vsel %vm76_vm0, %v51_v23, 0.0  ;;  %v95_v33 = vsel %vm76_vm0, %v50_v30, 0.0  ;;  %v92_v34 = vsel %vm76_vm0, %v49_v31, 0.0  ;;  %v46_v40 = vmul.f32 %v14_v37, %v14_v37  ;;  %v12_v46 = vld [vmem:[%s18091_s0] sm:$0xff]  ;;  %v29_v47 = vld [vmem:[%s18091_s0 + $0x88] sm:$0xff]  ;;  %v30_v55 = vld [vmem:[%s18091_s0 + $0x90] sm:$0xff] }
   0xc   :  { %v89_v35 = vsel %vm76_vm0, %v48_v32, 0.0  ;;  %v45_v41 = vmul.f32 %v13_v38, %v13_v38  ;;  %v86_v42 = vsel %vm76_vm0, %v47_v39, 0.0  ;;  %v60_v48 = vmul.f32 %v28_v45, %v28_v45  ;;  %v32_v56 = vld [vmem:[%s18091_s0 + $0xa0] sm:$0xff]  ;;  %v34_v63 = vld [vmem:[%s18091_s0 + $0xb0] sm:$0xff]  ;;  %v33_v3 = vld [vmem:[%s18091_s0 + $0xa8] sm:$0xff] }
   0xd   :  { %120 = vadd.xlane.f32.xlu0 %v119_v15  ;;  %114 = vadd.xlane.f32.xlu1 %v113_v16  ;;  %v83_v43 = vsel %vm76_vm0, %v46_v40, 0.0  ;;  %v44_v49 = vmul.f32 %v12_v46, %v12_v46  ;;  %v61_v50 = vmul.f32 %v29_v47, %v29_v47  ;;  %v63_v57 = vmul.f32 %v31_v54, %v31_v54  ;;  %v35_v4 = vld [vmem:[%s18091_s0 + $0xb8] sm:$0xff]  ;;  %v36_v15 = vld [vmem:[%s18091_s0 + $0xc0] sm:$0xff]  ;;  %v42_v16 = vld [vmem:[%s18091_s0 + $0xf0] sm:$0xff] }
   0xe   :  { %108 = vadd.xlane.f32.xlu2 %v107_v17  ;;  %v80_v44 = vsel %vm76_vm0, %v45_v41, 0.0  ;;  %v125_v51 = vsel %vm76_vm0, %v60_v48, 0.0  ;;  %v62_v58 = vmul.f32 %v30_v55, %v30_v55  ;;  %v64_v59 = vmul.f32 %v32_v56, %v32_v56  ;;  %v43_v14 = vld [vmem:[%s18091_s0 + $0xf8] sm:$0xff]  ;;  %v37_v27 = vld [vmem:[%s18091_s0 + $0xc8] sm:$0xff]  ;;  %v40_v28 = vld [vmem:[%s18091_s0 + $0xe0] sm:$0xff] }
   0xf   :  { %v77_v52 = vsel %vm76_vm0, %v44_v49, 0.0  ;;  %v128_v53 = vsel %vm76_vm0, %v61_v50, 0.0  ;;  %v134_v60 = vsel %vm76_vm0, %v63_v57, 0.0  ;;  %v66_v5 = vmul.f32 %v34_v63, %v34_v63  ;;  %v38_v36 = vld [vmem:[%s18091_s0 + $0xd0] sm:$0xff] }
  0x10   :  { %v131_v61 = vsel %vm76_vm0, %v62_v58, 0.0  ;;  %v137_v62 = vsel %vm76_vm0, %v64_v59, 0.0  ;;  %v65_v8 = vmul.f32 %v33_v3, %v33_v3  ;;  %v67_v9 = vmul.f32 %v35_v4, %v35_v4 }
  0x11   :  { %v143_v10 = vsel %vm76_vm0, %v66_v5, 0.0  ;;  %v75_v17 = vmul.f32 %v43_v14, %v43_v14  ;;  %v68_v21 = vmul.f32 %v36_v15, %v36_v15  ;;  %v74_v22 = vmul.f32 %v42_v16, %v42_v16 }
  0x12   :  { %v140_v12 = vsel %vm76_vm0, %v65_v8, 0.0  ;;  %v146_v13 = vsel %vm76_vm0, %v67_v9, 0.0  ;;  %v69_v30 = vmul.f32 %v37_v27, %v37_v27  ;;  %v72_v31 = vmul.f32 %v40_v28, %v40_v28 }
  0x13   :  { %v170_v23 = vsel %vm76_vm0, %v75_v17, 0.0  ;;  %v70_v38 = vmul.f32 %v38_v36, %v38_v36 }
  0x15   :  { %105 = vadd.xlane.f32.xlu0 %v104_v24  ;;  %102 = vadd.xlane.f32.xlu1 %v101_v25  ;;  %v149_v24 = vsel %vm76_vm0, %v68_v21, 0.0  ;;  %v167_v25 = vsel %vm76_vm0, %v74_v22, 0.0  ;;  %v155_v40 = vsel %vm76_vm0, %v70_v38, 0.0 }
  0x16   :  { %99 = vadd.xlane.f32.xlu2 %v98_v26  ;;  %v41_v26 = vld [vmem:[%s18091_s0 + $0xe8] sm:$0xff] }
  0x17   :  { %v73_v29 = vmul.f32 %v41_v26, %v41_v26 }
  0x19   :  { %v164_v32 = vsel %vm76_vm0, %v73_v29, 0.0 }
  0x1d   :  { %96 = vadd.xlane.f32.xlu0 %v95_v33  ;;  %93 = vadd.xlane.f32.xlu1 %v92_v34  ;;  %v152_v33 = vsel %vm76_vm0, %v69_v30, 0.0  ;;  %v161_v34 = vsel %vm76_vm0, %v72_v31, 0.0 }
  0x1e   :  { %90 = vadd.xlane.f32.xlu2 %v89_v35  ;;  %v39_v35 = vld [vmem:[%s18091_s0 + $0xd8] sm:$0xff] }
  0x1f   :  { %v71_v37 = vmul.f32 %v39_v35, %v39_v35 }
  0x21   :  { %v158_v39 = vsel %vm76_vm0, %v71_v37, 0.0 }
  0x25   :  { %87 = vadd.xlane.f32.xlu0 %v86_v42  ;;  %84 = vadd.xlane.f32.xlu1 %v83_v43 }
  0x26   :  { %81 = vadd.xlane.f32.xlu2 %v80_v44 }
  0x2d   :  { %126 = vadd.xlane.f32.xlu1 %v125_v51  ;;  %78 = vadd.xlane.f32.xlu0 %v77_v52 }
  0x2e   :  { %129 = vadd.xlane.f32.xlu2 %v128_v53 }
  0x35   :  { %135 = vadd.xlane.f32.xlu1 %v134_v60  ;;  %132 = vadd.xlane.f32.xlu0 %v131_v61 }
  0x36   :  { %138 = vadd.xlane.f32.xlu2 %v137_v62 }
  0x3d   :  { %144 = vadd.xlane.f32.xlu1 %v143_v10  ;;  %141 = vadd.xlane.f32.xlu0 %v140_v12 }
  0x3e   :  { %147 = vadd.xlane.f32.xlu2 %v146_v13 }
  0x45   :  { %171 = vadd.xlane.f32.xlu1 %v170_v23  ;;  %150 = vadd.xlane.f32.xlu0 %v149_v24 }
  0x46   :  { %168 = vadd.xlane.f32.xlu2 %v167_v25 }
  0x4d   :  { %165 = vadd.xlane.f32.xlu1 %v164_v32  ;;  %153 = vadd.xlane.f32.xlu0 %v152_v33 }
  0x4e   :  { %162 = vadd.xlane.f32.xlu2 %v161_v34 }
  0x55   :  { %159 = vadd.xlane.f32.xlu1 %v158_v39  ;;  %156 = vadd.xlane.f32.xlu0 %v155_v40 }
  0x78   :  { %v124_v41 = vpop.xlane.xlu0 %123  ;;  %v118_v42 = vpop.xlane.xlu1 %117 }
  0x79   :  { %v188_v43 = vmax.f32 %v124_v41, 1e-08  ;;  %v9241_v44 = vmax.f32 %v118_v42, 1e-08  ;;  %v112_v45 = vpop.xlane.xlu2 %111 }
  0x7a   :  { %v9243_v46 = vmax.f32 %v112_v45, 1e-08 }
  0x7b   :  { %8748 = vrsqrt.f32 %v188_v43  ;;  %vm392_vm1 = vcmp.eq.f32.partialorder %v188_v43, inf  ;;  %vm394_vm2 = vcmp.eq.f32.partialorder %v188_v43, 0.0  ;;  %v395_v9 = vand.u32 2147483648, %v188_v43 }
  0x7c   :  { %8750 = vrsqrt.f32 %v9241_v44  ;;  %vm368_vm3 = vcmp.eq.f32.partialorder %v9241_v44, inf  ;;  %vm370_vm4 = vcmp.eq.f32.partialorder %v9241_v44, 0.0  ;;  %v371_v21 = vand.u32 2147483648, %v9241_v44 }
  0x7d   :  { %8752 = vrsqrt.f32 %v9243_v46  ;;  %vm344_vm5 = vcmp.eq.f32.partialorder %v9243_v46, inf  ;;  %vm346_vm6 = vcmp.eq.f32.partialorder %v9243_v46, 0.0  ;;  %v347_v35 = vand.u32 2147483648, %v9243_v46 }
  0x80   :  { %v121_v47 = vpop.xlane.xlu0 %120  ;;  %v115_v48 = vpop.xlane.xlu1 %114 }
  0x81   :  { %v8749_v49 = vpop.eup %8748  ;;  %v9247_v50 = vmax.f32 %v121_v47, 1e-08  ;;  %v9249_v51 = vmax.f32 %v115_v48, 1e-08  ;;  %v109_v52 = vpop.xlane.xlu2 %108 }
  0x82   :  { %v8751_v53 = vpop.eup %8750  ;;  %v386_v54 = vmul.f32 %v8749_v49, %v188_v43  ;;  %v9251_v55 = vmax.f32 %v109_v52, 1e-08 }
  0x83   :  { %v8753_v56 = vpop.eup %8752  ;;  %v362_v57 = vmul.f32 %v8751_v53, %v9241_v44  ;;  %8754 = vrsqrt.f32 %v9247_v50  ;;  %vm380_vm7 = vcmp.eq.f32.partialorder %v9247_v50, inf  ;;  %vm382_vm8 = vcmp.eq.f32.partialorder %v9247_v50, 0.0 }
  0x84   :  { %v387_v58 = vmul.f32 %v8749_v49, %v386_v54  ;;  %v338_v59 = vmul.f32 %v8753_v56, %v9243_v46  ;;  %8756 = vrsqrt.f32 %v9249_v51  ;;  %v383_v38 = vand.u32 2147483648, %v9247_v50 }
  0x85   :  { %v363_v60 = vmul.f32 %v8751_v53, %v362_v57  ;;  %8758 = vrsqrt.f32 %v9251_v55  ;;  %vm356_vm9 = vcmp.eq.f32.partialorder %v9249_v51, inf  ;;  %vm358_vm10 = vcmp.eq.f32.partialorder %v9249_v51, 0.0 }
  0x86   :  { %v388_v61 = vmul.f32 0.5, %v387_v58  ;;  %v339_v62 = vmul.f32 %v8753_v56, %v338_v59  ;;  %v359_v54 = vand.u32 2147483648, %v9249_v51  ;;  %vm332_vm14 = vcmp.eq.f32.partialorder %v9251_v55, inf }
  0x87   :  { %v364_v63 = vmul.f32 0.5, %v363_v60 }
  0x88   :  { %v389_v3 = vsub.f32 1.5, %v388_v61  ;;  %v340_v4 = vmul.f32 0.5, %v339_v62  ;;  %v106_v5 = vpop.xlane.xlu0 %105  ;;  %v103_v37 = vpop.xlane.xlu1 %102 }
  0x89   :  { %v8755_v8 = vpop.eup %8754  ;;  %v365_v10 = vsub.f32 1.5, %v364_v63  ;;  %v9258_v12 = vmax.f32 %v106_v5, 1e-08  ;;  %v9296_v47 = vmax.f32 %v103_v37, 1e-08  ;;  %v100_v48 = vpop.xlane.xlu2 %99 }
  0x8a   :  { %v8757_v13 = vpop.eup %8756  ;;  %v390_v14 = vmul.f32 %v8749_v49, %v389_v3  ;;  %v341_v15 = vsub.f32 1.5, %v340_v4  ;;  %v374_v16 = vmul.f32 %v8755_v8, %v9247_v50  ;;  %v9312_v60 = vmax.f32 %v100_v48, 1e-08 }
  0x8b   :  { %v366_v17 = vmul.f32 %v8751_v53, %v365_v10  ;;  %v350_v22 = vmul.f32 %v8757_v13, %v9249_v51  ;;  %v9265_v23 = vpop.eup %8758  ;;  %8760 = vrsqrt.f32 %v9258_v12  ;;  %v323_v59 = vand.u32 2147483648, %v9258_v12 }
  0x8c   :  { %v391_v24 = vmul.f32 %v390_v14, %v188_v43  ;;  %v342_v25 = vmul.f32 %v8753_v56, %v341_v15  ;;  %v375_v26 = vmul.f32 %v8755_v8, %v374_v16  ;;  %v326_v32 = vmul.f32 %v9265_v23, %v9251_v55 }
  0x8d   :  { %v367_v27 = vmul.f32 %v366_v17, %v9241_v44  ;;  %v351_v28 = vmul.f32 %v8757_v13, %v350_v22  ;;  %v335_v56 = vand.u32 2147483648, %v9251_v55 }
  0x8e   :  { %v393_v29 = vsel %vm392_vm1, %v188_v43, %v391_v24  ;;  %v343_v30 = vmul.f32 %v342_v25, %v9243_v46  ;;  %v376_v31 = vmul.f32 0.5, %v375_v26  ;;  %v327_v45 = vmul.f32 %v9265_v23, %v326_v32 }
  0x8f   :  { %v9276_v33 = vsel %vm394_vm2, %v395_v9, %v393_v29  ;;  %v369_v34 = vsel %vm368_vm3, %v9241_v44, %v367_v27  ;;  %v352_v36 = vmul.f32 0.5, %v351_v28  ;;  %vm334_vm2 = vcmp.eq.f32.partialorder %v9251_v55, 0.0 }
  0x90   :  { %8762 = vrcp.f32 %v9276_v33  ;;  %v9288_v39 = vsel %vm370_vm4, %v371_v21, %v369_v34  ;;  %v345_v40 = vsel %vm344_vm5, %v9243_v46, %v343_v30  ;;  %v377_v41 = vsub.f32 1.5, %v376_v31 }
  0x91   :  { %v353_v42 = vsub.f32 1.5, %v352_v36  ;;  %v825_v43 = vand.u32 2147483648, %v9276_v33  ;;  %8764 = vrcp.f32 %v9288_v39  ;;  %v9298_v49 = vpop.eup %8760  ;;  %v823_v44 = vand.u32 2147483647, %v9276_v33 }
  0x92   :  { %v9303_v52 = vsel %vm346_vm6, %v347_v35, %v345_v40  ;;  %v378_v53 = vmul.f32 %v8755_v8, %v377_v41  ;;  %vm819_vm11 = vweird.f32 %v9276_v33  ;;  %v328_v62 = vmul.f32 0.5, %v327_v45 }
  0x93   :  { %8766 = vrcp.f32 %v9303_v52  ;;  %v354_v58 = vmul.f32 %v8757_v13, %v353_v42  ;;  %v826_v61 = vor.u32 1.1754944e-38, %v825_v43  ;;  %vm9317_vm12 = vcmp.eq.f32.partialorder %v823_v44, 8.507059e+37 }
  0x94   :  { %v379_v57 = vmul.f32 %v378_v53, %v9247_v50  ;;  %8768 = vrsqrt.f32 %v9296_v47  ;;  %v314_v8 = vmul.f32 %v9298_v49, %v9258_v12  ;;  %vm789_vm13 = vweird.f32 %v9288_v39 }
  0x95   :  { %v355_v5 = vmul.f32 %v354_v58, %v9249_v51  ;;  %v793_v10 = vand.u32 2147483647, %v9288_v39  ;;  %v329_v14 = vsub.f32 1.5, %v328_v62  ;;  %v795_v17 = vand.u32 2147483648, %v9288_v39 }
  0x96   :  { %v8763_v46 = vpop.eup %8762  ;;  %v381_v4 = vsel %vm380_vm7, %v9247_v50, %v379_v57  ;;  %vm759_vm1 = vweird.f32 %v9303_v52  ;;  %v763_v22 = vand.u32 2147483647, %v9303_v52  ;;  %v315_v27 = vmul.f32 %v9298_v49, %v314_v8 }
  0x97   :  { %v815_v63 = vmul.f32 %v8763_v46, %v9276_v33  ;;  %v8765_v9 = vpop.eup %8764  ;;  %v9331_v13 = vsel %vm382_vm8, %v383_v38, %v381_v4  ;;  %vm820_vm15 = vweird.f32 %v8763_v46  ;;  %v357_v50 = vsel %vm356_vm9, %v9249_v51, %v355_v5 }
  0x98   :  { %v785_v16 = vmul.f32 %v8765_v9, %v9288_v39  ;;  %8770 = vrcp.f32 %v9331_v13  ;;  %vm790_vm3 = vweird.f32 %v8765_v9  ;;  %v765_v29 = vand.u32 2147483648, %v9303_v52  ;;  %vm821_vm4 = vmor %vm819_vm11, %vm820_vm15 }
  0x99   :  { %v816_v15 = vsub.f32 1.0, %v815_v63  ;;  %v9337_v21 = vpop.eup %8766  ;;  %v9353_v30 = vsel %vm358_vm10, %v359_v54, %v357_v50  ;;  %v330_v31 = vmul.f32 %v9265_v23, %v329_v14  ;;  %vm9360_vm5 = vcmp.eq.f32.partialorder %v793_v10, 8.507059e+37  ;;  %vm9375_vm7 = vmor %vm789_vm13, %vm790_vm3 }
  0x9a   :  { %v786_v25 = vsub.f32 1.0, %v785_v16  ;;  %v755_v26 = vmul.f32 %v9337_v21, %v9303_v52  ;;  %v9348_v28 = vpop.eup %8768  ;;  %8772 = vrcp.f32 %v9353_v30  ;;  %v796_v37 = vor.u32 1.1754944e-38, %v795_v17 }
  0x9b   :  { %v817_v24 = vmul.f32 %v8763_v46, %v816_v15  ;;  %vm9364_vm6 = vcmp.eq.f32.partialorder %v763_v22, 8.507059e+37  ;;  %v331_v23 = vmul.f32 %v330_v31, %v9251_v55  ;;  %v316_v43 = vmul.f32 0.5, %v315_v27 }
  0x9c   :  { %v787_v34 = vmul.f32 %v8765_v9, %v786_v25  ;;  %v756_v35 = vsub.f32 1.0, %v755_v26  ;;  %vm760_vm8 = vweird.f32 %v9337_v21  ;;  %v302_v44 = vmul.f32 %v9348_v28, %v9296_v47 }
  0x9d   :  { %v818_v32 = vadd.f32 %v8763_v46, %v817_v24  ;;  %v808_v39 = vand.u32 2147483647, %v9331_v13  ;;  %vm320_vm10 = vcmp.eq.f32.partialorder %v9258_v12, inf  ;;  %vm9402_vm11 = vmor %vm759_vm1, %vm760_vm8  ;;  %v317_v5 = vsub.f32 1.5, %v316_v43 }
  0x9e   :  { %v8771_v38 = vpop.eup %8770  ;;  %v788_v41 = vadd.f32 %v8765_v9, %v787_v34  ;;  %v757_v42 = vmul.f32 %v9337_v21, %v756_v35  ;;  %v766_v14 = vor.u32 1.1754944e-38, %v765_v29  ;;  %vm804_vm13 = vweird.f32 %v9331_v13 }
  0x9f   :  { %v822_v40 = vsel %vm821_vm4, %v8763_v46, %v818_v32  ;;  %v800_v48 = vmul.f32 %v8771_v38, %v9331_v13  ;;  %vm805_vm9 = vweird.f32 %v8771_v38  ;;  %v810_v46 = vand.u32 2147483648, %v9331_v13 }
  0xa0   :  { %v827_v33 = vsel %vm9317_vm12, %v826_v61, %v822_v40  ;;  %v792_v54 = vsel %vm9375_vm7, %v8765_v9, %v788_v41  ;;  %v758_v57 = vadd.f32 %v9337_v21, %v757_v42  ;;  %v333_v61 = vsel %vm332_vm14, %v9251_v55, %v331_v23  ;;  %v8773_v62 = vpop.eup %8772  ;;  %vm806_vm15 = vmor %vm804_vm13, %vm805_vm9 }
  0xa1   :  { %v1084_v53 = vmul.f32 %v827_v33, %v9080_v0  ;;  %v801_v58 = vsub.f32 1.0, %v800_v48  ;;  %v797_v63 = vsel %vm9360_vm5, %v796_v37, %v792_v54  ;;  %v9410_v4 = vsel %vm334_vm2, %v335_v56, %v333_v61  ;;  %v97_v37 = vpop.xlane.xlu0 %96 }
  0xa2   :  { %v762_v9 = vsel %vm9402_vm11, %v9337_v21, %v758_v57  ;;  %v770_v52 = vmul.f32 %v8773_v62, %v9353_v30  ;;  %vm322_vm12 = vcmp.eq.f32.partialorder %v9258_v12, 0.0  ;;  %v778_v55 = vand.u32 2147483647, %v9353_v30 }
  0xa3   :  { %v9394_v0 = vsel %vm76_vm0, %v1084_v53, 0  ;;  %v802_v10 = vmul.f32 %v8771_v38, %v801_v58  ;;  %8774 = vrcp.f32 %v9410_v4  ;;  %vm809_vm14 = vcmp.eq.f32.partialorder %v808_v39, 8.507059e+37  ;;  %v94_v53 = vpop.xlane.xlu1 %93 }
  0xa4   :  { %v9413_v8 = vand.u32 4294901760, %v9394_v0  ;;  %v771_v15 = vsub.f32 1.0, %v770_v52  ;;  %v780_v16 = vand.u32 2147483648, %v9353_v30  ;;  %v1082_v17 = vmul.f32 %v797_v63, %v9085_v1 }
  0xa5   :  { %v803_v56 = vadd.f32 %v8771_v38, %v802_v10  ;;  %v767_v21 = vsel %vm9364_vm6, %v766_v14, %v762_v9  ;;  %v811_v13 = vor.u32 1.1754944e-38, %v810_v46  ;;  %v318_v22 = vmul.f32 %v9298_v49, %v317_v5 }
  0xa6   :  { %18863 = vst [vmem:[#allocation5_spill] sm:$0xff] %v9413_v8  ;;  %1198 = vmatpush.xpose.msra.mxu0 %v9413_v8  ;;  %1921 = vmatpush.xpose.msra.mxu3 %v9413_v8  ;;  %v772_v24 = vmul.f32 %v8773_v62, %v771_v15  ;;  %vm775_vm1 = vweird.f32 %v8773_v62  ;;  %v303_v25 = vmul.f32 %v9348_v28, %v302_v44  ;;  %vm774_vm2 = vweird.f32 %v9353_v30 }
  0xa7   :  { %v807_v50 = vsel %vm806_vm15, %v8771_v38, %v803_v56  ;;  %vm9433_vm3 = vcmp.eq.f32.partialorder %v778_v55, 8.507059e+37  ;;  %v319_v1 = vmul.f32 %v318_v22, %v9258_v12  ;;  %v781_v32 = vor.u32 1.1754944e-38, %v780_v16  ;;  %vm776_vm4 = vmor %vm774_vm2, %vm775_vm1 }
  0xa8   :  { %v812_v26 = vsel %vm809_vm14, %v811_v13, %v807_v50  ;;  %v773_v31 = vadd.f32 %v8773_v62, %v772_v24  ;;  %v304_v34 = vmul.f32 0.5, %v303_v25  ;;  %v9440_v35 = vsel %vm76_vm0, %v1082_v17, 0 }
  0xa9   :  { %v1083_v29 = vmul.f32 %v812_v26, %v9101_v6  ;;  %v8775_v49 = vpop.eup %8774  ;;  %v1080_v36 = vmul.f32 %v767_v21, %v9090_v2  ;;  %v321_v30 = vsel %vm320_vm10, %v9258_v12, %v319_v1  ;;  %8776 = vrsqrt.f32 %v9312_v60  ;;  %v88_v56 = vpop.xlane.xlu0 %87 }
  0xaa   :  { %v777_v6 = vsel %vm776_vm4, %v8773_v62, %v773_v31  ;;  %v740_v23 = vmul.f32 %v8775_v49, %v9410_v4  ;;  %v748_v38 = vand.u32 2147483647, %v9410_v4  ;;  %v9461_v41 = vsel %vm322_vm12, %v323_v59, %v321_v30 }
  0xab   :  { %v9448_v51 = vsel %vm76_vm0, %v1083_v29, 0  ;;  %v782_v2 = vsel %vm9433_vm3, %v781_v32, %v777_v6  ;;  %v305_v42 = vsub.f32 1.5, %v304_v34  ;;  %8778 = vrcp.f32 %v9461_v41  ;;  %v85_v27 = vpop.xlane.xlu1 %84 }
  0xac   :  { %v9453_v40 = vand.u32 4294901760, %v9448_v51  ;;  %v1081_v43 = vmul.f32 %v782_v2, %v9106_v7  ;;  %v741_v33 = vsub.f32 1.0, %v740_v23  ;;  %v9466_v45 = vand.u32 4294901760, %v9440_v35 }
  0xad   :  { %v750_v48 = vand.u32 2147483648, %v9410_v4  ;;  %v306_v44 = vmul.f32 %v9348_v28, %v305_v42  ;;  %vm744_vm5 = vweird.f32 %v9410_v4  ;;  %vm745_vm6 = vweird.f32 %v8775_v49  ;;  %v91_v4 = vpop.xlane.xlu2 %90 }
  0xae   :  { %18866 = vst [vmem:[#allocation6_spill] sm:$0xff] %v9453_v40  ;;  %1200 = vmatpush.xpose.msra.mxu0 %v9453_v40  ;;  %1923 = vmatpush.xpose.msra.mxu3 %v9453_v40  ;;  %v9473_v12 = vsel %vm76_vm0, %v1081_v43, 0  ;;  %v742_v59 = vmul.f32 %v8775_v49, %v741_v33  ;;  %v9477_v54 = vsel %vm76_vm0, %v1080_v36, 0  ;;  %vm9479_vm7 = vcmp.eq.f32.partialorder %v748_v38, 8.507059e+37  ;;  %vm746_vm9 = vmor %vm744_vm5, %vm745_vm6 }
  0xaf   :  { %18867 = vst [vmem:[#allocation7_spill] sm:$0xff] %v9466_v45  ;;  %v8777_v7 = vpop.eup %8776  ;;  %v307_v28 = vmul.f32 %v306_v44, %v9296_v47  ;;  %vm308_vm8 = vcmp.eq.f32.partialorder %v9296_v47, inf  ;;  %v311_v58 = vand.u32 2147483648, %v9296_v47  ;;  %v9487_v61 = vmax.f32 %v97_v37, 1e-08 }
  0xb0   :  { %v743_v39 = vadd.f32 %v8775_v49, %v742_v59  ;;  %v290_v46 = vmul.f32 %v8777_v7, %v9312_v60  ;;  %v9490_v62 = vand.u32 4294901760, %v9473_v12  ;;  %v751_v63 = vor.u32 1.1754944e-38, %v750_v48 }
  0xb1   :  { %v309_v3 = vsel %vm308_vm8, %v9296_v47, %v307_v28  ;;  %vm310_vm10 = vcmp.eq.f32.partialorder %v9296_v47, 0.0  ;;  %v8779_v5 = vpop.eup %8778  ;;  %8780 = vrsqrt.f32 %v9487_v61  ;;  %v9503_v47 = vmax.f32 %v94_v53, 1e-08 }
  0xb2   :  { %18870 = vst [vmem:[#allocation8_spill] sm:$0xff] %v9490_v62  ;;  %1202 = vmatpush.xpose.msra.mxu0 %v9466_v45  ;;  %1925 = vmatpush.xpose.msra.mxu3 %v9466_v45  ;;  %v747_v9 = vsel %vm746_vm9, %v8775_v49, %v743_v39  ;;  %v9496_v10 = vsel %vm310_vm10, %v311_v58, %v309_v3  ;;  %v733_v16 = vand.u32 2147483647, %v9461_v41  ;;  %v9507_v17 = vmax.f32 %v91_v4, 1e-08 }
  0xb3   :  { %v291_v52 = vmul.f32 %v8777_v7, %v290_v46  ;;  %v752_v14 = vsel %vm9479_vm7, %v751_v63, %v747_v9  ;;  %v725_v55 = vmul.f32 %v8779_v5, %v9461_v41  ;;  %8782 = vrcp.f32 %v9496_v10 }
  0xb4   :  { %v1079_v15 = vmul.f32 %v752_v14, %v9114_v11  ;;  %v9510_v21 = vand.u32 4294901760, %v9477_v54  ;;  %v735_v22 = vand.u32 2147483648, %v9461_v41  ;;  %vm729_vm11 = vweird.f32 %v9461_v41 }
  0xb5   :  { %v726_v13 = vsub.f32 1.0, %v725_v55  ;;  %v292_v50 = vmul.f32 0.5, %v291_v52  ;;  %vm730_vm12 = vweird.f32 %v8779_v5  ;;  %vm296_vm13 = vcmp.eq.f32.partialorder %v9312_v60, inf }
  0xb6   :  { %18871 = vst [vmem:[#allocation9_spill] sm:$0xff] %v9510_v21  ;;  %1204 = vmatpush.xpose.msra.mxu0 %v9490_v62  ;;  %1927 = vmatpush.xpose.msra.mxu3 %v9490_v62  ;;  %v9517_v11 = vmax.f32 %v88_v56, 1e-08  ;;  %v9520_v24 = vsel %vm76_vm0, %v1079_v15, 0  ;;  %8784 = vrsqrt.f32 %v9503_v47  ;;  %vm9523_vm14 = vcmp.eq.f32.partialorder %v733_v16, 8.507059e+37  ;;  %vm731_vm1 = vmor %vm729_vm11, %vm730_vm12 }
  0xb7   :  { %v727_v25 = vmul.f32 %v8779_v5, %v726_v13  ;;  %v293_v26 = vsub.f32 1.5, %v292_v50  ;;  %v8781_v1 = vpop.eup %8780  ;;  %vm298_vm15 = vcmp.eq.f32.partialorder %v9312_v60, 0.0  ;;  %v299_v31 = vand.u32 2147483648, %v9312_v60 }
  0xb8   :  { %8786 = vrsqrt.f32 %v9507_v17  ;;  %v736_v49 = vor.u32 1.1754944e-38, %v735_v22  ;;  %v278_v30 = vmul.f32 %v8781_v1, %v9487_v61  ;;  %v9534_v37 = vand.u32 4294901760, %v9520_v24 }
  0xb9   :  { %v8783_v32 = vpop.eup %8782  ;;  %v728_v34 = vadd.f32 %v8779_v5, %v727_v25  ;;  %v294_v36 = vmul.f32 %v8777_v7, %v293_v26  ;;  %vm714_vm2 = vweird.f32 %v9496_v10  ;;  %v9541_v23 = vmax.f32 %v85_v27, 1e-08 }
  0xba   :  { %1206 = vmatpush.xpose.msra.mxu0 %v9510_v21  ;;  %1929 = vmatpush.xpose.msra.mxu3 %v9510_v21  ;;  %18874 = vst [vmem:[#allocation10_spill] sm:$0xff] %v9534_v37  ;;  %v710_v6 = vmul.f32 %v8783_v32, %v9496_v10  ;;  %v279_v42 = vmul.f32 %v8781_v1, %v278_v30  ;;  %8788 = vrsqrt.f32 %v9517_v11  ;;  %v718_v48 = vand.u32 2147483647, %v9496_v10 }
  0xbb   :  { %v732_v38 = vsel %vm731_vm1, %v8779_v5, %v728_v34  ;;  %v295_v2 = vmul.f32 %v294_v36, %v9312_v60  ;;  %v720_v41 = vand.u32 2147483648, %v9496_v10  ;;  %vm715_vm3 = vweird.f32 %v8783_v32 }
  0xbc   :  { %v737_v43 = vsel %vm9523_vm14, %v736_v49, %v732_v38  ;;  %v711_v33 = vsub.f32 1.0, %v710_v6  ;;  %v8785_v44 = vpop.eup %8784  ;;  %v280_v7 = vmul.f32 0.5, %v279_v42  ;;  %8790 = vrsqrt.f32 %v9541_v23  ;;  %vm716_vm7 = vmor %vm714_vm2, %vm715_vm3 }
  0xbd   :  { %v1078_v53 = vmul.f32 %v737_v43, %v9128_v18  ;;  %v297_v59 = vsel %vm296_vm13, %v9312_v60, %v295_v2  ;;  %v266_v58 = vmul.f32 %v8785_v44, %v9503_v47  ;;  %vm284_vm4 = vcmp.eq.f32.partialorder %v9487_v61, inf }
  0xbe   :  { %1208 = vmatpush.xpose.msra.mxu0 %v9534_v37  ;;  %1931 = vmatpush.xpose.msra.mxu3 %v9534_v37  ;;  %v8787_v57 = vpop.eup %8786  ;;  %v712_v28 = vmul.f32 %v8783_v32, %v711_v33  ;;  %v9557_v39 = vsel %vm298_vm15, %v299_v31, %v297_v59  ;;  %vm286_vm5 = vcmp.eq.f32.partialorder %v9487_v61, 0.0  ;;  %vm719_vm6 = vcmp.eq.f32.partialorder %v718_v48, 8.507059e+37 }
  0xbf   :  { %v9562_v18 = vsel %vm76_vm0, %v1078_v53, 0  ;;  %8792 = vrcp.f32 %v9557_v39  ;;  %v281_v60 = vsub.f32 1.5, %v280_v7  ;;  %v721_v4 = vor.u32 1.1754944e-38, %v720_v41 }
  0xc0   :  { %v9568_v46 = vand.u32 4294901760, %v9562_v18  ;;  %v713_v63 = vadd.f32 %v8783_v32, %v712_v28  ;;  %v9570_v3 = vpop.eup %8788  ;;  %v287_v5 = vand.u32 2147483648, %v9487_v61  ;;  %v267_v9 = vmul.f32 %v8785_v44, %v266_v58 }
  0xc1   :  { %v254_v52 = vmul.f32 %v8787_v57, %v9507_v17  ;;  %v282_v55 = vmul.f32 %v8781_v1, %v281_v60  ;;  %vm272_vm8 = vcmp.eq.f32.partialorder %v9503_v47, inf  ;;  %v242_v56 = vmul.f32 %v9570_v3, %v9517_v11 }
  0xc2   :  { %18875 = vst [vmem:[#allocation11_spill] sm:$0xff] %v9568_v46  ;;  %v717_v14 = vsel %vm716_vm7, %v8783_v32, %v713_v63  ;;  %1210 = vmatpush.xpose.msra.mxu0 %v9568_v46  ;;  %1933 = vmatpush.xpose.msra.mxu3 %v9568_v46  ;;  %v268_v10 = vmul.f32 0.5, %v267_v9  ;;  %vm274_vm9 = vcmp.eq.f32.partialorder %v9503_v47, 0.0  ;;  %v9583_v13 = vpop.eup %8790  ;;  %v275_v25 = vand.u32 2147483648, %v9503_v47  ;;  %v82_v32 = vpop.xlane.xlu2 %81 }
  0xc3   :  { %v722_v15 = vsel %vm719_vm6, %v721_v4, %v717_v14  ;;  %v255_v16 = vmul.f32 %v8787_v57, %v254_v52  ;;  %v283_v50 = vmul.f32 %v282_v55, %v9487_v61  ;;  %vm260_vm10 = vcmp.eq.f32.partialorder %v9507_v17, inf }
  0xc4   :  { %v1077_v22 = vmul.f32 %v722_v15, %v9133_v19  ;;  %v269_v27 = vsub.f32 1.5, %v268_v10  ;;  %vm262_vm11 = vcmp.eq.f32.partialorder %v9507_v17, 0.0  ;;  %v263_v29 = vand.u32 2147483648, %v9507_v17 }
  0xc5   :  { %v8793_v26 = vpop.eup %8792  ;;  %v256_v1 = vmul.f32 0.5, %v255_v16  ;;  %v243_v31 = vmul.f32 %v9570_v3, %v242_v56  ;;  %v285_v49 = vsel %vm284_vm4, %v9487_v61, %v283_v50  ;;  %v230_v36 = vmul.f32 %v9583_v13, %v9541_v23 }
  0xc6   :  { %v9593_v34 = vsel %vm76_vm0, %v1077_v22, 0  ;;  %v695_v19 = vmul.f32 %v8793_v26, %v9557_v39  ;;  %v9606_v6 = vsel %vm286_vm5, %v287_v5, %v285_v49  ;;  %v270_v38 = vmul.f32 %v8785_v44, %v269_v27 }
  0xc7   :  { %v9602_v30 = vand.u32 4294901760, %v9593_v34  ;;  %v257_v2 = vsub.f32 1.5, %v256_v1  ;;  %vm248_vm12 = vcmp.eq.f32.partialorder %v9517_v11, inf  ;;  %v703_v43 = vand.u32 2147483647, %v9557_v39 }
  0xc8   :  { %v696_v42 = vsub.f32 1.0, %v695_v19  ;;  %8794 = vrcp.f32 %v9606_v6  ;;  %v9611_v33 = vmax.f32 %v82_v32, 1e-08  ;;  %v705_v48 = vand.u32 2147483648, %v9557_v39 }
  0xc9   :  { %18876 = vst [vmem:[#allocation12_spill] sm:$0xff] %v9602_v30  ;;  %v271_v41 = vmul.f32 %v270_v38, %v9503_v47  ;;  %v258_v53 = vmul.f32 %v8787_v57, %v257_v2  ;;  %v244_v59 = vmul.f32 0.5, %v243_v31  ;;  %1212 = vmatpush.xpose.msra.mxu0 %v9602_v30  ;;  %1935 = vmatpush.xpose.msra.mxu3 %v9602_v30  ;;  %vm700_vm13 = vweird.f32 %v8793_v26 }
  0xca   :  { %v697_v61 = vmul.f32 %v8793_v26, %v696_v42  ;;  %vm250_vm14 = vcmp.eq.f32.partialorder %v9517_v11, 0.0  ;;  %v231_v44 = vmul.f32 %v9583_v13, %v230_v36  ;;  %vm699_vm15 = vweird.f32 %v9557_v39 }
  0xcb   :  { %v273_v7 = vsel %vm272_vm8, %v9503_v47, %v271_v41  ;;  %v259_v28 = vmul.f32 %v258_v53, %v9507_v17  ;;  %v245_v57 = vsub.f32 1.5, %v244_v59  ;;  %8796 = vrsqrt.f32 %v9611_v33  ;;  %vm701_vm1 = vmor %vm699_vm15, %vm700_vm13 }
  0xcc   :  { %v698_v58 = vadd.f32 %v8793_v26, %v697_v61  ;;  %v9626_v63 = vsel %vm274_vm9, %v275_v25, %v273_v7  ;;  %v232_v60 = vmul.f32 0.5, %v231_v44  ;;  %vm704_vm2 = vcmp.eq.f32.partialorder %v703_v43, 8.507059e+37  ;;  %v79_v7 = vpop.xlane.xlu0 %78 }
  0xcd   :  { %v706_v4 = vor.u32 1.1754944e-38, %v705_v48  ;;  %8798 = vrcp.f32 %v9626_v63  ;;  %v251_v39 = vand.u32 2147483648, %v9517_v11  ;;  %v261_v52 = vsel %vm260_vm10, %v9507_v17, %v259_v28  ;;  %v9008_v28 = vld [vmem:[%s18091_s0 + $0x30] sm:$0xff] }
  0xce   :  { %v8795_v5 = vpop.eup %8794  ;;  %v702_v9 = vsel %vm701_vm1, %v8793_v26, %v698_v58  ;;  %v246_v47 = vmul.f32 %v9570_v3, %v245_v57  ;;  %v233_v14 = vsub.f32 1.5, %v232_v60  ;;  %vm236_vm3 = vcmp.eq.f32.partialorder %v9541_v23, inf }
  0xcf   :  { %v707_v55 = vsel %vm704_vm2, %v706_v4, %v702_v9  ;;  %v680_v56 = vmul.f32 %v8795_v5, %v9606_v6  ;;  %vm238_vm4 = vcmp.eq.f32.partialorder %v9541_v23, 0.0  ;;  %v688_v10 = vand.u32 2147483647, %v9606_v6 }
  0xd0   :  { %v1076_v15 = vmul.f32 %v707_v55, %v9138_v20  ;;  %v9642_v16 = vsel %vm262_vm11, %v263_v29, %v261_v52  ;;  %v247_v22 = vmul.f32 %v246_v47, %v9517_v11  ;;  %v690_v3 = vand.u32 2147483648, %v9606_v6 }
  0xd1   :  { %v681_v50 = vsub.f32 1.0, %v680_v56  ;;  %v673_v25 = vand.u32 2147483647, %v9626_v63  ;;  %8800 = vrcp.f32 %v9642_v16  ;;  %v9648_v26 = vpop.eup %8796  ;;  %v675_v20 = vand.u32 2147483648, %v9626_v63 }
  0xd2   :  { %v9651_v27 = vsel %vm76_vm0, %v1076_v15, 0  ;;  %v249_v17 = vsel %vm248_vm12, %v9517_v11, %v247_v22  ;;  %v234_v1 = vmul.f32 %v9583_v13, %v233_v14  ;;  %vm685_vm5 = vweird.f32 %v8795_v5 }
  0xd3   :  { %v8799_v29 = vpop.eup %8798  ;;  %v9659_v31 = vand.u32 4294901760, %v9651_v27  ;;  %v682_v32 = vmul.f32 %v8795_v5, %v681_v50  ;;  %v9663_v19 = vsel %vm250_vm14, %v251_v39, %v249_v17  ;;  %vm684_vm6 = vweird.f32 %v9606_v6 }
  0xd4   :  { %v665_v49 = vmul.f32 %v8799_v29, %v9626_v63  ;;  %8802 = vrcp.f32 %v9663_v19  ;;  %v239_v36 = vand.u32 2147483648, %v9541_v23  ;;  %vm689_vm7 = vcmp.eq.f32.partialorder %v688_v10, 8.507059e+37  ;;  %vm686_vm9 = vmor %vm684_vm6, %vm685_vm5 }
  0xd5   :  { %18877 = vst [vmem:[#allocation13_spill] sm:$0xff] %v9659_v31  ;;  %v683_v38 = vadd.f32 %v8795_v5, %v682_v32  ;;  %v691_v13 = vor.u32 1.1754944e-38, %v690_v3  ;;  %vm669_vm8 = vweird.f32 %v9626_v63  ;;  %1214 = vmatpush.xpose.msra.mxu0 %v9659_v31  ;;  %1937 = vmatpush.xpose.msra.mxu3 %v9659_v31  ;;  %vm9672_vm10 = vcmp.eq.f32.partialorder %v673_v25, 8.507059e+37  ;;  %v9009_v3 = vld [vmem:[%s18091_s0 + $0x28] sm:$0xff] }
  0xd6   :  { %v666_v11 = vsub.f32 1.0, %v665_v49  ;;  %v235_v6 = vmul.f32 %v234_v1, %v9541_v23  ;;  %v218_v42 = vmul.f32 %v9648_v26, %v9611_v33  ;;  %v676_v41 = vor.u32 1.1754944e-38, %v675_v20  ;;  %v9727_v49 = vpop.xlane.xlu1 %126 }
  0xd7   :  { %v8801_v43 = vpop.eup %8800  ;;  %v687_v48 = vsel %vm686_vm9, %v8795_v5, %v683_v38  ;;  %vm654_vm11 = vweird.f32 %v9642_v16  ;;  %v658_v53 = vand.u32 2147483647, %v9642_v16  ;;  %vm670_vm12 = vweird.f32 %v8799_v29 }
  0xd8   :  { %v692_v59 = vsel %vm689_vm7, %v691_v13, %v687_v48  ;;  %v667_v61 = vmul.f32 %v8799_v29, %v666_v11  ;;  %v650_v44 = vmul.f32 %v8801_v43, %v9642_v16  ;;  %v660_v58 = vand.u32 2147483648, %v9642_v16  ;;  %vm671_vm13 = vmor %vm669_vm8, %vm670_vm12 }
  0xd9   :  { %v1075_v57 = vmul.f32 %v9008_v28, %v692_v59  ;;  %v237_v60 = vsel %vm236_vm3, %v9541_v23, %v235_v6  ;;  %v219_v4 = vmul.f32 %v9648_v26, %v218_v42  ;;  %v9696_v47 = vsub.f32 %v9394_v0, %v9413_v8  ;;  %v9010_v42 = vld [vmem:[%s18091_s0 + $0x20] sm:$0xff] }
  0xda   :  { %v8803_v39 = vpop.eup %8802  ;;  %v668_v5 = vadd.f32 %v8799_v29, %v667_v61  ;;  %v651_v9 = vsub.f32 1.0, %v650_v44  ;;  %v9692_v52 = vsel %vm238_vm4, %v239_v36, %v237_v60  ;;  %vm224_vm14 = vcmp.eq.f32.partialorder %v9611_v33, inf  ;;  %v9011_v60 = vld [vmem:[%s18091_s0 + $0x18] sm:$0xff] }
  0xdb   :  { %18880 = vst [vmem:[#allocation14_spill] sm:$0xff] %v9696_v47  ;;  %v9699_v14 = vsel %vm76_vm0, %v1075_v57, 0  ;;  %v635_v55 = vmul.f32 %v8803_v39, %v9663_v19  ;;  %8804 = vrcp.f32 %v9692_v52  ;;  %v9706_v56 = vmax.f32 %v79_v7, 1e-08  ;;  %1713 = vmatpush.xpose.msra.mxu2 %v9696_v47 }
  0xdc   :  { %v9709_v23 = vand.u32 4294901760, %v9699_v14  ;;  %v672_v15 = vsel %vm671_vm13, %v8799_v29, %v668_v5  ;;  %v652_v0 = vmul.f32 %v8801_v43, %v651_v9  ;;  %vm655_vm15 = vweird.f32 %v8801_v43 }
  0xdd   :  { %v677_v63 = vsel %vm9672_vm10, %v676_v41, %v672_v15  ;;  %vm9714_vm1 = vcmp.eq.f32.partialorder %v658_v53, 8.507059e+37  ;;  %v661_v22 = vor.u32 1.1754944e-38, %v660_v58  ;;  %v636_v50 = vsub.f32 1.0, %v635_v55  ;;  %vm656_vm2 = vmor %vm654_vm11, %vm655_vm15 }
  0xde   :  { %18881 = vst [vmem:[#allocation15_spill] sm:$0xff] %v9709_v23  ;;  %v1074_v25 = vmul.f32 %v9009_v3, %v677_v63  ;;  %v653_v20 = vadd.f32 %v8801_v43, %v652_v0  ;;  %v645_v17 = vand.u32 2147483648, %v9663_v19  ;;  %v220_v1 = vmul.f32 0.5, %v219_v4  ;;  %1216 = vmatpush.xpose.msra.mxu0 %v9709_v23  ;;  %1939 = vmatpush.xpose.msra.mxu3 %v9709_v23 }
  0xdf   :  { %v637_v29 = vmul.f32 %v8803_v39, %v636_v50  ;;  %vm640_vm3 = vweird.f32 %v8803_v39  ;;  %v643_v32 = vand.u32 2147483647, %v9663_v19  ;;  %8806 = vrsqrt.f32 %v9706_v56 }
  0xe0   :  { %v9731_v36 = vsel %vm76_vm0, %v1074_v25, 0  ;;  %v657_v38 = vsel %vm656_vm2, %v8801_v43, %v653_v20  ;;  %vm639_vm4 = vweird.f32 %v9663_v19  ;;  %v221_v13 = vsub.f32 1.5, %v220_v1  ;;  %v136_v25 = vpop.xlane.xlu1 %135 }
  0xe1   :  { %v8805_v11 = vpop.eup %8804  ;;  %v9735_v2 = vand.u32 4294901760, %v9731_v36  ;;  %v662_v16 = vsel %vm9714_vm1, %v661_v22, %v657_v38  ;;  %v638_v6 = vadd.f32 %v8803_v39, %v637_v29  ;;  %vm226_vm5 = vcmp.eq.f32.partialorder %v9611_v33, 0.0  ;;  %vm641_vm6 = vmor %vm639_vm4, %vm640_vm3  ;;  %v9012_v29 = vld [vmem:[%s18091_s0 + $0x10] sm:$0xff] }
  0xe2   :  { %v1073_v48 = vmul.f32 %v9010_v42, %v662_v16  ;;  %v646_v43 = vor.u32 1.1754944e-38, %v645_v17  ;;  %v620_v19 = vmul.f32 %v8805_v11, %v9692_v52  ;;  %v222_v41 = vmul.f32 %v9648_v26, %v221_v13 }
  0xe3   :  { %18884 = vst [vmem:[#allocation16_spill] sm:$0xff] %v9735_v2  ;;  %v642_v53 = vsel %vm641_vm6, %v8803_v39, %v638_v6  ;;  %vm644_vm7 = vcmp.eq.f32.partialorder %v643_v32, 8.507059e+37  ;;  %v628_v59 = vand.u32 2147483647, %v9692_v52  ;;  %v227_v61 = vand.u32 2147483648, %v9611_v33  ;;  %1218 = vmatpush.xpose.msra.mxu0 %v9735_v2  ;;  %1941 = vmatpush.xpose.msra.mxu3 %v9735_v2 }
  0xe4   :  { %v9751_v44 = vsel %vm76_vm0, %v1073_v48, 0  ;;  %v647_v7 = vsel %vm644_vm7, %v646_v43, %v642_v53  ;;  %v621_v28 = vsub.f32 1.0, %v620_v19  ;;  %v223_v57 = vmul.f32 %v222_v41, %v9611_v33 }
  0xe5   :  { %v8807_v58 = vpop.eup %8806  ;;  %v9755_v26 = vand.u32 4294901760, %v9751_v44  ;;  %v1072_v4 = vmul.f32 %v9011_v60, %v647_v7  ;;  %vm625_vm8 = vweird.f32 %v8805_v11  ;;  %v630_v39 = vand.u32 2147483648, %v9692_v52  ;;  %v130_v7 = vpop.xlane.xlu2 %129 }
  0xe6   :  { %v622_v5 = vmul.f32 %v8805_v11, %v621_v28  ;;  %v225_v9 = vsel %vm224_vm14, %v9611_v33, %v223_v57  ;;  %v206_v55 = vmul.f32 %v8807_v58, %v9706_v56  ;;  %v9766_v15 = vand.u32 4294901760, %v9696_v47 }
  0xe7   :  { %18885 = vst [vmem:[#allocation17_spill] sm:$0xff] %v9755_v26  ;;  %v9769_v0 = vsel %vm76_vm0, %v1072_v4, 0  ;;  %v9773_v63 = vsel %vm226_vm5, %v227_v61, %v225_v9  ;;  %v9777_v10 = vsub.f32 %v9448_v51, %v9453_v40  ;;  %1220 = vmatpush.xpose.msra.mxu0 %v9755_v26  ;;  %1943 = vmatpush.xpose.msra.mxu3 %v9755_v26  ;;  %vm624_vm9 = vweird.f32 %v9692_v52 }
  0xe8   :  { %18886 = vst [vmem:[#allocation18_spill] sm:$0xff] %v9766_v15  ;;  %v623_v22 = vadd.f32 %v8805_v11, %v622_v5  ;;  %8808 = vrcp.f32 %v9773_v63  ;;  %v9784_v50 = vand.u32 4294901760, %v9769_v0  ;;  %vm626_vm10 = vmor %vm624_vm9, %vm625_vm8  ;;  %v631_v33 = vor.u32 1.1754944e-38, %v630_v39  ;;  %v145_v60 = vpop.xlane.xlu1 %144 }
  0xe9   :  { %18887 = vst [vmem:[#allocation19_spill] sm:$0xff] %v9777_v10  ;;  %v207_v3 = vmul.f32 %v8807_v58, %v206_v55  ;;  %1716 = vmatpush.xpose.msra.mxu2 %v9777_v10  ;;  %vm629_vm11 = vcmp.eq.f32.partialorder %v628_v59, 8.507059e+37  ;;  %v1352_v20 = vsub.f32 %v9696_v47, %v9766_v15  ;;  %v9791_v17 = vand.u32 4294901760, %v9777_v10 }
  0xea   :  { %18888 = vst [vmem:[#allocation20_spill] sm:$0xff] %v9784_v50  ;;  %v627_v51 = vsel %vm626_vm10, %v8805_v11, %v623_v22  ;;  %v9795_v1 = vsub.f32 %v9440_v35, %v9466_v45  ;;  %v9817_v43 = vsub.f32 %v9473_v12, %v9490_v62  ;;  %v9820_v19 = vmax.f32 %v9727_v49, 1e-08 }
  0xeb   :  { %18889 = vst [vmem:[#allocation21_spill] sm:$0xff] %v9791_v17  ;;  %v632_v52 = vsel %vm629_vm11, %v631_v33, %v627_v51  ;;  %1222 = vmatpush.xpose.msra.mxu0 %v9784_v50  ;;  %1945 = vmatpush.xpose.msra.mxu3 %v9784_v50  ;;  %v208_v38 = vmul.f32 0.5, %v207_v3  ;;  %v9802_v13 = vand.u32 4294901760, %v1352_v20  ;;  %v1344_v11 = vsub.f32 %v9777_v10, %v9791_v17 }
  0xec   :  { %18890 = vst [vmem:[#allocation22_spill] sm:$0xff] %v9795_v1  ;;  %v1071_v32 = vmul.f32 %v9012_v29, %v632_v52  ;;  %vm212_vm12 = vcmp.eq.f32.partialorder %v9706_v56, inf  ;;  %vm214_vm13 = vcmp.eq.f32.partialorder %v9706_v56, 0.0  ;;  %v215_v61 = vand.u32 2147483648, %v9706_v56 }
  0xed   :  { %18891 = vst [vmem:[#allocation23_spill] sm:$0xff] %v9802_v13  ;;  %1719 = vmatpush.xpose.msra.mxu2 %v9795_v1  ;;  %v209_v6 = vsub.f32 1.5, %v208_v38  ;;  %1491 = vmatpush.xpose.msra.mxu1 %v9802_v13  ;;  %v9822_v53 = vand.u32 4294901760, %v1344_v11  ;;  %vm609_vm14 = vweird.f32 %v9773_v63  ;;  %v615_v12 = vand.u32 2147483648, %v9773_v63  ;;  %v139_v11 = vpop.xlane.xlu2 %138 }
  0xee   :  { %v8809_v16 = vpop.eup %8808  ;;  %v9808_v35 = vsel %vm76_vm0, %v1071_v32, 0  ;;  %18893 = vst [vmem:[#allocation25_spill] sm:$0xff] %v9817_v43  ;;  %v9834_v28 = vand.u32 4294901760, %v9795_v1  ;;  %v9840_v4 = vsub.f32 %v9477_v54, %v9510_v21  ;;  %8810 = vrsqrt.f32 %v9820_v19 }
  0xef   :  { %v9812_v42 = vand.u32 4294901760, %v9808_v35  ;;  %v605_v48 = vmul.f32 %v8809_v16, %v9773_v63  ;;  %v210_v41 = vmul.f32 %v8807_v58, %v209_v6  ;;  %18894 = vst [vmem:[#allocation26_spill] sm:$0xff] %v9822_v53  ;;  %vm610_vm15 = vweird.f32 %v8809_v16 }
  0xf0   :  { %18895 = vst [vmem:[#allocation27_spill] sm:$0xff] %v9834_v28  ;;  %v613_v58 = vand.u32 2147483647, %v9773_v63  ;;  %v1336_v5 = vsub.f32 %v9795_v1, %v9834_v28  ;;  %vm611_vm1 = vmor %vm609_vm14, %vm610_vm15  ;;  %v616_v55 = vor.u32 1.1754944e-38, %v615_v12  ;;  %v9855_v3 = vmax.f32 %v130_v7, 1e-08  ;;  %v172_v6 = vpop.xlane.xlu1 %171 }
  0xf1   :  { %18892 = vst [vmem:[#allocation24_spill] sm:$0xff] %v9812_v42  ;;  %v606_v59 = vsub.f32 1.0, %v605_v48  ;;  %1722 = vmatpush.xpose.msra.mxu2 %v9817_v43  ;;  %1224 = vmatpush.xpose.msra.mxu0 %v9812_v42  ;;  %v211_v49 = vmul.f32 %v210_v41, %v9706_v56  ;;  %v9013_v63 = vld [vmem:[%s18091_s0 + $0x8] sm:$0xff]  ;;  %v9868_v29 = vand.u32 4294901760, %v9817_v43  ;;  %v9873_v41 = vmax.f32 %v145_v60, 1e-08 }
  0xf2   :  { %1497 = vmatpush.xpose.msra.mxu1 %v9822_v53  ;;  %1947 = vmatpush.xpose.msra.mxu3 %v9812_v42  ;;  %18896 = vst [vmem:[#allocation28_spill] sm:$0xff] %v9840_v4  ;;  %v9853_v22 = vand.u32 4294901760, %v1336_v5  ;;  %vm614_vm2 = vcmp.eq.f32.partialorder %v613_v58, 8.507059e+37  ;;  %vm404_vm7 = vcmp.eq.f32.partialorder %v9820_v19, inf  ;;  %vm406_vm8 = vcmp.eq.f32.partialorder %v9820_v19, 0.0 }
  0xf3   :  { %v607_v57 = vmul.f32 %v8809_v16, %v606_v59  ;;  %v213_v39 = vsel %vm212_vm12, %v9706_v56, %v211_v49  ;;  %v9865_v56 = vmax.f32 %v136_v25, 1e-08  ;;  %18898 = vst [vmem:[#allocation30_spill] sm:$0xff] %v9868_v29  ;;  %v1328_v59 = vsub.f32 %v9817_v43, %v9868_v29 }
  0xf4   :  { %v216_v54 = vsel %vm214_vm13, %v215_v61, %v213_v39  ;;  %18897 = vst [vmem:[#allocation29_spill] sm:$0xff] %v9853_v22  ;;  %v8811_v32 = vpop.eup %8810  ;;  %v9883_v61 = vsub.f32 %v9520_v24, %v9534_v37  ;;  %v9885_v49 = vmax.f32 %v172_v6, 1e-08  ;;  %vm416_vm9 = vcmp.eq.f32.partialorder %v9855_v3, inf }
  0xf5   :  { %v608_v9 = vadd.f32 %v8809_v16, %v607_v57  ;;  %1725 = vmatpush.xpose.msra.mxu2 %v9840_v4  ;;  %8812 = vrcp.f32 %v216_v54  ;;  %v398_v25 = vmul.f32 %v8811_v32, %v9820_v19  ;;  %v600_v57 = vand.u32 2147483648, %v216_v54 }
  0xf6   :  { %1503 = vmatpush.xpose.msra.mxu1 %v9853_v22  ;;  %8814 = vrsqrt.f32 %v9855_v3  ;;  %18900 = vst [vmem:[#allocation32_spill] sm:$0xff] %v9883_v61  ;;  %v9887_v58 = vand.u32 4294901760, %v1328_v59  ;;  %v598_v39 = vand.u32 2147483647, %v216_v54  ;;  %vm594_vm4 = vweird.f32 %v216_v54 }
  0xf7   :  { %v612_v33 = vsel %vm611_vm1, %v8809_v16, %v608_v9  ;;  %8816 = vrsqrt.f32 %v9865_v56  ;;  %v399_v5 = vmul.f32 %v8811_v32, %v398_v25  ;;  %v9014_v25 = vld [vmem:[%s18091_s0] sm:$0xff]  ;;  %vm418_vm10 = vcmp.eq.f32.partialorder %v9855_v3, 0.0 }
  0xf8   :  { %v617_v51 = vsel %vm614_vm2, %v616_v55, %v612_v33  ;;  %18901 = vst [vmem:[#allocation33_spill] sm:$0xff] %v9887_v58  ;;  %8818 = vrsqrt.f32 %v9873_v41  ;;  %v601_v33 = vor.u32 1.1754944e-38, %v600_v57  ;;  %vm599_vm6 = vcmp.eq.f32.partialorder %v598_v39, 8.507059e+37 }
  0xf9   :  { %v1070_v20 = vmul.f32 %v9013_v63, %v617_v51  ;;  %1728 = vmatpush.xpose.msra.mxu2 %v9883_v61  ;;  %8820 = vrsqrt.f32 %v9885_v49  ;;  %v148_v63 = vpop.xlane.xlu2 %147  ;;  %vm440_vm11 = vcmp.eq.f32.partialorder %v9865_v56, inf  ;;  %vm442_vm12 = vcmp.eq.f32.partialorder %v9865_v56, 0.0 }
  0xfa   :  { %1509 = vmatpush.xpose.msra.mxu1 %v9887_v58  ;;  %vm476_vm13 = vcmp.eq.f32.partialorder %v9873_v41, inf  ;;  %vm584_vm14 = vcmp.eq.f32.partialorder %v9885_v49, inf  ;;  %vm478_vm15 = vcmp.eq.f32.partialorder %v9873_v41, 0.0  ;;  %vm586_vm1 = vcmp.eq.f32.partialorder %v9885_v49, 0.0 }
  0xfb   :  { %v9862_v52 = vsel %vm76_vm0, %v1070_v20, 0  ;;  %v8813_v16 = vpop.eup %8812  ;;  %v400_v20 = vmul.f32 0.5, %v399_v5 }
  0xfc   :  { %v9871_v38 = vand.u32 4294901760, %v9862_v52  ;;  %v590_v48 = vmul.f32 %v8813_v16, %v216_v54  ;;  %v8815_v7 = vpop.eup %8814  ;;  %vm595_vm3 = vweird.f32 %v8813_v16 }
  0xfd   :  { %v410_v24 = vmul.f32 %v8815_v7, %v9855_v3  ;;  %v8817_v55 = vpop.eup %8816  ;;  %vm596_vm5 = vmor %vm594_vm4, %vm595_vm3  ;;  %v401_v57 = vsub.f32 1.5, %v400_v20 }
  0xfe   :  { %18899 = vst [vmem:[#allocation31_spill] sm:$0xff] %v9871_v38  ;;  %1226 = vmatpush.xpose.msra.mxu0 %v9871_v38  ;;  %1949 = vmatpush.xpose.msra.mxu3 %v9871_v38  ;;  %v591_v12 = vsub.f32 1.0, %v590_v48  ;;  %v9894_v48 = vmax.f32 %v148_v63, 1e-08  ;;  %v8819_v59 = vpop.eup %8818 }
  0xff   :  { %v8821_v47 = vpop.eup %8820  ;;  %v470_v5 = vmul.f32 %v8819_v59, %v9873_v41 }
 0x100   :  { %v592_v60 = vmul.f32 %v8813_v16, %v591_v12  ;;  %v411_v12 = vmul.f32 %v8815_v7, %v410_v24  ;;  %8822 = vrsqrt.f32 %v9894_v48  ;;  %v578_v63 = vmul.f32 %v8821_v47, %v9885_v49 }
 0x101   :  { %v471_v20 = vmul.f32 %v8819_v59, %v470_v5  ;;  %v169_v22 = vpop.xlane.xlu2 %168  ;;  %vm488_vm2 = vcmp.eq.f32.partialorder %v9894_v48, inf  ;;  %vm490_vm4 = vcmp.eq.f32.partialorder %v9894_v48, 0.0 }
 0x102   :  { %v593_v9 = vadd.f32 %v8813_v16, %v592_v60  ;;  %v434_v60 = vmul.f32 %v8817_v55, %v9865_v56 }
 0x104   :  { %v597_v51 = vsel %vm596_vm5, %v8813_v16, %v593_v9  ;;  %v9903_v16 = vmax.f32 %v139_v11, 1e-08  ;;  %v412_v9 = vmul.f32 0.5, %v411_v12  ;;  %v402_v11 = vmul.f32 %v8811_v32, %v401_v57 }
 0x105   :  { %v602_v6 = vsel %vm599_vm6, %v601_v33, %v597_v51  ;;  %v435_v33 = vmul.f32 %v8817_v55, %v434_v60  ;;  %v133_v51 = vpop.xlane.xlu0 %132  ;;  %v579_v12 = vmul.f32 %v8821_v47, %v578_v63 }
 0x106   :  { %v1069_v54 = vmul.f32 %v9014_v25, %v602_v6  ;;  %v9910_v24 = vmax.f32 %v133_v51, 1e-08  ;;  %8824 = vrsqrt.f32 %v9903_v16  ;;  %v413_v6 = vsub.f32 1.5, %v412_v9 }
 0x107   :  { %v436_v25 = vmul.f32 0.5, %v435_v33  ;;  %v403_v60 = vmul.f32 %v402_v11, %v9820_v19  ;;  %v472_v51 = vmul.f32 0.5, %v471_v20  ;;  %v580_v57 = vmul.f32 0.5, %v579_v12 }
 0x108   :  { %v9901_v13 = vsel %vm76_vm0, %v1069_v54, 0  ;;  %v9917_v54 = vpop.eup %8822  ;;  %8826 = vrsqrt.f32 %v9910_v24  ;;  %v414_v53 = vmul.f32 %v8815_v7, %v413_v6  ;;  %v407_v33 = vand.u32 2147483648, %v9820_v19 }
 0x109   :  { %v9906_v39 = vand.u32 4294901760, %v9901_v13  ;;  %v482_v32 = vmul.f32 %v9917_v54, %v9894_v48  ;;  %v405_v9 = vsel %vm404_vm7, %v9820_v19, %v403_v60  ;;  %v473_v11 = vsub.f32 1.5, %v472_v51 }
 0x10a   :  { %v415_v20 = vmul.f32 %v414_v53, %v9855_v3  ;;  %v581_v1 = vsub.f32 1.5, %v580_v57  ;;  %v419_v60 = vand.u32 2147483648, %v9855_v3  ;;  %v9951_v51 = vand.u32 4294901760, %v9840_v4 }
 0x10b   :  { %18902 = vst [vmem:[#allocation34_spill] sm:$0xff] %v9906_v39  ;;  %1228 = vmatpush.xpose.msra.mxu0 %v9906_v39  ;;  %1951 = vmatpush.xpose.msra.mxu3 %v9906_v39  ;;  %vm452_vm3 = vcmp.eq.f32.partialorder %v9903_v16, inf  ;;  %vm454_vm5 = vcmp.eq.f32.partialorder %v9903_v16, 0.0  ;;  %vm428_vm6 = vcmp.eq.f32.partialorder %v9910_v24, inf  ;;  %vm430_vm7 = vcmp.eq.f32.partialorder %v9910_v24, 0.0 }
 0x10c   :  { %v9922_v10 = vpop.eup %8824  ;;  %18904 = vst [vmem:[#allocation36_spill] sm:$0xff] %v9951_v51  ;;  %v582_v43 = vmul.f32 %v8821_v47, %v581_v1 }
 0x10d   :  { %v446_v63 = vmul.f32 %v9922_v10, %v9903_v16  ;;  %v142_v7 = vpop.xlane.xlu0 %141 }
 0x10e   :  { %v9929_v5 = vpop.eup %8826  ;;  %v9937_v12 = vmax.f32 %v142_v7, 1e-08 }
 0x10f   :  { %2148 = vmatpush.xpose.msrb.mxu0 %v9766_v15  ;;  %v437_v15 = vsub.f32 1.5, %v436_v25  ;;  %v483_v25 = vmul.f32 %v9917_v54, %v482_v32  ;;  %v447_v53 = vmul.f32 %v9922_v10, %v446_v63  ;;  %v417_v32 = vsel %vm416_vm9, %v9855_v3, %v415_v20 }
 0x110   :  { %8828 = vrsqrt.f32 %v9937_v12  ;;  %v479_v3 = vand.u32 2147483648, %v9873_v41  ;;  %vm464_vm9 = vcmp.eq.f32.partialorder %v9937_v12, inf }
 0x111   :  { %v438_v6 = vmul.f32 %v8817_v55, %v437_v15  ;;  %v9947_v15 = vsel %vm406_vm8, %v407_v33, %v405_v9  ;;  %v474_v55 = vmul.f32 %v8819_v59, %v473_v11  ;;  %v484_v7 = vmul.f32 0.5, %v483_v25 }
 0x112   :  { %18903 = vst [vmem:[#allocation35_spill] sm:$0xff] %v9947_v15  ;;  %8830 = vrcp.f32 %v9947_v15  ;;  %v9964_v59 = vsel %vm418_vm10, %v419_v60, %v417_v32  ;;  %v443_v9 = vand.u32 2147483648, %v9865_v56  ;;  %v448_v33 = vmul.f32 0.5, %v447_v53 }
 0x113   :  { %2152 = vmatpush.xpose.msrb.mxu0 %v9791_v17  ;;  %v422_v17 = vmul.f32 %v9929_v5, %v9910_v24  ;;  %v439_v57 = vmul.f32 %v438_v6, %v9865_v56  ;;  %18905 = vst [vmem:[#allocation37_spill] sm:$0xff] %v9964_v59  ;;  %v475_v63 = vmul.f32 %v474_v55, %v9873_v41  ;;  %v485_v47 = vsub.f32 1.5, %v484_v7 }
 0x114   :  { %v449_v6 = vsub.f32 1.5, %v448_v33  ;;  %v587_v60 = vand.u32 2147483648, %v9885_v49 }
 0x115   :  { %v423_v19 = vmul.f32 %v9929_v5, %v422_v17  ;;  %v441_v11 = vsel %vm440_vm11, %v9865_v56, %v439_v57  ;;  %v583_v17 = vmul.f32 %v582_v43, %v9885_v49  ;;  %v477_v56 = vsel %vm476_vm13, %v9873_v41, %v475_v63 }
 0x116   :  { %v9973_v1 = vpop.eup %8828  ;;  %v9978_v20 = vsel %vm442_vm12, %v443_v9, %v441_v11  ;;  %v486_v43 = vmul.f32 %v9917_v54, %v485_v47  ;;  %v9991_v57 = vsel %vm478_vm15, %v479_v3, %v477_v56  ;;  %v450_v41 = vmul.f32 %v9922_v10, %v449_v6 }
 0x117   :  { %2156 = vmatpush.xpose.msrb.mxu0 %v9834_v28  ;;  %v9957_v28 = vmax.f32 %v169_v22, 1e-08  ;;  %v424_v22 = vmul.f32 0.5, %v423_v19  ;;  %v458_v53 = vmul.f32 %v9973_v1, %v9937_v12  ;;  %v585_v55 = vsel %vm584_vm14, %v9885_v49, %v583_v17 }
 0x118   :  { %v9982_v25 = vpop.eup %8830  ;;  %v487_v54 = vmul.f32 %v486_v43, %v9894_v48  ;;  %v9999_v9 = vsel %vm586_vm1, %v587_v60, %v585_v55  ;;  %v451_v10 = vmul.f32 %v450_v41, %v9903_v16  ;;  %v491_v11 = vand.u32 2147483648, %v9894_v48 }
 0x119   :  { %8832 = vrsqrt.f32 %v9957_v28  ;;  %18906 = vst [vmem:[#allocation38_spill] sm:$0xff] %v9982_v25  ;;  %v425_v32 = vsub.f32 1.5, %v424_v22  ;;  %v459_v49 = vmul.f32 %v9973_v1, %v458_v53  ;;  %v10008_v63 = vmul.f32 %v9982_v25, %v9947_v15 }
 0x11a   :  { %8834 = vrcp.f32 %v9964_v59  ;;  %v489_v22 = vsel %vm488_vm2, %v9894_v48, %v487_v54  ;;  %v455_v6 = vand.u32 2147483648, %v9903_v16  ;;  %v453_v53 = vsel %vm452_vm3, %v9903_v16, %v451_v10 }
 0x11b   :  { %2160 = vmatpush.xpose.msrb.mxu0 %v9868_v29  ;;  %8836 = vrcp.f32 %v9978_v20  ;;  %v426_v33 = vmul.f32 %v9929_v5, %v425_v32  ;;  %18908 = vst [vmem:[#allocation40_spill] sm:$0xff] %v10008_v63  ;;  %v460_v3 = vmul.f32 0.5, %v459_v49  ;;  %v10030_v48 = vsel %vm490_vm4, %v491_v11, %v489_v22  ;;  %v151_v29 = vpop.xlane.xlu0 %150  ;;  %v166_v32 = vpop.xlane.xlu1 %165 }
 0x11c   :  { %8838 = vrcp.f32 %v9991_v57  ;;  %v1320_v10 = vsub.f32 %v9840_v4, %v9951_v51  ;;  %v10042_v11 = vsel %vm454_vm5, %v455_v6, %v453_v53  ;;  %v10062_v37 = vmax.f32 %v151_v29, 1e-08 }
 0x11d   :  { %8840 = vrcp.f32 %v9999_v9  ;;  %v427_v56 = vmul.f32 %v426_v33, %v9910_v24  ;;  %v431_v33 = vand.u32 2147483648, %v9910_v24  ;;  %v461_v58 = vsub.f32 1.5, %v460_v3 }
 0x11e   :  { %8842 = vrcp.f32 %v10030_v48  ;;  %v930_v3 = vand.u32 2147483648, %v9991_v57  ;;  %v10064_v21 = vmax.f32 %v166_v32, 1e-08  ;;  %vm572_vm8 = vcmp.eq.f32.partialorder %v9957_v28, inf  ;;  %v163_v32 = vpop.xlane.xlu2 %162 }
 0x11f   :  { %2164 = vmatpush.xpose.msrb.mxu0 %v9951_v51  ;;  %v9993_v7 = vpop.eup %8832  ;;  %v429_v22 = vsel %vm428_vm6, %v9910_v24, %v427_v56  ;;  %v945_v56 = vand.u32 2147483648, %v10030_v48  ;;  %8844 = vrcp.f32 %v10042_v11  ;;  %v462_v4 = vmul.f32 %v9973_v1, %v461_v58 }
 0x120   :  { %v9996_v19 = vpop.eup %8834  ;;  %v566_v5 = vmul.f32 %v9993_v7, %v9957_v28  ;;  %8846 = vrsqrt.f32 %v10062_v37  ;;  %v575_v1 = vand.u32 2147483648, %v9957_v28  ;;  %vm574_vm10 = vcmp.eq.f32.partialorder %v9957_v28, 0.0 }
 0x121   :  { %18907 = vst [vmem:[#allocation39_spill] sm:$0xff] %v9996_v19  ;;  %v10013_v47 = vpop.eup %8836  ;;  %v845_v17 = vmul.f32 %v9996_v19, %v9964_v59  ;;  %v10076_v53 = vor.u32 1.1754944e-38, %v945_v56  ;;  %v463_v58 = vmul.f32 %v462_v4, %v9937_v12  ;;  %v10101_v56 = vsub.f32 %v9562_v18, %v9568_v46 }
 0x122   :  { %v10024_v43 = vpop.eup %8838  ;;  %v875_v60 = vmul.f32 %v10013_v47, %v9978_v20  ;;  %v567_v54 = vmul.f32 %v9993_v7, %v566_v5  ;;  %vm466_vm11 = vcmp.eq.f32.partialorder %v9937_v12, 0.0  ;;  %vm1059_vm12 = vweird.f32 %v9999_v9 }
 0x123   :  { %18909 = vst [vmem:[#allocation41_spill] sm:$0xff] %v10024_v43  ;;  %v10032_v55 = vpop.eup %8840  ;;  %v846_v41 = vsub.f32 1.0, %v845_v17  ;;  %v920_v5 = vmul.f32 %v10024_v43, %v9991_v57  ;;  %1731 = vmatpush.xpose.msra.mxu2 %v10101_v56  ;;  %v10159_v63 = vand.u32 4294901760, %v10101_v56  ;;  %vm500_vm1 = vcmp.eq.f32.partialorder %v10062_v37, inf }
 0x124   :  { %v876_v17 = vsub.f32 1.0, %v875_v60  ;;  %v1055_v49 = vmul.f32 %v10032_v55, %v9999_v9  ;;  %v568_v24 = vmul.f32 0.5, %v567_v54  ;;  %v10058_v60 = vsel %vm430_vm7, %v431_v33, %v429_v22  ;;  %v10073_v33 = vpop.eup %8842  ;;  %18915 = vst [vmem:[#allocation47_spill] sm:$0xff] %v10101_v56 }
 0x125   :  { %v10053_v16 = vmul.f32 %v9996_v19, %v846_v41  ;;  %18911 = vst [vmem:[#allocation43_spill] sm:$0xff] %v10058_v60  ;;  %v10066_v41 = vand.u32 4294901760, %v1320_v10  ;;  %v921_v62 = vsub.f32 1.0, %v920_v5  ;;  %v10071_v54 = vor.u32 1.1754944e-38, %v930_v3  ;;  %v154_v5 = vpop.xlane.xlu0 %153 }
 0x126   :  { %v569_v51 = vsub.f32 1.5, %v568_v24  ;;  %v10069_v6 = vmul.f32 %v10013_v47, %v876_v17  ;;  %v1056_v15 = vsub.f32 1.0, %v1055_v49  ;;  %8848 = vrcp.f32 %v10058_v60  ;;  %18923 = vst [vmem:[#allocation53_spill] sm:$0xff] %v10159_v63 }
 0x127   :  { %18910 = vst [vmem:[#allocation42_spill] sm:$0xff] %v10053_v16  ;;  %1515 = vmatpush.xpose.msra.mxu1 %v10066_v41  ;;  %8850 = vrsqrt.f32 %v10064_v21  ;;  %v10094_v4 = vmul.f32 %v10073_v33, %v10030_v48  ;;  %v467_v10 = vand.u32 2147483648, %v9937_v12  ;;  %v10103_v24 = vmax.f32 %v163_v32, 1e-08 }
 0x128   :  { %18912 = vst [vmem:[#allocation44_spill] sm:$0xff] %v10066_v41  ;;  %v570_v29 = vmul.f32 %v9993_v7, %v569_v51  ;;  %v10089_v51 = vpop.eup %8844  ;;  %v922_v7 = vmul.f32 %v10024_v43, %v921_v62  ;;  %v1057_v17 = vmul.f32 %v10032_v55, %v1056_v15  ;;  %v465_v62 = vsel %vm464_vm9, %v9937_v12, %v463_v58 }
 0x129   :  { %18913 = vst [vmem:[#allocation45_spill] sm:$0xff] %v10069_v6  ;;  %v10112_v41 = vand.u32 4294901760, %v9883_v61  ;;  %v8847_v15 = vpop.eup %8846  ;;  %vm1060_vm13 = vweird.f32 %v10032_v55  ;;  %v1063_v58 = vand.u32 2147483647, %v9999_v9  ;;  %vm502_vm2 = vcmp.eq.f32.partialorder %v10062_v37, 0.0 }
 0x12a   :  { %18914 = vst [vmem:[#allocation46_spill] sm:$0xff] %v10071_v54  ;;  %v571_v49 = vmul.f32 %v570_v29, %v9957_v28  ;;  %v10105_v29 = vmax.f32 %v154_v5, 1e-08  ;;  %v494_v32 = vmul.f32 %v8847_v15, %v10062_v37  ;;  %v1058_v46 = vadd.f32 %v10032_v55, %v1057_v17  ;;  %vm10145_vm14 = vmor %vm1059_vm12, %vm1060_vm13 }
 0x12b   :  { %18916 = vst [vmem:[#allocation48_spill] sm:$0xff] %v10112_v41  ;;  %2168 = vmatpush.xpose.msrb.mxu0 %v10112_v41  ;;  %v1312_v45 = vsub.f32 %v9883_v61, %v10112_v41  ;;  %v10138_v25 = vadd.f32 %v10024_v43, %v922_v7  ;;  %v10154_v61 = vsub.f32 %v9593_v34, %v9602_v30  ;;  %vm10162_vm15 = vcmp.eq.f32.partialorder %v1063_v58, 8.507059e+37 }
 0x12c   :  { %v573_v3 = vsel %vm572_vm8, %v9957_v28, %v571_v49  ;;  %v10116_v28 = vmul.f32 %v10089_v51, %v10042_v11  ;;  %v10122_v18 = vpop.eup %8848  ;;  %v160_v49 = vpop.xlane.xlu1 %159  ;;  %v1304_v12 = vsub.f32 %v10101_v56, %v10159_v63  ;;  %vm924_vm3 = vweird.f32 %v9991_v57 }
 0x12d   :  { %v10109_v22 = vsel %vm574_vm10, %v575_v1, %v573_v3  ;;  %18917 = vst [vmem:[#allocation49_spill] sm:$0xff] %v10122_v18  ;;  %v1065_v1 = vand.u32 2147483648, %v9999_v9  ;;  %v8851_v5 = vpop.eup %8850  ;;  %v10131_v3 = vsel %vm466_vm11, %v467_v10, %v465_v62  ;;  %v495_v10 = vmul.f32 %v8847_v15, %v494_v32  ;;  %1734 = vmatpush.xpose.msra.mxu2 %v10154_v61  ;;  %v157_v30 = vpop.xlane.xlu0 %156 }
 0x12e   :  { %8852 = vrcp.f32 %v10109_v22  ;;  %18918 = vst [vmem:[#allocation50_spill] sm:$0xff] %v10138_v25  ;;  %v554_v17 = vmul.f32 %v8851_v5, %v10064_v21  ;;  %v10150_v62 = vand.u32 4294901760, %v1312_v45  ;;  %v10156_v7 = vmax.f32 %v160_v49, 1e-08 }
 0x12f   :  { %8854 = vrsqrt.f32 %v10103_v24  ;;  %18922 = vst [vmem:[#allocation52_spill] sm:$0xff] %v10154_v61  ;;  %v496_v32 = vmul.f32 0.5, %v495_v10  ;;  %v1062_v45 = vsel %vm10145_vm14, %v10032_v55, %v1058_v46  ;;  %v1066_v34 = vor.u32 1.1754944e-38, %v1065_v1  ;;  %2172 = vmatpush.xpose.msrb.mxu0 %v10159_v63 }
 0x130   :  { %8856 = vrsqrt.f32 %v10105_v29  ;;  %18921 = vst [vmem:[#allocation51_spill] sm:$0xff] %v10150_v62  ;;  %v555_v41 = vmul.f32 %v8851_v5, %v554_v17  ;;  %1521 = vmatpush.xpose.msra.mxu1 %v10150_v62  ;;  %v503_v55 = vand.u32 2147483648, %v10062_v37  ;;  %v10185_v62 = vsub.f32 %v9651_v27, %v9659_v31 }
 0x131   :  { %8858 = vrcp.f32 %v10131_v3  ;;  %v497_v10 = vsub.f32 1.5, %v496_v32  ;;  %vm925_vm4 = vweird.f32 %v10024_v43  ;;  %v10190_v19 = vand.u32 4294901760, %v1304_v12 }
 0x132   :  { %v556_v17 = vmul.f32 0.5, %v555_v41  ;;  %8860 = vrsqrt.f32 %v10156_v7  ;;  %18926 = vst [vmem:[#allocation54_spill] sm:$0xff] %v10185_v62  ;;  %1737 = vmatpush.xpose.msra.mxu2 %v10185_v62  ;;  %v10193_v59 = vmax.f32 %v157_v30, 1e-08  ;;  %v10196_v56 = vand.u32 4294901760, %v10154_v61 }
 0x133   :  { %v498_v32 = vmul.f32 %v8847_v15, %v497_v10  ;;  %18927 = vst [vmem:[#allocation55_spill] sm:$0xff] %v10190_v19  ;;  %vm939_vm5 = vweird.f32 %v10030_v48  ;;  %vm940_vm6 = vweird.f32 %v10073_v33  ;;  %vm560_vm7 = vcmp.eq.f32.partialorder %v10064_v21, inf }
 0x134   :  { %v10166_v40 = vpop.eup %8852  ;;  %v557_v41 = vsub.f32 1.5, %v556_v17  ;;  %18928 = vst [vmem:[#allocation56_spill] sm:$0xff] %v10196_v56  ;;  %vm562_vm8 = vcmp.eq.f32.partialorder %v10064_v21, 0.0  ;;  %1527 = vmatpush.xpose.msra.mxu1 %v10190_v19  ;;  %2176 = vmatpush.xpose.msrb.mxu0 %v10196_v56  ;;  %vm1044_vm9 = vweird.f32 %v10109_v22  ;;  %8862 = vrsqrt.f32 %v10193_v59 }
 0x135   :  { %v8855_v58 = vpop.eup %8854  ;;  %v1040_v49 = vmul.f32 %v10166_v40, %v10109_v22  ;;  %vm1045_vm10 = vweird.f32 %v10166_v40  ;;  %vm548_vm12 = vcmp.eq.f32.partialorder %v10103_v24, inf  ;;  %vm550_vm13 = vcmp.eq.f32.partialorder %v10103_v24, 0.0 }
 0x136   :  { %v8857_v46 = vpop.eup %8856  ;;  %v542_v1 = vmul.f32 %v8855_v58, %v10103_v24  ;;  %v558_v10 = vmul.f32 %v8851_v5, %v557_v41  ;;  %v563_v5 = vand.u32 2147483648, %v10064_v21  ;;  %vm10242_vm11 = vmor %vm1044_vm9, %vm1045_vm10 }
 0x137   :  { %v1041_v16 = vsub.f32 1.0, %v1040_v49  ;;  %v506_v8 = vmul.f32 %v8857_v46, %v10105_v29  ;;  %v10198_v27 = vpop.eup %8858  ;;  %v499_v49 = vmul.f32 %v498_v32, %v10062_v37 }
 0x138   :  { %v543_v6 = vmul.f32 %v8855_v58, %v542_v1  ;;  %v1067_v1 = vsel %vm10162_vm15, %v1066_v34, %v1062_v45  ;;  %v10210_v12 = vpop.eup %8860  ;;  %v18929_v34 = vsub.f32 1.0, %v10094_v4  ;;  %vm10269_vm15 = vmor %vm924_vm3, %vm925_vm4  ;;  %vm514_vm3 = vcmp.eq.f32.partialorder %v10105_v29, 0.0 }
 0x139   :  { %v1042_v15 = vmul.f32 %v10166_v40, %v1041_v16  ;;  %v507_v17 = vmul.f32 %v8857_v46, %v506_v8  ;;  %v501_v16 = vsel %vm500_vm1, %v10062_v37, %v499_v49  ;;  %v559_v8 = vmul.f32 %v558_v10, %v10064_v21 }
 0x13a   :  { %v544_v30 = vmul.f32 0.5, %v543_v6  ;;  %v1050_v6 = vand.u32 2147483648, %v10109_v22  ;;  %v937_v32 = vmul.f32 %v10073_v33, %v18929_v34  ;;  %v1048_v49 = vand.u32 2147483647, %v10109_v22 }
 0x13b   :  { %v508_v9 = vmul.f32 0.5, %v507_v17  ;;  %v1043_v41 = vadd.f32 %v10166_v40, %v1042_v15  ;;  %v10228_v10 = vsel %vm502_vm2, %v503_v55, %v501_v16  ;;  %v561_v17 = vsel %vm560_vm7, %v10064_v21, %v559_v8  ;;  %v9015_v15 = vld [vmem:[%s18091_s0 + $0xf8] sm:$0xff]  ;;  %vm10280_vm2 = vmor %vm939_vm5, %vm940_vm6 }
 0x13c   :  { %v545_v45 = vsub.f32 1.5, %v544_v30  ;;  %v530_v4 = vmul.f32 %v10210_v12, %v10156_v7  ;;  %v905_v30 = vmul.f32 %v10198_v27, %v10131_v3  ;;  %v1100_v34 = vmul.f32 %v9015_v15, %v1067_v1 }
 0x13d   :  { %v509_v55 = vsub.f32 1.5, %v508_v9  ;;  %v1051_v16 = vor.u32 1.1754944e-38, %v1050_v6  ;;  %v551_v8 = vand.u32 2147483648, %v10103_v24  ;;  %v1047_v21 = vsel %vm10242_vm11, %v10166_v40, %v1043_v41  ;;  %v10263_v9 = vpop.eup %8862 }
 0x13e   :  { %v546_v19 = vmul.f32 %v8855_v58, %v545_v45  ;;  %v10248_v58 = vsel %vm562_vm8, %v563_v5, %v561_v17  ;;  %v10257_v45 = vadd.f32 %v10073_v33, %v937_v32  ;;  %vm1049_vm14 = vcmp.eq.f32.partialorder %v1048_v49, 8.507059e+37 }
 0x13f   :  { %8864 = vrcp.f32 %v10248_v58  ;;  %v510_v1 = vmul.f32 %v8857_v46, %v509_v55  ;;  %v531_v5 = vmul.f32 %v10210_v12, %v530_v4  ;;  %v906_v46 = vsub.f32 1.0, %v905_v30 }
 0x140   :  { %8866 = vrcp.f32 %v10228_v10  ;;  %v547_v22 = vmul.f32 %v546_v19, %v10103_v24  ;;  %v18932_v19 = vmov 0  ;;  %vm512_vm1 = vcmp.eq.f32.partialorder %v10105_v29, inf }
 0x141   :  { %v18933_v19 = vsel %vm10269_vm15, 4294967295, %v18932_v19  ;;  %v511_v32 = vmul.f32 %v510_v1, %v10105_v29  ;;  %v10285_v41 = vsel %vm76_vm0, %v1100_v34, 0  ;;  %v515_v17 = vand.u32 2147483648, %v10105_v29 }
 0x142   :  { %18934 = vst [vmem:[#allocation57_spill] sm:$0xff] %v18933_v19  ;;  %v549_v6 = vsel %vm548_vm12, %v10103_v24, %v547_v22  ;;  %v532_v24 = vmul.f32 0.5, %v531_v5  ;;  %v1052_v30 = vsel %vm1049_vm14, %v1051_v16, %v1047_v21  ;;  %v10309_v1 = vmul.f32 %v10198_v27, %v906_v46  ;;  %v9016_v5 = vld [vmem:[%s18091_s0 + $0xf0] sm:$0xff] }
 0x143   :  { %v10287_v49 = vsel %vm550_vm13, %v551_v8, %v549_v6  ;;  %v513_v37 = vsel %vm512_vm1, %v10105_v29, %v511_v32  ;;  %v518_v8 = vmul.f32 %v10263_v9, %v10193_v59  ;;  %v10312_v21 = vand.u32 4294901760, %v10285_v41 }
 0x144   :  { %8868 = vrcp.f32 %v10287_v49  ;;  %v533_v55 = vsub.f32 1.5, %v532_v24  ;;  %v1099_v6 = vmul.f32 %v9016_v5, %v1052_v30  ;;  %v10319_v32 = vsel %vm514_vm3, %v515_v17, %v513_v37 }
 0x145   :  { %v10293_v15 = vpop.eup %8864  ;;  %18937 = vst [vmem:[#allocation58_spill] sm:$0xff] %v10312_v21  ;;  %v519_v34 = vmul.f32 %v10263_v9, %v518_v8  ;;  %v960_v46 = vand.u32 2147483648, %v10228_v10  ;;  %8870 = vrcp.f32 %v10319_v32  ;;  %vm536_vm4 = vcmp.eq.f32.partialorder %v10156_v7, inf }
 0x146   :  { %v10302_v22 = vpop.eup %8866  ;;  %v1025_v29 = vmul.f32 %v10293_v15, %v10248_v58  ;;  %v534_v24 = vmul.f32 %v10210_v12, %v533_v55  ;;  %v539_v30 = vand.u32 2147483648, %v10156_v7  ;;  %vm1029_vm5 = vweird.f32 %v10248_v58 }
 0x147   :  { %v950_v16 = vmul.f32 %v10302_v22, %v10228_v10  ;;  %v520_v17 = vmul.f32 0.5, %v519_v34  ;;  %vm1030_vm6 = vweird.f32 %v10293_v15  ;;  %vm538_vm7 = vcmp.eq.f32.partialorder %v10156_v7, 0.0 }
 0x148   :  { %v1026_v4 = vsub.f32 1.0, %v1025_v29  ;;  %v535_v63 = vmul.f32 %v534_v24, %v10156_v7  ;;  %v10337_v55 = vsel %vm76_vm0, %v1099_v6, 0  ;;  %v1033_v8 = vand.u32 2147483647, %v10248_v58  ;;  %vm10349_vm8 = vmor %vm1029_vm5, %vm1030_vm6 }
 0x149   :  { %v1035_v29 = vand.u32 2147483648, %v10248_v58  ;;  %v1020_v24 = vand.u32 2147483648, %v10287_v49  ;;  %v951_v54 = vsub.f32 1.0, %v950_v16  ;;  %v521_v43 = vsub.f32 1.5, %v520_v17  ;;  %v3934_v16 = vld [vmem:[%s18092_s1 + $0x28] sm:$0xff] }
 0x14a   :  { %v10330_v37 = vpop.eup %8868  ;;  %v1027_v12 = vmul.f32 %v10293_v15, %v1026_v4  ;;  %v1018_v4 = vand.u32 2147483647, %v10287_v49  ;;  %v537_v31 = vsel %vm536_vm4, %v10156_v7, %v535_v63  ;;  %v10361_v60 = vor.u32 1.1754944e-38, %v960_v46 }
 0x14b   :  { %v1010_v34 = vmul.f32 %v10330_v37, %v10287_v49  ;;  %v10353_v58 = vsel %vm538_vm7, %v539_v30, %v537_v31  ;;  %v10355_v19 = vpop.eup %8870  ;;  %v1036_v63 = vor.u32 1.1754944e-38, %v1035_v29  ;;  %vm1014_vm9 = vweird.f32 %v10287_v49 }
 0x14c   :  { %v1028_v5 = vadd.f32 %v10293_v15, %v1027_v12  ;;  %v10358_v12 = vand.u32 4294901760, %v10337_v55  ;;  %8872 = vrcp.f32 %v10353_v58  ;;  %vm1015_vm10 = vweird.f32 %v10330_v37 }
 0x14d   :  { %v1011_v25 = vsub.f32 1.0, %v1010_v34  ;;  %vm1034_vm11 = vcmp.eq.f32.partialorder %v1033_v8, 8.507059e+37  ;;  %vm10370_vm12 = vcmp.eq.f32.partialorder %v1018_v4, 8.507059e+37  ;;  %v965_v46 = vmul.f32 %v10355_v19, %v10319_v32  ;;  %vm10379_vm13 = vmor %vm1014_vm9, %vm1015_vm10 }
 0x14e   :  { %18940 = vst [vmem:[#allocation59_spill] sm:$0xff] %v10358_v12  ;;  %v1032_v31 = vsel %vm10349_vm8, %v10293_v15, %v1028_v5  ;;  %v952_v30 = vmul.f32 %v10302_v22, %v951_v54  ;;  %v1021_v17 = vor.u32 1.1754944e-38, %v1020_v24  ;;  %v522_v49 = vmul.f32 %v10263_v9, %v521_v43  ;;  %v3931_v9 = vld [vmem:[%s18092_s1 + $0x10] sm:$0xff] }
 0x14f   :  { %v1012_v7 = vmul.f32 %v10330_v37, %v1011_v25  ;;  %vm969_vm14 = vweird.f32 %v10319_v32  ;;  %v1296_v15 = vsub.f32 %v10154_v61, %v10196_v56  ;;  %v10388_v8 = vsub.f32 %v9699_v14, %v9709_v23 }
 0x150   :  { %v1037_v34 = vsel %vm1034_vm11, %v1036_v63, %v1032_v31  ;;  %vm524_vm1 = vcmp.eq.f32.partialorder %v10193_v59, inf  ;;  %vm526_vm3 = vcmp.eq.f32.partialorder %v10193_v59, 0.0  ;;  %v527_v43 = vand.u32 2147483648, %v10193_v59 }
 0x151   :  { %v1013_v25 = vadd.f32 %v10330_v37, %v1012_v7  ;;  %18945 = vst [vmem:[#allocation60_spill] sm:$0xff] %v10388_v8  ;;  %v9057_v54 = vmov 0   ;;  %v966_v4 = vsub.f32 1.0, %v965_v46  ;;  %v523_v14 = vmul.f32 %v522_v49, %v10193_v59  ;;  %1740 = vmatpush.xpose.msra.mxu2 %v10388_v8 }
 0x152   :  { %8747 = vset.pattern.permute.xlu1 %v9057_v54  ;;  %8746 = vset.pattern.permute.xlu0 %v9057_v54  ;;  %v10396_v5 = vpop.eup %8872  ;;  %v10399_v24 = vand.u32 4294901760, %v1296_v15  ;;  %v10403_v6 = vand.u32 4294901760, %v10185_v62  ;;  %v973_v7 = vand.u32 2147483647, %v10319_v32  ;;  %v975_v31 = vand.u32 2147483648, %v10319_v32 }
 0x153   :  { %8745 = vset.pattern.permute.xlu2 %v9057_v54  ;;  %v1017_v63 = vsel %vm10379_vm13, %v10330_v37, %v1013_v25  ;;  %v995_v46 = vmul.f32 %v10396_v5, %v10353_v58  ;;  %v525_v49 = vsel %vm524_vm1, %v10193_v59, %v523_v14  ;;  %v3963_v54 = vcvt.s32.f32 %v3931_v9  ;;  %v9017_v25 = vld [vmem:[%s18091_s0 + $0xe8] sm:$0xff] }
 0x154   :  { %18946 = vst [vmem:[#allocation61_spill] sm:$0xff] %v10399_v24  ;;  %1533 = vmatpush.xpose.msra.mxu1 %v10399_v24  ;;  %v1288_v15 = vsub.f32 %v10185_v62, %v10403_v6  ;;  %v10420_v37 = vsub.f32 %v9731_v36, %v9735_v2  ;;  %2180 = vmatpush.xpose.msrb.mxu0 %v10403_v6  ;;  %vm999_vm4 = vweird.f32 %v10353_v58  ;;  %vm1000_vm5 = vweird.f32 %v10396_v5 }
 0x155   :  { %18947 = vst [vmem:[#allocation62_spill] sm:$0xff] %v10403_v6  ;;  %v1098_v29 = vmul.f32 %v9017_v25, %v1037_v34  ;;  %v996_v18 = vsub.f32 1.0, %v995_v46  ;;  %v10429_v14 = vsel %vm526_vm3, %v527_v43, %v525_v49  ;;  %v1022_v9 = vsel %vm10370_vm12, %v1021_v17, %v1017_v63  ;;  %4005 = vperm.xlu1 %8747, %v3963_v54   ;;  %vm10472_vm7 = vmor %vm999_vm4, %vm1000_vm5 }
 0x156   :  { %18948 = vst [vmem:[#allocation63_spill] sm:$0xff] %v10420_v37  ;;  %v967_v36 = vmul.f32 %v10355_v19, %v966_v4  ;;  %8874 = vrcp.f32 %v10429_v14  ;;  %1743 = vmatpush.xpose.msra.mxu2 %v10420_v37  ;;  %vm970_vm6 = vweird.f32 %v10355_v19  ;;  %v1003_v59 = vand.u32 2147483647, %v10353_v58 }
 0x157   :  { %v997_v34 = vmul.f32 %v10396_v5, %v996_v18  ;;  %v1005_v43 = vand.u32 2147483648, %v10353_v58  ;;  %v10444_v17 = vand.u32 4294901760, %v1288_v15  ;;  %v10447_v4 = vand.u32 4294901760, %v10388_v8  ;;  %v3930_v18 = vld [vmem:[%s18092_s1 + $0x8] sm:$0xff]  ;;  %v9018_v15 = vld [vmem:[%s18091_s0 + $0xe0] sm:$0xff]  ;;  %vm10496_vm11 = vmor %vm969_vm14, %vm970_vm6 }
 0x158   :  { %v10451_v63 = vsub.f32 %v9751_v44, %v9755_v26  ;;  %v10454_v46 = vand.u32 4294901760, %v10420_v37  ;;  %v10460_v49 = vadd.f32 %v10302_v22, %v952_v30  ;;  %v1097_v54 = vmul.f32 %v9018_v15, %v1022_v9 }
 0x159   :  { %18949 = vst [vmem:[#allocation64_spill] sm:$0xff] %v10444_v17  ;;  %v10465_v25 = vor.u32 1.1754944e-38, %v975_v31  ;;  %v998_v44 = vadd.f32 %v10396_v5, %v997_v34  ;;  %vm954_vm8 = vweird.f32 %v10228_v10  ;;  %vm955_vm9 = vweird.f32 %v10302_v22  ;;  %1539 = vmatpush.xpose.msra.mxu1 %v10444_v17  ;;  %2184 = vmatpush.xpose.msrb.mxu0 %v10447_v4 }
 0x15a   :  { %18950 = vst [vmem:[#allocation65_spill] sm:$0xff] %v10447_v4  ;;  %v10479_v30 = vsel %vm76_vm0, %v1098_v29, 0  ;;  %v10482_v31 = vadd.f32 %v10355_v19, %v967_v36  ;;  %vm10484_vm10 = vcmp.eq.f32.partialorder %v973_v7, 8.507059e+37  ;;  %v1280_v58 = vsub.f32 %v10388_v8, %v10447_v4  ;;  %1746 = vmatpush.xpose.msra.mxu2 %v10451_v63 }
 0x15b   :  { %18951 = vst [vmem:[#allocation66_spill] sm:$0xff] %v10451_v63  ;;  %v3966_v34 = vcvt.s32.f32 %v3934_v16  ;;  %vm10500_vm12 = vcmp.eq.f32.partialorder %v1003_v59, 8.507059e+37  ;;  %v1006_v36 = vor.u32 1.1754944e-38, %v1005_v43  ;;  %v3962_v15 = vcvt.s32.f32 %v3930_v18  ;;  %v3929_v16 = vld [vmem:[%s18092_s1] sm:$0xff] }
 0x15c   :  { %18952 = vst [vmem:[#allocation67_spill] sm:$0xff] %v10454_v46  ;;  %v10505_v24 = vand.u32 4294901760, %v10451_v63  ;;  %v10511_v32 = vpop.eup %8874  ;;  %v1002_v59 = vsel %vm10472_vm7, %v10396_v5, %v998_v44  ;;  %v10516_v62 = vand.u32 4294901760, %v1280_v58  ;;  %v1272_v43 = vsub.f32 %v10420_v37, %v10454_v46  ;;  %v3937_v44 = vld [vmem:[%s18092_s1 + $0x40] sm:$0xff]  ;;  %v19018_v37 = vld [vmem:[#allocation46_spill] sm:$0xff] }
 0x15d   :  { %v10522_v18 = vsub.f32 %v9769_v0, %v9784_v50  ;;  %v10525_v56 = vand.u32 4294901760, %v10479_v30  ;;  %v10528_v17 = vsel %vm76_vm0, %v1097_v54, 0  ;;  %v980_v8 = vmul.f32 %v10511_v32, %v10429_v14  ;;  %4000 = vperm.xlu0 %8746, %v3962_v15   ;;  %4020 = vperm.xlu1 %8747, %v3966_v34  }
 0x15e   :  { %18961 = vst [vmem:[#allocation68_spill] sm:$0xff] %v10505_v24  ;;  %v988_v61 = vand.u32 2147483647, %v10429_v14  ;;  %v972_v5 = vsel %vm10496_vm11, %v10355_v19, %v10482_v31  ;;  %vm984_vm13 = vweird.f32 %v10429_v14  ;;  %v990_v0 = vand.u32 2147483648, %v10429_v14  ;;  %1545 = vmatpush.xpose.msra.mxu1 %v10516_v62  ;;  %v3936_v31 = vld [vmem:[%s18092_s1 + $0x38] sm:$0xff]  ;;  %2188 = vmatpush.xpose.msrb.mxu0 %v10454_v46  ;;  %vm10636_vm11 = vmor %vm954_vm8, %vm955_vm9 }
 0x15f   :  { %18962 = vst [vmem:[#allocation69_spill] sm:$0xff] %v10516_v62  ;;  %v3961_v54 = vcvt.s32.f32 %v3929_v16  ;;  %v1007_v58 = vsel %vm10500_vm12, %v1006_v36, %v1002_v59  ;;  %v981_v15 = vsub.f32 1.0, %v980_v8  ;;  %vm985_vm14 = vweird.f32 %v10511_v32  ;;  %1749 = vmatpush.xpose.msra.mxu2 %v10522_v18  ;;  %v9019_v14 = vld [vmem:[%s18091_s0 + $0xd8] sm:$0xff] }
 0x160   :  { %18963 = vst [vmem:[#allocation70_spill] sm:$0xff] %v10522_v18  ;;  %v1264_v19 = vsub.f32 %v10451_v63, %v10505_v24  ;;  %v10553_v34 = vand.u32 4294901760, %v1272_v43  ;;  %v10557_v29 = vsub.f32 %v9808_v35, %v9812_v42  ;;  %v10560_v8 = vand.u32 4294901760, %v10522_v18  ;;  %vm10593_vm5 = vmor %vm984_vm13, %vm985_vm14  ;;  %v3945_v43 = vld [vmem:[%s18092_s1 + $0x80] sm:$0xff] }
 0x161   :  { %18964 = vst [vmem:[#allocation71_spill] sm:$0xff] %v10525_v56  ;;  %3995 = vperm.xlu2 %8745, %v3961_v54   ;;  %v10564_v7 = vsub.f32 %v9901_v13, %v9906_v39  ;;  %v18969_v36 = vand.u32 2147483647, %v10030_v48  ;;  %v18972_v59 = vand.u32 2147483647, %v10228_v10  ;;  %v10579_v35 = vand.u32 4294901760, %v10528_v17 }
 0x162   :  { %18965 = vst [vmem:[#allocation72_spill] sm:$0xff] %v10553_v34  ;;  %v982_v54 = vmul.f32 %v10511_v32, %v981_v15  ;;  %vm10582_vm4 = vcmp.eq.f32.partialorder %v988_v61, 8.507059e+37  ;;  %v3969_v48 = vcvt.s32.f32 %v3937_v44  ;;  %v991_v2 = vor.u32 1.1754944e-38, %v990_v0  ;;  %1551 = vmatpush.xpose.msra.mxu1 %v10553_v34  ;;  %2192 = vmatpush.xpose.msrb.mxu0 %v10505_v24  ;;  %v3939_v13 = vld [vmem:[%s18092_s1 + $0x50] sm:$0xff] }
 0x163   :  { %18966 = vst [vmem:[#allocation73_spill] sm:$0xff] %v10557_v29  ;;  %vm10568_vm1 = vcmp.eq.f32.partialorder %v18969_v36, 8.507059e+37  ;;  %vm10574_vm3 = vcmp.eq.f32.partialorder %v18972_v59, 8.507059e+37  ;;  %v3932_v36 = vld [vmem:[%s18092_s1 + $0x18] sm:$0xff]  ;;  %v3968_v61 = vcvt.s32.f32 %v3936_v31  ;;  %v10600_v15 = vsub.f32 %v9862_v52, %v9871_v38  ;;  %1752 = vmatpush.xpose.msra.mxu2 %v10557_v29 }
 0x164   :  { %18967 = vst [vmem:[#allocation74_spill] sm:$0xff] %v10560_v8  ;;  %v10603_v44 = vand.u32 4294901760, %v10564_v7  ;;  %vm909_vm6 = vweird.f32 %v10131_v3  ;;  %v1096_v6 = vmul.f32 %v9019_v14, %v1007_v58  ;;  %v983_v23 = vadd.f32 %v10511_v32, %v982_v54 }
 0x165   :  { %18968 = vst [vmem:[#allocation75_spill] sm:$0xff] %v10564_v7  ;;  %v10610_v0 = vand.u32 4294901760, %v1264_v19  ;;  %v10615_v52 = vsub.f32 %v10285_v41, %v10312_v21  ;;  %v1256_v31 = vsub.f32 %v10522_v18, %v10560_v8  ;;  %v10621_v26 = vand.u32 4294901760, %v10557_v29  ;;  %4035 = vperm.xlu0 %8746, %v3969_v48   ;;  %4030 = vperm.xlu1 %8747, %v3968_v61   ;;  %v9021_v41 = vld [vmem:[%s18091_s0 + $0xc8] sm:$0xff] }
 0x166   :  { %18975 = vst [vmem:[#allocation76_spill] sm:$0xff] %v10579_v35  ;;  %v1232_v58 = vsub.f32 %v10564_v7, %v10603_v44  ;;  %1955 = vmatmul.f32.vlgmr.msra.gmra.mxu3 %v10603_v44  ;;  %v3964_v19 = vcvt.s32.f32 %v3932_v36  ;;  %v18985_v54 = vand.u32 2147483647, %v9991_v57  ;;  %v977_v62 = vsel %vm10484_vm10, %v10465_v25, %v972_v5  ;;  %2196 = vmatpush.xpose.msrb.mxu0 %v10560_v8 }
 0x167   :  { %18980 = vst [vmem:[#allocation77_spill] sm:$0xff] %v10600_v15  ;;  %v987_v57 = vsel %vm10593_vm5, %v10511_v32, %v983_v23  ;;  %v10647_v36 = vand.u32 4294901760, %v10615_v52  ;;  %1557 = vmatpush.xpose.msra.mxu1 %v10610_v0  ;;  %v10659_v25 = vand.u32 4294901760, %v10600_v15  ;;  %v3940_v23 = vld [vmem:[%s18092_s1 + $0x58] sm:$0xff]  ;;  %v10666_v32 = vsub.f32 %v10479_v30, %v10525_v56  ;;  %1755 = vmatpush.xpose.msra.mxu2 %v10600_v15 }
 0x168   :  { %18981 = vst [vmem:[#allocation78_spill] sm:$0xff] %v10603_v44  ;;  %vm10628_vm7 = vcmp.eq.f32.partialorder %v18985_v54, 8.507059e+37  ;;  %v10651_v54 = vsub.f32 %v10337_v55, %v10358_v12  ;;  %v992_v10 = vsel %vm10582_vm4, %v991_v2, %v987_v57  ;;  %v10656_v9 = vand.u32 4294901760, %v1232_v58  ;;  %v9020_v2 = vld [vmem:[%s18091_s0 + $0xd0] sm:$0xff] }
 0x169   :  { %18982 = vst [vmem:[#allocation79_spill] sm:$0xff] %v10610_v0  ;;  %v1183_v55 = vsel %vm76_vm0, %v1096_v6, 0  ;;  %v1095_v5 = vmul.f32 %v9020_v2, %v992_v10  ;;  %v1480_v48 = vsub.f32 %v10615_v52, %v10647_v36  ;;  %v957_v6 = vsel %vm10636_vm11, %v10302_v22, %v10460_v49  ;;  %4010 = vperm.xlu2 %8745, %v3964_v19  }
 0x16a   :  { %18983 = vst [vmem:[#allocation80_spill] sm:$0xff] %v10615_v52  ;;  %v10679_v59 = vand.u32 4294901760, %v10651_v54  ;;  %v10686_v30 = vand.u32 4294901760, %v1256_v31  ;;  %v1248_v61 = vsub.f32 %v10557_v29, %v10621_v26  ;;  %1234 = vmatmul.f32.vlgmr.msra.gmra.mxu0 %v10656_v9  ;;  %v10692_v58 = vand.u32 4294901760, %v10666_v32 }
 0x16b   :  { %18984 = vst [vmem:[#allocation81_spill] sm:$0xff] %v10621_v26  ;;  %vm879_vm8 = vweird.f32 %v9978_v20  ;;  %vm880_vm9 = vweird.f32 %v10013_v47  ;;  %v1094_v22 = vmul.f32 %v9021_v41, %v977_v62  ;;  %v3972_v49 = vcvt.s32.f32 %v3940_v23  ;;  %v3933_v62 = vld [vmem:[%s18092_s1 + $0x20] sm:$0xff]  ;;  %1758 = vmatpush.xpose.msra.mxu2 %v10564_v7  ;;  %2200 = vmatpush.xpose.msrb.mxu0 %v10621_v26 }
 0x16c   :  { %18990 = vst [vmem:[#allocation82_spill] sm:$0xff] %v10647_v36  ;;  %v10699_v31 = vand.u32 4294901760, %v1480_v48  ;;  %v1472_v57 = vsub.f32 %v10651_v54, %v10679_v59  ;;  %vm894_vm10 = vweird.f32 %v10042_v11  ;;  %v10704_v19 = vand.u32 4294901760, %v1183_v55  ;;  %1563 = vmatpush.xpose.msra.mxu1 %v10686_v30 }
 0x16d   :  { %18991 = vst [vmem:[#allocation83_spill] sm:$0xff] %v10651_v54  ;;  %v3971_v10 = vcvt.s32.f32 %v3939_v13  ;;  %v1240_v2 = vsub.f32 %v10600_v15, %v10659_v25  ;;  %v10714_v23 = vsub.f32 %v10528_v17, %v10579_v35  ;;  %vm910_vm12 = vweird.f32 %v10198_v27  ;;  %4050 = vperm.xlu0 %8746, %v3972_v49  }
 0x16e   :  { %18992 = vst [vmem:[#allocation84_spill] sm:$0xff] %v10656_v9  ;;  %v1180_v48 = vsel %vm76_vm0, %v1095_v5, 0  ;;  %2793 = vmatpush.xpose.msrb.mxu3 %v10699_v31  ;;  %v10720_v13 = vand.u32 4294901760, %v1472_v57  ;;  %v1464_v41 = vsub.f32 %v10666_v32, %v10692_v58  ;;  %v913_v5 = vand.u32 2147483647, %v10131_v3  ;;  %1761 = vmatmul.f32.vlgmr.msra.gmra.mxu2 %v10564_v7 }
 0x16f   :  { %18993 = vst [vmem:[#allocation85_spill] sm:$0xff] %v10659_v25  ;;  %v10736_v57 = vand.u32 4294901760, %v1248_v61  ;;  %2500 = vmatpush.xpose.msrb.mxu2 %v10312_v21  ;;  %1961 = vmatmul.f32.gmra.mxu3 %v10659_v25  ;;  %v908_v40 = vadd.f32 %v10198_v27, %v10309_v1  ;;  %v10753_v16 = vand.u32 4294901760, %v1180_v48  ;;  %v10756_v1 = vand.u32 4294901760, %v1240_v2  ;;  %v19013_v2 = vld [vmem:[#allocation49_spill] sm:$0xff]  ;;  %v19016_v21 = vld [vmem:[#allocation50_spill] sm:$0xff] }
 0x170   :  { %18994 = vst [vmem:[#allocation86_spill] sm:$0xff] %v10666_v32  ;;  %4045 = vperm.xlu1 %8747, %v3971_v10   ;;  %vm895_vm13 = vweird.f32 %v10089_v51  ;;  %v3942_v10 = vld [vmem:[%s18092_s1 + $0x68] sm:$0xff]  ;;  %vm10794_vm14 = vcmp.eq.f32.partialorder %v913_v5, 8.507059e+37  ;;  %2204 = vmatpush.xpose.msrb.mxu0 %v10659_v25  ;;  %vm865_vm11 = vweird.f32 %v19013_v2 }
 0x171   :  { %18995 = vst [vmem:[#allocation87_spill] sm:$0xff] %v10679_v59  ;;  %v19002_v59 = vsel %vm10280_vm2, %v10073_v33, %v10257_v45  ;;  %v915_v33 = vand.u32 2147483648, %v10131_v3  ;;  %v1177_v45 = vsel %vm76_vm0, %v1094_v22, 0  ;;  %vm10749_vm2 = vmor %vm909_vm6, %vm910_vm12  ;;  %1569 = vmatpush.xpose.msra.mxu1 %v10736_v57  ;;  %v10765_v3 = vsub.f32 %v1183_v55, %v10704_v19  ;;  %v9022_v22 = vld [vmem:[%s18091_s0 + $0xc0] sm:$0xff]  ;;  %v3946_v25 = vld [vmem:[%s18092_s1 + $0x88] sm:$0xff] }
 0x172   :  { %18996 = vst [vmem:[#allocation88_spill] sm:$0xff] %v10686_v30  ;;  %v947_v17 = vsel %vm10568_vm1, %v10076_v53, %v19002_v59  ;;  %v3965_v53 = vcvt.s32.f32 %v3933_v62  ;;  %v10762_v59 = vand.u32 4294901760, %v10714_v23  ;;  %2799 = vmatpush.xpose.msrb.mxu3 %v10720_v13  ;;  %v10779_v55 = vand.u32 4294901760, %v1464_v41  ;;  %1242 = vmatmul.f32.gmra.mxu0 %v10756_v1  ;;  %vm10845_vm4 = vmor %vm894_vm10, %vm895_vm13 }
 0x173   :  { %18997 = vst [vmem:[#allocation89_spill] sm:$0xff] %v10692_v58  ;;  %v19015_v58 = vld [vmem:[#allocation41_spill] sm:$0xff]  ;;  %2502 = vmatpush.xpose.msrb.mxu2 %v10358_v12  ;;  %v10803_v14 = vand.u32 4294901760, %v1177_v45  ;;  %v3974_v5 = vcvt.s32.f32 %v3942_v10  ;;  %v898_v10 = vand.u32 2147483647, %v10042_v11 }
 0x174   :  { %18998 = vst [vmem:[#allocation90_spill] sm:$0xff] %v10699_v31  ;;  %v962_v31 = vsel %vm10574_vm3, %v10361_v60, %v957_v6  ;;  %v19010_v6 = vsub.f32 1.0, %v10116_v28  ;;  %v19012_v28 = vld [vmem:[#allocation43_spill] sm:$0xff]  ;;  %v19017_v36 = vsel %vm10269_vm15, %v19015_v58, %v19016_v21  ;;  %v912_v21 = vsel %vm10749_vm2, %v10198_v27, %v908_v40  ;;  %4015 = vperm.xlu2 %8745, %v3965_v53   ;;  %v19026_v53 = vld [vmem:[#allocation45_spill] sm:$0xff]  ;;  %vm10830_vm3 = vmor %vm879_vm8, %vm880_vm9 }
 0x175   :  { %18999 = vst [vmem:[#allocation91_spill] sm:$0xff] %v10704_v19  ;;  %v1093_v49 = vmul.f32 %v9022_v22, %v962_v31  ;;  %v860_v62 = vmul.f32 %v19013_v2, %v19012_v28  ;;  %v932_v31 = vsel %vm10628_vm7, %v19018_v37, %v19017_v36  ;;  %v9023_v22 = vld [vmem:[%s18091_s0 + $0xb8] sm:$0xff]  ;;  %v916_v58 = vor.u32 1.1754944e-38, %v915_v33  ;;  %v19022_v36 = vld [vmem:[#allocation37_spill] sm:$0xff]  ;;  %1575 = vmatpush.xpose.msra.mxu1 %v10756_v1 }
 0x176   :  { %19000 = vst [vmem:[#allocation92_spill] sm:$0xff] %v10714_v23  ;;  %v892_v61 = vmul.f32 %v10089_v51, %v19010_v6  ;;  %v1092_v7 = vmul.f32 %v9023_v22, %v947_v17  ;;  %v3977_v37 = vcvt.s32.f32 %v3945_v43  ;;  %vm849_vm15 = vweird.f32 %v19022_v36  ;;  %v19023_v17 = vld [vmem:[#allocation39_spill] sm:$0xff]  ;;  %2805 = vmatpush.xpose.msrb.mxu3 %v10779_v55  ;;  %2208 = vmatpush.xpose.msrb.mxu0 %v10603_v44 }
 0x177   :  { %19001 = vst [vmem:[#allocation93_spill] sm:$0xff] %v10720_v13  ;;  %vm850_vm1 = vweird.f32 %v19023_v17  ;;  %v3935_v6 = vld [vmem:[%s18092_s1 + $0x30] sm:$0xff]  ;;  %v1456_v27 = vsub.f32 %v10714_v23, %v10762_v59  ;;  %v10815_v40 = vand.u32 4294901760, %v10765_v3  ;;  %v10818_v33 = vsub.f32 %v1180_v48, %v10753_v16  ;;  %2504 = vmatpush.xpose.msrb.mxu2 %v10525_v56  ;;  %1967 = vmatmul.f32.gmra.mxu3 %v10621_v26 }
 0x178   :  { %19003 = vst [vmem:[#allocation94_spill] sm:$0xff] %v10736_v57  ;;  %v878_v60 = vadd.f32 %v10013_v47, %v19026_v53  ;;  %v885_v43 = vand.u32 2147483648, %v9978_v20  ;;  %v1174_v22 = vsel %vm76_vm0, %v1093_v49, 0  ;;  %v893_v48 = vadd.f32 %v10089_v51, %v892_v61  ;;  %v9024_v13 = vld [vmem:[%s18091_s0 + $0xb0] sm:$0xff]  ;;  %4075 = vperm.xlu0 %8746, %v3977_v37   ;;  %4060 = vperm.xlu1 %8747, %v3974_v5   ;;  %vm10940_vm8 = vmor %vm849_vm15, %vm850_vm1 }
 0x179   :  { %19006 = vst [vmem:[#allocation95_spill] sm:$0xff] %v10753_v16  ;;  %v900_v53 = vand.u32 2147483648, %v10042_v11  ;;  %v1091_v49 = vmul.f32 %v9024_v13, %v932_v31  ;;  %v10850_v61 = vsel %vm76_vm0, %v1092_v7, 0  ;;  %v3967_v13 = vcvt.s32.f32 %v3935_v6  ;;  %1581 = vmatpush.xpose.msra.mxu1 %v10656_v9  ;;  %1766 = vmatmul.f32.gmra.mxu2 %v10600_v15 }
 0x17a   :  { %19007 = vst [vmem:[#allocation96_spill] sm:$0xff] %v10756_v1  ;;  %v861_v1 = vsub.f32 1.0, %v860_v62  ;;  %v917_v62 = vsel %vm10794_vm14, %v916_v58, %v912_v21  ;;  %v10855_v31 = vsub.f32 %v1177_v45, %v10803_v14  ;;  %v10858_v26 = vand.u32 4294901760, %v1174_v22  ;;  %v3944_v45 = vld [vmem:[%s18092_s1 + $0x78] sm:$0xff]  ;;  %1250 = vmatmul.f32.gmra.mxu0 %v10736_v57 }
 0x17b   :  { %19008 = vst [vmem:[#allocation97_spill] sm:$0xff] %v10762_v59  ;;  %v10861_v11 = vand.u32 4294901760, %v1456_v27  ;;  %v1448_v7 = vsub.f32 %v10765_v3, %v10815_v40  ;;  %v10866_v41 = vand.u32 4294901760, %v10818_v33  ;;  %v882_v21 = vsel %vm10830_vm3, %v10013_v47, %v878_v60  ;;  %v19040_v27 = vld [vmem:[#allocation5_spill] sm:$0xff]  ;;  %2506 = vmatpush.xpose.msrb.mxu2 %v10579_v35  ;;  %3015 = vmatpush.xpose.msra.mxu0 %v10615_v52  ;;  %v19057_v52 = vld [vmem:[#allocation38_spill] sm:$0xff] }
 0x17c   :  { %19009 = vst [vmem:[#allocation98_spill] sm:$0xff] %v10765_v3  ;;  %v19035_v58 = vand.u32 2147483647, %v9978_v20  ;;  %v886_v5 = vor.u32 1.1754944e-38, %v885_v43  ;;  %vm10880_vm6 = vcmp.eq.f32.partialorder %v898_v10, 8.507059e+37  ;;  %v897_v20 = vsel %vm10845_vm4, %v10089_v51, %v893_v48  ;;  %1583 = vmatmul.f32.vlgmr.msra.gmra.mxu1 %v9906_v39  ;;  %4025 = vperm.xlu2 %8745, %v3967_v13   ;;  %v19045_v13 = vld [vmem:[#allocation42_spill] sm:$0xff] }
 0x17d   :  { %19011 = vst [vmem:[#allocation99_spill] sm:$0xff] %v10779_v55  ;;  %2339 = vmatpush.xpose.msrb.mxu1 %v19040_v27  ;;  %v901_v47 = vor.u32 1.1754944e-38, %v900_v53  ;;  %v862_v60 = vmul.f32 %v19013_v2, %v861_v1  ;;  %v10894_v43 = vsel %vm76_vm0, %v1091_v49, 0  ;;  %v10899_v10 = vand.u32 4294901760, %v10850_v61  ;;  %2811 = vmatpush.xpose.msrb.mxu3 %v10861_v11  ;;  %v3938_v53 = vld [vmem:[%s18092_s1 + $0x48] sm:$0xff]  ;;  %v19061_v27 = vld [vmem:[#allocation7_spill] sm:$0xff] }
 0x17e   :  { %19021 = vst [vmem:[#allocation43_spill] sm:$0xff] %v10803_v14  ;;  %vm10876_vm5 = vcmp.eq.f32.partialorder %v19035_v58, 8.507059e+37  ;;  %v9025_v58 = vld [vmem:[%s18091_s0 + $0xa8] sm:$0xff]  ;;  %v10906_v51 = vand.u32 4294901760, %v10855_v31  ;;  %v3976_v1 = vcvt.s32.f32 %v3944_v45  ;;  %v3978_v55 = vcvt.s32.f32 %v3946_v25 }
 0x17f   :  { %19024 = vst [vmem:[#allocation49_spill] sm:$0xff] %v10815_v40  ;;  %v1090_v44 = vmul.f32 %v9025_v58, %v917_v62  ;;  %v10909_v48 = vand.u32 4294901760, %v1448_v7  ;;  %v1440_v49 = vsub.f32 %v10818_v33, %v10866_v41  ;;  %v10917_v62 = vsub.f32 %v1174_v22, %v10858_v26  ;;  %v19046_v7 = vld [vmem:[#allocation6_spill] sm:$0xff]  ;;  %2508 = vmatpush.xpose.msrb.mxu2 %v10704_v19 }
 0x180   :  { %19025 = vst [vmem:[#allocation57_spill] sm:$0xff] %v10818_v33  ;;  %v10922_v45 = vadd.f32 %v19023_v17, %v19045_v13  ;;  %v855_v25 = vand.u32 2147483648, %v19022_v36  ;;  %vm864_vm7 = vweird.f32 %v19012_v28  ;;  %v887_v58 = vsel %vm10876_vm5, %v886_v5, %v882_v21  ;;  %1973 = vmatmul.f32.gmra.mxu3 %v10560_v8  ;;  %4070 = vperm.xlu0 %8746, %v3976_v1   ;;  %v19055_v1 = vld [vmem:[#allocation40_spill] sm:$0xff] }
 0x181   :  { %19031 = vst [vmem:[#allocation41_spill] sm:$0xff] %v10855_v31  ;;  %2341 = vmatpush.xpose.msrb.mxu1 %v19046_v7  ;;  %v902_v22 = vsel %vm10880_vm6, %v901_v47, %v897_v20  ;;  %v868_v15 = vand.u32 2147483647, %v19012_v28  ;;  %v870_v57 = vand.u32 2147483648, %v19012_v28  ;;  %v863_v21 = vadd.f32 %v19013_v2, %v862_v60  ;;  %vm10952_vm9 = vmor %vm864_vm7, %vm865_vm11  ;;  %4080 = vperm.xlu1 %8747, %v3978_v55   ;;  %v3949_v28 = vld [vmem:[%s18092_s1 + $0xa0] sm:$0xff] }
 0x182   :  { %19032 = vst [vmem:[#allocation50_spill] sm:$0xff] %v10858_v26  ;;  %v10946_v37 = vand.u32 4294901760, %v10894_v43  ;;  %v3970_v5 = vcvt.s32.f32 %v3938_v53  ;;  %v1432_v6 = vsub.f32 %v10855_v31, %v10906_v51  ;;  %v1165_v47 = vsel %vm76_vm0, %v1090_v44, 0  ;;  %2817 = vmatpush.xpose.msrb.mxu3 %v10909_v48  ;;  %1771 = vmatmul.f32.gmra.mxu2 %v10557_v29  ;;  %v19069_v20 = vld [vmem:[#allocation8_spill] sm:$0xff] }
 0x183   :  { %19033 = vst [vmem:[#allocation46_spill] sm:$0xff] %v10861_v11  ;;  %v10958_v60 = vand.u32 4294901760, %v1440_v49  ;;  %v10961_v8 = vand.u32 4294901760, %v10917_v62  ;;  %v10965_v53 = vsub.f32 %v10850_v61, %v10899_v10  ;;  %v19056_v9 = vsub.f32 1.0, %v19055_v1  ;;  %v9026_v61 = vld [vmem:[%s18091_s0 + $0xa0] sm:$0xff]  ;;  %2510 = vmatpush.xpose.msrb.mxu2 %v10753_v16  ;;  %1258 = vmatmul.f32.gmra.mxu0 %v10686_v30 }
 0x184   :  { %19034 = vst [vmem:[#allocation37_spill] sm:$0xff] %v10866_v41  ;;  %v19058_v55 = vand.u32 2147483647, %v19022_v36  ;;  %v856_v11 = vor.u32 1.1754944e-38, %v855_v25  ;;  %v852_v36 = vsel %vm10940_vm8, %v19023_v17, %v10922_v45  ;;  %v9027_v25 = vld [vmem:[%s18091_s0 + $0x98] sm:$0xff]  ;;  %vm10994_vm12 = vcmp.eq.f32.partialorder %v868_v15, 8.507059e+37  ;;  %1587 = vmatmul.f32.gmra.mxu1 %v9871_v38  ;;  %4040 = vperm.xlu2 %8745, %v3970_v5  }
 0x185   :  { %19041 = vst [vmem:[#allocation39_spill] sm:$0xff] %v10899_v10  ;;  %v832_v44 = vmul.f32 %v19057_v52, %v19056_v9  ;;  %2343 = vmatpush.xpose.msrb.mxu1 %v19061_v27  ;;  %v3948_v9 = vld [vmem:[%s18092_s1 + $0x98] sm:$0xff]  ;;  %v1088_v1 = vmul.f32 %v9027_v25, %v887_v58  ;;  %v11003_v13 = vand.u32 4294901760, %v1165_v47  ;;  %v11006_v17 = vand.u32 4294901760, %v1432_v6  ;;  %3018 = vmatpush.xpose.msra.mxu0 %v10651_v54 }
 0x186   :  { %19042 = vst [vmem:[#allocation45_spill] sm:$0xff] %v10906_v51  ;;  %vm10975_vm10 = vcmp.eq.f32.partialorder %v19058_v55, 8.507059e+37  ;;  %v871_v55 = vor.u32 1.1754944e-38, %v870_v57  ;;  %v3981_v15 = vcvt.s32.f32 %v3949_v28  ;;  %2823 = vmatpush.xpose.msrb.mxu3 %v10958_v60  ;;  %v3980_v45 = vcvt.s32.f32 %v3948_v9  ;;  %v3941_v57 = vld [vmem:[%s18092_s1 + $0x60] sm:$0xff]  ;;  %v19068_v5 = vld [vmem:[#allocation35_spill] sm:$0xff] }
 0x187   :  { %19043 = vst [vmem:[#allocation100_spill] sm:$0xff] %v10909_v48  ;;  %v1089_v48 = vmul.f32 %v9026_v61, %v902_v22  ;;  %v867_v61 = vsel %vm10952_vm9, %v19013_v2, %v863_v21  ;;  %v1424_v58 = vsub.f32 %v10917_v62, %v10961_v8  ;;  %v11015_v2 = vand.u32 4294901760, %v10965_v53  ;;  %2512 = vmatpush.xpose.msrb.mxu2 %v10803_v14 }
 0x188   :  { %19044 = vst [vmem:[#allocation101_spill] sm:$0xff] %v10917_v62  ;;  %v11019_v21 = vsub.f32 %v10894_v43, %v10946_v37  ;;  %vm834_vm2 = vweird.f32 %v19068_v5  ;;  %vm835_vm13 = vweird.f32 %v19057_v52  ;;  %v833_v28 = vadd.f32 %v19057_v52, %v832_v44  ;;  %1979 = vmatmul.f32.gmra.mxu3 %v10505_v24  ;;  %4095 = vperm.xlu0 %8746, %v3981_v15  }
 0x189   :  { %19049 = vst [vmem:[#allocation42_spill] sm:$0xff] %v10946_v37  ;;  %v1162_v6 = vsel %vm76_vm0, %v1089_v48, 0  ;;  %2345 = vmatpush.xpose.msrb.mxu1 %v19069_v20  ;;  %v838_v9 = vand.u32 2147483647, %v19068_v5  ;;  %v840_v25 = vand.u32 2147483648, %v19068_v5  ;;  %v872_v43 = vsel %vm10994_vm12, %v871_v55, %v867_v61  ;;  %vm11041_vm14 = vmor %vm834_vm2, %vm835_vm13  ;;  %4090 = vperm.xlu1 %8747, %v3980_v45   ;;  %v19076_v55 = vld [vmem:[#allocation9_spill] sm:$0xff] }
 0x18a   :  { %19052 = vst [vmem:[#allocation102_spill] sm:$0xff] %v10958_v60  ;;  %v857_v29 = vsel %vm10975_vm10, %v856_v11, %v852_v36  ;;  %v1159_v48 = vsel %vm76_vm0, %v1088_v1, 0  ;;  %v3973_v30 = vcvt.s32.f32 %v3941_v57  ;;  %v11037_v44 = vsub.f32 %v1165_v47, %v11003_v13  ;;  %2829 = vmatpush.xpose.msrb.mxu3 %v11006_v17  ;;  %v9028_v47 = vld [vmem:[%s18091_s0 + $0x90] sm:$0xff]  ;;  %1776 = vmatmul.f32.gmra.mxu2 %v10522_v18 }
 0x18b   :  { %19053 = vst [vmem:[#allocation103_spill] sm:$0xff] %v10961_v8  ;;  %v11045_v22 = vand.u32 4294901760, %v1162_v6  ;;  %v11048_v49 = vand.u32 4294901760, %v1424_v58  ;;  %v1416_v11 = vsub.f32 %v10965_v53, %v11015_v2  ;;  %v11053_v36 = vand.u32 4294901760, %v11019_v21  ;;  %v3951_v61 = vld [vmem:[%s18092_s1 + $0xb0] sm:$0xff]  ;;  %2514 = vmatpush.xpose.msrb.mxu2 %v10858_v26  ;;  %1266 = vmatmul.f32.gmra.mxu0 %v10610_v0  ;;  %v9029_v58 = vld [vmem:[%s18091_s0 + $0x88] sm:$0xff] }
 0x18c   :  { %19054 = vst [vmem:[#allocation104_spill] sm:$0xff] %v10965_v53  ;;  %v1087_v1 = vmul.f32 %v9028_v47, %v872_v43  ;;  %vm11063_vm15 = vcmp.eq.f32.partialorder %v838_v9, 8.507059e+37  ;;  %v841_v45 = vor.u32 1.1754944e-38, %v840_v25  ;;  %v837_v57 = vsel %vm11041_vm14, %v19057_v52, %v833_v28  ;;  %1591 = vmatmul.f32.gmra.mxu1 %v9812_v42  ;;  %4055 = vperm.xlu2 %8745, %v3973_v30   ;;  %v3943_v52 = vld [vmem:[%s18092_s1 + $0x70] sm:$0xff]  ;;  %v19093_v0 = vld [vmem:[#allocation12_spill] sm:$0xff] }
 0x18d   :  { %19064 = vst [vmem:[#allocation40_spill] sm:$0xff] %v11003_v13  ;;  %2347 = vmatpush.xpose.msrb.mxu1 %v19076_v55  ;;  %v1086_v5 = vmul.f32 %v9029_v58, %v857_v29  ;;  %v11075_v43 = vand.u32 4294901760, %v1159_v48  ;;  %v11079_v9 = vand.u32 4294901760, %v11037_v44  ;;  %v11082_v25 = vand.u32 4294901760, %v1416_v11  ;;  %3021 = vmatpush.xpose.msra.mxu0 %v10666_v32  ;;  %v19083_v47 = vld [vmem:[#allocation10_spill] sm:$0xff] }
 0x18e   :  { %19065 = vst [vmem:[#allocation38_spill] sm:$0xff] %v11006_v17  ;;  %2835 = vmatpush.xpose.msrb.mxu3 %v11048_v49  ;;  %v1408_v54 = vsub.f32 %v11019_v21, %v11053_v36  ;;  %v3983_v29 = vcvt.s32.f32 %v3951_v61  ;;  %v11090_v28 = vsub.f32 %v1162_v6, %v11045_v22  ;;  %v1156_v30 = vsel %vm76_vm0, %v1087_v1, 0 }
 0x18f   :  { %19066 = vst [vmem:[#allocation105_spill] sm:$0xff] %v11015_v2  ;;  %v842_v11 = vsel %vm11063_vm15, %v841_v45, %v837_v57  ;;  %2516 = vmatpush.xpose.msrb.mxu2 %v10899_v10  ;;  %v3975_v58 = vcvt.s32.f32 %v3943_v52  ;;  %v1400_v61 = vsub.f32 %v11037_v44, %v11079_v9  ;;  %v11102_v6 = vsub.f32 %v1159_v48, %v11075_v43  ;;  %v9030_v45 = vld [vmem:[%s18091_s0 + $0x80] sm:$0xff]  ;;  %v19088_v52 = vld [vmem:[#allocation11_spill] sm:$0xff]  ;;  %v3954_v48 = vld [vmem:[%s18092_s1 + $0xc8] sm:$0xff] }
 0x190   :  { %19067 = vst [vmem:[#allocation106_spill] sm:$0xff] %v11019_v21  ;;  %1985 = vmatmul.f32.gmra.mxu3 %v10454_v46  ;;  %v1153_v24 = vsel %vm76_vm0, %v1086_v5, 0  ;;  %v11105_v18 = vand.u32 4294901760, %v1156_v30  ;;  %v11108_v1 = vand.u32 4294901760, %v1408_v54  ;;  %v11111_v15 = vand.u32 4294901760, %v11090_v28 }
 0x191   :  { %19070 = vst [vmem:[#allocation35_spill] sm:$0xff] %v11037_v44  ;;  %2349 = vmatpush.xpose.msrb.mxu1 %v19083_v47  ;;  %4105 = vperm.xlu1 %8747, %v3983_v29   ;;  %v1085_v57 = vmul.f32 %v9030_v45, %v842_v11  ;;  %v11123_v5 = vand.u32 4294901760, %v1153_v24  ;;  %v11126_v54 = vand.u32 4294901760, %v1400_v61  ;;  %v11129_v29 = vand.u32 4294901760, %v11102_v6  ;;  %v3952_v11 = vld [vmem:[%s18092_s1 + $0xb8] sm:$0xff]  ;;  %v3947_v45 = vld [vmem:[%s18092_s1 + $0x90] sm:$0xff] }
 0x192   :  { %19073 = vst [vmem:[#allocation107_spill] sm:$0xff] %v11045_v22  ;;  %2841 = vmatpush.xpose.msrb.mxu3 %v11082_v25  ;;  %1781 = vmatmul.f32.gmra.mxu2 %v10451_v63  ;;  %v1392_v46 = vsub.f32 %v11090_v28, %v11111_v15  ;;  %v3986_v63 = vcvt.s32.f32 %v3954_v48  ;;  %v3984_v61 = vcvt.s32.f32 %v3952_v11  ;;  %v3979_v32 = vcvt.s32.f32 %v3947_v45  ;;  %v19099_v45 = vld [vmem:[#allocation63_spill] sm:$0xff] }
 0x193   :  { %19074 = vst [vmem:[#allocation108_spill] sm:$0xff] %v11048_v49  ;;  %2518 = vmatpush.xpose.msrb.mxu2 %v10946_v37  ;;  %1274 = vmatmul.f32.gmra.mxu0 %v10553_v34  ;;  %v1150_v34 = vsel %vm76_vm0, %v1085_v57, 0  ;;  %v1384_v60 = vsub.f32 %v11102_v6, %v11129_v29  ;;  %v11159_v11 = vsub.f32 %v1153_v24, %v11123_v5  ;;  %v3950_v49 = vld [vmem:[%s18092_s1 + $0xa8] sm:$0xff] }
 0x194   :  { %19075 = vst [vmem:[#allocation109_spill] sm:$0xff] %v11053_v36  ;;  %1595 = vmatmul.f32.gmra.mxu1 %v9784_v50  ;;  %4065 = vperm.xlu2 %8745, %v3975_v58   ;;  %v11141_v58 = vsub.f32 %v1156_v30, %v11105_v18  ;;  %v11150_v48 = vand.u32 4294901760, %v1150_v34  ;;  %v11153_v30 = vand.u32 4294901760, %v1392_v46  ;;  %v19101_v46 = vld [vmem:[#allocation17_spill] sm:$0xff] }
 0x195   :  { %19079 = vst [vmem:[#allocation110_spill] sm:$0xff] %v11075_v43  ;;  %2351 = vmatpush.xpose.msrb.mxu1 %v19088_v52  ;;  %3024 = vmatpush.xpose.msra.mxu0 %v10714_v23  ;;  %v19098_v23 = vld [vmem:[#allocation13_spill] sm:$0xff] }
 0x196   :  { %19080 = vst [vmem:[#allocation111_spill] sm:$0xff] %v11079_v9  ;;  %2847 = vmatpush.xpose.msrb.mxu3 %v11108_v1  ;;  %4110 = vperm.xlu0 %8746, %v3984_v61   ;;  %v11156_v57 = vand.u32 4294901760, %v11141_v58  ;;  %v3957_v61 = vld [vmem:[%s18092_s1 + $0xe0] sm:$0xff] }
 0x197   :  { %19081 = vst [vmem:[#allocation112_spill] sm:$0xff] %v11082_v25  ;;  %2520 = vmatpush.xpose.msrb.mxu2 %v11003_v13  ;;  %v3989_v17 = vcvt.s32.f32 %v3957_v61  ;;  %v3982_v25 = vcvt.s32.f32 %v3950_v49 }
 0x198   :  { %19082 = vst [vmem:[#allocation113_spill] sm:$0xff] %v11090_v28  ;;  %1991 = vmatmul.f32.gmra.mxu3 %v10447_v4  ;;  %v19100_v4 = vld [vmem:[#allocation69_spill] sm:$0xff]  ;;  %v1376_v24 = vsub.f32 %v11141_v58, %v11156_v57 }
 0x199   :  { %19084 = vst [vmem:[#allocation114_spill] sm:$0xff] %v11102_v6  ;;  %2353 = vmatpush.xpose.msrb.mxu1 %v19093_v0  ;;  %4120 = vperm.xlu1 %8747, %v3986_v63   ;;  %v11169_v63 = vand.u32 4294901760, %v1384_v60  ;;  %v19105_v60 = vld [vmem:[#allocation62_spill] sm:$0xff] }
 0x19a   :  { %19085 = vst [vmem:[#allocation115_spill] sm:$0xff] %v11105_v18  ;;  %2853 = vmatpush.xpose.msrb.mxu3 %v11126_v54  ;;  %1786 = vmatmul.f32.gmra.mxu2 %v19099_v45  ;;  %v11175_v45 = vand.u32 4294901760, %v11159_v11  ;;  %v11188_v61 = vand.u32 4294901760, %v1376_v24  ;;  %v3953_v24 = vld [vmem:[%s18092_s1 + $0xc0] sm:$0xff] }
 0x19b   :  { %19086 = vst [vmem:[#allocation116_spill] sm:$0xff] %v11108_v1  ;;  %2522 = vmatpush.xpose.msrb.mxu2 %v11045_v22  ;;  %1282 = vmatmul.f32.gmra.mxu0 %v19100_v4  ;;  %v11181_v4 = vsub.f32 %v1150_v34, %v11150_v48 }
 0x19c   :  { %19087 = vst [vmem:[#allocation117_spill] sm:$0xff] %v11111_v15  ;;  %1599 = vmatmul.f32.gmra.mxu1 %v19101_v46  ;;  %4085 = vperm.xlu2 %8745, %v3979_v32   ;;  %v19104_v32 = vld [vmem:[#allocation15_spill] sm:$0xff]  ;;  %v1368_v1 = vsub.f32 %v11159_v11, %v11175_v45 }
 0x19d   :  { %19089 = vst [vmem:[#allocation118_spill] sm:$0xff] %v11123_v5  ;;  %2355 = vmatpush.xpose.msrb.mxu1 %v19098_v23  ;;  %3027 = vmatpush.xpose.msra.mxu0 %v10765_v3  ;;  %v11193_v34 = vand.u32 4294901760, %v11181_v4  ;;  %v19109_v3 = vld [vmem:[#allocation60_spill] sm:$0xff] }
 0x19e   :  { %19090 = vst [vmem:[#allocation119_spill] sm:$0xff] %v11126_v54  ;;  %2859 = vmatpush.xpose.msrb.mxu3 %v11153_v30  ;;  %v19108_v54 = vld [vmem:[#allocation16_spill] sm:$0xff] }
 0x19f   :  { %19091 = vst [vmem:[#allocation120_spill] sm:$0xff] %v11129_v29  ;;  %2524 = vmatpush.xpose.msrb.mxu2 %v11075_v43  ;;  %v1360_v49 = vsub.f32 %v11181_v4, %v11193_v34 }
 0x1a0   :  { %19092 = vst [vmem:[#allocation121_spill] sm:$0xff] %v11141_v58  ;;  %1997 = vmatmul.f32.gmra.mxu3 %v19105_v60  ;;  %v19112_v60 = vld [vmem:[#allocation56_spill] sm:$0xff] }
 0x1a1   :  { %19094 = vst [vmem:[#allocation122_spill] sm:$0xff] %v11150_v48  ;;  %2357 = vmatpush.xpose.msrb.mxu1 %v19104_v32  ;;  %4135 = vperm.xlu1 %8747, %v3989_v17   ;;  %v11201_v17 = vand.u32 4294901760, %v1368_v1  ;;  %v3985_v1 = vcvt.s32.f32 %v3953_v24 }
 0x1a2   :  { %19095 = vst [vmem:[#allocation123_spill] sm:$0xff] %v11153_v30  ;;  %2865 = vmatpush.xpose.msrb.mxu3 %v11169_v63  ;;  %1791 = vmatmul.f32.gmra.mxu2 %v19109_v3  ;;  %v19110_v30 = vld [vmem:[#allocation64_spill] sm:$0xff]  ;;  %v19114_v3 = vld [vmem:[#allocation54_spill] sm:$0xff] }
 0x1a3   :  { %19096 = vst [vmem:[#allocation124_spill] sm:$0xff] %v11156_v57  ;;  %2526 = vmatpush.xpose.msrb.mxu2 %v11105_v18  ;;  %1290 = vmatmul.f32.gmra.mxu0 %v19110_v30  ;;  %v19115_v30 = vld [vmem:[#allocation61_spill] sm:$0xff] }
 0x1a4   :  { %19097 = vst [vmem:[#allocation125_spill] sm:$0xff] %v11159_v11  ;;  %1603 = vmatmul.f32.gmra.mxu1 %v19108_v54  ;;  %4100 = vperm.xlu2 %8745, %v3982_v25   ;;  %v11213_v25 = vand.u32 4294901760, %v1360_v49  ;;  %v3955_v49 = vld [vmem:[%s18092_s1 + $0xd0] sm:$0xff] }
 0x1a5   :  { %19102 = vst [vmem:[#allocation126_spill] sm:$0xff] %v11175_v45  ;;  %2359 = vmatpush.xpose.msrb.mxu1 %v19108_v54  ;;  %3030 = vmatpush.xpose.msra.mxu0 %v10818_v33  ;;  %v19116_v54 = vld [vmem:[#allocation82_spill] sm:$0xff]  ;;  %v3987_v24 = vcvt.s32.f32 %v3955_v49  ;;  %v19121_v49 = vld [vmem:[#allocation55_spill] sm:$0xff] }
 0x1a6   :  { %19103 = vst [vmem:[#allocation127_spill] sm:$0xff] %v11181_v4  ;;  %2871 = vmatpush.xpose.msrb.mxu3 %v11188_v61 }
 0x1a7   :  { %19106 = vst [vmem:[#allocation128_spill] sm:$0xff] %v11188_v61  ;;  %2528 = vmatpush.xpose.msrb.mxu2 %v11123_v5  ;;  %4125 = vperm.xlu0 %8746, %v3987_v24   ;;  %v19123_v24 = vld [vmem:[#allocation48_spill] sm:$0xff] }
 0x1a8   :  { %19107 = vst [vmem:[#allocation129_spill] sm:$0xff] %v11193_v34  ;;  %2003 = vmatmul.f32.gmra.mxu3 %v19112_v60  ;;  %v19117_v60 = vld [vmem:[#allocation58_spill] sm:$0xff] }
 0x1a9   :  { %19111 = vst [vmem:[#allocation130_spill] sm:$0xff] %v11201_v17  ;;  %2361 = vmatpush.xpose.msrb.mxu1 %v19101_v46  ;;  %3033 = vmatpush.xpose.msra.mxu0 %v10855_v31 }
 0x1aa   :  { %2877 = vmatpush.xpose.msrb.mxu3 %v11201_v17  ;;  %19113 = vst [vmem:[#allocation131_spill] sm:$0xff] %v11213_v25  ;;  %1796 = vmatmul.f32.gmra.mxu2 %v19114_v3  ;;  %v3956_v3 = vld [vmem:[%s18092_s1 + $0xd8] sm:$0xff] }
 0x1ab   :  { %2530 = vmatpush.xpose.msrb.mxu2 %v11150_v48  ;;  %1298 = vmatmul.f32.gmra.mxu0 %v19115_v30  ;;  %v19118_v30 = vld [vmem:[#allocation53_spill] sm:$0xff]  ;;  %v3988_v46 = vcvt.s32.f32 %v3956_v3  ;;  %v3959_v3 = vld [vmem:[%s18092_s1 + $0xf0] sm:$0xff] }
 0x1ac   :  { %1607 = vmatmul.f32.gmra.mxu1 %v19104_v32  ;;  %4115 = vperm.xlu2 %8745, %v3985_v1   ;;  %v19119_v32 = vld [vmem:[#allocation87_spill] sm:$0xff]  ;;  %v19120_v1 = vld [vmem:[#allocation52_spill] sm:$0xff] }
 0x1ad   :  { %2363 = vmatpush.xpose.msrb.mxu1 %v9784_v50  ;;  %3036 = vmatpush.xpose.msra.mxu0 %v10917_v62  ;;  %v19122_v50 = vld [vmem:[#allocation89_spill] sm:$0xff] }
 0x1ae   :  { %2883 = vmatpush.xpose.msrb.mxu3 %v11213_v25 }
 0x1af   :  { %3450 = vmatpush.xpose.msra.mxu2 %v19116_v54 }
 0x1b0   :  { %2009 = vmatmul.f32.gmra.mxu3 %v19118_v30  ;;  %v3991_v30 = vcvt.s32.f32 %v3959_v3  ;;  %v19127_v3 = vld [vmem:[#allocation36_spill] sm:$0xff] }
 0x1b1   :  { %2365 = vmatpush.xpose.msrb.mxu1 %v9812_v42  ;;  %3039 = vmatpush.xpose.msra.mxu0 %v10965_v53  ;;  %v19143_v42 = vld [vmem:[#allocation22_spill] sm:$0xff] }
 0x1b2   :  { %3641 = vmatpush.xpose.msra.mxu3 %v19117_v60  ;;  %1801 = vmatmul.f32.gmra.mxu2 %v19120_v1  ;;  %v19125_v1 = vld [vmem:[#allocation51_spill] sm:$0xff] }
 0x1b3   :  { %3454 = vmatpush.xpose.msra.mxu2 %v19119_v32  ;;  %1306 = vmatmul.f32.gmra.mxu0 %v19121_v49 }
 0x1b4   :  { %1611 = vmatmul.f32.gmra.mxu1 %v19098_v23  ;;  %4130 = vperm.xlu2 %8745, %v3988_v46   ;;  %v19124_v46 = vld [vmem:[#allocation47_spill] sm:$0xff] }
 0x1b5   :  { %2367 = vmatpush.xpose.msrb.mxu1 %v9871_v38  ;;  %3042 = vmatpush.xpose.msra.mxu0 %v11019_v21 }
 0x1b6   :  { %3643 = vmatpush.xpose.msra.mxu3 %v10358_v12 }
 0x1b7   :  { %3458 = vmatpush.xpose.msra.mxu2 %v19122_v50 }
 0x1b8   :  { %2015 = vmatmul.f32.gmra.mxu3 %v19123_v24  ;;  %v19128_v24 = vld [vmem:[#allocation32_spill] sm:$0xff] }
 0x1b9   :  { %2369 = vmatpush.xpose.msrb.mxu1 %v9906_v39  ;;  %3045 = vmatpush.xpose.msra.mxu0 %v11037_v44 }
 0x1ba   :  { %3645 = vmatpush.xpose.msra.mxu3 %v10525_v56  ;;  %1806 = vmatmul.f32.gmra.mxu2 %v19124_v46  ;;  %v19129_v46 = vld [vmem:[#allocation44_spill] sm:$0xff] }
 0x1bb   :  { %3462 = vmatpush.xpose.msra.mxu2 %v10762_v59  ;;  %1314 = vmatmul.f32.gmra.mxu0 %v19125_v1  ;;  %v11256_v49 = vpop.permute.xlu2 %3995 }
 0x1bc   :  { %1615 = vmatmul.f32.gmra.mxu1 %v19093_v0  ;;  %19126 = vst [vmem:[#allocation132_spill] sm:$0xff] %v11256_v49  ;;  %4145 = vperm.xlu2 %8745, %v3991_v30   ;;  %v3958_v30 = vld [vmem:[%s18092_s1 + $0xe8] sm:$0xff] }
 0x1bd   :  { %3223 = vmatpush.xpose.msra.mxu1 %v19117_v60  ;;  %3048 = vmatpush.xpose.msra.mxu0 %v11090_v28 }
 0x1be   :  { %3647 = vmatpush.xpose.msra.mxu3 %v10579_v35 }
 0x1bf   :  { %3466 = vmatpush.xpose.msra.mxu2 %v10815_v40 }
 0x1c0   :  { %2021 = vmatmul.f32.gmra.mxu3 %v19127_v3  ;;  %v3990_v3 = vcvt.s32.f32 %v3958_v30  ;;  %v19134_v30 = vld [vmem:[#allocation33_spill] sm:$0xff] }
 0x1c1   :  { %3225 = vmatpush.xpose.msra.mxu1 %v10358_v12  ;;  %3051 = vmatpush.xpose.msra.mxu0 %v11102_v6 }
 0x1c2   :  { %3649 = vmatpush.xpose.msra.mxu3 %v10704_v19  ;;  %1811 = vmatmul.f32.gmra.mxu2 %v19128_v24  ;;  %v19131_v24 = vld [vmem:[#allocation30_spill] sm:$0xff] }
 0x1c3   :  { %3470 = vmatpush.xpose.msra.mxu2 %v10866_v41  ;;  %1322 = vmatmul.f32.gmra.mxu0 %v19129_v46  ;;  %v11273_v1 = vpop.permute.xlu2 %4010 }
 0x1c4   :  { %1619 = vmatmul.f32.gmra.mxu1 %v19088_v52  ;;  %19130 = vst [vmem:[#allocation133_spill] sm:$0xff] %v11273_v1  ;;  %4140 = vperm.xlu0 %8746, %v3990_v3   ;;  %v19132_v52 = vld [vmem:[#allocation28_spill] sm:$0xff]  ;;  %v19136_v3 = vld [vmem:[#allocation27_spill] sm:$0xff] }
 0x1c5   :  { %3227 = vmatpush.xpose.msra.mxu1 %v10525_v56  ;;  %3054 = vmatpush.xpose.msra.mxu0 %v11141_v58 }
 0x1c6   :  { %3651 = vmatpush.xpose.msra.mxu3 %v10753_v16 }
 0x1c7   :  { %3474 = vmatpush.xpose.msra.mxu2 %v10906_v51  ;;  %v11283_v46 = vpop.permute.xlu1 %4005 }
 0x1c8   :  { %2027 = vmatmul.f32.gmra.mxu3 %v19131_v24  ;;  %19133 = vst [vmem:[#allocation134_spill] sm:$0xff] %v11283_v46  ;;  %v19137_v24 = vld [vmem:[#allocation25_spill] sm:$0xff] }
 0x1c9   :  { %3229 = vmatpush.xpose.msra.mxu1 %v10579_v35  ;;  %3057 = vmatpush.xpose.msra.mxu0 %v11159_v11 }
 0x1ca   :  { %3653 = vmatpush.xpose.msra.mxu3 %v10803_v14  ;;  %1816 = vmatmul.f32.gmra.mxu2 %v19132_v52 }
 0x1cb   :  { %3478 = vmatpush.xpose.msra.mxu2 %v10961_v8  ;;  %1330 = vmatmul.f32.gmra.mxu0 %v19134_v30 }
 0x1cc   :  { %1623 = vmatmul.f32.gmra.mxu1 %v19083_v47  ;;  %v19140_v47 = vld [vmem:[#allocation29_spill] sm:$0xff] }
 0x1cd   :  { %3231 = vmatpush.xpose.msra.mxu1 %v10704_v19  ;;  %3060 = vmatpush.xpose.msra.mxu0 %v11181_v4 }
 0x1ce   :  { %3655 = vmatpush.xpose.msra.mxu3 %v10858_v26  ;;  %v11289_v0 = vpop.permute.xlu2 %4015 }
 0x1cf   :  { %3482 = vmatpush.xpose.msra.mxu2 %v11015_v2  ;;  %19135 = vst [vmem:[#allocation135_spill] sm:$0xff] %v11289_v0  ;;  %v11297_v52 = vpop.permute.xlu0 %4000  ;;  %v11301_v30 = vpop.permute.xlu1 %4020 }
 0x1d0   :  { %2033 = vmatmul.f32.gmra.mxu3 %v19136_v3  ;;  %19138 = vst [vmem:[#allocation136_spill] sm:$0xff] %v11297_v52  ;;  %v3960_v3 = vld [vmem:[%s18092_s1 + $0xf8] sm:$0xff]  ;;  %s9061_s1 = smov [#allocation2]  }
 0x1d1   :  { %3233 = vmatpush.xpose.msra.mxu1 %v10753_v16  ;;  %19139 = vst [vmem:[#allocation137_spill] sm:$0xff] %v11301_v30  ;;  %s8601_s14 = sshll.u32 %s9061_s1, 4  ;;  %s8602_s14 = int_to_ptr.vmem [resolvable:$true] %s8601_s14 }
 0x1d2   :  { %3657 = vmatpush.xpose.msra.mxu3 %v10899_v10  ;;  %1821 = vmatmul.f32.gmra.mxu2 %v19137_v24  ;;  %v3992_v24 = vcvt.s32.f32 %v3960_v3 }
 0x1d3   :  { %3486 = vmatpush.xpose.msra.mxu2 %v11053_v36  ;;  %1338 = vmatmul.f32.gmra.mxu0 %v19140_v47  ;;  %v19146_v47 = vld [vmem:[#allocation26_spill] sm:$0xff] }
 0x1d4   :  { %1627 = vmatmul.f32.gmra.mxu1 %v19076_v55  ;;  %v19142_v55 = vld [vmem:[#allocation21_spill] sm:$0xff]  ;;  %4150 = vperm.xlu0 %8746, %v3992_v24   ;;  %v19148_v24 = vld [vmem:[#allocation18_spill] sm:$0xff] }
 0x1d5   :  { %3235 = vmatpush.xpose.msra.mxu1 %v10803_v14 }
 0x1d6   :  { %3659 = vmatpush.xpose.msra.mxu3 %v10946_v37  ;;  %v11310_v23 = vpop.permute.xlu2 %4025  ;;  %4153 = vxpose.xlu1.b32.start [1/16] %v11256_v49, 128 }
 0x1d7   :  { %3490 = vmatpush.xpose.msra.mxu2 %v11079_v9  ;;  %19141 = vst [vmem:[#allocation138_spill] sm:$0xff] %v11310_v23  ;;  %v11318_v60 = vpop.permute.xlu0 %4035  ;;  %v11321_v3 = vpop.permute.xlu1 %4030 }
 0x1d8   :  { %2039 = vmatmul.f32.gmra.mxu3 %v19142_v55  ;;  %19144 = vst [vmem:[#allocation139_spill] sm:$0xff] %v11318_v60  ;;  %v19149_v55 = vld [vmem:[#allocation19_spill] sm:$0xff] }
 0x1d9   :  { %3237 = vmatpush.xpose.msra.mxu1 %v10858_v26  ;;  %19145 = vst [vmem:[#allocation140_spill] sm:$0xff] %v11321_v3 }
 0x1da   :  { %3661 = vmatpush.xpose.msra.mxu3 %v11003_v13  ;;  %1826 = vmatmul.f32.gmra.mxu2 %v19143_v42 }
 0x1db   :  { %3494 = vmatpush.xpose.msra.mxu2 %v11111_v15  ;;  %1346 = vmatmul.f32.gmra.mxu0 %v19146_v47  ;;  %v19152_v47 = vld [vmem:[#allocation23_spill] sm:$0xff] }
 0x1dc   :  { %1631 = vmatmul.f32.gmra.mxu1 %v19069_v20 }
 0x1dd   :  { %3239 = vmatpush.xpose.msra.mxu1 %v10899_v10 }
 0x1de   :  { %3663 = vmatpush.xpose.msra.mxu3 %v11045_v22  ;;  %v11327_v49 = vpop.permute.xlu2 %4040  ;;  %4154 = vxpose.xlu1.b32.cont [2/16] %v11297_v52, 128 }
 0x1df   :  { %3498 = vmatpush.xpose.msra.mxu2 %v11129_v29  ;;  %19147 = vst [vmem:[#allocation141_spill] sm:$0xff] %v11327_v49  ;;  %v11335_v42 = vpop.permute.xlu0 %4050 }
 0x1e0   :  { %2045 = vmatmul.f32.gmra.mxu3 %v19148_v24  ;;  %19150 = vst [vmem:[#allocation142_spill] sm:$0xff] %v11335_v42 }
 0x1e1   :  { %3241 = vmatpush.xpose.msra.mxu1 %v10946_v37 }
 0x1e2   :  { %3665 = vmatpush.xpose.msra.mxu3 %v11075_v43  ;;  %1831 = vmatmul.f32.gmra.mxu2 %v19149_v55  ;;  %v11338_v20 = vpop.permute.xlu1 %4045  ;;  %v19154_v55 = vld [vmem:[#allocation14_spill] sm:$0xff] }
 0x1e3   :  { %3502 = vmatpush.xpose.msra.mxu2 %v11156_v57  ;;  %19151 = vst [vmem:[#allocation143_spill] sm:$0xff] %v11338_v20  ;;  %1354 = vmatmul.f32.gmra.mxu0 %v19152_v47 }
 0x1e4   :  { %1635 = vmatmul.f32.gmra.mxu1 %v19061_v27 }
 0x1e5   :  { %3243 = vmatpush.xpose.msra.mxu1 %v11003_v13 }
 0x1e6   :  { %3667 = vmatpush.xpose.msra.mxu3 %v11105_v18  ;;  %v11344_v52 = vpop.permute.xlu2 %4055  ;;  %4155 = vxpose.xlu1.b32.cont [3/16] %v11283_v46, 128 }
 0x1e7   :  { %3506 = vmatpush.xpose.msra.mxu2 %v11175_v45  ;;  %19153 = vst [vmem:[#allocation144_spill] sm:$0xff] %v11344_v52  ;;  %v1235_v24 = vpop.f32.mrf.mxu0 }
 0x1e8   :  { %2051 = vmatmul.f32.gmra.mxu3 %v11193_v34 }
 0x1e9   :  { %3245 = vmatpush.xpose.msra.mxu1 %v11045_v22  ;;  %v1956_v38 = vpop.f32.mrf.mxu3 }
 0x1ea   :  { %3669 = vmatpush.xpose.msra.mxu3 %v11123_v5  ;;  %1836 = vmatmul.f32.gmra.mxu2 %v19154_v55  ;;  %v11352_v27 = vpop.permute.xlu0 %4075  ;;  %v11355_v47 = vpop.permute.xlu1 %4060 }
 0x1eb   :  { %3510 = vmatpush.xpose.msra.mxu2 %v11193_v34  ;;  %19155 = vst [vmem:[#allocation145_spill] sm:$0xff] %v11352_v27  ;;  %4185 = vxpose.xlu2.b32.start [1/16] %v11352_v27, 128 }
 0x1ec   :  { %19156 = vst [vmem:[#allocation146_spill] sm:$0xff] %v11355_v47  ;;  %1639 = vmatmul.f32.gmra.mxu1 %v19046_v7  ;;  %1362 = vmatmul.f32.gmra.mxu0 %v11213_v25  ;;  %v19159_v7 = vld [vmem:[#allocation5_spill] sm:$0xff] }
 0x1ed   :  { %3247 = vmatpush.xpose.msra.mxu1 %v11075_v43 }
 0x1ee   :  { %3671 = vmatpush.xpose.msra.mxu3 %v11150_v48  ;;  %4156 = vxpose.xlu1.b32.cont [4/16] %v11273_v1, 128  ;;  %v11363_v34 = vpop.permute.xlu2 %4065 }
 0x1ef   :  { %19157 = vst [vmem:[#allocation147_spill] sm:$0xff] %v11363_v34  ;;  %v1243_v55 = vpop.f32.mrf.mxu0 }
 0x1f0   :  { %2057 = vmatmul.f32.gmra.mxu3 %v11175_v45 }
 0x1f1   :  { %3249 = vmatpush.xpose.msra.mxu1 %v11105_v18  ;;  %v1762_v25 = vpop.f32.mrf.mxu2 }
 0x1f2   :  { %1841 = vmatmul.f32.gmra.mxu2 %v11181_v4  ;;  %v1962_v46 = vpop.f32.mrf.mxu3 }
 0x1f3   :  { %v11368_v27 = vpop.permute.xlu1 %4080 }
 0x1f4   :  { %19158 = vst [vmem:[#allocation148_spill] sm:$0xff] %v11368_v27  ;;  %1643 = vmatmul.f32.gmra.mxu1 %v19159_v7  ;;  %4186 = vxpose.xlu2.b32.cont [2/16] %v11368_v27, 128 }
 0x1f5   :  { %3251 = vmatpush.xpose.msra.mxu1 %v11123_v5  ;;  %1370 = vmatmul.f32.gmra.mxu0 %v11201_v17 }
 0x1f6   :  { %4157 = vxpose.xlu1.b32.cont [5/16] %v11289_v0, 128  ;;  %v11375_v12 = vpop.permute.xlu2 %4085 }
 0x1f7   :  { %v1251_v1 = vpop.f32.mrf.mxu0  ;;  %19160 = vst [vmem:[#allocation149_spill] sm:$0xff] %v11375_v12 }
 0x1f8   :  { %2063 = vmatmul.f32.gmra.mxu3 %v11156_v57  ;;  %v11384_v57 = vpop.permute.xlu0 %4070 }
 0x1f9   :  { %3253 = vmatpush.xpose.msra.mxu1 %v11150_v48  ;;  %v1584_v45 = vpop.f32.mrf.mxu1  ;;  %19162 = vst [vmem:[#allocation151_spill] sm:$0xff] %v11384_v57 }
 0x1fa   :  { %v1585_v4 = vadd.f32 %v1584_v45, %v1235_v24  ;;  %1846 = vmatmul.f32.gmra.mxu2 %v11159_v11  ;;  %v1968_v39 = vpop.f32.mrf.mxu3 }
 0x1fb   :  { %v11387_v24 = vpop.permute.xlu1 %4090 }
 0x1fc   :  { %v1763_v56 = vadd.f32 %v1762_v25, %v1585_v4  ;;  %1647 = vmatmul.f32.gmra.mxu1 %v11150_v48  ;;  %4187 = vxpose.xlu2.b32.cont [3/16] %v11375_v12, 128  ;;  %v1767_v7 = vpop.f32.mrf.mxu2  ;;  %19163 = vst [vmem:[#allocation152_spill] sm:$0xff] %v11387_v24 }
 0x1fd   :  { %1378 = vmatmul.f32.gmra.mxu0 %v11188_v61 }
 0x1fe   :  { %4158 = vxpose.xlu1.b32.cont [6/16] %v11301_v30, 128  ;;  %v11382_v17 = vadd.f32 %v1956_v38, %v1763_v56 }
 0x200   :  { %19161 = vst [vmem:[#allocation150_spill] sm:$0xff] %v11382_v17  ;;  %v1259_v0 = vpop.f32.mrf.mxu0  ;;  %2069 = vmatmul.f32.gmra.mxu3 %v11129_v29  ;;  %v19166_v17 = vld [vmem:[#allocation123_spill] sm:$0xff] }
 0x201   :  { %v1588_v45 = vpop.f32.mrf.mxu1 }
 0x202   :  { %v1589_v4 = vadd.f32 %v1588_v45, %v1243_v55  ;;  %1851 = vmatmul.f32.gmra.mxu2 %v11141_v58  ;;  %v11397_v55 = vpop.permute.xlu0 %4095 }
 0x203   :  { %v1974_v25 = vpop.f32.mrf.mxu3  ;;  %19165 = vst [vmem:[#allocation154_spill] sm:$0xff] %v11397_v55 }
 0x204   :  { %v1768_v11 = vadd.f32 %v1767_v7, %v1589_v4  ;;  %1651 = vmatmul.f32.gmra.mxu1 %v11123_v5  ;;  %4188 = vxpose.xlu2.b32.cont [4/16] %v11387_v24, 128 }
 0x205   :  { %v1772_v61 = vpop.f32.mrf.mxu2  ;;  %1386 = vmatmul.f32.gmra.mxu0 %v11169_v63 }
 0x206   :  { %4159 = vxpose.xlu1.b32.cont [7/16] %v11310_v23, 128  ;;  %v11394_v38 = vadd.f32 %v1962_v46, %v1768_v11 }
 0x208   :  { %19164 = vst [vmem:[#allocation153_spill] sm:$0xff] %v11394_v38  ;;  %v1267_v56 = vpop.f32.mrf.mxu0  ;;  %2075 = vmatmul.f32.gmra.mxu3 %v11111_v15  ;;  %v19169_v38 = vld [vmem:[#allocation119_spill] sm:$0xff] }
 0x209   :  { %v1592_v29 = vpop.f32.mrf.mxu1 }
 0x20a   :  { %v1593_v45 = vadd.f32 %v1592_v29, %v1251_v1  ;;  %1856 = vmatmul.f32.gmra.mxu2 %v11102_v6  ;;  %v11407_v29 = vpop.permute.xlu2 %4100 }
 0x20b   :  { %v1980_v7 = vpop.f32.mrf.mxu3  ;;  %19168 = vst [vmem:[#allocation155_spill] sm:$0xff] %v11407_v29 }
 0x20c   :  { %v1773_v4 = vadd.f32 %v1772_v61, %v1593_v45  ;;  %1655 = vmatmul.f32.gmra.mxu1 %v11105_v18  ;;  %4189 = vxpose.xlu2.b32.cont [5/16] %v11397_v55, 128 }
 0x20d   :  { %v1777_v58 = vpop.f32.mrf.mxu2  ;;  %1394 = vmatmul.f32.gmra.mxu0 %v19166_v17 }
 0x20e   :  { %4160 = vxpose.xlu1.b32.cont [8/16] %v11321_v3, 128  ;;  %v11404_v11 = vadd.f32 %v1968_v39, %v1773_v4 }
 0x210   :  { %19167 = vst [vmem:[#allocation123_spill] sm:$0xff] %v11404_v11  ;;  %v1275_v46 = vpop.f32.mrf.mxu0  ;;  %2081 = vmatmul.f32.gmra.mxu3 %v11079_v9  ;;  %v19172_v11 = vld [vmem:[#allocation116_spill] sm:$0xff] }
 0x211   :  { %v1596_v15 = vpop.f32.mrf.mxu1 }
 0x212   :  { %v1597_v1 = vadd.f32 %v1596_v15, %v1259_v0  ;;  %1861 = vmatmul.f32.gmra.mxu2 %v11090_v28  ;;  %v11417_v0 = vpop.permute.xlu1 %4105 }
 0x213   :  { %v1986_v61 = vpop.f32.mrf.mxu3  ;;  %19171 = vst [vmem:[#allocation156_spill] sm:$0xff] %v11417_v0 }
 0x214   :  { %v1778_v45 = vadd.f32 %v1777_v58, %v1597_v1  ;;  %1659 = vmatmul.f32.gmra.mxu1 %v11075_v43  ;;  %4190 = vxpose.xlu2.b32.cont [6/16] %v11407_v29, 128 }
 0x215   :  { %v1782_v6 = vpop.f32.mrf.mxu2  ;;  %1402 = vmatmul.f32.gmra.mxu0 %v19169_v38 }
 0x216   :  { %4161 = vxpose.xlu1.b32.cont [9/16] %v11318_v60, 128  ;;  %v11414_v39 = vadd.f32 %v1974_v25, %v1778_v45 }
 0x218   :  { %19170 = vst [vmem:[#allocation119_spill] sm:$0xff] %v11414_v39  ;;  %v1283_v4 = vpop.f32.mrf.mxu0  ;;  %2087 = vmatmul.f32.gmra.mxu3 %v11053_v36  ;;  %v19175_v39 = vld [vmem:[#allocation112_spill] sm:$0xff] }
 0x219   :  { %v1600_v9 = vpop.f32.mrf.mxu1 }
 0x21a   :  { %v1601_v15 = vadd.f32 %v1600_v9, %v1267_v56  ;;  %1866 = vmatmul.f32.gmra.mxu2 %v11037_v44  ;;  %v11427_v9 = vpop.permute.xlu0 %4110 }
 0x21b   :  { %v1992_v58 = vpop.f32.mrf.mxu3  ;;  %19174 = vst [vmem:[#allocation157_spill] sm:$0xff] %v11427_v9 }
 0x21c   :  { %v1783_v1 = vadd.f32 %v1782_v6, %v1601_v15  ;;  %1663 = vmatmul.f32.gmra.mxu1 %v11045_v22  ;;  %4191 = vxpose.xlu2.b32.cont [7/16] %v11417_v0, 128 }
 0x21d   :  { %v1787_v28 = vpop.f32.mrf.mxu2  ;;  %1410 = vmatmul.f32.gmra.mxu0 %v19172_v11 }
 0x21e   :  { %4162 = vxpose.xlu1.b32.cont [10/16] %v11327_v49, 128  ;;  %v11424_v25 = vadd.f32 %v1980_v7, %v1783_v1 }
 0x220   :  { %19173 = vst [vmem:[#allocation116_spill] sm:$0xff] %v11424_v25  ;;  %v1291_v45 = vpop.f32.mrf.mxu0  ;;  %2093 = vmatmul.f32.gmra.mxu3 %v11015_v2  ;;  %v19178_v25 = vld [vmem:[#allocation108_spill] sm:$0xff] }
 0x221   :  { %v1604_v36 = vpop.f32.mrf.mxu1 }
 0x222   :  { %v1605_v56 = vadd.f32 %v1604_v36, %v1275_v46  ;;  %1871 = vmatmul.f32.gmra.mxu2 %v11019_v21  ;;  %v11437_v36 = vpop.permute.xlu2 %4115 }
 0x223   :  { %v1998_v6 = vpop.f32.mrf.mxu3  ;;  %19177 = vst [vmem:[#allocation159_spill] sm:$0xff] %v11437_v36 }
 0x224   :  { %v1788_v15 = vadd.f32 %v1787_v28, %v1605_v56  ;;  %1667 = vmatmul.f32.gmra.mxu1 %v11003_v13  ;;  %4192 = vxpose.xlu2.b32.cont [8/16] %v11427_v9, 128 }
 0x225   :  { %v1792_v44 = vpop.f32.mrf.mxu2  ;;  %1418 = vmatmul.f32.gmra.mxu0 %v19175_v39 }
 0x226   :  { %4163 = vxpose.xlu1.b32.cont [11/16] %v11338_v20, 128  ;;  %v11434_v7 = vadd.f32 %v1986_v61, %v1788_v15 }
 0x228   :  { %19176 = vst [vmem:[#allocation158_spill] sm:$0xff] %v11434_v7  ;;  %v1299_v1 = vpop.f32.mrf.mxu0  ;;  %2099 = vmatmul.f32.gmra.mxu3 %v10961_v8  ;;  %v19181_v7 = vld [vmem:[#allocation38_spill] sm:$0xff] }
 0x229   :  { %v1608_v2 = vpop.f32.mrf.mxu1 }
 0x22a   :  { %v1609_v46 = vadd.f32 %v1608_v2, %v1283_v4  ;;  %1876 = vmatmul.f32.gmra.mxu2 %v10965_v53  ;;  %v11447_v2 = vpop.permute.xlu1 %4120 }
 0x22b   :  { %v2004_v28 = vpop.f32.mrf.mxu3  ;;  %19180 = vst [vmem:[#allocation161_spill] sm:$0xff] %v11447_v2 }
 0x22c   :  { %v1793_v56 = vadd.f32 %v1792_v44, %v1609_v46  ;;  %1671 = vmatmul.f32.gmra.mxu1 %v10946_v37  ;;  %4193 = vxpose.xlu2.b32.cont [9/16] %v11437_v36, 128 }
 0x22d   :  { %v1797_v21 = vpop.f32.mrf.mxu2  ;;  %1426 = vmatmul.f32.gmra.mxu0 %v19178_v25  ;;  %v19232_v25 = vld [vmem:[#allocation20_spill] sm:$0xff] }
 0x22e   :  { %4164 = vxpose.xlu1.b32.cont [12/16] %v11335_v42, 128  ;;  %v11444_v61 = vadd.f32 %v1992_v58, %v1793_v56 }
 0x230   :  { %19179 = vst [vmem:[#allocation160_spill] sm:$0xff] %v11444_v61  ;;  %v1307_v15 = vpop.f32.mrf.mxu0  ;;  %2105 = vmatmul.f32.gmra.mxu3 %v10906_v51  ;;  %v11457_v51 = vpop.permute.xlu0 %4125  ;;  %v19184_v61 = vld [vmem:[#allocation102_spill] sm:$0xff] }
 0x231   :  { %v1612_v8 = vpop.f32.mrf.mxu1  ;;  %19183 = vst [vmem:[#allocation163_spill] sm:$0xff] %v11457_v51 }
 0x232   :  { %v1613_v4 = vadd.f32 %v1612_v8, %v1291_v45  ;;  %1881 = vmatmul.f32.gmra.mxu2 %v10917_v62 }
 0x233   :  { %v2010_v44 = vpop.f32.mrf.mxu3 }
 0x234   :  { %v1798_v46 = vadd.f32 %v1797_v21, %v1613_v4  ;;  %1675 = vmatmul.f32.gmra.mxu1 %v10899_v10  ;;  %4194 = vxpose.xlu2.b32.cont [10/16] %v11447_v2, 128 }
 0x235   :  { %v1802_v53 = vpop.f32.mrf.mxu2  ;;  %1434 = vmatmul.f32.gmra.mxu0 %v19181_v7 }
 0x236   :  { %4165 = vxpose.xlu1.b32.cont [13/16] %v11344_v52, 128  ;;  %v11454_v58 = vadd.f32 %v1998_v6, %v1798_v46 }
 0x238   :  { %19182 = vst [vmem:[#allocation162_spill] sm:$0xff] %v11454_v58  ;;  %2111 = vmatmul.f32.gmra.mxu3 %v10866_v41  ;;  %v1315_v21 = vpop.f32.mrf.mxu0  ;;  %v19187_v58 = vld [vmem:[#allocation100_spill] sm:$0xff] }
 0x239   :  { %v1616_v56 = vpop.f32.mrf.mxu1 }
 0x23a   :  { %v1617_v8 = vadd.f32 %v1616_v56, %v1299_v1  ;;  %1886 = vmatmul.f32.gmra.mxu2 %v10855_v31  ;;  %v11467_v1 = vpop.permute.xlu2 %4130 }
 0x23b   :  { %v2016_v45 = vpop.f32.mrf.mxu3  ;;  %19186 = vst [vmem:[#allocation165_spill] sm:$0xff] %v11467_v1 }
 0x23c   :  { %v1803_v4 = vadd.f32 %v1802_v53, %v1617_v8  ;;  %1679 = vmatmul.f32.gmra.mxu1 %v10858_v26  ;;  %4195 = vxpose.xlu2.b32.cont [11/16] %v11457_v51, 128 }
 0x23d   :  { %v1807_v62 = vpop.f32.mrf.mxu2  ;;  %1442 = vmatmul.f32.gmra.mxu0 %v19184_v61  ;;  %v19191_v61 = vld [vmem:[#allocation46_spill] sm:$0xff] }
 0x23e   :  { %4166 = vxpose.xlu1.b32.cont [14/16] %v11355_v47, 128  ;;  %v11464_v6 = vadd.f32 %v2004_v28, %v1803_v4  ;;  %v19233_v47 = vld [vmem:[#allocation94_spill] sm:$0xff] }
 0x240   :  { %19185 = vst [vmem:[#allocation164_spill] sm:$0xff] %v11464_v6  ;;  %2117 = vmatmul.f32.gmra.mxu3 %v10815_v40  ;;  %v1323_v53 = vpop.f32.mrf.mxu0  ;;  %v19190_v40 = vld [vmem:[#allocation98_spill] sm:$0xff] }
 0x241   :  { %v1620_v46 = vpop.f32.mrf.mxu1 }
 0x242   :  { %v1621_v56 = vadd.f32 %v1620_v46, %v1307_v15  ;;  %1891 = vmatmul.f32.gmra.mxu2 %v10818_v33  ;;  %v11477_v15 = vpop.permute.xlu1 %4135 }
 0x243   :  { %v2022_v8 = vpop.f32.mrf.mxu3  ;;  %19189 = vst [vmem:[#allocation167_spill] sm:$0xff] %v11477_v15 }
 0x244   :  { %v1808_v41 = vadd.f32 %v1807_v62, %v1621_v56  ;;  %1683 = vmatmul.f32.gmra.mxu1 %v10803_v14  ;;  %4196 = vxpose.xlu2.b32.cont [12/16] %v11467_v1, 128 }
 0x245   :  { %v1812_v31 = vpop.f32.mrf.mxu2  ;;  %1450 = vmatmul.f32.gmra.mxu0 %v19187_v58 }
 0x246   :  { %4167 = vxpose.xlu1.b32.cont [15/16] %v11363_v34, 128  ;;  %v11474_v28 = vadd.f32 %v2010_v44, %v1808_v41  ;;  %v19223_v34 = vmov 0 }
 0x248   :  { %19188 = vst [vmem:[#allocation166_spill] sm:$0xff] %v11474_v28  ;;  %2123 = vmatmul.f32.gmra.mxu3 %v10762_v59  ;;  %v1331_v62 = vpop.f32.mrf.mxu0  ;;  %v19194_v59 = vld [vmem:[#allocation92_spill] sm:$0xff] }
 0x249   :  { %v1624_v4 = vpop.f32.mrf.mxu1 }
 0x24a   :  { %v1625_v46 = vadd.f32 %v1624_v4, %v1315_v21  ;;  %1896 = vmatmul.f32.gmra.mxu2 %v19190_v40  ;;  %v11487_v21 = vpop.permute.xlu0 %4140 }
 0x24b   :  { %v2028_v56 = vpop.f32.mrf.mxu3  ;;  %19193 = vst [vmem:[#allocation169_spill] sm:$0xff] %v11487_v21 }
 0x24c   :  { %v1813_v33 = vadd.f32 %v1812_v31, %v1625_v46  ;;  %1687 = vmatmul.f32.gmra.mxu1 %v10753_v16  ;;  %4197 = vxpose.xlu2.b32.cont [13/16] %v11477_v15, 128 }
 0x24d   :  { %v1817_v58 = vpop.f32.mrf.mxu2  ;;  %1458 = vmatmul.f32.gmra.mxu0 %v19191_v61  ;;  %v19195_v61 = vld [vmem:[#allocation99_spill] sm:$0xff] }
 0x24e   :  { %4168 = vxpose.xlu1.b32.end [16/16] %v11384_v57, 128  ;;  %v11484_v41 = vadd.f32 %v2016_v45, %v1813_v33  ;;  %v19199_v57 = vld [vmem:[#allocation93_spill] sm:$0xff] }
 0x250   :  { %19192 = vst [vmem:[#allocation168_spill] sm:$0xff] %v11484_v41  ;;  %2129 = vmatmul.f32.gmra.mxu3 %v19122_v50  ;;  %v1339_v31 = vpop.f32.mrf.mxu0  ;;  %v11496_v50 = vpop.permute.xlu2 %4145 }
 0x251   :  { %v1628_v44 = vpop.f32.mrf.mxu1  ;;  %19197 = vst [vmem:[#allocation171_spill] sm:$0xff] %v11496_v50 }
 0x252   :  { %v1629_v4 = vadd.f32 %v1628_v44, %v1323_v53  ;;  %1901 = vmatmul.f32.gmra.mxu2 %v19194_v59  ;;  %v19198_v44 = vld [vmem:[#allocation86_spill] sm:$0xff] }
 0x253   :  { %v2034_v46 = vpop.f32.mrf.mxu3 }
 0x254   :  { %v1818_v40 = vadd.f32 %v1817_v58, %v1629_v4  ;;  %1691 = vmatmul.f32.gmra.mxu1 %v10704_v19  ;;  %4198 = vxpose.xlu2.b32.cont [14/16] %v11487_v21, 128  ;;  %v19208_v19 = vld [vmem:[#allocation59_spill] sm:$0xff] }
 0x255   :  { %v1822_v28 = vpop.f32.mrf.mxu2  ;;  %1466 = vmatmul.f32.gmra.mxu0 %v19195_v61 }
 0x256   :  { %v11493_v33 = vadd.f32 %v2022_v8, %v1818_v40 }
 0x258   :  { %19196 = vst [vmem:[#allocation170_spill] sm:$0xff] %v11493_v33  ;;  %2135 = vmatmul.f32.gmra.mxu3 %v19119_v32  ;;  %v1347_v59 = vpop.f32.mrf.mxu0  ;;  %v11505_v32 = vpop.permute.xlu0 %4150 }
 0x259   :  { %v1632_v45 = vpop.f32.mrf.mxu1  ;;  %19201 = vst [vmem:[#allocation173_spill] sm:$0xff] %v11505_v32 }
 0x25a   :  { %v1633_v53 = vadd.f32 %v1632_v45, %v1331_v62  ;;  %1906 = vmatmul.f32.gmra.mxu2 %v19198_v44  ;;  %v19202_v45 = vld [vmem:[#allocation83_spill] sm:$0xff] }
 0x25b   :  { %v2040_v41 = vpop.f32.mrf.mxu3 }
 0x25c   :  { %v1823_v58 = vadd.f32 %v1822_v28, %v1633_v53  ;;  %1695 = vmatmul.f32.gmra.mxu1 %v10579_v35  ;;  %4199 = vxpose.xlu2.b32.cont [15/16] %v11496_v50, 128  ;;  %v19203_v53 = vld [vmem:[#allocation71_spill] sm:$0xff]  ;;  %v19204_v35 = vld [vmem:[#allocation90_spill] sm:$0xff] }
 0x25d   :  { %v1827_v4 = vpop.f32.mrf.mxu2  ;;  %1474 = vmatmul.f32.gmra.mxu0 %v19199_v57  ;;  %v19207_v57 = vld [vmem:[#allocation80_spill] sm:$0xff] }
 0x25e   :  { %v11502_v40 = vadd.f32 %v2028_v56, %v1823_v58  ;;  %v19206_v58 = vld [vmem:[#allocation34_spill] sm:$0xff] }
 0x260   :  { %19200 = vst [vmem:[#allocation172_spill] sm:$0xff] %v11502_v40  ;;  %2141 = vmatmul.f32.gmra.mxu3 %v19116_v54  ;;  %v1355_v44 = vpop.f32.mrf.mxu0 }
 0x261   :  { %v1636_v8 = vpop.f32.mrf.mxu1 }
 0x262   :  { %v1637_v62 = vadd.f32 %v1636_v8, %v1339_v31  ;;  %1911 = vmatmul.f32.gmra.mxu2 %v19202_v45 }
 0x263   :  { %v2046_v33 = vpop.f32.mrf.mxu3 }
 0x264   :  { %v1828_v28 = vadd.f32 %v1827_v4, %v1637_v62  ;;  %1699 = vmatmul.f32.gmra.mxu1 %v19203_v53  ;;  %4200 = vxpose.xlu2.b32.end [16/16] %v11505_v32, 128  ;;  %v4281_v4 = vlaneseq  ;;  %v19214_v32 = vld [vmem:[#allocation58_spill] sm:$0xff] }
 0x265   :  { %v1832_v61 = vpop.f32.mrf.mxu2  ;;  %1482 = vmatmul.f32.gmra.mxu0 %v19204_v35  ;;  %v19210_v35 = vld [vmem:[#allocation31_spill] sm:$0xff] }
 0x266   :  { %v11511_v56 = vadd.f32 %v2034_v46, %v1828_v28  ;;  %v11520_v46 = vshrl.u32 %v4281_v4, 7 }
 0x268   :  { %19205 = vst [vmem:[#allocation174_spill] sm:$0xff] %v11511_v56  ;;  %2885 = vmatmul.f32.vlgmr.msrb.gmra.mxu3 %v19206_v58 }
 0x269   :  { %v1640_v54 = vpop.f32.mrf.mxu1  ;;  %v1363_v31 = vpop.f32.mrf.mxu0  ;;  %19211 = vst [vmem:[#allocation31_spill] sm:$0xff] %v11520_v46 }
 0x26a   :  { %v1641_v40 = vadd.f32 %v1640_v54, %v1347_v59  ;;  %1916 = vmatmul.f32.gmra.mxu2 %v19207_v57  ;;  %v19212_v59 = vld [vmem:[#allocation84_spill] sm:$0xff]  ;;  %v11524_v57 = vadd.s32 128, %v11520_v46 }
 0x26b   :  { %v2052_v8 = vpop.f32.mrf.mxu3 }
 0x26c   :  { %v1833_v45 = vadd.f32 %v1832_v61, %v1641_v40  ;;  %1703 = vmatmul.f32.gmra.mxu1 %v19208_v19  ;;  %v11526_v40 = vand.u32 127, %v4281_v4 }
 0x26d   :  { %v1837_v62 = vpop.f32.mrf.mxu2  ;;  %2210 = vmatmul.f32.vlgmr.msrb.gmra.mxu0 %v19206_v58 }
 0x26e   :  { %v11517_v53 = vadd.f32 %v2040_v41, %v1833_v45  ;;  %19213 = vst [vmem:[#allocation84_spill] sm:$0xff] %v11526_v40  ;;  %v11531_v45 = vshra.s32 %v11524_v57, 3 }
 0x270   :  { %19209 = vst [vmem:[#allocation175_spill] sm:$0xff] %v11517_v53  ;;  %2889 = vmatmul.f32.gmra.mxu3 %v19210_v35 }
 0x271   :  { %v1644_v28 = vpop.f32.mrf.mxu1  ;;  %19215 = vst [vmem:[#allocation176_spill] sm:$0xff] %v11531_v45 }
 0x272   :  { %v1645_v56 = vadd.f32 %v1644_v28, %v1355_v44  ;;  %2536 = vmatmul.f32.vlgmr.msrb.gmra.mxu2 %v19212_v59  ;;  %v1371_v54 = vpop.f32.mrf.mxu0  ;;  %v11536_v44 = vshra.s32 %v11520_v46, 3  ;;  %v11539_v28 = vshra.s32 %v11526_v40, 3  ;;  %v19218_v59 = vld [vmem:[#allocation24_spill] sm:$0xff] }
 0x273   :  { %v2058_v61 = vpop.f32.mrf.mxu3 }
 0x274   :  { %v1838_v19 = vadd.f32 %v1837_v62, %v1645_v56  ;;  %1707 = vmatmul.f32.gmra.mxu1 %v19214_v32  ;;  %19217 = vst [vmem:[#allocation178_spill] sm:$0xff] %v11536_v44  ;;  %v19219_v62 = vld [vmem:[#allocation96_spill] sm:$0xff]  ;;  %vm18344_vm0 = vcmp.eq.s32.totalorder %v11531_v45, %v11539_v28  ;;  %vm18346_vm1 = vcmp.eq.s32.totalorder %v11536_v44, %v11539_v28 }
 0x275   :  { %v1842_v41 = vpop.f32.mrf.mxu2  ;;  %2214 = vmatmul.f32.gmra.mxu0 %v19210_v35 }
 0x276   :  { %v11533_v53 = vadd.f32 %v2046_v33, %v1838_v19  ;;  %v11548_v19 = vadd.s32 136, %v11520_v46 }
 0x278   :  { %19216 = vst [vmem:[#allocation177_spill] sm:$0xff] %v11533_v53  ;;  %2893 = vmatmul.f32.gmra.mxu3 %v19218_v59  ;;  %v19221_v53 = vld [vmem:[#allocation132_spill] sm:$0xff] }
 0x279   :  { %v1648_v4 = vpop.f32.mrf.mxu1 }
 0x27a   :  { %v1649_v56 = vadd.f32 %v1648_v4, %v1363_v31  ;;  %2544 = vmatmul.f32.gmra.mxu2 %v19219_v62  ;;  %v1379_v32 = vpop.f32.mrf.mxu0  ;;  %v11545_v50 = vpop.trf.xlu1  ;;  %v19222_v31 = vld [vmem:[#allocation145_spill] sm:$0xff]  ;;  %v4283_v4 = vadd.s32 8, %v11520_v46 }
 0x27b   :  { %19220 = vst [vmem:[#allocation24_spill] sm:$0xff] %v11545_v50  ;;  %v2064_v33 = vpop.f32.mrf.mxu3  ;;  %vm18361_vm3 = vcmp.eq.f32.partialorder %v19221_v53, %v11545_v50  ;;  %vm18345_vm4 = vcmp.eq.f32.partialorder %v19222_v31, %v11545_v50 }
 0x27c   :  { %v1843_v62 = vadd.f32 %v1842_v41, %v1649_v56  ;;  %2371 = vmatmul.f32.vlgmr.msrb.gmra.mxu1 %v19206_v58  ;;  %vm11564_vm5 = vmand %vm18361_vm3, %vm18346_vm1  ;;  %v19226_v41 = vmov 0  ;;  %v11580_v56 = vadd.s32 128, %v11526_v40  ;;  %v11583_v58 = vshra.s32 %v11548_v19, 3 }
 0x27d   :  { %v19224_v34 = vsel %vm11564_vm5, 4294967295, %v19223_v34  ;;  %v1847_v7 = vpop.f32.mrf.mxu2  ;;  %2218 = vmatmul.f32.gmra.mxu0 %v19218_v59  ;;  %vm11575_vm6 = vmand %vm18345_vm4, %vm18344_vm0  ;;  %v11587_v16 = vshra.s32 %v4283_v4, 3  ;;  %vm4417_vm8 = vcmp.ne.s32.totalorder %v4283_v4, %v11526_v40  ;;  %v19248_v4 = vld [vmem:[#allocation17_spill] sm:$0xff] }
 0x27e   :  { %19225 = vst [vmem:[#allocation96_spill] sm:$0xff] %v19224_v34  ;;  %v19227_v41 = vsel %vm11575_vm6, 4294967295, %v19226_v41  ;;  %v11585_v34 = vadd.f32 %v2052_v8, %v1843_v62  ;;  %v11592_v6 = vshra.s32 %v11580_v56, 3  ;;  %vm18347_vm7 = vcmp.eq.s32.totalorder %v11583_v58, %v11539_v28 }
 0x27f   :  { %19228 = vst [vmem:[#allocation179_spill] sm:$0xff] %v19227_v41  ;;  %vm18356_vm11 = vcmp.eq.s32.totalorder %v11587_v16, %v11539_v28  ;;  %vm4448_vm15 = vcmp.ne.s32.totalorder %v11524_v57, %v11580_v56  ;;  %v19244_v57 = vmov 0 }
 0x280   :  { %19229 = vst [vmem:[#allocation180_spill] sm:$0xff] %v11583_v58  ;;  %2897 = vmatmul.f32.gmra.mxu3 %v19232_v25  ;;  %vm18353_vm12 = vcmp.eq.s32.totalorder %v11536_v44, %v11592_v6  ;;  %vm4384_vm13 = vcmp.eq.s32.totalorder %v11531_v45, %v11592_v6 }
 0x281   :  { %19230 = vst [vmem:[#allocation181_spill] sm:$0xff] %v11585_v34  ;;  %v1652_v21 = vpop.f32.mrf.mxu1  ;;  %v19252_v34 = vld [vmem:[#allocation88_spill] sm:$0xff] }
 0x282   :  { %19231 = vst [vmem:[#allocation182_spill] sm:$0xff] %v11587_v16  ;;  %v1653_v14 = vadd.f32 %v1652_v21, %v1371_v54  ;;  %2552 = vmatmul.f32.gmra.mxu2 %v19233_v47  ;;  %v1387_v50 = vpop.f32.mrf.mxu0  ;;  %v11596_v41 = vpop.trf.xlu1  ;;  %v19236_v21 = vld [vmem:[#allocation136_spill] sm:$0xff] }
 0x283   :  { %19234 = vst [vmem:[#allocation94_spill] sm:$0xff] %v11592_v6  ;;  %v11598_v39 = vpop.f32.mrf.mxu3  ;;  %vm18362_vm9 = vcmp.eq.f32.partialorder %v19236_v21, %v11596_v41  ;;  %vm18348_vm10 = vcmp.eq.f32.partialorder %v11368_v27, %v11596_v41 }
 0x284   :  { %19235 = vst [vmem:[#allocation183_spill] sm:$0xff] %v11596_v41  ;;  %v1848_v47 = vadd.f32 %v1847_v7, %v1653_v14  ;;  %2375 = vmatmul.f32.gmra.mxu1 %v19210_v35  ;;  %vm4481_vm2 = vmand %vm18362_vm9, %vm18356_vm11  ;;  %v19238_v14 = vmov 0  ;;  %v19241_v7 = vmov 0 }
 0x285   :  { %v1852_v8 = vpop.f32.mrf.mxu2  ;;  %v11618_v54 = vpop.trf.xlu2  ;;  %2222 = vmatmul.f32.gmra.mxu0 %v19232_v25  ;;  %vm11627_vm14 = vmand %vm18348_vm10, %vm18347_vm7 }
 0x286   :  { %19237 = vst [vmem:[#allocation184_spill] sm:$0xff] %v11618_v54  ;;  %v19239_v14 = vsel %vm11627_vm14, 4294967295, %v19238_v14  ;;  %vm18354_vm0 = vcmp.eq.f32.partialorder %v19221_v53, %v11618_v54  ;;  %vm4250_vm4 = vcmp.eq.f32.partialorder %v19222_v31, %v11618_v54  ;;  %vm11639_vm1 = vmand %vm4481_vm2, %vm4417_vm8  ;;  %v11653_v62 = vadd.f32 %v2058_v61, %v1848_v47 }
 0x287   :  { %19240 = vst [vmem:[#allocation185_spill] sm:$0xff] %v19239_v14  ;;  %v19242_v7 = vsel %vm11639_vm1, 4294967295, %v19241_v7  ;;  %vm11649_vm7 = vmand %vm18354_vm0, %vm18353_vm12  ;;  %vm18368_vm2 = vmmov 1  }
 0x288   :  { %19243 = vst [vmem:[#allocation186_spill] sm:$0xff] %v19242_v7  ;;  %v19245_v57 = vsel %vm11649_vm7, 4294967295, %v19244_v57  ;;  %vm4512_vm10 = vmand %vm4250_vm4, %vm4384_vm13  ;;  %2901 = vmatmul.f32.gmra.mxu3 %v19248_v4  ;;  %v19249_v7 = vmov 0 }
 0x289   :  { %19246 = vst [vmem:[#allocation187_spill] sm:$0xff] %v19245_v57  ;;  %v1656_v14 = vpop.f32.mrf.mxu1  ;;  %vm11659_vm8 = vmand %vm4512_vm10, %vm4448_vm15  ;;  %v19253_v57 = vmov 0  ;;  %vm4450_vm15 = vcmp.ne.s32.totalorder %v11548_v19, %v11580_v56 }
 0x28a   :  { %19247 = vst [vmem:[#allocation188_spill] sm:$0xff] %v11653_v62  ;;  %v19250_v7 = vsel %vm11659_vm8, 4294967295, %v19249_v7  ;;  %v1657_v31 = vadd.f32 %v1656_v14, %v1379_v32  ;;  %2560 = vmatmul.f32.gmra.mxu2 %v19252_v34  ;;  %v1395_v54 = vpop.f32.mrf.mxu0  ;;  %vm4640_vm12 = vmxor %vm4250_vm4, %vm18368_vm2  ;;  %vm18364_vm4 = vcmp.eq.s32.totalorder %v11587_v16, %v11592_v6  ;;  %v19258_v14 = vld [vmem:[#allocation16_spill] sm:$0xff]  ;;  %v11722_v44 = vpop.trf.xlu1 }
 0x28b   :  { %19251 = vst [vmem:[#allocation189_spill] sm:$0xff] %v19250_v7  ;;  %v2076_v61 = vpop.f32.mrf.mxu3  ;;  %vm11669_vm0 = vmand %vm4640_vm12, %vm4384_vm13  ;;  %vm4386_vm12 = vcmp.eq.s32.totalorder %v11583_v58, %v11592_v6  ;;  %v19259_v7 = vmov 0  ;;  %v19280_v58 = vmov 0 }
 0x28c   :  { %v1853_v47 = vadd.f32 %v1852_v8, %v1657_v31  ;;  %2379 = vmatmul.f32.gmra.mxu1 %v19218_v59  ;;  %v19254_v57 = vsel %vm11669_vm0, 4294967295, %v19253_v57  ;;  %v4300_v31 = vadd.s32 144, %v11520_v46  ;;  %v4284_v8 = vadd.s32 16, %v11520_v46  ;;  %19268 = vst [vmem:[#allocation195_spill] sm:$0xff] %v11722_v44 }
 0x28d   :  { %19255 = vst [vmem:[#allocation88_spill] sm:$0xff] %v19254_v57  ;;  %v1857_v62 = vpop.f32.mrf.mxu2  ;;  %2226 = vmatmul.f32.gmra.mxu0 %v19248_v4  ;;  %v11674_v32 = vpop.trf.xlu2  ;;  %v19262_v57 = vld [vmem:[#allocation79_spill] sm:$0xff] }
 0x28e   :  { %19256 = vst [vmem:[#allocation190_spill] sm:$0xff] %v11674_v32  ;;  %v11676_v34 = vadd.f32 %v2064_v33, %v1853_v47  ;;  %vm18367_vm10 = vcmp.eq.f32.partialorder %v19236_v21, %v11674_v32  ;;  %vm4252_vm13 = vcmp.eq.f32.partialorder %v11368_v27, %v11674_v32  ;;  %v19274_v32 = vld [vmem:[#allocation15_spill] sm:$0xff] }
 0x28f   :  { %vm11697_vm11 = vmand %vm18367_vm10, %vm18364_vm4 }
 0x290   :  { %19257 = vst [vmem:[#allocation191_spill] sm:$0xff] %v11676_v34  ;;  %2905 = vmatmul.f32.gmra.mxu3 %v19258_v14  ;;  %v19260_v7 = vsel %vm11697_vm11, 4294967295, %v19259_v7  ;;  %vm4514_vm3 = vmand %vm4252_vm13, %vm4386_vm12  ;;  %v19264_v34 = vmov 0 }
 0x291   :  { %v1660_v33 = vpop.f32.mrf.mxu1  ;;  %19261 = vst [vmem:[#allocation192_spill] sm:$0xff] %v19260_v7  ;;  %vm11710_vm9 = vmand %vm4514_vm3, %vm4450_vm15  ;;  %v11715_v7 = vshra.s32 %v4284_v8, 3  ;;  %vm18379_vm15 = vcmp.eq.f32.partialorder %v11375_v12, %v11722_v44 }
 0x292   :  { %v1661_v47 = vadd.f32 %v1660_v33, %v1387_v50  ;;  %2568 = vmatmul.f32.gmra.mxu2 %v19262_v57  ;;  %v1403_v45 = vpop.f32.mrf.mxu0  ;;  %v11708_v50 = vshra.s32 %v4300_v31, 3  ;;  %v19265_v34 = vsel %vm11710_vm9, 4294967295, %v19264_v34  ;;  %vm4642_vm4 = vmxor %vm4252_vm13, %vm18368_vm2  ;;  %vm4419_vm2 = vcmp.ne.s32.totalorder %v4284_v8, %v11526_v40  ;;  %v11812_v21 = vpop.trf.xlu1 }
 0x293   :  { %v2082_v19 = vpop.f32.mrf.mxu3  ;;  %19266 = vst [vmem:[#allocation193_spill] sm:$0xff] %v19265_v34  ;;  %vm11734_vm10 = vmand %vm4642_vm4, %vm4386_vm12  ;;  %vm18378_vm13 = vcmp.eq.s32.totalorder %v11715_v7, %v11539_v28  ;;  %v19273_v34 = vld [vmem:[#allocation134_spill] sm:$0xff]  ;;  %v19276_v8 = vmov 0 }
 0x294   :  { %19263 = vst [vmem:[#allocation79_spill] sm:$0xff] %v11708_v50  ;;  %v1858_v33 = vadd.f32 %v1857_v62, %v1661_v47  ;;  %2383 = vmatmul.f32.gmra.mxu1 %v19232_v25  ;;  %v19270_v47 = vmov 0  ;;  %vm18380_vm3 = vcmp.eq.f32.partialorder %v19273_v34, %v11722_v44  ;;  %vm19275_vm12 = vcmp.eq.s32.totalorder %v11708_v50, %v11539_v28 }
 0x295   :  { %19267 = vst [vmem:[#allocation194_spill] sm:$0xff] %v11715_v7  ;;  %v1862_v57 = vpop.f32.mrf.mxu2  ;;  %2230 = vmatmul.f32.gmra.mxu0 %v19258_v14  ;;  %v19271_v47 = vsel %vm11734_vm10, 4294967295, %v19270_v47  ;;  %vm4483_vm4 = vmand %vm18380_vm3, %vm18378_vm13  ;;  %vm18388_vm13 = vcmp.eq.s32.totalorder %v11715_v7, %v11592_v6 }
 0x296   :  { %v11729_v62 = vadd.f32 %v11598_v39, %v1858_v33  ;;  %19272 = vst [vmem:[#allocation197_spill] sm:$0xff] %v19271_v47  ;;  %vm11756_vm8 = vmand %vm18379_vm15, %vm19275_vm12  ;;  %v19279_v33 = vld [vmem:[#allocation72_spill] sm:$0xff]  ;;  %vm4452_vm15 = vcmp.ne.s32.totalorder %v4300_v31, %v11580_v56  ;;  %v19290_v31 = vmov 0 }
 0x297   :  { %v19277_v8 = vsel %vm11756_vm8, 4294967295, %v19276_v8  ;;  %vm11761_vm9 = vmand %vm4483_vm4, %vm4419_vm2  ;;  %vm4388_vm2 = vcmp.eq.s32.totalorder %v11708_v50, %v11592_v6 }
 0x298   :  { %19269 = vst [vmem:[#allocation196_spill] sm:$0xff] %v11729_v62  ;;  %2909 = vmatmul.f32.gmra.mxu3 %v19274_v32  ;;  %v19281_v58 = vsel %vm11761_vm9, 4294967295, %v19280_v58 }
 0x299   :  { %v1664_v27 = vpop.f32.mrf.mxu1  ;;  %19278 = vst [vmem:[#allocation198_spill] sm:$0xff] %v19277_v8  ;;  %v19285_v8 = vmov 0 }
 0x29a   :  { %v1665_v39 = vadd.f32 %v1664_v27, %v1395_v54  ;;  %2576 = vmatmul.f32.gmra.mxu2 %v19279_v33  ;;  %v1411_v47 = vpop.f32.mrf.mxu0  ;;  %19282 = vst [vmem:[#allocation72_spill] sm:$0xff] %v19281_v58  ;;  %v11765_v27 = vpop.trf.xlu2  ;;  %v4301_v33 = vadd.s32 152, %v11520_v46  ;;  %v19288_v58 = vld [vmem:[#allocation13_spill] sm:$0xff] }
 0x29b   :  { %v2088_v62 = vpop.f32.mrf.mxu3  ;;  %19283 = vst [vmem:[#allocation199_spill] sm:$0xff] %v11765_v27  ;;  %vm18389_vm12 = vcmp.eq.f32.partialorder %v19273_v34, %v11765_v27  ;;  %vm4254_vm4 = vcmp.eq.f32.partialorder %v11375_v12, %v11765_v27  ;;  %v19368_v34 = vmov 0 }
 0x29c   :  { %v1863_v16 = vadd.f32 %v1862_v57, %v1665_v39  ;;  %2387 = vmatmul.f32.gmra.mxu1 %v19248_v4  ;;  %v4285_v57 = vadd.s32 24, %v11520_v46  ;;  %vm11788_vm3 = vmand %vm18389_vm12, %vm18388_vm13  ;;  %vm19295_vm13 = vmmov 1  }
 0x29d   :  { %v1867_v54 = vpop.f32.mrf.mxu2  ;;  %2234 = vmatmul.f32.gmra.mxu0 %v19274_v32  ;;  %v19286_v8 = vsel %vm11788_vm3, 4294967295, %v19285_v8  ;;  %vm4516_vm7 = vmand %vm4254_vm4, %vm4388_vm2 }
 0x29e   :  { %v11779_v39 = vadd.f32 %v2076_v61, %v1863_v16  ;;  %19287 = vst [vmem:[#allocation201_spill] sm:$0xff] %v19286_v8  ;;  %v11799_v61 = vshra.s32 %v4301_v33, 3  ;;  %vm11801_vm11 = vmand %vm4516_vm7, %vm4452_vm15  ;;  %v11805_v4 = vshra.s32 %v4285_v57, 3  ;;  %v19294_v8 = vld [vmem:[#allocation69_spill] sm:$0xff]  ;;  %vm4421_vm3 = vcmp.ne.s32.totalorder %v4285_v57, %v11526_v40 }
 0x29f   :  { %v19291_v31 = vsel %vm11801_vm11, 4294967295, %v19290_v31  ;;  %vm4644_vm12 = vmxor %vm4254_vm4, %vm19295_vm13  ;;  %19296 = vst [vmem:[#allocation69_spill] sm:$0xff] %v11812_v21  ;;  %v19304_v57 = vmov 0 }
 0x2a0   :  { %19284 = vst [vmem:[#allocation200_spill] sm:$0xff] %v11779_v39  ;;  %2913 = vmatmul.f32.gmra.mxu3 %v19288_v58  ;;  %vm11823_vm11 = vmand %vm4644_vm12, %vm4388_vm2  ;;  %vm18398_vm4 = vcmp.eq.s32.totalorder %v11805_v4, %v11539_v28  ;;  %vm19302_vm12 = vcmp.eq.s32.totalorder %v11799_v61, %v11539_v28  ;;  %vm19303_vm2 = vcmp.eq.f32.partialorder %v11387_v24, %v11812_v21 }
 0x2a1   :  { %v1668_v16 = vpop.f32.mrf.mxu1  ;;  %19289 = vst [vmem:[#allocation202_spill] sm:$0xff] %v11799_v61  ;;  %vm11846_vm14 = vmand %vm19303_vm2, %vm19302_vm12  ;;  %vm4454_vm2 = vcmp.ne.s32.totalorder %v4301_v33, %v11580_v56 }
 0x2a2   :  { %19292 = vst [vmem:[#allocation203_spill] sm:$0xff] %v19291_v31  ;;  %v1669_v39 = vadd.f32 %v1668_v16, %v1403_v45  ;;  %2584 = vmatmul.f32.gmra.mxu2 %v19294_v8  ;;  %v1419_v53 = vpop.f32.mrf.mxu0  ;;  %v19297_v8 = vmov 0  ;;  %v19305_v57 = vsel %vm11846_vm14, 4294967295, %v19304_v57  ;;  %v19307_v16 = vld [vmem:[#allocation12_spill] sm:$0xff]  ;;  %v19308_v31 = vmov 0  ;;  %v11855_v27 = vpop.trf.xlu2 }
 0x2a3   :  { %19293 = vst [vmem:[#allocation204_spill] sm:$0xff] %v11805_v4  ;;  %v2094_v7 = vpop.f32.mrf.mxu3  ;;  %v19298_v8 = vsel %vm11823_vm11, 4294967295, %v19297_v8 }
 0x2a4   :  { %v1868_v41 = vadd.f32 %v1867_v54, %v1669_v39  ;;  %2391 = vmatmul.f32.gmra.mxu1 %v19258_v14  ;;  %19299 = vst [vmem:[#allocation205_spill] sm:$0xff] %v19298_v8  ;;  %v19300_v54 = vld [vmem:[#allocation133_spill] sm:$0xff] }
 0x2a5   :  { %v1872_v45 = vpop.f32.mrf.mxu2  ;;  %2238 = vmatmul.f32.gmra.mxu0 %v19288_v58  ;;  %vm18402_vm7 = vcmp.eq.f32.partialorder %v19300_v54, %v11812_v21  ;;  %19306 = vst [vmem:[#allocation207_spill] sm:$0xff] %v19305_v57  ;;  %vm18408_vm12 = vcmp.eq.f32.partialorder %v19300_v54, %v11855_v27  ;;  %v4302_v57 = vadd.s32 160, %v11520_v46 }
 0x2a6   :  { %vm4485_vm15 = vmand %vm18402_vm7, %vm18398_vm4  ;;  %v11838_v39 = vadd.f32 %v2082_v19, %v1868_v41  ;;  %19311 = vst [vmem:[#allocation209_spill] sm:$0xff] %v11855_v27  ;;  %v19312_v19 = vld [vmem:[#allocation64_spill] sm:$0xff]  ;;  %vm18405_vm4 = vcmp.eq.s32.totalorder %v11805_v4, %v11592_v6  ;;  %v19325_v4 = vmov 0 }
 0x2a7   :  { %vm11851_vm8 = vmand %vm4485_vm15, %vm4421_vm3  ;;  %vm4390_vm3 = vcmp.eq.s32.totalorder %v11799_v61, %v11592_v6  ;;  %vm4256_vm15 = vcmp.eq.f32.partialorder %v11387_v24, %v11855_v27  ;;  %v11889_v33 = vshra.s32 %v4302_v57, 3  ;;  %v19337_v27 = vld [vmem:[#allocation10_spill] sm:$0xff]  ;;  %v4303_v61 = vadd.s32 168, %v11520_v46 }
 0x2a8   :  { %19301 = vst [vmem:[#allocation206_spill] sm:$0xff] %v11838_v39  ;;  %2917 = vmatmul.f32.gmra.mxu3 %v19307_v16  ;;  %v19309_v31 = vsel %vm11851_vm8, 4294967295, %v19308_v31  ;;  %vm11877_vm7 = vmand %vm18408_vm12, %vm18405_vm4 }
 0x2a9   :  { %19310 = vst [vmem:[#allocation208_spill] sm:$0xff] %v19309_v31  ;;  %v1672_v8 = vpop.f32.mrf.mxu1  ;;  %vm4518_vm14 = vmand %vm4256_vm15, %vm4390_vm3 }
 0x2aa   :  { %v1673_v41 = vadd.f32 %v1672_v8, %v1411_v47  ;;  %2592 = vmatmul.f32.gmra.mxu2 %v19312_v19  ;;  %v1427_v50 = vpop.f32.mrf.mxu0  ;;  %v4286_v47 = vadd.s32 32, %v11520_v46  ;;  %v19313_v19 = vmov 0  ;;  %19317 = vst [vmem:[#allocation211_spill] sm:$0xff] %v11889_v33  ;;  %vm11891_vm1 = vmand %vm4518_vm14, %vm4454_vm2  ;;  %vm18418_vm14 = vcmp.eq.s32.totalorder %v11889_v33, %v11539_v28 }
 0x2ab   :  { %v2100_v12 = vpop.f32.mrf.mxu3  ;;  %v19314_v19 = vsel %vm11877_vm7, 4294967295, %v19313_v19  ;;  %vm4646_vm4 = vmxor %vm4256_vm15, %vm19295_vm13 }
 0x2ac   :  { %v1873_v31 = vadd.f32 %v1872_v45, %v1673_v41  ;;  %2395 = vmatmul.f32.gmra.mxu1 %v19274_v32  ;;  %19315 = vst [vmem:[#allocation64_spill] sm:$0xff] %v19314_v19  ;;  %v19318_v41 = vmov 0  ;;  %v11895_v39 = vshra.s32 %v4286_v47, 3  ;;  %v19322_v32 = vld [vmem:[#allocation11_spill] sm:$0xff]  ;;  %vm11912_vm12 = vmand %vm4646_vm4, %vm4390_vm3 }
 0x2ad   :  { %v1877_v8 = vpop.f32.mrf.mxu2  ;;  %2242 = vmatmul.f32.gmra.mxu0 %v19307_v16  ;;  %v19319_v41 = vsel %vm11891_vm1, 4294967295, %v19318_v41  ;;  %v19326_v4 = vsel %vm11912_vm12, 4294967295, %v19325_v4  ;;  %vm4423_vm1 = vcmp.ne.s32.totalorder %v4286_v47, %v11526_v40  ;;  %v19329_v47 = vmov 0 }
 0x2ae   :  { %v11881_v45 = vadd.f32 %v2088_v62, %v1873_v31  ;;  %19320 = vst [vmem:[#allocation212_spill] sm:$0xff] %v19319_v41  ;;  %v11902_v62 = vpop.trf.xlu1  ;;  %vm18413_vm15 = vcmp.eq.s32.totalorder %v11895_v39, %v11539_v28 }
 0x2af   :  { %19321 = vst [vmem:[#allocation213_spill] sm:$0xff] %v11895_v39  ;;  %vm18421_vm2 = vcmp.eq.f32.partialorder %v11397_v55, %v11902_v62 }
 0x2b0   :  { %19316 = vst [vmem:[#allocation210_spill] sm:$0xff] %v11881_v45  ;;  %2921 = vmatmul.f32.gmra.mxu3 %v19322_v32  ;;  %v19324_v45 = vld [vmem:[#allocation61_spill] sm:$0xff]  ;;  %vm11935_vm3 = vmand %vm18421_vm2, %vm18418_vm14  ;;  %vm4392_vm14 = vcmp.eq.s32.totalorder %v11889_v33, %v11592_v6 }
 0x2b1   :  { %v1676_v19 = vpop.f32.mrf.mxu1  ;;  %19323 = vst [vmem:[#allocation214_spill] sm:$0xff] %v11902_v62  ;;  %v19330_v47 = vsel %vm11935_vm3, 4294967295, %v19329_v47 }
 0x2b2   :  { %v1677_v31 = vadd.f32 %v1676_v19, %v1419_v53  ;;  %2600 = vmatmul.f32.gmra.mxu2 %v19324_v45  ;;  %v1435_v14 = vpop.f32.mrf.mxu0  ;;  %19327 = vst [vmem:[#allocation61_spill] sm:$0xff] %v19326_v4  ;;  %v19328_v53 = vld [vmem:[#allocation135_spill] sm:$0xff]  ;;  %v11945_v4 = vpop.trf.xlu2 }
 0x2b3   :  { %v2106_v41 = vpop.f32.mrf.mxu3  ;;  %vm18414_vm7 = vcmp.eq.f32.partialorder %v19328_v53, %v11902_v62  ;;  %19331 = vst [vmem:[#allocation215_spill] sm:$0xff] %v19330_v47  ;;  %v19338_v47 = vld [vmem:[#allocation55_spill] sm:$0xff] }
 0x2b4   :  { %v1878_v19 = vadd.f32 %v1877_v8, %v1677_v31  ;;  %2399 = vmatmul.f32.gmra.mxu1 %v19288_v58  ;;  %vm4487_vm4 = vmand %vm18414_vm7, %vm18413_vm15  ;;  %v19333_v31 = vmov 0  ;;  %19336 = vst [vmem:[#allocation218_spill] sm:$0xff] %v11945_v4  ;;  %vm18425_vm15 = vcmp.eq.s32.totalorder %v11895_v39, %v11592_v6  ;;  %vm18427_vm7 = vcmp.eq.f32.partialorder %v19328_v53, %v11945_v4  ;;  %v19537_v53 = vld [vmem:[#allocation43_spill] sm:$0xff] }
 0x2b5   :  { %v1882_v45 = vpop.f32.mrf.mxu2  ;;  %2246 = vmatmul.f32.gmra.mxu0 %v19322_v32  ;;  %vm11941_vm9 = vmand %vm4487_vm4, %vm4423_vm1  ;;  %vm4258_vm1 = vcmp.eq.f32.partialorder %v11397_v55, %v11945_v4  ;;  %vm4456_vm4 = vcmp.ne.s32.totalorder %v4302_v57, %v11580_v56  ;;  %v19339_v58 = vmov 0  ;;  %v19343_v57 = vmov 0  ;;  %v19353_v4 = vld [vmem:[#allocation51_spill] sm:$0xff] }
 0x2b6   :  { %v11939_v8 = vadd.f32 %v2094_v7, %v1878_v19  ;;  %v19334_v31 = vsel %vm11941_vm9, 4294967295, %v19333_v31  ;;  %v4287_v7 = vadd.s32 40, %v11520_v46  ;;  %vm11966_vm2 = vmand %vm18427_vm7, %vm18425_vm15 }
 0x2b7   :  { %19335 = vst [vmem:[#allocation217_spill] sm:$0xff] %v19334_v31  ;;  %v19340_v58 = vsel %vm11966_vm2, 4294967295, %v19339_v58  ;;  %vm4520_vm3 = vmand %vm4258_vm1, %vm4392_vm14 }
 0x2b8   :  { %19332 = vst [vmem:[#allocation216_spill] sm:$0xff] %v11939_v8  ;;  %2925 = vmatmul.f32.gmra.mxu3 %v19337_v27  ;;  %vm11980_vm5 = vmand %vm4520_vm3, %vm4456_vm4 }
 0x2b9   :  { %v1680_v24 = vpop.f32.mrf.mxu1  ;;  %19341 = vst [vmem:[#allocation55_spill] sm:$0xff] %v19340_v58  ;;  %v19344_v57 = vsel %vm11980_vm5, 4294967295, %v19343_v57  ;;  %vm4648_vm15 = vmxor %vm4258_vm1, %vm19295_vm13  ;;  %v19349_v58 = vld [vmem:[#allocation9_spill] sm:$0xff]  ;;  %vm4425_vm5 = vcmp.ne.s32.totalorder %v4287_v7, %v11526_v40 }
 0x2ba   :  { %v1681_v19 = vadd.f32 %v1680_v24, %v1427_v50  ;;  %2608 = vmatmul.f32.gmra.mxu2 %v19338_v47  ;;  %v1443_v31 = vpop.f32.mrf.mxu0  ;;  %v11977_v24 = vshra.s32 %v4303_v61, 3  ;;  %19345 = vst [vmem:[#allocation220_spill] sm:$0xff] %v19344_v57  ;;  %v11984_v47 = vshra.s32 %v4287_v7, 3  ;;  %vm12002_vm4 = vmand %vm4648_vm15, %vm4392_vm14  ;;  %v19354_v7 = vmov 0  ;;  %v12034_v33 = vpop.trf.xlu2 }
 0x2bb   :  { %v2112_v8 = vpop.f32.mrf.mxu3  ;;  %19360 = vst [vmem:[#allocation226_spill] sm:$0xff] %v12034_v33 }
 0x2bc   :  { %v1883_v44 = vadd.f32 %v1882_v45, %v1681_v19  ;;  %2403 = vmatmul.f32.gmra.mxu1 %v19307_v16  ;;  %19342 = vst [vmem:[#allocation219_spill] sm:$0xff] %v11977_v24  ;;  %v11992_v19 = vpop.trf.xlu1  ;;  %vm18435_vm7 = vcmp.eq.s32.totalorder %v11977_v24, %v11539_v28  ;;  %vm18438_vm1 = vcmp.eq.s32.totalorder %v11984_v47, %v11539_v28 }
 0x2bd   :  { %v1887_v50 = vpop.f32.mrf.mxu2  ;;  %2250 = vmatmul.f32.gmra.mxu0 %v19337_v27  ;;  %19346 = vst [vmem:[#allocation221_spill] sm:$0xff] %v11984_v47  ;;  %vm18436_vm3 = vcmp.eq.f32.partialorder %v11407_v29, %v11992_v19  ;;  %vm18439_vm2 = vcmp.eq.f32.partialorder %v11301_v30, %v11992_v19 }
 0x2be   :  { %v11986_v45 = vadd.f32 %v2100_v12, %v1883_v44  ;;  %19348 = vst [vmem:[#allocation223_spill] sm:$0xff] %v11992_v19  ;;  %v19350_v12 = vmov 0  ;;  %vm4489_vm14 = vmand %vm18439_vm2, %vm18438_vm1  ;;  %vm4458_vm1 = vcmp.ne.s32.totalorder %v4303_v61, %v11580_v56 }
 0x2bf   :  { %v19351_v12 = vsel %vm12002_vm4, 4294967295, %v19350_v12  ;;  %vm12024_vm15 = vmand %vm18436_vm3, %vm18435_vm7  ;;  %vm18445_vm7 = vcmp.eq.s32.totalorder %v11984_v47, %v11592_v6  ;;  %vm18447_vm3 = vcmp.eq.f32.partialorder %v11301_v30, %v12034_v33  ;;  %v19527_v47 = vmov 0  ;;  %v19560_v30 = vld [vmem:[#allocation38_spill] sm:$0xff] }
 0x2c0   :  { %19347 = vst [vmem:[#allocation222_spill] sm:$0xff] %v11986_v45  ;;  %2929 = vmatmul.f32.gmra.mxu3 %v19349_v58  ;;  %v19355_v7 = vsel %vm12024_vm15, 4294967295, %v19354_v7  ;;  %vm12029_vm8 = vmand %vm4489_vm14, %vm4425_vm5  ;;  %vm4394_vm5 = vcmp.eq.s32.totalorder %v11977_v24, %v11592_v6  ;;  %vm4260_vm14 = vcmp.eq.f32.partialorder %v11407_v29, %v12034_v33  ;;  %v19382_v33 = vmov 0 }
 0x2c1   :  { %v1684_v57 = vpop.f32.mrf.mxu1  ;;  %19352 = vst [vmem:[#allocation224_spill] sm:$0xff] %v19351_v12  ;;  %vm12056_vm2 = vmand %vm18447_vm3, %vm18445_vm7 }
 0x2c2   :  { %v1685_v44 = vadd.f32 %v1684_v57, %v1435_v14  ;;  %2616 = vmatmul.f32.gmra.mxu2 %v19353_v4  ;;  %v1451_v55 = vpop.f32.mrf.mxu0  ;;  %19356 = vst [vmem:[#allocation51_spill] sm:$0xff] %v19355_v7  ;;  %v19357_v14 = vmov 0  ;;  %v19362_v7 = vld [vmem:[#allocation8_spill] sm:$0xff]  ;;  %vm4522_vm15 = vmand %vm4260_vm14, %vm4394_vm5  ;;  %v12123_v29 = vpop.trf.xlu2 }
 0x2c3   :  { %v2118_v12 = vpop.f32.mrf.mxu3  ;;  %v19358_v14 = vsel %vm12029_vm8, 4294967295, %v19357_v14  ;;  %vm12069_vm8 = vmand %vm4522_vm15, %vm4458_vm1  ;;  %19385 = vst [vmem:[#allocation235_spill] sm:$0xff] %v12123_v29 }
 0x2c4   :  { %v1888_v4 = vadd.f32 %v1887_v50, %v1685_v44  ;;  %2407 = vmatmul.f32.gmra.mxu1 %v19322_v32  ;;  %19359 = vst [vmem:[#allocation225_spill] sm:$0xff] %v19358_v14  ;;  %v4304_v50 = vadd.s32 176, %v11520_v46  ;;  %v4288_v44 = vadd.s32 48, %v11520_v46  ;;  %v19369_v34 = vsel %vm12069_vm8, 4294967295, %v19368_v34  ;;  %vm4650_vm7 = vmxor %vm4260_vm14, %vm19295_vm13 }
 0x2c5   :  { %v1892_v57 = vpop.f32.mrf.mxu2  ;;  %2254 = vmatmul.f32.gmra.mxu0 %v19349_v58  ;;  %19370 = vst [vmem:[#allocation229_spill] sm:$0xff] %v19369_v34  ;;  %vm12092_vm3 = vmand %vm4650_vm7, %vm4394_vm5  ;;  %v19381_v34 = vld [vmem:[#allocation33_spill] sm:$0xff] }
 0x2c6   :  { %v12036_v16 = vadd.f32 %v2106_v41, %v1888_v4  ;;  %v19363_v4 = vmov 0  ;;  %v12067_v61 = vshra.s32 %v4304_v50, 3  ;;  %v12073_v39 = vshra.s32 %v4288_v44, 3 }
 0x2c7   :  { %v19364_v4 = vsel %vm12056_vm2, 4294967295, %v19363_v4  ;;  %vm4427_vm8 = vcmp.ne.s32.totalorder %v4288_v44, %v11526_v40  ;;  %v19378_v44 = vmov 0 }
 0x2c8   :  { %19361 = vst [vmem:[#allocation227_spill] sm:$0xff] %v12036_v16  ;;  %2933 = vmatmul.f32.gmra.mxu3 %v19362_v7  ;;  %v19366_v16 = vld [vmem:[#allocation44_spill] sm:$0xff]  ;;  %vm18454_vm1 = vcmp.eq.s32.totalorder %v12067_v61, %v11539_v28  ;;  %vm18456_vm14 = vcmp.eq.s32.totalorder %v12073_v39, %v11539_v28 }
 0x2c9   :  { %v1688_v41 = vpop.f32.mrf.mxu1  ;;  %19365 = vst [vmem:[#allocation228_spill] sm:$0xff] %v19364_v4 }
 0x2ca   :  { %v1689_v14 = vadd.f32 %v1688_v41, %v1443_v31  ;;  %2624 = vmatmul.f32.gmra.mxu2 %v19366_v16  ;;  %v1459_v32 = vpop.f32.mrf.mxu0  ;;  %19367 = vst [vmem:[#allocation44_spill] sm:$0xff] %v12067_v61  ;;  %v12081_v41 = vpop.trf.xlu1 }
 0x2cb   :  { %v2124_v45 = vpop.f32.mrf.mxu3  ;;  %19371 = vst [vmem:[#allocation230_spill] sm:$0xff] %v12073_v39  ;;  %vm18455_vm15 = vcmp.eq.f32.partialorder %v11417_v0, %v12081_v41  ;;  %vm18457_vm2 = vcmp.eq.f32.partialorder %v11310_v23, %v12081_v41 }
 0x2cc   :  { %v1893_v31 = vadd.f32 %v1892_v57, %v1689_v14  ;;  %2411 = vmatmul.f32.gmra.mxu1 %v19337_v27  ;;  %19372 = vst [vmem:[#allocation231_spill] sm:$0xff] %v12081_v41  ;;  %v19374_v14 = vmov 0  ;;  %vm4491_vm7 = vmand %vm18457_vm2, %vm18456_vm14  ;;  %vm4460_vm14 = vcmp.ne.s32.totalorder %v4304_v50, %v11580_v56 }
 0x2cd   :  { %v1897_v16 = vpop.f32.mrf.mxu2  ;;  %2258 = vmatmul.f32.gmra.mxu0 %v19362_v7  ;;  %v19375_v14 = vsel %vm12092_vm3, 4294967295, %v19374_v14  ;;  %vm12114_vm5 = vmand %vm18455_vm15, %vm18454_vm1  ;;  %vm18463_vm1 = vcmp.eq.s32.totalorder %v12073_v39, %v11592_v6  ;;  %vm18467_vm15 = vcmp.eq.f32.partialorder %v11310_v23, %v12123_v29  ;;  %v4296_v39 = vadd.s32 112, %v11520_v46 }
 0x2ce   :  { %v12083_v4 = vadd.f32 %v2112_v8, %v1893_v31  ;;  %19376 = vst [vmem:[#allocation233_spill] sm:$0xff] %v19375_v14  ;;  %v19377_v8 = vld [vmem:[#allocation7_spill] sm:$0xff]  ;;  %v19379_v44 = vsel %vm12114_vm5, 4294967295, %v19378_v44  ;;  %vm12119_vm9 = vmand %vm4491_vm7, %vm4427_vm8  ;;  %vm4396_vm8 = vcmp.eq.s32.totalorder %v12067_v61, %v11592_v6  ;;  %vm4262_vm7 = vcmp.eq.f32.partialorder %v11417_v0, %v12123_v29 }
 0x2cf   :  { %19380 = vst [vmem:[#allocation234_spill] sm:$0xff] %v19379_v44  ;;  %v19383_v33 = vsel %vm12119_vm9, 4294967295, %v19382_v33  ;;  %vm12146_vm2 = vmand %vm18467_vm15, %vm18463_vm1  ;;  %v19390_v44 = vld [vmem:[#allocation6_spill] sm:$0xff]  ;;  %v19562_v23 = vmov 0 }
 0x2d0   :  { %19373 = vst [vmem:[#allocation232_spill] sm:$0xff] %v12083_v4  ;;  %2937 = vmatmul.f32.gmra.mxu3 %v19377_v8  ;;  %vm4524_vm5 = vmand %vm4262_vm7, %vm4396_vm8 }
 0x2d1   :  { %v1692_v57 = vpop.f32.mrf.mxu1  ;;  %19384 = vst [vmem:[#allocation33_spill] sm:$0xff] %v19383_v33  ;;  %vm12159_vm9 = vmand %vm4524_vm5, %vm4460_vm14 }
 0x2d2   :  { %v1693_v31 = vadd.f32 %v1692_v57, %v1451_v55  ;;  %2632 = vmatmul.f32.gmra.mxu2 %v19381_v34  ;;  %v1467_v14 = vpop.f32.mrf.mxu0  ;;  %v4305_v55 = vadd.s32 184, %v11520_v46  ;;  %vm4652_vm1 = vmxor %vm4262_vm7, %vm19295_vm13  ;;  %v12170_v21 = vpop.trf.xlu1 }
 0x2d3   :  { %v2130_v24 = vpop.f32.mrf.mxu3  ;;  %vm18475_vm5 = vcmp.eq.f32.partialorder %v11427_v9, %v12170_v21  ;;  %vm12181_vm15 = vmand %vm4652_vm1, %vm4396_vm8  ;;  %vm18476_vm14 = vcmp.eq.f32.partialorder %v11321_v3, %v12170_v21 }
 0x2d4   :  { %v1898_v4 = vadd.f32 %v1897_v16, %v1693_v31  ;;  %2415 = vmatmul.f32.gmra.mxu1 %v19349_v58  ;;  %v4289_v16 = vadd.s32 56, %v11520_v46  ;;  %v19387_v31 = vmov 0 }
 0x2d5   :  { %v1902_v34 = vpop.f32.mrf.mxu2  ;;  %2262 = vmatmul.f32.gmra.mxu0 %v19377_v8  ;;  %v19388_v31 = vsel %vm12146_vm2, 4294967295, %v19387_v31 }
 0x2d6   :  { %v12137_v57 = vadd.f32 %v2118_v12, %v1898_v4  ;;  %19389 = vst [vmem:[#allocation237_spill] sm:$0xff] %v19388_v31  ;;  %v12157_v12 = vshra.s32 %v4305_v55, 3  ;;  %v19392_v4 = vmov 0  ;;  %v12163_v33 = vshra.s32 %v4289_v16, 3  ;;  %v19396_v31 = vld [vmem:[#allocation29_spill] sm:$0xff] }
 0x2d7   :  { %v19393_v4 = vsel %vm12159_vm9, 4294967295, %v19392_v4  ;;  %19397 = vst [vmem:[#allocation29_spill] sm:$0xff] %v12170_v21  ;;  %vm4429_vm9 = vcmp.ne.s32.totalorder %v4289_v16, %v11526_v40  ;;  %v19403_v16 = vmov 0  ;;  %v19588_v21 = vld [vmem:[#allocation76_spill] sm:$0xff] }
 0x2d8   :  { %19386 = vst [vmem:[#allocation236_spill] sm:$0xff] %v12137_v57  ;;  %2941 = vmatmul.f32.gmra.mxu3 %v19390_v44  ;;  %vm18471_vm7 = vcmp.eq.s32.totalorder %v12163_v33, %v11539_v28  ;;  %vm19402_vm8 = vcmp.eq.s32.totalorder %v12157_v12, %v11539_v28 }
 0x2d9   :  { %19391 = vst [vmem:[#allocation238_spill] sm:$0xff] %v12157_v12  ;;  %v1696_v50 = vpop.f32.mrf.mxu1  ;;  %vm4493_vm1 = vmand %vm18476_vm14, %vm18471_vm7  ;;  %vm18480_vm7 = vcmp.eq.s32.totalorder %v12163_v33, %v11592_v6 }
 0x2da   :  { %19394 = vst [vmem:[#allocation239_spill] sm:$0xff] %v19393_v4  ;;  %v1697_v57 = vadd.f32 %v1696_v50, %v1459_v32  ;;  %2640 = vmatmul.f32.gmra.mxu2 %v19396_v31  ;;  %v1475_v58 = vpop.f32.mrf.mxu0  ;;  %v19398_v31 = vmov 0  ;;  %vm12204_vm2 = vmand %vm18475_vm5, %vm19402_vm8  ;;  %v12213_v50 = vpop.trf.xlu2  ;;  %vm4462_vm5 = vcmp.ne.s32.totalorder %v4305_v55, %v11580_v56 }
 0x2db   :  { %19395 = vst [vmem:[#allocation240_spill] sm:$0xff] %v12163_v33  ;;  %v2136_v27 = vpop.f32.mrf.mxu3  ;;  %v19399_v31 = vsel %vm12181_vm15, 4294967295, %v19398_v31  ;;  %v19404_v16 = vsel %vm12204_vm2, 4294967295, %v19403_v16  ;;  %vm12209_vm6 = vmand %vm4493_vm1, %vm4429_vm9  ;;  %vm18483_vm8 = vcmp.eq.f32.partialorder %v11321_v3, %v12213_v50  ;;  %vm4398_vm9 = vcmp.eq.s32.totalorder %v12157_v12, %v11592_v6  ;;  %v19596_v3 = vld [vmem:[#allocation151_spill] sm:$0xff] }
 0x2dc   :  { %v1903_v54 = vadd.f32 %v1902_v34, %v1697_v57  ;;  %2419 = vmatmul.f32.gmra.mxu1 %v19362_v7  ;;  %19400 = vst [vmem:[#allocation241_spill] sm:$0xff] %v19399_v31  ;;  %v19406_v57 = vld [vmem:[#allocation5_spill] sm:$0xff]  ;;  %v19411_v31 = vld [vmem:[#allocation26_spill] sm:$0xff]  ;;  %vm4264_vm1 = vcmp.eq.f32.partialorder %v11427_v9, %v12213_v50  ;;  %vm12235_vm14 = vmand %vm18483_vm8, %vm18480_vm7 }
 0x2dd   :  { %v1907_v32 = vpop.f32.mrf.mxu2  ;;  %2266 = vmatmul.f32.gmra.mxu0 %v19390_v44  ;;  %19405 = vst [vmem:[#allocation243_spill] sm:$0xff] %v19404_v16  ;;  %v4306_v16 = vadd.s32 192, %v11520_v46  ;;  %vm4526_vm2 = vmand %vm4264_vm1, %vm4398_vm9 }
 0x2de   :  { %v12190_v34 = vadd.f32 %v2124_v45, %v1903_v54  ;;  %v19407_v54 = vmov 0  ;;  %19410 = vst [vmem:[#allocation245_spill] sm:$0xff] %v12213_v50  ;;  %vm4654_vm7 = vmxor %vm4264_vm1, %vm19295_vm13  ;;  %v19424_v50 = vmov 0 }
 0x2df   :  { %v19408_v54 = vsel %vm12209_vm6, 4294967295, %v19407_v54  ;;  %v12247_v55 = vshra.s32 %v4306_v16, 3  ;;  %vm12249_vm6 = vmand %vm4526_vm2, %vm4462_vm5 }
 0x2e0   :  { %19401 = vst [vmem:[#allocation242_spill] sm:$0xff] %v12190_v34  ;;  %2945 = vmatmul.f32.gmra.mxu3 %v19406_v57  ;;  %vm12272_vm8 = vmand %vm4654_vm7, %vm4398_vm9 }
 0x2e1   :  { %19409 = vst [vmem:[#allocation244_spill] sm:$0xff] %v19408_v54  ;;  %v1700_v45 = vpop.f32.mrf.mxu1  ;;  %v19412_v54 = vmov 0  ;;  %vm18490_vm2 = vcmp.eq.s32.totalorder %v12247_v55, %v11539_v28  ;;  %v19425_v50 = vsel %vm12272_vm8, 4294967295, %v19424_v50 }
 0x2e2   :  { %v1701_v4 = vadd.f32 %v1700_v45, %v1467_v14  ;;  %2648 = vmatmul.f32.gmra.mxu2 %v19411_v31  ;;  %v1483_v29 = vpop.f32.mrf.mxu0  ;;  %v4290_v14 = vadd.s32 64, %v11520_v46  ;;  %v19413_v54 = vsel %vm12235_vm14, 4294967295, %v19412_v54  ;;  %19416 = vst [vmem:[#allocation247_spill] sm:$0xff] %v12247_v55 }
 0x2e3   :  { %v2142_v61 = vpop.f32.mrf.mxu3  ;;  %19414 = vst [vmem:[#allocation26_spill] sm:$0xff] %v19413_v54 }
 0x2e4   :  { %v1908_v45 = vadd.f32 %v1907_v32, %v1701_v4  ;;  %2423 = vmatmul.f32.gmra.mxu1 %v19377_v8  ;;  %v19417_v4 = vmov 0  ;;  %v12253_v32 = vshra.s32 %v4290_v14, 3  ;;  %v19422_v8 = vld [vmem:[#allocation23_spill] sm:$0xff]  ;;  %19426 = vst [vmem:[#allocation251_spill] sm:$0xff] %v19425_v50  ;;  %v4307_v50 = vadd.s32 200, %v11520_v46 }
 0x2e5   :  { %v1912_v31 = vpop.f32.mrf.mxu2  ;;  %2270 = vmatmul.f32.gmra.mxu0 %v19406_v57  ;;  %v19418_v4 = vsel %vm12249_vm6, 4294967295, %v19417_v4  ;;  %vm4431_vm6 = vcmp.ne.s32.totalorder %v4290_v14, %v11526_v40 }
 0x2e6   :  { %v12239_v0 = vadd.f32 %v2130_v24, %v1908_v45  ;;  %19419 = vst [vmem:[#allocation248_spill] sm:$0xff] %v19418_v4  ;;  %v12260_v24 = vpop.trf.xlu1  ;;  %vm18485_vm1 = vcmp.eq.s32.totalorder %v12253_v32, %v11539_v28 }
 0x2e7   :  { %19420 = vst [vmem:[#allocation249_spill] sm:$0xff] %v12253_v32  ;;  %vm18494_vm5 = vcmp.eq.f32.partialorder %v11437_v36, %v12260_v24  ;;  %vm18486_vm14 = vcmp.eq.f32.partialorder %v11318_v60, %v12260_v24 }
 0x2e8   :  { %19415 = vst [vmem:[#allocation246_spill] sm:$0xff] %v12239_v0  ;;  %2949 = vmatmul.f32.gmra.mxu3 %v11150_v48  ;;  %vm4495_vm7 = vmand %vm18486_vm14, %vm18485_vm1  ;;  %vm18496_vm1 = vcmp.eq.s32.totalorder %v12253_v32, %v11592_v6  ;;  %v4297_v32 = vadd.s32 120, %v11520_v46 }
 0x2e9   :  { %v1704_v54 = vpop.f32.mrf.mxu1  ;;  %19421 = vst [vmem:[#allocation250_spill] sm:$0xff] %v12260_v24  ;;  %vm12295_vm9 = vmand %vm18494_vm5, %vm18490_vm2  ;;  %vm4400_vm2 = vcmp.eq.s32.totalorder %v12247_v55, %v11592_v6  ;;  %v19632_v24 = vld [vmem:[#allocation93_spill] sm:$0xff] }
 0x2ea   :  { %v1705_v45 = vadd.f32 %v1704_v54, %v1475_v58  ;;  %2656 = vmatmul.f32.gmra.mxu2 %v19422_v8  ;;  %v12263_v34 = vpop.f32.mrf.mxu0  ;;  %v19427_v54 = vmov 0  ;;  %vm12301_vm0 = vmand %vm4495_vm7, %vm4431_vm6  ;;  %vm4464_vm7 = vcmp.ne.s32.totalorder %v4306_v16, %v11580_v56  ;;  %v19440_v16 = vmov 0 }
 0x2eb   :  { %19423 = vst [vmem:[#allocation23_spill] sm:$0xff] %v12263_v34  ;;  %v2886_v4 = vpop.f32.mrf.mxu3  ;;  %v19428_v54 = vsel %vm12295_vm9, 4294967295, %v19427_v54  ;;  %v19638_v34 = vld [vmem:[#allocation34_spill] sm:$0xff] }
 0x2ec   :  { %v1913_v58 = vadd.f32 %v1912_v31, %v1705_v45  ;;  %2427 = vmatmul.f32.gmra.mxu1 %v19390_v44  ;;  %19429 = vst [vmem:[#allocation252_spill] sm:$0xff] %v19428_v54  ;;  %v19431_v31 = vmov 0  ;;  %v12305_v45 = vpop.trf.xlu2  ;;  %v19435_v54 = vld [vmem:[#allocation131_spill] sm:$0xff]  ;;  %v19436_v44 = vmov 0 }
 0x2ed   :  { %v1917_v8 = vpop.f32.mrf.mxu2  ;;  %2274 = vmatmul.f32.gmra.mxu0 %v11150_v48  ;;  %v19432_v31 = vsel %vm12301_vm0, 4294967295, %v19431_v31  ;;  %19434 = vst [vmem:[#allocation255_spill] sm:$0xff] %v12305_v45  ;;  %vm18499_vm14 = vcmp.eq.f32.partialorder %v11318_v60, %v12305_v45  ;;  %vm4266_vm6 = vcmp.eq.f32.partialorder %v11437_v36, %v12305_v45  ;;  %v19633_v60 = vld [vmem:[#allocation172_spill] sm:$0xff] }
 0x2ee   :  { %v12299_v14 = vadd.f32 %v2136_v27, %v1913_v58  ;;  %19433 = vst [vmem:[#allocation254_spill] sm:$0xff] %v19432_v31  ;;  %v4291_v27 = vadd.s32 72, %v11520_v46  ;;  %vm12328_vm5 = vmand %vm18499_vm14, %vm18496_vm1 }
 0x2ef   :  { %v19437_v44 = vsel %vm12328_vm5, 4294967295, %v19436_v44  ;;  %vm4528_vm9 = vmand %vm4266_vm6, %vm4400_vm2 }
 0x2f0   :  { %19430 = vst [vmem:[#allocation253_spill] sm:$0xff] %v12299_v14  ;;  %2953 = vmatmul.f32.gmra.mxu3 %v11123_v5  ;;  %vm12342_vm0 = vmand %vm4528_vm9, %vm4464_vm7 }
 0x2f1   :  { %v1708_v12 = vpop.f32.mrf.mxu1  ;;  %19438 = vst [vmem:[#allocation131_spill] sm:$0xff] %v19437_v44  ;;  %v19441_v16 = vsel %vm12342_vm0, 4294967295, %v19440_v16  ;;  %vm4656_vm1 = vmxor %vm4266_vm6, %vm19295_vm13  ;;  %v12356_v44 = vpop.trf.xlu1  ;;  %vm4433_vm0 = vcmp.ne.s32.totalorder %v4291_v27, %v11526_v40 }
 0x2f2   :  { %v1709_v58 = vadd.f32 %v1708_v12, %v1483_v29  ;;  %2664 = vmatmul.f32.gmra.mxu2 %v19435_v54  ;;  %v12319_v31 = vpop.f32.mrf.mxu0  ;;  %v12339_v29 = vshra.s32 %v4307_v50, 3  ;;  %19442 = vst [vmem:[#allocation257_spill] sm:$0xff] %v19441_v16  ;;  %v12346_v54 = vshra.s32 %v4291_v27, 3  ;;  %vm18505_vm7 = vcmp.eq.f32.partialorder %v11447_v2, %v12356_v44  ;;  %vm12368_vm14 = vmand %vm4656_vm1, %vm4400_vm2 }
 0x2f3   :  { %v2890_v9 = vpop.f32.mrf.mxu3  ;;  %vm18506_vm9 = vcmp.eq.f32.partialorder %v11327_v49, %v12356_v44  ;;  %v19452_v27 = vmov 0 }
 0x2f4   :  { %v1918_v14 = vadd.f32 %v1917_v8, %v1709_v58  ;;  %2431 = vmatmul.f32.gmra.mxu1 %v19406_v57  ;;  %19439 = vst [vmem:[#allocation256_spill] sm:$0xff] %v12339_v29  ;;  %vm18502_vm6 = vcmp.eq.s32.totalorder %v12346_v54, %v11539_v28  ;;  %vm19451_vm1 = vcmp.eq.s32.totalorder %v12339_v29, %v11539_v28  ;;  %v12402_v45 = vpop.trf.xlu2 }
 0x2f5   :  { %v2537_v12 = vpop.f32.mrf.mxu2  ;;  %2278 = vmatmul.f32.gmra.mxu0 %v11123_v5  ;;  %19443 = vst [vmem:[#allocation258_spill] sm:$0xff] %v12346_v54  ;;  %vm4497_vm2 = vmand %vm18506_vm9, %vm18502_vm6  ;;  %vm18513_vm6 = vcmp.eq.s32.totalorder %v12346_v54, %v11592_v6 }
 0x2f6   :  { %v12348_v8 = vadd.f32 %v2886_v4, %v2537_v12  ;;  %v12350_v58 = vadd.f32 %v2142_v61, %v1918_v14  ;;  %v19447_v61 = vmov 0  ;;  %v19450_v4 = vld [vmem:[#allocation130_spill] sm:$0xff]  ;;  %vm12392_vm5 = vmand %vm18505_vm7, %vm19451_vm1  ;;  %19458 = vst [vmem:[#allocation264_spill] sm:$0xff] %v12402_v45  ;;  %vm18516_vm1 = vcmp.eq.f32.partialorder %v11327_v49, %v12402_v45 }
 0x2f7   :  { %v19448_v61 = vsel %vm12368_vm14, 4294967295, %v19447_v61  ;;  %v19453_v27 = vsel %vm12392_vm5, 4294967295, %v19452_v27  ;;  %vm12397_vm10 = vmand %vm4497_vm2, %vm4433_vm0  ;;  %vm4402_vm0 = vcmp.eq.s32.totalorder %v12339_v29, %v11592_v6  ;;  %vm4268_vm2 = vcmp.eq.f32.partialorder %v11447_v2, %v12402_v45 }
 0x2f8   :  { %19444 = vst [vmem:[#allocation259_spill] sm:$0xff] %v12348_v8  ;;  %2957 = vmatmul.f32.gmra.mxu3 %v11105_v18  ;;  %vm4466_vm7 = vcmp.ne.s32.totalorder %v4307_v50, %v11580_v56  ;;  %vm12426_vm9 = vmand %vm18516_vm1, %vm18513_vm6  ;;  %v19483_v29 = vmov 0  ;;  %v19505_v2 = vmov 0 }
 0x2f9   :  { %19445 = vst [vmem:[#allocation260_spill] sm:$0xff] %v12350_v58  ;;  %v12363_v16 = vpop.f32.mrf.mxu1  ;;  %vm4530_vm5 = vmand %vm4268_vm2, %vm4402_vm0 }
 0x2fa   :  { %19446 = vst [vmem:[#allocation261_spill] sm:$0xff] %v12363_v16  ;;  %2672 = vmatmul.f32.gmra.mxu2 %v19450_v4  ;;  %v12378_v14 = vpop.f32.mrf.mxu0  ;;  %v19455_v4 = vmov 0  ;;  %vm4658_vm6 = vmxor %vm4268_vm2, %vm19295_vm13 }
 0x2fb   :  { %19449 = vst [vmem:[#allocation262_spill] sm:$0xff] %v19448_v61  ;;  %v2894_v12 = vpop.f32.mrf.mxu3  ;;  %v19456_v4 = vsel %vm12397_vm10, 4294967295, %v19455_v4  ;;  %vm12441_vm10 = vmand %vm4530_vm5, %vm4466_vm7 }
 0x2fc   :  { %19454 = vst [vmem:[#allocation130_spill] sm:$0xff] %v19453_v27  ;;  %2435 = vmatmul.f32.gmra.mxu1 %v11150_v48  ;;  %v4308_v27 = vadd.s32 208, %v11520_v46  ;;  %v19465_v48 = vmov 0  ;;  %vm12464_vm1 = vmand %vm4658_vm6, %vm4402_vm0 }
 0x2fd   :  { %19457 = vst [vmem:[#allocation263_spill] sm:$0xff] %v19456_v4  ;;  %v2545_v61 = vpop.f32.mrf.mxu2  ;;  %2282 = vmatmul.f32.gmra.mxu0 %v11105_v18  ;;  %v4292_v4 = vadd.s32 80, %v11520_v46  ;;  %v19466_v48 = vsel %vm12441_vm10, 4294967295, %v19465_v48 }
 0x2fe   :  { %v12404_v8 = vadd.f32 %v2890_v9, %v2545_v61  ;;  %v19460_v61 = vmov 0  ;;  %v12439_v50 = vshra.s32 %v4308_v27, 3  ;;  %19467 = vst [vmem:[#allocation267_spill] sm:$0xff] %v19466_v48 }
 0x2ff   :  { %v19461_v61 = vsel %vm12426_vm9, 4294967295, %v19460_v61  ;;  %v12445_v57 = vshra.s32 %v4292_v4, 3  ;;  %vm4435_vm10 = vcmp.ne.s32.totalorder %v4292_v4, %v11526_v40  ;;  %v19475_v4 = vmov 0 }
 0x300   :  { %19459 = vst [vmem:[#allocation265_spill] sm:$0xff] %v12404_v8  ;;  %2961 = vmatmul.f32.gmra.mxu3 %v11075_v43  ;;  %v19463_v8 = vld [vmem:[#allocation128_spill] sm:$0xff]  ;;  %vm19474_vm0 = vcmp.eq.s32.totalorder %v12439_v50, %v11539_v28 }
 0x301   :  { %v12418_v9 = vpop.f32.mrf.mxu1  ;;  %19462 = vst [vmem:[#allocation266_spill] sm:$0xff] %v19461_v61  ;;  %v12453_v61 = vpop.trf.xlu1  ;;  %vm18521_vm2 = vcmp.eq.s32.totalorder %v12445_v57, %v11539_v28 }
 0x302   :  { %2680 = vmatmul.f32.gmra.mxu2 %v19463_v8  ;;  %v12431_v55 = vpop.f32.mrf.mxu0  ;;  %19464 = vst [vmem:[#allocation128_spill] sm:$0xff] %v12439_v50  ;;  %vm18526_vm7 = vcmp.eq.f32.partialorder %v11457_v51, %v12453_v61  ;;  %vm18527_vm5 = vcmp.eq.f32.partialorder %v11338_v20, %v12453_v61 }
 0x303   :  { %v2898_v36 = vpop.f32.mrf.mxu3  ;;  %19468 = vst [vmem:[#allocation268_spill] sm:$0xff] %v12445_v57  ;;  %vm4499_vm6 = vmand %vm18527_vm5, %vm18521_vm2  ;;  %vm18532_vm2 = vcmp.eq.s32.totalorder %v12445_v57, %v11592_v6 }
 0x304   :  { %2439 = vmatmul.f32.gmra.mxu1 %v11123_v5  ;;  %19469 = vst [vmem:[#allocation269_spill] sm:$0xff] %v12453_v61  ;;  %v19471_v5 = vmov 0  ;;  %vm12488_vm9 = vmand %vm18526_vm7, %vm19474_vm0  ;;  %vm4468_vm7 = vcmp.ne.s32.totalorder %v4308_v27, %v11580_v56  ;;  %v19487_v27 = vmov 0 }
 0x305   :  { %v2553_v8 = vpop.f32.mrf.mxu2  ;;  %2286 = vmatmul.f32.gmra.mxu0 %v11075_v43  ;;  %v19472_v5 = vsel %vm12464_vm1, 4294967295, %v19471_v5  ;;  %v19476_v4 = vsel %vm12488_vm9, 4294967295, %v19475_v4  ;;  %vm12495_vm11 = vmand %vm4499_vm6, %vm4435_vm10  ;;  %vm4404_vm10 = vcmp.eq.s32.totalorder %v12439_v50, %v11592_v6 }
 0x306   :  { %v12459_v48 = vadd.f32 %v2894_v12, %v2553_v8  ;;  %19473 = vst [vmem:[#allocation271_spill] sm:$0xff] %v19472_v5  ;;  %v19478_v5 = vmov 0 }
 0x307   :  { %19477 = vst [vmem:[#allocation272_spill] sm:$0xff] %v19476_v4  ;;  %v19479_v5 = vsel %vm12495_vm11, 4294967295, %v19478_v5  ;;  %v4309_v4 = vadd.s32 216, %v11520_v46 }
 0x308   :  { %19470 = vst [vmem:[#allocation270_spill] sm:$0xff] %v12459_v48  ;;  %2965 = vmatmul.f32.gmra.mxu3 %v11045_v22  ;;  %v12499_v48 = vpop.trf.xlu2 }
 0x309   :  { %v12480_v12 = vpop.f32.mrf.mxu1  ;;  %19480 = vst [vmem:[#allocation273_spill] sm:$0xff] %v19479_v5  ;;  %vm18534_vm0 = vcmp.eq.f32.partialorder %v11338_v20, %v12499_v48  ;;  %vm4270_vm6 = vcmp.eq.f32.partialorder %v11457_v51, %v12499_v48  ;;  %v4293_v5 = vadd.s32 88, %v11520_v46  ;;  %v12544_v51 = vpop.trf.xlu1 }
 0x30a   :  { %2688 = vmatmul.f32.gmra.mxu2 %v11169_v63  ;;  %v12493_v8 = vpop.f32.mrf.mxu0  ;;  %19481 = vst [vmem:[#allocation274_spill] sm:$0xff] %v12499_v48  ;;  %vm12522_vm5 = vmand %vm18534_vm0, %vm18532_vm2  ;;  %vm18544_vm0 = vcmp.eq.f32.partialorder %v11335_v42, %v12544_v51 }
 0x30b   :  { %v2902_v45 = vpop.f32.mrf.mxu3  ;;  %v19484_v29 = vsel %vm12522_vm5, 4294967295, %v19483_v29  ;;  %vm4532_vm9 = vmand %vm4270_vm6, %vm4404_vm10  ;;  %19491 = vst [vmem:[#allocation280_spill] sm:$0xff] %v12544_v51 }
 0x30c   :  { %2443 = vmatmul.f32.gmra.mxu1 %v11105_v18  ;;  %19485 = vst [vmem:[#allocation276_spill] sm:$0xff] %v19484_v29  ;;  %vm12534_vm11 = vmand %vm4532_vm9, %vm4468_vm7 }
 0x30d   :  { %v2561_v63 = vpop.f32.mrf.mxu2  ;;  %2290 = vmatmul.f32.gmra.mxu0 %v11045_v22  ;;  %v19488_v27 = vsel %vm12534_vm11, 4294967295, %v19487_v27  ;;  %vm4660_vm2 = vmxor %vm4270_vm6, %vm19295_vm13  ;;  %vm4437_vm11 = vcmp.ne.s32.totalorder %v4293_v5, %v11526_v40 }
 0x30e   :  { %v12513_v18 = vadd.f32 %v2898_v36, %v2561_v63  ;;  %v12530_v36 = vshra.s32 %v4309_v4, 3  ;;  %19489 = vst [vmem:[#allocation278_spill] sm:$0xff] %v19488_v27  ;;  %vm12555_vm7 = vmand %vm4660_vm2, %vm4404_vm10  ;;  %vm19497_vm10 = vcmp.eq.f32.partialorder %v11467_v1, %v12544_v51 }
 0x310   :  { %19482 = vst [vmem:[#allocation275_spill] sm:$0xff] %v12513_v18  ;;  %2969 = vmatmul.f32.gmra.mxu3 %v11003_v13  ;;  %v12538_v18 = vshra.s32 %v4293_v5, 3  ;;  %vm19496_vm2 = vcmp.eq.s32.totalorder %v12530_v36, %v11539_v28  ;;  %v19498_v5 = vmov 0 }
 0x311   :  { %19486 = vst [vmem:[#allocation277_spill] sm:$0xff] %v12530_v36  ;;  %v12532_v63 = vpop.f32.mrf.mxu1  ;;  %vm12578_vm5 = vmand %vm19497_vm10, %vm19496_vm2 }
 0x312   :  { %19490 = vst [vmem:[#allocation279_spill] sm:$0xff] %v12538_v18  ;;  %2696 = vmatmul.f32.gmra.mxu2 %v19166_v17  ;;  %v12541_v48 = vpop.f32.mrf.mxu0  ;;  %v19492_v17 = vmov 0  ;;  %vm18543_vm6 = vcmp.eq.s32.totalorder %v12538_v18, %v11539_v28  ;;  %v19499_v5 = vsel %vm12578_vm5, 4294967295, %v19498_v5  ;;  %vm18550_vm2 = vcmp.eq.s32.totalorder %v12538_v18, %v11592_v6 }
 0x313   :  { %v2906_v29 = vpop.f32.mrf.mxu3  ;;  %v19493_v17 = vsel %vm12555_vm7, 4294967295, %v19492_v17  ;;  %vm4501_vm9 = vmand %vm18544_vm0, %vm18543_vm6  ;;  %19500 = vst [vmem:[#allocation283_spill] sm:$0xff] %v19499_v5  ;;  %v4310_v5 = vadd.s32 224, %v11520_v46  ;;  %vm4470_vm6 = vcmp.ne.s32.totalorder %v4309_v4, %v11580_v56 }
 0x314   :  { %2447 = vmatmul.f32.gmra.mxu1 %v11075_v43  ;;  %19494 = vst [vmem:[#allocation281_spill] sm:$0xff] %v19493_v17  ;;  %vm12583_vm12 = vmand %vm4501_vm9, %vm4437_vm11  ;;  %v19501_v17 = vmov 0  ;;  %vm4406_vm11 = vcmp.eq.s32.totalorder %v12530_v36, %v11592_v6  ;;  %v4295_v36 = vadd.s32 104, %v11520_v46 }
 0x315   :  { %v2569_v27 = vpop.f32.mrf.mxu2  ;;  %2294 = vmatmul.f32.gmra.mxu0 %v11003_v13  ;;  %v19502_v17 = vsel %vm12583_vm12, 4294967295, %v19501_v17  ;;  %v12622_v4 = vshra.s32 %v4310_v5, 3 }
 0x316   :  { %v12570_v43 = vadd.f32 %v2902_v45, %v2569_v27  ;;  %19503 = vst [vmem:[#allocation284_spill] sm:$0xff] %v19502_v17  ;;  %v12589_v45 = vpop.trf.xlu2  ;;  %v4294_v17 = vadd.s32 96, %v11520_v46  ;;  %v12707_v62 = vshra.s32 %v4295_v36, 3 }
 0x317   :  { %19504 = vst [vmem:[#allocation285_spill] sm:$0xff] %v12589_v45  ;;  %vm18552_vm10 = vcmp.eq.f32.partialorder %v11335_v42, %v12589_v45  ;;  %vm4272_vm9 = vcmp.eq.f32.partialorder %v11467_v1, %v12589_v45 }
 0x318   :  { %19495 = vst [vmem:[#allocation282_spill] sm:$0xff] %v12570_v43  ;;  %2973 = vmatmul.f32.gmra.mxu3 %v10946_v37  ;;  %vm12613_vm0 = vmand %vm18552_vm10, %vm18550_vm2  ;;  %v12628_v58 = vshra.s32 %v4294_v17, 3 }
 0x319   :  { %v12587_v50 = vpop.f32.mrf.mxu1  ;;  %v19506_v2 = vsel %vm12613_vm0, 4294967295, %v19505_v2  ;;  %vm4534_vm5 = vmand %vm4272_vm9, %vm4406_vm11  ;;  %19509 = vst [vmem:[#allocation288_spill] sm:$0xff] %v12622_v4 }
 0x31a   :  { %2704 = vmatmul.f32.gmra.mxu2 %v19169_v38  ;;  %v12592_v27 = vpop.f32.mrf.mxu0  ;;  %19507 = vst [vmem:[#allocation286_spill] sm:$0xff] %v19506_v2  ;;  %vm12624_vm12 = vmand %vm4534_vm5, %vm4470_vm6  ;;  %vm18560_vm5 = vcmp.eq.s32.totalorder %v12622_v4, %v11539_v28  ;;  %v19514_v2 = vmov 0 }
 0x31b   :  { %v2910_v43 = vpop.f32.mrf.mxu3  ;;  %19513 = vst [vmem:[#allocation290_spill] sm:$0xff] %v12628_v58  ;;  %vm4662_vm2 = vmxor %vm4272_vm9, %vm19295_vm13  ;;  %vm18559_vm9 = vcmp.eq.s32.totalorder %v12628_v58, %v11539_v28 }
 0x31c   :  { %2451 = vmatmul.f32.gmra.mxu1 %v11045_v22  ;;  %v19510_v22 = vmov 0  ;;  %vm12646_vm10 = vmand %vm4662_vm2, %vm4406_vm11 }
 0x31d   :  { %v2577_v38 = vpop.f32.mrf.mxu2  ;;  %2298 = vmatmul.f32.gmra.mxu0 %v10946_v37  ;;  %v19511_v22 = vsel %vm12624_vm12, 4294967295, %v19510_v22  ;;  %v19515_v2 = vsel %vm12646_vm10, 4294967295, %v19514_v2  ;;  %vm4439_vm12 = vcmp.ne.s32.totalorder %v4294_v17, %v11526_v40  ;;  %v19517_v17 = vmov 0 }
 0x31e   :  { %v12617_v1 = vadd.f32 %v2906_v29, %v2577_v38  ;;  %19512 = vst [vmem:[#allocation289_spill] sm:$0xff] %v19511_v22  ;;  %v12634_v29 = vpop.trf.xlu1 }
 0x31f   :  { %vm18563_vm6 = vcmp.eq.f32.partialorder %v11477_v15, %v12634_v29  ;;  %19516 = vst [vmem:[#allocation291_spill] sm:$0xff] %v19515_v2  ;;  %vm18565_vm0 = vcmp.eq.f32.partialorder %v11344_v52, %v12634_v29 }
 0x320   :  { %19508 = vst [vmem:[#allocation287_spill] sm:$0xff] %v12617_v1  ;;  %2977 = vmatmul.f32.gmra.mxu3 %v10899_v10  ;;  %vm4503_vm2 = vmand %vm18565_vm0, %vm18559_vm9  ;;  %v19521_v1 = vmov 0  ;;  %vm18570_vm9 = vcmp.eq.s32.totalorder %v12628_v58, %v11592_v6 }
 0x321   :  { %v12631_v45 = vpop.f32.mrf.mxu1  ;;  %vm12669_vm11 = vmand %vm18563_vm6, %vm18560_vm5  ;;  %vm4472_vm6 = vcmp.ne.s32.totalorder %v4310_v5, %v11580_v56 }
 0x322   :  { %2712 = vmatmul.f32.gmra.mxu2 %v19172_v11  ;;  %v12637_v38 = vpop.f32.mrf.mxu0  ;;  %v19518_v17 = vsel %vm12669_vm11, 4294967295, %v19517_v17  ;;  %vm12675_vm4 = vmand %vm4503_vm2, %vm4439_vm12  ;;  %vm18573_vm12 = vcmp.eq.s32.totalorder %v12622_v4, %v11592_v6 }
 0x323   :  { %v2914_v22 = vpop.f32.mrf.mxu3  ;;  %19519 = vst [vmem:[#allocation292_spill] sm:$0xff] %v19518_v17  ;;  %v19522_v1 = vsel %vm12675_vm4, 4294967295, %v19521_v1  ;;  %v4311_v17 = vadd.s32 232, %v11520_v46 }
 0x324   :  { %2455 = vmatmul.f32.gmra.mxu1 %v11003_v13  ;;  %19523 = vst [vmem:[#allocation294_spill] sm:$0xff] %v19522_v1  ;;  %v12679_v13 = vpop.trf.xlu2 }
 0x325   :  { %v2585_v11 = vpop.f32.mrf.mxu2  ;;  %2302 = vmatmul.f32.gmra.mxu0 %v10899_v10  ;;  %19524 = vst [vmem:[#allocation295_spill] sm:$0xff] %v12679_v13  ;;  %vm18572_vm5 = vcmp.eq.f32.partialorder %v11344_v52, %v12679_v13  ;;  %vm4274_vm2 = vcmp.eq.f32.partialorder %v11477_v15, %v12679_v13  ;;  %v19543_v13 = vld [vmem:[#allocation108_spill] sm:$0xff] }
 0x326   :  { %v12673_v2 = vadd.f32 %v2910_v43, %v2585_v11  ;;  %v19525_v11 = vld [vmem:[#allocation112_spill] sm:$0xff]  ;;  %vm12703_vm0 = vmand %vm18572_vm5, %vm18570_vm9 }
 0x327   :  { %v19528_v47 = vsel %vm12703_vm0, 4294967295, %v19527_v47  ;;  %vm4536_vm11 = vmand %vm4274_vm2, %vm18573_vm12  ;;  %vm4441_vm12 = vcmp.ne.s32.totalorder %v4295_v36, %v11526_v40  ;;  %v19547_v36 = vmov 0 }
 0x328   :  { %19520 = vst [vmem:[#allocation293_spill] sm:$0xff] %v12673_v2  ;;  %2981 = vmatmul.f32.gmra.mxu3 %v10858_v26  ;;  %v19526_v2 = vld [vmem:[#allocation164_spill] sm:$0xff]  ;;  %vm12721_vm9 = vmand %vm4536_vm11, %vm4472_vm6  ;;  %vm19544_vm6 = vcmp.eq.s32.totalorder %v12707_v62, %v11539_v28 }
 0x329   :  { %v12688_v43 = vpop.f32.mrf.mxu1  ;;  %19529 = vst [vmem:[#allocation112_spill] sm:$0xff] %v19528_v47  ;;  %vm4664_vm5 = vmxor %vm4274_vm2, %vm19295_vm13 }
 0x32a   :  { %2720 = vmatmul.f32.gmra.mxu2 %v19525_v11  ;;  %v2243_v1 = vpop.f32.mrf.mxu0  ;;  %19530 = vst [vmem:[#allocation164_spill] sm:$0xff] %v12707_v62  ;;  %v19532_v11 = vmov 0 }
 0x32b   :  { %v2244_v0 = vadd.f32 %v2243_v1, %v19526_v2  ;;  %v2918_v7 = vpop.f32.mrf.mxu3  ;;  %v12716_v2 = vshra.s32 %v4311_v17, 3  ;;  %v12718_v1 = vpop.trf.xlu1  ;;  %v19533_v11 = vsel %vm12721_vm9, 4294967295, %v19532_v11  ;;  %vm19539_vm9 = vcmp.eq.s32.totalorder %v12622_v4, %v11592_v6 }
 0x32c   :  { %2459 = vmatmul.f32.gmra.mxu1 %v10946_v37  ;;  %19534 = vst [vmem:[#allocation297_spill] sm:$0xff] %v19533_v11  ;;  %v19536_v37 = vld [vmem:[#allocation146_spill] sm:$0xff]  ;;  %v19538_v11 = vld [vmem:[#allocation169_spill] sm:$0xff]  ;;  %vm12745_vm2 = vmand %vm4664_vm5, %vm19539_vm9 }
 0x32d   :  { %19531 = vst [vmem:[#allocation296_spill] sm:$0xff] %v12716_v2  ;;  %v2593_v5 = vpop.f32.mrf.mxu2  ;;  %2306 = vmatmul.f32.gmra.mxu0 %v10858_v26  ;;  %vm18589_vm0 = vcmp.eq.f32.partialorder %v19536_v37, %v12718_v1  ;;  %vm19545_vm5 = vcmp.eq.s32.totalorder %v12716_v2, %v11539_v28  ;;  %vm19546_vm9 = vcmp.eq.f32.partialorder %v19538_v11, %v12718_v1 }
 0x32e   :  { %v12725_v47 = vadd.f32 %v2914_v22, %v2593_v5  ;;  %v19540_v5 = vmov 0  ;;  %vm4505_vm11 = vmand %vm18589_vm0, %vm19544_vm6  ;;  %vm18599_vm6 = vcmp.eq.s32.totalorder %v12707_v62, %v11592_v6 }
 0x32f   :  { %v19541_v5 = vsel %vm12745_vm2, 4294967295, %v19540_v5  ;;  %vm12765_vm4 = vmand %vm19546_vm9, %vm19545_vm5  ;;  %vm4474_vm9 = vcmp.ne.s32.totalorder %v4311_v17, %v11580_v56 }
 0x330   :  { %19535 = vst [vmem:[#allocation298_spill] sm:$0xff] %v12725_v47  ;;  %2985 = vmatmul.f32.gmra.mxu3 %v19537_v53  ;;  %v19548_v36 = vsel %vm12765_vm4, 4294967295, %v19547_v36  ;;  %vm12772_vm3 = vmand %vm4505_vm11, %vm4441_vm12  ;;  %vm18603_vm12 = vcmp.eq.s32.totalorder %v12716_v2, %v11592_v6 }
 0x331   :  { %v12740_v22 = vpop.f32.mrf.mxu1  ;;  %19542 = vst [vmem:[#allocation299_spill] sm:$0xff] %v19541_v5  ;;  %v19551_v5 = vmov 0 }
 0x332   :  { %2728 = vmatmul.f32.gmra.mxu2 %v19543_v13  ;;  %v12751_v47 = vpop.f32.mrf.mxu0  ;;  %19549 = vst [vmem:[#allocation108_spill] sm:$0xff] %v19548_v36  ;;  %v12769_v13 = vpop.trf.xlu2  ;;  %v19552_v5 = vsel %vm12772_vm3, 4294967295, %v19551_v5  ;;  %v4312_v36 = vadd.s32 240, %v11520_v46 }
 0x333   :  { %v2922_v15 = vpop.f32.mrf.mxu3  ;;  %19550 = vst [vmem:[#allocation300_spill] sm:$0xff] %v12769_v13  ;;  %vm18602_vm5 = vcmp.eq.f32.partialorder %v19536_v37, %v12769_v13  ;;  %vm4276_vm11 = vcmp.eq.f32.partialorder %v19538_v11, %v12769_v13  ;;  %v12816_v41 = vpop.trf.xlu1  ;;  %v19569_v13 = vmov 0 }
 0x334   :  { %2463 = vmatmul.f32.gmra.mxu1 %v10899_v10  ;;  %19553 = vst [vmem:[#allocation301_spill] sm:$0xff] %v19552_v5  ;;  %v19555_v5 = vld [vmem:[#allocation95_spill] sm:$0xff]  ;;  %vm12797_vm0 = vmand %vm18602_vm5, %vm18599_vm6  ;;  %v12814_v17 = vshra.s32 %v4312_v36, 3 }
 0x335   :  { %v2601_v4 = vpop.f32.mrf.mxu2  ;;  %2310 = vmatmul.f32.gmra.mxu0 %v19537_v53  ;;  %vm4538_vm4 = vmand %vm4276_vm11, %vm18603_vm12 }
 0x336   :  { %v12778_v19 = vadd.f32 %v2918_v7, %v2601_v4  ;;  %v19556_v4 = vmov 0  ;;  %19561 = vst [vmem:[#allocation38_spill] sm:$0xff] %v12814_v17  ;;  %vm12818_vm6 = vmand %vm4538_vm4, %vm4474_vm9  ;;  %vm19573_vm9 = vcmp.eq.s32.totalorder %v12814_v17, %v11539_v28 }
 0x337   :  { %v19557_v4 = vsel %vm12797_vm0, 4294967295, %v19556_v4  ;;  %v19563_v23 = vsel %vm12818_vm6, 4294967295, %v19562_v23  ;;  %vm4666_vm5 = vmxor %vm4276_vm11, %vm19295_vm13  ;;  %vm19568_vm6 = vcmp.eq.s32.totalorder %v12716_v2, %v11592_v6  ;;  %vm4443_vm11 = vcmp.ne.s32.totalorder %v4296_v39, %v11526_v40 }
 0x338   :  { %19554 = vst [vmem:[#allocation302_spill] sm:$0xff] %v12778_v19  ;;  %2989 = vmatmul.f32.gmra.mxu3 %v19555_v5  ;;  %v12801_v19 = vshra.s32 %v4296_v39, 3  ;;  %vm12841_vm3 = vmand %vm4666_vm5, %vm19568_vm6  ;;  %v19580_v2 = vmov 0 }
 0x339   :  { %v2404_v7 = vpop.f32.mrf.mxu1  ;;  %19558 = vst [vmem:[#allocation303_spill] sm:$0xff] %v19557_v4  ;;  %v19570_v13 = vsel %vm12841_vm3, 4294967295, %v19569_v13 }
 0x33a   :  { %19559 = vst [vmem:[#allocation304_spill] sm:$0xff] %v12801_v19  ;;  %v12803_v10 = vadd.f32 %v2404_v7, %v2244_v0  ;;  %2736 = vmatmul.f32.gmra.mxu2 %v19560_v30  ;;  %v12806_v33 = vpop.f32.mrf.mxu0  ;;  %vm18616_vm12 = vcmp.eq.s32.totalorder %v12801_v19, %v11539_v28  ;;  %v19565_v0 = vld [vmem:[#allocation147_spill] sm:$0xff]  ;;  %v12865_v39 = vpop.trf.xlu2 }
 0x33b   :  { %v2926_v4 = vpop.f32.mrf.mxu3  ;;  %19564 = vst [vmem:[#allocation305_spill] sm:$0xff] %v19563_v23  ;;  %vm18617_vm0 = vcmp.eq.f32.partialorder %v19565_v0, %v12816_v41  ;;  %v19567_v23 = vld [vmem:[#allocation171_spill] sm:$0xff] }
 0x33c   :  { %2467 = vmatmul.f32.gmra.mxu1 %v10858_v26  ;;  %19571 = vst [vmem:[#allocation307_spill] sm:$0xff] %v19570_v13  ;;  %v19572_v26 = vld [vmem:[#allocation91_spill] sm:$0xff]  ;;  %vm4507_vm4 = vmand %vm18617_vm0, %vm18616_vm12  ;;  %vm19574_vm6 = vcmp.eq.f32.partialorder %v19567_v23, %v12816_v41  ;;  %v19579_v13 = vld [vmem:[#allocation102_spill] sm:$0xff]  ;;  %vm4476_vm12 = vcmp.ne.s32.totalorder %v4312_v36, %v11580_v56  ;;  %v12907_v36 = vpop.trf.xlu1 }
 0x33d   :  { %v2609_v30 = vpop.f32.mrf.mxu2  ;;  %2314 = vmatmul.f32.gmra.mxu0 %v19555_v5  ;;  %vm12861_vm5 = vmand %vm19574_vm6, %vm19573_vm9  ;;  %19578 = vst [vmem:[#allocation309_spill] sm:$0xff] %v12865_v39  ;;  %vm18626_vm9 = vcmp.eq.s32.totalorder %v12801_v19, %v11592_v6  ;;  %vm18627_vm6 = vcmp.eq.f32.partialorder %v19565_v0, %v12865_v39 }
 0x33e   :  { %v12832_v7 = vadd.f32 %v2922_v15, %v2609_v30  ;;  %v19575_v30 = vmov 0  ;;  %vm12870_vm15 = vmand %vm4507_vm4, %vm4443_vm11  ;;  %vm18630_vm4 = vcmp.eq.s32.totalorder %v12814_v17, %v11592_v6  ;;  %vm4278_vm11 = vcmp.eq.f32.partialorder %v19567_v23, %v12865_v39  ;;  %19590 = vst [vmem:[#allocation314_spill] sm:$0xff] %v12907_v36 }
 0x33f   :  { %v19576_v30 = vsel %vm12861_vm5, 4294967295, %v19575_v30  ;;  %v19581_v2 = vsel %vm12870_vm15, 4294967295, %v19580_v2  ;;  %vm12895_vm0 = vmand %vm18627_vm6, %vm18626_vm9  ;;  %v19591_v39 = vmov 0 }
 0x340   :  { %19566 = vst [vmem:[#allocation306_spill] sm:$0xff] %v12832_v7  ;;  %2993 = vmatmul.f32.gmra.mxu3 %v19572_v26  ;;  %vm4540_vm5 = vmand %vm4278_vm11, %vm18630_vm4  ;;  %vm4445_vm4 = vcmp.ne.s32.totalorder %v4297_v32, %v11526_v40 }
 0x341   :  { %v12853_v15 = vpop.f32.mrf.mxu1  ;;  %19577 = vst [vmem:[#allocation308_spill] sm:$0xff] %v19576_v30  ;;  %v4313_v30 = vadd.s32 248, %v11520_v46  ;;  %v19584_v46 = vmov 0  ;;  %vm12911_vm15 = vmand %vm4540_vm5, %vm4476_vm12  ;;  %vm19603_vm5 = vcmp.eq.f32.partialorder %v19596_v3, %v12907_v36 }
 0x342   :  { %2744 = vmatmul.f32.gmra.mxu2 %v19579_v13  ;;  %v12868_v7 = vpop.f32.mrf.mxu0  ;;  %19582 = vst [vmem:[#allocation102_spill] sm:$0xff] %v19581_v2  ;;  %v19585_v46 = vsel %vm12895_vm0, 4294967295, %v19584_v46  ;;  %v19592_v39 = vsel %vm12911_vm15, 4294967295, %v19591_v39  ;;  %vm4668_vm9 = vmxor %vm4278_vm11, %vm19295_vm13  ;;  %vm19598_vm11 = vcmp.eq.s32.totalorder %v12814_v17, %v11592_v6 }
 0x343   :  { %v2930_v11 = vpop.f32.mrf.mxu3  ;;  %19586 = vst [vmem:[#allocation311_spill] sm:$0xff] %v19585_v46  ;;  %vm12932_vm15 = vmand %vm4668_vm9, %vm19598_vm11 }
 0x344   :  { %2471 = vmatmul.f32.gmra.mxu1 %v19537_v53  ;;  %v12899_v53 = vshra.s32 %v4297_v32, 3  ;;  %19593 = vst [vmem:[#allocation315_spill] sm:$0xff] %v19592_v39  ;;  %v19597_v39 = vld [vmem:[#allocation173_spill] sm:$0xff]  ;;  %v12955_v32 = vpop.trf.xlu2 }
 0x345   :  { %v2617_v13 = vpop.f32.mrf.mxu2  ;;  %2318 = vmatmul.f32.gmra.mxu0 %v19572_v26  ;;  %vm19605_vm9 = vcmp.eq.f32.partialorder %v19597_v39, %v12907_v36  ;;  %19609 = vst [vmem:[#allocation319_spill] sm:$0xff] %v12955_v32 }
 0x346   :  { %v12886_v2 = vadd.f32 %v2926_v4, %v2617_v13  ;;  %19587 = vst [vmem:[#allocation312_spill] sm:$0xff] %v12899_v53  ;;  %v12905_v4 = vshra.s32 %v4313_v30, 3  ;;  %vm18640_vm6 = vcmp.eq.s32.totalorder %v12899_v53, %v11539_v28 }
 0x347   :  { %vm4509_vm12 = vmand %vm19603_vm5, %vm18640_vm6  ;;  %vm18644_vm5 = vcmp.eq.s32.totalorder %v12899_v53, %v11592_v6  ;;  %v19637_v53 = vld [vmem:[#allocation175_spill] sm:$0xff] }
 0x348   :  { %19583 = vst [vmem:[#allocation310_spill] sm:$0xff] %v12886_v2  ;;  %2997 = vmatmul.f32.gmra.mxu3 %v19588_v21  ;;  %v19594_v2 = vld [vmem:[#allocation100_spill] sm:$0xff]  ;;  %vm19604_vm0 = vcmp.eq.s32.totalorder %v12905_v4, %v11539_v28  ;;  %vm12958_vm8 = vmand %vm4509_vm12, %vm4445_vm4  ;;  %vm4280_vm4 = vcmp.eq.f32.partialorder %v19597_v39, %v12955_v32  ;;  %vm4478_vm12 = vcmp.ne.s32.totalorder %v4313_v30, %v11580_v56  ;;  %v19620_v56 = vmov 0  ;;  %v19623_v30 = vld [vmem:[#allocation59_spill] sm:$0xff] }
 0x349   :  { %19589 = vst [vmem:[#allocation313_spill] sm:$0xff] %v12905_v4  ;;  %v12909_v13 = vpop.f32.mrf.mxu1  ;;  %vm12951_vm11 = vmand %vm19605_vm9, %vm19604_vm0  ;;  %vm18665_vm0 = vcmp.eq.f32.partialorder %v19596_v3, %v12955_v32  ;;  %vm4414_vm9 = vcmp.eq.s32.totalorder %v12905_v4, %v11592_v6  ;;  %v19631_v39 = vld [vmem:[#allocation174_spill] sm:$0xff] }
 0x34a   :  { %2752 = vmatmul.f32.gmra.mxu2 %v19594_v2  ;;  %v2259_v46 = vpop.f32.mrf.mxu0  ;;  %vm12984_vm6 = vmand %vm18665_vm0, %vm18644_vm5 }
 0x34b   :  { %v12916_v23 = vpop.f32.mrf.mxu3  ;;  %vm4670_vm14 = vmxor %vm4280_vm4, %vm19295_vm13  ;;  %v2260_v6 = vadd.f32 %v2259_v46, %v19633_v60  ;;  %v19639_v60 = vld [vmem:[#allocation168_spill] sm:$0xff] }
 0x34c   :  { %19595 = vst [vmem:[#allocation100_spill] sm:$0xff] %v12916_v23  ;;  %2475 = vmatmul.f32.gmra.mxu1 %v19555_v5  ;;  %v19599_v23 = vmov 0  ;;  %v19606_v5 = vmov 0  ;;  %vm13003_vm5 = vmand %vm4670_vm14, %vm4414_vm9  ;;  %v2252_v46 = vadd.f32 %v12806_v33, %v19639_v60  ;;  %vm19654_vm14 = vcmp.eq.f32.partialorder %v11335_v42, %v12544_v51  ;;  %v19754_v42 = vld [vmem:[#allocation230_spill] sm:$0xff] }
 0x34d   :  { %v2625_v2 = vpop.f32.mrf.mxu2  ;;  %2322 = vmatmul.f32.gmra.mxu0 %v19588_v21  ;;  %v19600_v23 = vsel %vm12932_vm15, 4294967295, %v19599_v23  ;;  %v19607_v5 = vsel %vm12951_vm11, 4294967295, %v19606_v5  ;;  %vm4542_vm11 = vmand %vm4280_vm4, %vm4414_vm9  ;;  %vm19661_vm9 = vcmp.eq.f32.partialorder %v19565_v0, %v12816_v41 }
 0x34e   :  { %19601 = vst [vmem:[#allocation316_spill] sm:$0xff] %v19600_v23  ;;  %v12937_v54 = vadd.f32 %v2930_v11, %v2625_v2  ;;  %v19610_v11 = vld [vmem:[#allocation71_spill] sm:$0xff]  ;;  %v19611_v2 = vmov 0  ;;  %v19614_v23 = vld [vmem:[#allocation46_spill] sm:$0xff]  ;;  %vm13088_vm4 = vmxor %vm19661_vm9, %vm19295_vm13  ;;  %vm19670_vm9 = vcmp.eq.f32.partialorder %v19536_v37, %v12718_v1 }
 0x34f   :  { %19608 = vst [vmem:[#allocation318_spill] sm:$0xff] %v19607_v5  ;;  %v19612_v2 = vsel %vm12958_vm8, 4294967295, %v19611_v2  ;;  %v19617_v5 = vmov 0  ;;  %vm12991_vm8 = vmand %vm4542_vm11, %vm4478_vm12  ;;  %vm19666_vm12 = vcmp.eq.f32.partialorder %v11344_v52, %v12634_v29  ;;  %v19761_v52 = vld [vmem:[#allocation214_spill] sm:$0xff] }
 0x350   :  { %19602 = vst [vmem:[#allocation317_spill] sm:$0xff] %v12937_v54  ;;  %3001 = vmatmul.f32.gmra.mxu3 %v19610_v11  ;;  %v19618_v5 = vsel %vm12984_vm6, 4294967295, %v19617_v5  ;;  %v19621_v56 = vsel %vm12991_vm8, 4294967295, %v19620_v56  ;;  %vm13073_vm11 = vmxor %vm19654_vm14, %vm19295_vm13 }
 0x351   :  { %19613 = vst [vmem:[#allocation320_spill] sm:$0xff] %v19612_v2  ;;  %v2416_v40 = vpop.f32.mrf.mxu1  ;;  %vm13100_vm14 = vmxor %vm19666_vm12, %vm19295_vm13  ;;  %vm19673_vm12 = vcmp.eq.s32.totalorder %v12801_v19, %v11539_v28  ;;  %v19766_v19 = vld [vmem:[#allocation221_spill] sm:$0xff] }
 0x352   :  { %2760 = vmatmul.f32.gmra.mxu2 %v19614_v23  ;;  %v2263_v54 = vpop.f32.mrf.mxu0  ;;  %19619 = vst [vmem:[#allocation322_spill] sm:$0xff] %v19618_v5  ;;  %v19626_v5 = vmov 0  ;;  %vm13112_vm0 = vmxor %vm19670_vm9, %vm19295_vm13  ;;  %vm19675_vm9 = vcmp.eq.s32.totalorder %v12628_v58, %v11539_v28 }
 0x353   :  { %v12967_v17 = vpop.f32.mrf.mxu3  ;;  %19622 = vst [vmem:[#allocation323_spill] sm:$0xff] %v19621_v56  ;;  %v19627_v5 = vsel %vm13003_vm5, 4294967295, %v19626_v5  ;;  %vm4699_vm8 = vmand %vm13088_vm4, %vm19673_vm12  ;;  %vm19680_vm4 = vcmp.eq.s32.totalorder %v12707_v62, %v11539_v28  ;;  %v19760_v62 = vld [vmem:[#allocation135_spill] sm:$0xff] }
 0x354   :  { %19615 = vst [vmem:[#allocation46_spill] sm:$0xff] %v12967_v17  ;;  %2479 = vmatmul.f32.gmra.mxu1 %v19572_v26  ;;  %v19630_v26 = vld [vmem:[#allocation58_spill] sm:$0xff]  ;;  %vm13132_vm6 = vmand %vm13100_vm14, %vm19675_vm9 }
 0x355   :  { %v12975_v23 = vpop.f32.mrf.mxu2  ;;  %2326 = vmatmul.f32.gmra.mxu0 %v19610_v11  ;;  %19628 = vst [vmem:[#allocation324_spill] sm:$0xff] %v19627_v5  ;;  %vm4697_vm14 = vmand %vm13112_vm0, %vm19680_vm4  ;;  %vm19689_vm0 = vcmp.eq.f32.partialorder %v19596_v3, %v12907_v36  ;;  %vm19694_vm4 = vcmp.eq.s32.totalorder %v12538_v18, %v11539_v28  ;;  %v19835_v36 = vld [vmem:[#allocation67_spill] sm:$0xff] }
 0x356   :  { %19616 = vst [vmem:[#allocation321_spill] sm:$0xff] %v12975_v23  ;;  %v19624_v23 = vld [vmem:[#allocation99_spill] sm:$0xff]  ;;  %vm13171_vm9 = vmxor %vm19689_vm0, %vm19295_vm13 }
 0x358   :  { %3005 = vmatmul.f32.gmra.mxu3 %v19623_v30 }
 0x359   :  { %v2420_v2 = vpop.f32.mrf.mxu1 }
 0x35a   :  { %2768 = vmatmul.f32.gmra.mxu2 %v19624_v23  ;;  %v2267_v32 = vpop.f32.mrf.mxu0  ;;  %v2264_v23 = vadd.f32 %v2263_v54, %v19631_v39  ;;  %v2421_v5 = vadd.f32 %v2420_v2, %v2260_v6  ;;  %v19640_v6 = vld [vmem:[#allocation90_spill] sm:$0xff] }
 0x35b   :  { %v12998_v17 = vpop.f32.mrf.mxu3 }
 0x35c   :  { %19625 = vst [vmem:[#allocation99_spill] sm:$0xff] %v12998_v17  ;;  %2483 = vmatmul.f32.gmra.mxu1 %v19588_v21 }
 0x35d   :  { %v13008_v56 = vpop.f32.mrf.mxu2  ;;  %2330 = vmatmul.f32.gmra.mxu0 %v19623_v30 }
 0x35e   :  { %19629 = vst [vmem:[#allocation325_spill] sm:$0xff] %v13008_v56  ;;  %v19636_v56 = vld [vmem:[#allocation170_spill] sm:$0xff] }
 0x35f   :  { %v2256_v25 = vadd.f32 %v12868_v7, %v19636_v56  ;;  %v2413_v7 = vadd.f32 %v12909_v13, %v2252_v46  ;;  %v19646_v56 = vld [vmem:[#allocation75_spill] sm:$0xff]  ;;  %v19648_v13 = vld [vmem:[#allocation162_spill] sm:$0xff] }
 0x360   :  { %3009 = vmatmul.f32.gmra.mxu3 %v19630_v26 }
 0x361   :  { %v2424_v16 = vpop.f32.mrf.mxu1  ;;  %v2417_v39 = vadd.f32 %v2416_v40, %v2256_v25 }
 0x362   :  { %2776 = vmatmul.f32.gmra.mxu2 %v19632_v24  ;;  %v2271_v17 = vpop.f32.mrf.mxu0  ;;  %v2425_v4 = vadd.f32 %v2424_v16, %v2264_v23  ;;  %v2268_v24 = vadd.f32 %v2267_v32, %v19637_v53  ;;  %v3825_v16 = vmax.f32 %v2421_v5, 1e-10 }
 0x363   :  { %v13015_v57 = vpop.f32.mrf.mxu3  ;;  %v3823_v53 = vmax.f32 %v2417_v39, 1e-10 }
 0x364   :  { %19634 = vst [vmem:[#allocation174_spill] sm:$0xff] %v13015_v57  ;;  %2487 = vmatmul.f32.gmra.mxu1 %v19610_v11  ;;  %v3827_v54 = vmax.f32 %v2425_v4, 1e-10  ;;  %v13039_v5 = vmul.f32 10.0, %v3825_v16 }
 0x365   :  { %v13018_v21 = vpop.f32.mrf.mxu2  ;;  %2334 = vmatmul.f32.gmra.mxu0 %v19630_v26  ;;  %v13049_v39 = vmul.f32 10.0, %v3823_v53 }
 0x366   :  { %19635 = vst [vmem:[#allocation93_spill] sm:$0xff] %v13018_v21  ;;  %v19641_v21 = vld [vmem:[#allocation166_spill] sm:$0xff]  ;;  %v13033_v25 = vmul.f32 10.0, %v3827_v54  ;;  %v2240_v54 = vadd.f32 %v12637_v38, %v19648_v13  ;;  %v4783_v46 = vmul.f32 1.442695, %v13039_v5 }
 0x367   :  { %v2248_v11 = vadd.f32 %v12751_v47, %v19641_v21  ;;  %19644 = vst [vmem:[#allocation175_spill] sm:$0xff] %v13039_v5  ;;  %v3821_v21 = vmax.f32 %v2413_v7, 1e-10  ;;  %v4779_v13 = vmul.f32 1.442695, %v13049_v39  ;;  %v19711_v5 = vld [vmem:[#allocation139_spill] sm:$0xff] }
 0x368   :  { %3673 = vmatmul.f32.vlgmr.msra.gmra.mxu3 %v19638_v34  ;;  %19642 = vst [vmem:[#allocation172_spill] sm:$0xff] %v13033_v25  ;;  %v4787_v47 = vmul.f32 1.442695, %v13033_v25  ;;  %v2401_v7 = vadd.f32 %v12740_v22, %v2240_v54 }
 0x369   :  { %v2428_v23 = vpop.f32.mrf.mxu1  ;;  %v2409_v33 = vadd.f32 %v12853_v15, %v2248_v11  ;;  %19649 = vst [vmem:[#allocation90_spill] sm:$0xff] %v13049_v39  ;;  %v13062_v53 = vmul.f32 10.0, %v3821_v21  ;;  %v19712_v39 = vld [vmem:[#allocation250_spill] sm:$0xff] }
 0x36a   :  { %v2429_v57 = vadd.f32 %v2428_v23, %v2268_v24  ;;  %2784 = vmatmul.f32.gmra.mxu2 %v19640_v6  ;;  %v13028_v2 = vpop.f32.mrf.mxu0  ;;  %v19651_v23 = vld [vmem:[#allocation160_spill] sm:$0xff] }
 0x36b   :  { %v13035_v40 = vpop.f32.mrf.mxu3  ;;  %v3819_v11 = vmax.f32 %v2409_v33, 1e-10  ;;  %v2236_v6 = vadd.f32 %v12592_v27, %v19651_v23  ;;  %19652 = vst [vmem:[#allocation166_spill] sm:$0xff] %v13062_v53  ;;  %v4775_v23 = vmul.f32 1.442695, %v13062_v53  ;;  %v19716_v53 = vld [vmem:[#allocation261_spill] sm:$0xff] }
 0x36c   :  { %19643 = vst [vmem:[#allocation170_spill] sm:$0xff] %v13035_v40  ;;  %v3829_v4 = vmax.f32 %v2429_v57, 1e-10  ;;  %2491 = vmatmul.f32.gmra.mxu1 %v19623_v30  ;;  %v19650_v57 = vld [vmem:[#allocation177_spill] sm:$0xff] }
 0x36d   :  { %v13041_v32 = vpop.f32.mrf.mxu2  ;;  %3063 = vmatmul.f32.vlgmr.msra.gmra.mxu0 %v19646_v56  ;;  %v2272_v60 = vadd.f32 %v2271_v17, %v19650_v57  ;;  %v3817_v17 = vmax.f32 %v12803_v10, 1e-10  ;;  %v2397_v56 = vadd.f32 %v12688_v43, %v2236_v6  ;;  %v19657_v10 = vld [vmem:[#allocation158_spill] sm:$0xff]  ;;  %v13079_v21 = vmul.f32 10.0, %v3819_v11  ;;  %v19664_v57 = vld [vmem:[#allocation116_spill] sm:$0xff] }
 0x36e   :  { %19645 = vst [vmem:[#allocation34_spill] sm:$0xff] %v13041_v32  ;;  %v13044_v24 = vmul.f32 10.0, %v3829_v4  ;;  %v2232_v22 = vadd.f32 %v12541_v48, %v19657_v10  ;;  %v19798_v32 = vld [vmem:[#allocation194_spill] sm:$0xff] }
 0x36f   :  { %19658 = vst [vmem:[#allocation162_spill] sm:$0xff] %v13079_v21 }
 0x370   :  { %19647 = vst [vmem:[#allocation168_spill] sm:$0xff] %v13044_v24  ;;  %v4791_v15 = vmul.f32 1.442695, %v13044_v24  ;;  %3677 = vmatmul.f32.gmra.mxu3 %v19210_v35 }
 0x371   :  { %v2432_v16 = vpop.f32.mrf.mxu1 }
 0x372   :  { %8876 = vpow2.f32 %v4791_v15  ;;  %v2433_v4 = vadd.f32 %v2432_v16, %v2272_v60  ;;  %3512 = vmatmul.f32.vlgmr.msra.gmra.mxu2 %v19638_v34  ;;  %v13059_v38 = vpop.f32.mrf.mxu0  ;;  %v2228_v60 = vadd.f32 %v12493_v8, %v19664_v57  ;;  %v3815_v15 = vmax.f32 %v2401_v7, 1e-10 }
 0x373   :  { %8878 = vpow2.f32 %v4787_v47  ;;  %v13064_v33 = vpop.f32.mrf.mxu3  ;;  %v19660_v47 = vld [vmem:[#allocation77_spill] sm:$0xff]  ;;  %v13105_v16 = vmul.f32 10.0, %v3817_v17  ;;  %v4771_v17 = vmul.f32 1.442695, %v13079_v21 }
 0x374   :  { %19653 = vst [vmem:[#allocation75_spill] sm:$0xff] %v13064_v33  ;;  %v3831_v27 = vmax.f32 %v2433_v4, 1e-10  ;;  %2495 = vmatmul.f32.gmra.mxu1 %v19630_v26  ;;  %8880 = vpow2.f32 %v4783_v46  ;;  %v2393_v46 = vadd.f32 %v12631_v45, %v2232_v22  ;;  %v2389_v7 = vadd.f32 %v12587_v50, %v2228_v60  ;;  %v19681_v60 = vld [vmem:[#allocation123_spill] sm:$0xff]  ;;  %v19742_v33 = vld [vmem:[#allocation240_spill] sm:$0xff] }
 0x375   :  { %v13081_v43 = vpop.f32.mrf.mxu2  ;;  %3068 = vmatmul.f32.gmra.mxu0 %v19660_v47  ;;  %19669 = vst [vmem:[#allocation158_spill] sm:$0xff] %v13105_v16  ;;  %v3813_v4 = vmax.f32 %v2397_v56, 1e-10  ;;  %8882 = vpow2.f32 %v4779_v13  ;;  %v19678_v56 = vld [vmem:[#allocation119_spill] sm:$0xff]  ;;  %v13138_v22 = vmul.f32 10.0, %v3815_v15  ;;  %v2220_v11 = vadd.f32 %v12378_v14, %v19681_v60  ;;  %v19687_v14 = vld [vmem:[#allocation78_spill] sm:$0xff] }
 0x376   :  { %19659 = vst [vmem:[#allocation177_spill] sm:$0xff] %v13081_v43  ;;  %v13094_v48 = vmul.f32 10.0, %v3831_v27  ;;  %v2224_v13 = vadd.f32 %v12431_v55, %v19678_v56  ;;  %v4767_v55 = vmul.f32 1.442695, %v13105_v16  ;;  %v3809_v8 = vmax.f32 %v2389_v7, 1e-10 }
 0x377   :  { %19679 = vst [vmem:[#allocation116_spill] sm:$0xff] %v13138_v22  ;;  %v19688_v56 = vld [vmem:[#allocation153_spill] sm:$0xff]  ;;  %v19803_v26 = vld [vmem:[#allocation132_spill] sm:$0xff] }
 0x378   :  { %19665 = vst [vmem:[#allocation160_spill] sm:$0xff] %v13094_v48  ;;  %v8877_v6 = vpop.eup %8876  ;;  %v4795_v27 = vmul.f32 1.442695, %v13094_v48  ;;  %3681 = vmatmul.f32.gmra.mxu3 %v19218_v59  ;;  %v3811_v48 = vmax.f32 %v2393_v46, 1e-10  ;;  %v13213_v25 = vmul.f32 10.0, %v3809_v8 }
 0x379   :  { %v8879_v45 = vpop.eup %8878  ;;  %v13125_v10 = vpop.f32.mrf.mxu1  ;;  %v4891_v54 = vsel %vm4699_vm8, %v8877_v6, 0.0  ;;  %vm19683_vm8 = vcmp.eq.f32.partialorder %v11338_v20, %v12453_v61  ;;  %v2385_v6 = vadd.f32 %v12532_v63, %v2224_v13  ;;  %v19693_v63 = vld [vmem:[#allocation73_spill] sm:$0xff] }
 0x37a   :  { %19674 = vst [vmem:[#allocation77_spill] sm:$0xff] %v13125_v10  ;;  %8884 = vpow2.f32 %v4795_v27  ;;  %3516 = vmatmul.f32.gmra.mxu2 %v19210_v35  ;;  %v13141_v47 = vpop.f32.mrf.mxu0  ;;  %v8881_v57 = vpop.eup %8880  ;;  %vm13157_vm12 = vmxor %vm19683_vm8, %vm19295_vm13  ;;  %v13162_v27 = vmul.f32 10.0, %v3813_v4  ;;  %v4889_v46 = vsel %vm4697_vm14, %v8879_v45, 0.0  ;;  %v13178_v7 = vand.u32 4294901760, %v4891_v54  ;;  %v19728_v43 = vld [vmem:[#allocation85_spill] sm:$0xff] }
 0x37b   :  { %8886 = vpow2.f32 %v4775_v23  ;;  %v13151_v15 = vpop.f32.mrf.mxu3  ;;  %v2216_v23 = vadd.f32 %v12319_v31, %v19688_v56  ;;  %v8883_v4 = vpop.eup %8882  ;;  %vm13185_vm14 = vmand %vm13073_vm11, %vm19694_vm4  ;;  %v2381_v45 = vadd.f32 %v12480_v12, %v2220_v11  ;;  %v4887_v13 = vsel %vm13132_vm6, %v8881_v57, 0.0  ;;  %v19701_v11 = vld [vmem:[#allocation150_spill] sm:$0xff]  ;;  %v19703_v57 = vld [vmem:[#allocation312_spill] sm:$0xff]  ;;  %19705 = vst [vmem:[#allocation73_spill] sm:$0xff] %v13213_v25 }
 0x37c   :  { %19682 = vst [vmem:[#allocation119_spill] sm:$0xff] %v13151_v15  ;;  %3257 = vmatmul.f32.vlgmr.msra.gmra.mxu1 %v19687_v14  ;;  %8888 = vpow2.f32 %v4771_v17  ;;  %v4763_v17 = vmul.f32 1.442695, %v13138_v22  ;;  %vm19697_vm8 = vcmp.eq.f32.partialorder %v11327_v49, %v12356_v44  ;;  %v13202_v56 = vmul.f32 10.0, %v3811_v48  ;;  %v19702_v22 = vld [vmem:[#allocation23_spill] sm:$0xff]  ;;  %v19706_v48 = vld [vmem:[#allocation20_spill] sm:$0xff] }
 0x37d   :  { %19686 = vst [vmem:[#allocation123_spill] sm:$0xff] %v13162_v27  ;;  %v13175_v16 = vpop.f32.mrf.mxu2  ;;  %3073 = vmatmul.f32.gmra.mxu0 %v19693_v63  ;;  %vm13197_vm0 = vmxor %vm19697_vm8, %vm19295_vm13  ;;  %v2377_v34 = vadd.f32 %v12418_v9, %v2216_v23  ;;  %8890 = vpow2.f32 %v4767_v55  ;;  %v13204_v63 = vand.u32 4294901760, %v4889_v46  ;;  %v2212_v50 = vadd.f32 %v19702_v22, %v19701_v11  ;;  %v19707_v23 = vld [vmem:[#allocation268_spill] sm:$0xff] }
 0x37e   :  { %19692 = vst [vmem:[#allocation78_spill] sm:$0xff] %v13175_v16  ;;  %vm19704_vm6 = vcmp.eq.s32.totalorder %v19703_v57, %v11539_v28  ;;  %v3807_v24 = vmax.f32 %v2385_v6, 1e-10  ;;  %v4759_v9 = vmul.f32 1.442695, %v13162_v27  ;;  %vm19708_vm4 = vcmp.eq.s32.totalorder %v19707_v23, %v11539_v28 }
 0x37f   :  { %19700 = vst [vmem:[#allocation153_spill] sm:$0xff] %v13202_v56  ;;  %vm4701_vm11 = vmand %vm13171_vm9, %vm19704_vm6  ;;  %v13229_v6 = vsub.f32 %v4891_v54, %v13178_v7  ;;  %v13231_v8 = vand.u32 4294901760, %v4887_v13  ;;  %v4885_v27 = vsel %vm13185_vm14, %v8883_v4, 0.0  ;;  %vm19713_vm9 = vcmp.eq.f32.partialorder %v19711_v5, %v19712_v39  ;;  %v19717_v4 = vld [vmem:[#allocation258_spill] sm:$0xff]  ;;  %v19826_v39 = vld [vmem:[#allocation16_spill] sm:$0xff] }
 0x380   :  { %v8885_v12 = vpop.eup %8884  ;;  %3685 = vmatmul.f32.gmra.mxu3 %v19706_v48  ;;  %vm13222_vm8 = vmand %vm13157_vm12, %vm19708_vm4  ;;  %v2373_v21 = vadd.f32 %v19716_v53, %v2212_v50  ;;  %v3805_v15 = vmax.f32 %v2381_v45, 1e-10  ;;  %8892 = vpow2.f32 %v4763_v17  ;;  %vm19718_vm12 = vcmp.eq.s32.totalorder %v19717_v4, %v11539_v28  ;;  %v19723_v50 = vld [vmem:[#allocation29_spill] sm:$0xff]  ;;  %v19734_v5 = vld [vmem:[#allocation70_spill] sm:$0xff] }
 0x381   :  { %v8887_v55 = vpop.eup %8886  ;;  %v13226_v11 = vpop.f32.mrf.mxu1  ;;  %v4893_v60 = vsel %vm4701_vm11, %v8885_v12, 0.0  ;;  %vm13239_vm6 = vmxor %vm19713_vm9, %vm19295_vm13  ;;  %v3803_v16 = vmax.f32 %v2377_v34, 1e-10  ;;  %v4755_v53 = vmul.f32 1.442695, %v13202_v56  ;;  %v13260_v45 = vsub.f32 %v4889_v46, %v13204_v63  ;;  %v19729_v4 = vld [vmem:[#allocation249_spill] sm:$0xff] }
 0x382   :  { %v13244_v12 = vand.u32 4294901760, %v4893_v60  ;;  %3520 = vmatmul.f32.gmra.mxu2 %v19218_v59  ;;  %v13247_v54 = vpop.f32.mrf.mxu0  ;;  %v8889_v31 = vpop.eup %8888  ;;  %vm13254_vm14 = vmand %vm13197_vm0, %vm19718_vm12  ;;  %v19722_v59 = vld [vmem:[#allocation140_spill] sm:$0xff]  ;;  %v13272_v14 = vmul.f32 10.0, %v3807_v24  ;;  %v13279_v46 = vand.u32 4294901760, %v4885_v27  ;;  %v4883_v56 = vsel %vm13222_vm8, %v8887_v55, 0.0  ;;  %v19773_v24 = vld [vmem:[#allocation69_spill] sm:$0xff] }
 0x383   :  { %v13262_v17 = vpop.f32.mrf.mxu3  ;;  %vm19724_vm11 = vcmp.eq.f32.partialorder %v19722_v59, %v19723_v50  ;;  %vm19730_vm0 = vcmp.eq.s32.totalorder %v19729_v4, %v11539_v28  ;;  %8894 = vpow2.f32 %v4759_v9  ;;  %v13298_v55 = vsub.f32 %v4887_v13, %v13231_v8  ;;  %v19792_v59 = vld [vmem:[#allocation183_spill] sm:$0xff] }
 0x384   :  { %19721 = vst [vmem:[#allocation150_spill] sm:$0xff] %v13262_v17  ;;  %vm13268_vm4 = vmxor %vm19724_vm11, %vm19295_vm13  ;;  %3263 = vmatmul.f32.gmra.mxu1 %v19728_v43  ;;  %4928 = vmatpush.msrb.mxu0 %v13244_v12  ;;  %v13277_v34 = vsub.f32 %v4893_v60, %v13244_v12  ;;  %v8891_v17 = vpop.eup %8890  ;;  %v4751_v43 = vmul.f32 1.442695, %v13213_v25  ;;  %v3801_v4 = vmax.f32 %v2373_v21, 1e-10  ;;  %v13301_v35 = vmul.f32 10.0, %v3805_v15 }
 0x385   :  { %19727 = vst [vmem:[#allocation23_spill] sm:$0xff] %v13272_v14  ;;  %vm13288_vm9 = vmand %vm13239_vm6, %vm19730_vm0  ;;  %5116 = vmatpush.msrb.mxu3 %v13244_v12  ;;  %v13294_v60 = vpop.f32.mrf.mxu2  ;;  %3078 = vmatmul.f32.gmra.mxu0 %v19734_v5  ;;  %v4881_v25 = vsel %vm13254_vm14, %v8889_v31, 0.0  ;;  %v19737_v5 = vld [vmem:[#allocation231_spill] sm:$0xff]  ;;  %v13316_v21 = vmul.f32 10.0, %v3803_v16  ;;  %8896 = vpow2.f32 %v4755_v53  ;;  %v13319_v15 = vand.u32 4294901760, %v4883_v56 }
 0x386   :  { %19733 = vst [vmem:[#allocation20_spill] sm:$0xff] %v13294_v60  ;;  %4930 = vmatpush.msrb.mxu0 %v13178_v7  ;;  %5065 = vmatpush.msrb.mxu2 %v13277_v34  ;;  %v19736_v60 = vld [vmem:[#allocation138_spill] sm:$0xff]  ;;  %v8893_v9 = vpop.eup %8892  ;;  %vm19743_vm12 = vcmp.eq.s32.totalorder %v19742_v33, %v11539_v28  ;;  %v4747_v16 = vmul.f32 1.442695, %v13272_v14  ;;  %v19746_v53 = vand.u32 4294901760, %v13277_v34  ;;  %v13338_v23 = vsub.f32 %v4885_v27, %v13279_v46  ;;  %v19749_v27 = vld [vmem:[#allocation223_spill] sm:$0xff] }
 0x387   :  { %19735 = vst [vmem:[#allocation261_spill] sm:$0xff] %v13301_v35  ;;  %vm19738_vm8 = vcmp.eq.f32.partialorder %v19736_v60, %v19737_v5  ;;  %5118 = vmatpush.msrb.mxu3 %v13178_v7  ;;  %vm13327_vm14 = vmand %vm13268_vm4, %vm19743_vm12  ;;  %v4879_v40 = vsel %vm13288_vm9, %v8891_v17, 0.0  ;;  %8898 = vpow2.f32 %v4751_v43  ;;  %v19747_v14 = vand.u32 4294901760, %v13229_v6 }
 0x388   :  { %vm13312_vm6 = vmxor %vm19738_vm8, %vm19295_vm13  ;;  %19741 = vst [vmem:[#allocation85_spill] sm:$0xff] %v13316_v21  ;;  %4932 = vmatpush.msrb.mxu0 %v13204_v63  ;;  %5068 = vmatpush.msrb.mxu2 %v13229_v6  ;;  %v4966_v22 = vsub.f32 %v13277_v34, %v19746_v53  ;;  %v13348_v18 = vand.u32 4294901760, %v4881_v25  ;;  %v19748_v53 = vld [vmem:[#allocation137_spill] sm:$0xff]  ;;  %v13359_v17 = vmul.f32 10.0, %v3801_v4  ;;  %v4743_v43 = vmul.f32 1.442695, %v13301_v35 }
 0x389   :  { %5120 = vmatpush.msrb.mxu3 %v13204_v63  ;;  %v13343_v33 = vpop.f32.mrf.mxu1  ;;  %v4972_v49 = vsub.f32 %v13229_v6, %v19747_v14  ;;  %vm19750_vm11 = vcmp.eq.f32.partialorder %v19748_v53, %v19749_v27  ;;  %v8895_v20 = vpop.eup %8894  ;;  %vm19755_vm0 = vcmp.eq.s32.totalorder %v19754_v42, %v11539_v28  ;;  %v19758_v4 = vand.u32 4294901760, %v13260_v45  ;;  %v19836_v27 = vld [vmem:[#allocation15_spill] sm:$0xff] }
 0x38a   :  { %vm13355_vm4 = vmxor %vm19750_vm11, %vm19295_vm13  ;;  %19753 = vst [vmem:[#allocation70_spill] sm:$0xff] %v13359_v17  ;;  %4934 = vmatpush.msrb.mxu0 %v13231_v8  ;;  %5071 = vmatpush.msrb.mxu2 %v13260_v45  ;;  %v4967_v14 = vand.u32 4294901760, %v4966_v22  ;;  %v13364_v58 = vpop.f32.mrf.mxu0  ;;  %v13381_v35 = vsub.f32 %v4883_v56, %v13319_v15  ;;  %v13383_v60 = vand.u32 4294901760, %v4879_v40  ;;  %v4877_v13 = vsel %vm13327_vm14, %v8893_v9, 0.0  ;;  %v19765_v56 = vld [vmem:[#allocation81_spill] sm:$0xff] }
 0x38b   :  { %vm13371_vm9 = vmand %vm13312_vm6, %vm19755_vm0  ;;  %5122 = vmatpush.msrb.mxu3 %v13231_v8  ;;  %3524 = vmatmul.f32.gmra.mxu2 %v19706_v48  ;;  %v4978_v22 = vsub.f32 %v13260_v45, %v19758_v4  ;;  %v13387_v42 = vpop.f32.mrf.mxu3  ;;  %vm19762_vm8 = vcmp.eq.f32.partialorder %v19760_v62, %v19761_v52  ;;  %v4739_v4 = vmul.f32 1.442695, %v13316_v21  ;;  %8900 = vpow2.f32 %v4747_v16  ;;  %v8897_v9 = vpop.eup %8896  ;;  %v19817_v52 = vld [vmem:[#allocation178_spill] sm:$0xff] }
 0x38c   :  { %19759 = vst [vmem:[#allocation326_spill] sm:$0xff] %v13387_v42  ;;  %vm13393_vm6 = vmxor %vm19762_vm8, %vm19295_vm13  ;;  %3269 = vmatmul.f32.gmra.mxu1 %v19765_v56  ;;  %4936 = vmatpush.msrb.mxu0 %v13279_v46  ;;  %vm19767_vm12 = vcmp.eq.s32.totalorder %v19766_v19, %v11539_v28  ;;  %v4973_v16 = vand.u32 4294901760, %v4972_v49  ;;  %v19771_v56 = vand.u32 4294901760, %v13298_v55  ;;  %v13417_v62 = vsub.f32 %v4881_v25, %v13348_v18  ;;  %v19772_v19 = vld [vmem:[#allocation133_spill] sm:$0xff] }
 0x38d   :  { %vm13406_vm14 = vmand %vm13355_vm4, %vm19767_vm12  ;;  %4968 = vmatpush.msrb.mxu1 %v4967_v14  ;;  %5074 = vmatpush.msrb.mxu2 %v13298_v55  ;;  %v13411_v21 = vpop.f32.mrf.mxu2  ;;  %vm19774_vm11 = vcmp.eq.f32.partialorder %v19772_v19, %v19773_v24  ;;  %v4735_v14 = vmul.f32 1.442695, %v13359_v17  ;;  %8902 = vpow2.f32 %v4743_v43  ;;  %v13430_v49 = vand.u32 4294901760, %v4877_v13  ;;  %v19804_v19 = vld [vmem:[#allocation24_spill] sm:$0xff]  ;;  %v19812_v24 = vld [vmem:[#allocation182_spill] sm:$0xff] }
 0x38e   :  { %19770 = vst [vmem:[#allocation81_spill] sm:$0xff] %v13411_v21  ;;  %v4984_v31 = vsub.f32 %v13298_v55, %v19771_v56  ;;  %vm13423_vm4 = vmxor %vm19774_vm11, %vm19295_vm13  ;;  %5124 = vmatpush.msrb.mxu3 %v13279_v46  ;;  %4938 = vmatpush.msrb.mxu0 %v13319_v15  ;;  %v4875_v25 = vsel %vm13371_vm9, %v8895_v20, 0.0  ;;  %v8899_v56 = vpop.eup %8898  ;;  %v19777_v21 = vld [vmem:[#allocation213_spill] sm:$0xff]  ;;  %v4979_v43 = vand.u32 4294901760, %v4978_v22  ;;  %v13445_v17 = vsub.f32 %v4879_v40, %v13383_v60  ;;  %v19783_v22 = vld [vmem:[#allocation195_spill] sm:$0xff] }
 0x38f   :  { %vm19778_vm0 = vcmp.eq.s32.totalorder %v19777_v21, %v11539_v28  ;;  %4974 = vmatpush.msrb.mxu1 %v4973_v16  ;;  %5077 = vmatpush.msrb.mxu2 %v13338_v23  ;;  %8904 = vpow2.f32 %v4739_v4  ;;  %v19781_v20 = vand.u32 4294901760, %v13338_v23  ;;  %v4873_v16 = vsel %vm13406_vm14, %v8897_v9, 0.0  ;;  %v19782_v21 = vld [vmem:[#allocation134_spill] sm:$0xff]  ;;  %v19787_v9 = vld [vmem:[#allocation204_spill] sm:$0xff]  ;;  %v19809_v40 = vld [vmem:[#allocation17_spill] sm:$0xff] }
 0x390   :  { %vm13439_vm8 = vmand %vm13393_vm6, %vm19778_vm0  ;;  %5126 = vmatpush.msrb.mxu3 %v13319_v15  ;;  %4940 = vmatpush.msrb.mxu0 %v13348_v18  ;;  %vm19784_vm9 = vcmp.eq.f32.partialorder %v19782_v21, %v19783_v22  ;;  %v4985_v53 = vand.u32 4294901760, %v4984_v31  ;;  %v13466_v37 = vand.u32 4294901760, %v4875_v25  ;;  %vm19788_vm12 = vcmp.eq.s32.totalorder %v19787_v9, %v11539_v28  ;;  %v19791_v9 = vld [vmem:[#allocation136_spill] sm:$0xff] }
 0x391   :  { %v4990_v48 = vsub.f32 %v13338_v23, %v19781_v20  ;;  %vm13459_vm6 = vmxor %vm19784_vm9, %vm19295_vm13  ;;  %4980 = vmatpush.msrb.mxu1 %v4979_v43  ;;  %5080 = vmatpush.msrb.mxu2 %v13381_v35  ;;  %v13464_v4 = vpop.f32.mrf.mxu1  ;;  %v8901_v42 = vpop.eup %8900  ;;  %8906 = vpow2.f32 %v4735_v14  ;;  %v13481_v31 = vsub.f32 %v4877_v13, %v13430_v49  ;;  %v4871_v20 = vsel %vm13439_vm8, %v8899_v56, 0.0 }
 0x392   :  { %vm13474_vm14 = vmand %vm13423_vm4, %vm19788_vm12  ;;  %5128 = vmatpush.msrb.mxu3 %v13348_v18  ;;  %4942 = vmatpush.msrb.mxu0 %v13383_v60  ;;  %v13483_v43 = vpop.f32.mrf.mxu0  ;;  %vm19793_vm11 = vcmp.eq.f32.partialorder %v19791_v9, %v19792_v59  ;;  %v19796_v14 = vand.u32 4294901760, %v13381_v35  ;;  %v13499_v0 = vand.u32 4294901760, %v4873_v16  ;;  %vm19799_vm0 = vcmp.eq.s32.totalorder %v19798_v32, %v11539_v28  ;;  %v19802_v9 = vld [vmem:[#allocation66_spill] sm:$0xff] }
 0x393   :  { %vm13491_vm4 = vmxor %vm19793_vm11, %vm19295_vm13  ;;  %4986 = vmatpush.msrb.mxu1 %v4985_v53  ;;  %5083 = vmatpush.msrb.mxu2 %v13417_v62  ;;  %v13502_v56 = vpop.f32.mrf.mxu3  ;;  %v8903_v3 = vpop.eup %8902  ;;  %vm19805_vm9 = vcmp.eq.f32.partialorder %v19803_v26, %v19804_v19  ;;  %v19808_v32 = vld [vmem:[#allocation74_spill] sm:$0xff]  ;;  %v19810_v30 = vand.u32 4294901760, %v13417_v62  ;;  %v13529_v22 = vsub.f32 %v4875_v25, %v13466_v37  ;;  %v4869_v26 = vsel %vm13474_vm14, %v8901_v42, 0.0 }
 0x394   :  { %v4996_v13 = vsub.f32 %v13381_v35, %v19796_v14  ;;  %19797 = vst [vmem:[#allocation327_spill] sm:$0xff] %v13502_v56  ;;  %vm13509_vm8 = vmand %vm13459_vm6, %vm19799_vm0  ;;  %5130 = vmatpush.msrb.mxu3 %v13383_v60  ;;  %3083 = vmatmul.f32.gmra.mxu0 %v19802_v9  ;;  %v4991_v14 = vand.u32 4294901760, %v4990_v48  ;;  %v13533_v9 = vand.u32 4294901760, %v4871_v20  ;;  %vm19813_vm6 = vcmp.eq.s32.totalorder %v19812_v24, %v11539_v28  ;;  %v19824_v56 = vld [vmem:[#allocation63_spill] sm:$0xff] }
 0x395   :  { %vm13519_vm12 = vmxor %vm19805_vm9, %vm19295_vm13  ;;  %3275 = vmatmul.f32.gmra.mxu1 %v19808_v32  ;;  %3689 = vmatmul.f32.gmra.mxu3 %v19809_v40  ;;  %v5002_v59 = vsub.f32 %v13417_v62, %v19810_v30  ;;  %v13531_v48 = vpop.f32.mrf.mxu2  ;;  %v8905_v19 = vpop.eup %8904  ;;  %v18699_v30 = vand.u32 4294901760, %v13481_v31  ;;  %v19816_v25 = vand.u32 4294901760, %v13445_v17  ;;  %v13554_v57 = vsub.f32 %v4873_v16, %v13499_v0 }
 0x396   :  { %19811 = vst [vmem:[#allocation66_spill] sm:$0xff] %v13531_v48  ;;  %vm13542_vm11 = vmand %vm13491_vm4, %vm19813_vm6  ;;  %4944 = vmatpush.msrb.mxu0 %v13430_v49  ;;  %4992 = vmatpush.msrb.mxu1 %v4991_v14  ;;  %v4997_v21 = vand.u32 4294901760, %v4996_v13  ;;  %v4867_v48 = vsel %vm13509_vm8, %v8903_v3, 0.0  ;;  %vm19818_vm14 = vcmp.eq.s32.totalorder %v19817_v52, %v11539_v28  ;;  %v13569_v13 = vand.u32 4294901760, %v4869_v26 }
 0x397   :  { %5086 = vmatpush.msrb.mxu2 %v13445_v17  ;;  %5132 = vmatpush.msrb.mxu3 %v13430_v49  ;;  %v5008_v42 = vsub.f32 %v13445_v17, %v19816_v25  ;;  %v8907_v24 = vpop.eup %8906  ;;  %vm13563_vm4 = vmand %vm13519_vm12, %vm19818_vm14  ;;  %v5003_v3 = vand.u32 4294901760, %v5002_v59  ;;  %v13575_v53 = vsub.f32 %v4871_v20, %v13533_v9  ;;  %v4865_v25 = vsel %vm13542_vm11, %v8905_v19, 0.0 }
 0x398   :  { %3528 = vmatmul.f32.gmra.mxu2 %v19809_v40  ;;  %4946 = vmatpush.msrb.mxu0 %v13466_v37  ;;  %v5014_v40 = vsub.f32 %v13481_v31, %v18699_v30  ;;  %v4863_v19 = vsel %vm13563_vm4, %v8907_v24, 0.0  ;;  %v13598_v30 = vsub.f32 %v4869_v26, %v13569_v13  ;;  %v13600_v52 = vand.u32 4294901760, %v4865_v25 }
 0x399   :  { %4998 = vmatpush.msrb.mxu1 %v4997_v21  ;;  %5089 = vmatpush.msrb.mxu2 %v13481_v31  ;;  %v13572_v16 = vpop.f32.mrf.mxu1  ;;  %v13585_v21 = vand.u32 4294901760, %v4867_v48  ;;  %v5009_v20 = vand.u32 4294901760, %v5008_v42  ;;  %v19822_v42 = vand.u32 4294901760, %v13529_v22  ;;  %v13614_v50 = vand.u32 4294901760, %v4863_v19 }
 0x39a   :  { %5134 = vmatpush.msrb.mxu3 %v13466_v37  ;;  %4948 = vmatpush.msrb.mxu0 %v13499_v0  ;;  %v13587_v59 = vpop.f32.mrf.mxu0  ;;  %v13623_v24 = vsub.f32 %v4865_v25, %v13600_v52  ;;  %v19843_v51 = vand.u32 4294901760, %v13298_v55  ;;  %v19852_v55 = vand.u32 4294901760, %v13445_v17  ;;  %v19858_v17 = vand.u32 4294901760, %v13529_v22 }
 0x39b   :  { %5004 = vmatpush.msrb.mxu1 %v5003_v3  ;;  %5092 = vmatpush.msrb.mxu2 %v13529_v22  ;;  %v13593_v32 = vpop.f32.mrf.mxu3  ;;  %v5020_v3 = vsub.f32 %v13529_v22, %v19822_v42  ;;  %v13612_v26 = vsub.f32 %v4867_v48, %v13585_v21  ;;  %v19827_v42 = vand.u32 4294901760, %v13554_v57  ;;  %v13636_v25 = vsub.f32 %v4863_v19, %v13614_v50 }
 0x39c   :  { %19821 = vst [vmem:[#allocation74_spill] sm:$0xff] %v13593_v32  ;;  %5136 = vmatpush.msrb.mxu3 %v13499_v0  ;;  %4950 = vmatpush.msrb.mxu0 %v13533_v9  ;;  %v5015_v32 = vand.u32 4294901760, %v5014_v40  ;;  %v18702_v19 = vand.u32 4294901760, %v13623_v24  ;;  %v19862_v22 = vand.u32 4294901760, %v13598_v30 }
 0x39d   :  { %5010 = vmatpush.msrb.mxu1 %v5009_v20  ;;  %5095 = vmatpush.msrb.mxu2 %v13554_v57  ;;  %v13606_v14 = vpop.f32.mrf.mxu2  ;;  %v19825_v20 = vld [vmem:[#allocation68_spill] sm:$0xff]  ;;  %v5021_v48 = vand.u32 4294901760, %v5020_v3  ;;  %v19837_v5 = vand.u32 4294901760, %v13636_v25 }
 0x39e   :  { %19823 = vst [vmem:[#allocation17_spill] sm:$0xff] %v13606_v14  ;;  %5138 = vmatpush.msrb.mxu3 %v13533_v9  ;;  %3088 = vmatmul.f32.gmra.mxu0 %v19824_v56  ;;  %v5026_v14 = vsub.f32 %v13554_v57, %v19827_v42 }
 0x39f   :  { %3281 = vmatmul.f32.gmra.mxu1 %v19825_v20  ;;  %3693 = vmatmul.f32.gmra.mxu3 %v19826_v39  ;;  %v19828_v20 = vand.u32 4294901760, %v13575_v53 }
 0x3a0   :  { %4952 = vmatpush.msrb.mxu0 %v13569_v13  ;;  %5016 = vmatpush.msrb.mxu1 %v5015_v32  ;;  %v5027_v3 = vand.u32 4294901760, %v5026_v14  ;;  %v19832_v14 = vand.u32 4294901760, %v13612_v26 }
 0x3a1   :  { %5098 = vmatpush.msrb.mxu2 %v13575_v53  ;;  %5140 = vmatpush.msrb.mxu3 %v13569_v13  ;;  %v13628_v40 = vpop.f32.mrf.mxu1  ;;  %v5032_v61 = vsub.f32 %v13575_v53, %v19828_v20 }
 0x3a2   :  { %3532 = vmatmul.f32.gmra.mxu2 %v19826_v39  ;;  %4954 = vmatpush.msrb.mxu0 %v13585_v21  ;;  %v13639_v42 = vpop.f32.mrf.mxu0  ;;  %v19830_v39 = vand.u32 4294901760, %v13598_v30 }
 0x3a3   :  { %5022 = vmatpush.msrb.mxu1 %v5021_v48  ;;  %5101 = vmatpush.msrb.mxu2 %v13598_v30  ;;  %v13642_v56 = vpop.f32.mrf.mxu3  ;;  %v5033_v32 = vand.u32 4294901760, %v5032_v61 }
 0x3a4   :  { %19829 = vst [vmem:[#allocation63_spill] sm:$0xff] %v13642_v56  ;;  %5142 = vmatpush.msrb.mxu3 %v13585_v21  ;;  %4956 = vmatpush.msrb.mxu0 %v13600_v52  ;;  %v5038_v20 = vsub.f32 %v13598_v30, %v19830_v39  ;;  %v5044_v56 = vsub.f32 %v13612_v26, %v19832_v14  ;;  %v19870_v30 = vand.u32 4294901760, %v13636_v25 }
 0x3a5   :  { %5028 = vmatpush.msrb.mxu1 %v5027_v3  ;;  %5104 = vmatpush.msrb.mxu2 %v13612_v26  ;;  %v13651_v48 = vpop.f32.mrf.mxu2  ;;  %v19833_v3 = vand.u32 4294901760, %v13277_v34  ;;  %v5050_v39 = vsub.f32 %v13623_v24, %v18702_v19  ;;  %v5056_v34 = vsub.f32 %v13636_v25, %v19837_v5  ;;  %v19839_v19 = vld [vmem:[#allocation222_spill] sm:$0xff] }
 0x3a6   :  { %19831 = vst [vmem:[#allocation68_spill] sm:$0xff] %v13651_v48  ;;  %5144 = vmatpush.msrb.mxu3 %v13600_v52  ;;  %4958 = vmatpush.msrb.mxu0 %v13614_v50  ;;  %v5039_v61 = vand.u32 4294901760, %v5038_v20  ;;  %v19834_v48 = vld [vmem:[#allocation60_spill] sm:$0xff]  ;;  %v19838_v20 = vand.u32 4294901760, %v13229_v6  ;;  %v19844_v6 = vand.u32 4294901760, %v13338_v23  ;;  %v19850_v23 = vand.u32 4294901760, %v13417_v62 }
 0x3a7   :  { %5034 = vmatpush.msrb.mxu1 %v5033_v32  ;;  %5107 = vmatpush.msrb.mxu2 %v13623_v24  ;;  %v5045_v32 = vand.u32 4294901760, %v5044_v56  ;;  %v19841_v56 = vand.u32 4294901760, %v13260_v45  ;;  %v5057_v5 = vand.u32 4294901760, %v5056_v34  ;;  %v19848_v34 = vand.u32 4294901760, %v13381_v35 }
 0x3a8   :  { %5146 = vmatpush.msrb.mxu3 %v13614_v50  ;;  %5154 = vmatpush.msra.mxu0 %v19833_v3  ;;  %v19853_v35 = vand.u32 4294901760, %v13481_v31  ;;  %v19861_v31 = vand.u32 4294901760, %v13575_v53  ;;  %v19867_v53 = vand.u32 4294901760, %v13612_v26  ;;  %v19871_v26 = vld [vmem:[#allocation32_spill] sm:$0xff] }
 0x3a9   :  { %3093 = vmatmul.f32.gmra.mxu0 %v19834_v48  ;;  %3287 = vmatmul.f32.gmra.mxu1 %v19835_v36  ;;  %v13668_v14 = vpop.f32.mrf.mxu1 }
 0x3aa   :  { %3697 = vmatmul.f32.gmra.mxu3 %v19836_v27  ;;  %5040 = vmatpush.msrb.mxu1 %v5039_v61  ;;  %v2307_v3 = vpop.f32.mrf.mxu0  ;;  %v5051_v61 = vand.u32 4294901760, %v5050_v39  ;;  %v19846_v39 = vld [vmem:[#allocation65_spill] sm:$0xff] }
 0x3ab   :  { %5110 = vmatpush.msrb.mxu2 %v13636_v25  ;;  %5158 = vmatpush.msra.mxu0 %v19838_v20  ;;  %v13678_v48 = vadd.f32 %v2307_v3, %v19839_v19  ;;  %v13680_v36 = vpop.f32.mrf.mxu3  ;;  %v19855_v20 = vld [vmem:[#allocation62_spill] sm:$0xff] }
 0x3ac   :  { %19840 = vst [vmem:[#allocation16_spill] sm:$0xff] %v13680_v36  ;;  %3536 = vmatmul.f32.gmra.mxu2 %v19836_v27  ;;  %5046 = vmatpush.msrb.mxu1 %v5045_v32  ;;  %v19845_v27 = vld [vmem:[#allocation54_spill] sm:$0xff]  ;;  %v19847_v32 = vld [vmem:[#allocation13_spill] sm:$0xff] }
 0x3ad   :  { %5162 = vmatpush.msra.mxu0 %v19841_v56  ;;  %v13685_v10 = vpop.f32.mrf.mxu2 }
 0x3ae   :  { %19842 = vst [vmem:[#allocation60_spill] sm:$0xff] %v13685_v10  ;;  %5052 = vmatpush.msrb.mxu1 %v5051_v61  ;;  %v19856_v61 = vld [vmem:[#allocation12_spill] sm:$0xff] }
 0x3af   :  { %5166 = vmatpush.msra.mxu0 %v19843_v51 }
 0x3b0   :  { %5058 = vmatpush.msrb.mxu1 %v5057_v5  ;;  %v19863_v5 = vld [vmem:[#allocation47_spill] sm:$0xff] }
 0x3b1   :  { %5170 = vmatpush.msra.mxu0 %v19844_v6  ;;  %v13692_v19 = vpop.f32.mrf.mxu1  ;;  %3293 = vmatmul.f32.gmra.mxu1 %v19846_v39  ;;  %v19864_v6 = vld [vmem:[#allocation56_spill] sm:$0xff] }
 0x3b2   :  { %5220 = vmatpush.msra.mxu1 %v13244_v12  ;;  %3098 = vmatmul.f32.gmra.mxu0 %v19845_v27  ;;  %v13696_v45 = vpop.f32.mrf.mxu0 }
 0x3b3   :  { %3701 = vmatmul.f32.gmra.mxu3 %v19847_v32  ;;  %5174 = vmatpush.msra.mxu0 %v19848_v34  ;;  %v13701_v51 = vpop.f32.mrf.mxu3  ;;  %v19874_v34 = vld [vmem:[#allocation10_spill] sm:$0xff] }
 0x3b4   :  { %19849 = vst [vmem:[#allocation67_spill] sm:$0xff] %v13701_v51  ;;  %5222 = vmatpush.msra.mxu1 %v13178_v7  ;;  %3540 = vmatmul.f32.gmra.mxu2 %v19847_v32  ;;  %v19854_v7 = vld [vmem:[#allocation52_spill] sm:$0xff]  ;;  %v19873_v32 = vld [vmem:[#allocation53_spill] sm:$0xff] }
 0x3b5   :  { %5178 = vmatpush.msra.mxu0 %v19850_v23  ;;  %v13707_v12 = vpop.f32.mrf.mxu2  ;;  %v19878_v23 = vld [vmem:[#allocation48_spill] sm:$0xff] }
 0x3b6   :  { %19851 = vst [vmem:[#allocation15_spill] sm:$0xff] %v13707_v12  ;;  %5224 = vmatpush.msra.mxu1 %v13204_v63  ;;  %v20051_v51 = vld [vmem:[#allocation148_spill] sm:$0xff] }
 0x3b7   :  { %5182 = vmatpush.msra.mxu0 %v19852_v55  ;;  %v19879_v55 = vld [vmem:[#allocation9_spill] sm:$0xff] }
 0x3b8   :  { %5226 = vmatpush.msra.mxu1 %v13231_v8 }
 0x3b9   :  { %5186 = vmatpush.msra.mxu0 %v19853_v35  ;;  %v13715_v3 = vpop.f32.mrf.mxu1  ;;  %3299 = vmatmul.f32.gmra.mxu1 %v19855_v20  ;;  %v19881_v20 = vld [vmem:[#allocation25_spill] sm:$0xff] }
 0x3ba   :  { %5228 = vmatpush.msra.mxu1 %v13279_v46  ;;  %3103 = vmatmul.f32.gmra.mxu0 %v19854_v7  ;;  %v13719_v62 = vpop.f32.mrf.mxu0  ;;  %v19860_v46 = vand.u32 4294901760, %v13554_v57 }
 0x3bb   :  { %3705 = vmatmul.f32.gmra.mxu3 %v19856_v61  ;;  %v13723_v63 = vpop.f32.mrf.mxu3  ;;  %5190 = vmatpush.msra.mxu0 %v19858_v17 }
 0x3bc   :  { %19857 = vst [vmem:[#allocation222_spill] sm:$0xff] %v13723_v63  ;;  %5230 = vmatpush.msra.mxu1 %v13319_v15  ;;  %3544 = vmatmul.f32.gmra.mxu2 %v19856_v61 }
 0x3bd   :  { %v13729_v8 = vpop.f32.mrf.mxu2  ;;  %5194 = vmatpush.msra.mxu0 %v19860_v46  ;;  %v19886_v46 = vld [vmem:[#allocation246_spill] sm:$0xff] }
 0x3be   :  { %19859 = vst [vmem:[#allocation54_spill] sm:$0xff] %v13729_v8  ;;  %5232 = vmatpush.msra.mxu1 %v13348_v18  ;;  %v19866_v18 = vld [vmem:[#allocation11_spill] sm:$0xff] }
 0x3bf   :  { %5198 = vmatpush.msra.mxu0 %v19861_v31 }
 0x3c0   :  { %5234 = vmatpush.msra.mxu1 %v13383_v60 }
 0x3c1   :  { %v13737_v56 = vpop.f32.mrf.mxu1  ;;  %5202 = vmatpush.msra.mxu0 %v19862_v22  ;;  %3305 = vmatmul.f32.gmra.mxu1 %v19864_v6  ;;  %v19887_v6 = vld [vmem:[#allocation242_spill] sm:$0xff] }
 0x3c2   :  { %5236 = vmatpush.msra.mxu1 %v13430_v49  ;;  %v2319_v15 = vpop.f32.mrf.mxu0  ;;  %3108 = vmatmul.f32.gmra.mxu0 %v19863_v5  ;;  %v19869_v49 = vand.u32 4294901760, %v13623_v24  ;;  %v19876_v24 = vld [vmem:[#allocation28_spill] sm:$0xff] }
 0x3c3   :  { %v13744_v57 = vpop.f32.mrf.mxu3  ;;  %3709 = vmatmul.f32.gmra.mxu3 %v19866_v18  ;;  %5206 = vmatpush.msra.mxu0 %v19867_v53  ;;  %v19888_v53 = vld [vmem:[#allocation22_spill] sm:$0xff] }
 0x3c4   :  { %19865 = vst [vmem:[#allocation65_spill] sm:$0xff] %v13744_v57  ;;  %5238 = vmatpush.msra.mxu1 %v13466_v37  ;;  %3548 = vmatmul.f32.gmra.mxu2 %v19866_v18 }
 0x3c5   :  { %v13751_v60 = vpop.f32.mrf.mxu2  ;;  %5210 = vmatpush.msra.mxu0 %v19869_v49 }
 0x3c6   :  { %19868 = vst [vmem:[#allocation13_spill] sm:$0xff] %v13751_v60  ;;  %5240 = vmatpush.msra.mxu1 %v13499_v0 }
 0x3c7   :  { %5214 = vmatpush.msra.mxu0 %v19870_v30  ;;  %v19889_v30 = vld [vmem:[#allocation30_spill] sm:$0xff] }
 0x3c8   :  { %5242 = vmatpush.msra.mxu1 %v13533_v9 }
 0x3c9   :  { %v2476_v27 = vpop.f32.mrf.mxu1  ;;  %3311 = vmatmul.f32.gmra.mxu1 %v19873_v32  ;;  %v19891_v32 = vld [vmem:[#allocation236_spill] sm:$0xff] }
 0x3ca   :  { %v2323_v39 = vpop.f32.mrf.mxu0  ;;  %5244 = vmatpush.msra.mxu1 %v13569_v13  ;;  %3113 = vmatmul.f32.gmra.mxu0 %v19871_v26  ;;  %v19890_v26 = vld [vmem:[#allocation7_spill] sm:$0xff] }
 0x3cb   :  { %v13761_v37 = vpop.f32.mrf.mxu3  ;;  %3713 = vmatmul.f32.gmra.mxu3 %v19874_v34  ;;  %v2324_v18 = vadd.f32 %v2323_v39, %v19887_v6 }
 0x3cc   :  { %19872 = vst [vmem:[#allocation52_spill] sm:$0xff] %v13761_v37  ;;  %5246 = vmatpush.msra.mxu1 %v13585_v21  ;;  %3552 = vmatmul.f32.gmra.mxu2 %v19874_v34  ;;  %v2320_v34 = vadd.f32 %v2319_v15, %v19891_v32  ;;  %v20076_v37 = vld [vmem:[#allocation124_spill] sm:$0xff] }
 0x3cd   :  { %v13767_v0 = vpop.f32.mrf.mxu2 }
 0x3ce   :  { %19875 = vst [vmem:[#allocation62_spill] sm:$0xff] %v13767_v0  ;;  %5248 = vmatpush.msra.mxu1 %v13600_v52  ;;  %v19882_v52 = vld [vmem:[#allocation36_spill] sm:$0xff] }
 0x3d0   :  { %5250 = vmatpush.msra.mxu1 %v13614_v50  ;;  %v19883_v50 = vld [vmem:[#allocation8_spill] sm:$0xff] }
 0x3d1   :  { %v2480_v9 = vpop.f32.mrf.mxu1  ;;  %3317 = vmatmul.f32.gmra.mxu1 %v19878_v23 }
 0x3d2   :  { %v2327_v13 = vpop.f32.mrf.mxu0  ;;  %3118 = vmatmul.f32.gmra.mxu0 %v19876_v24 }
 0x3d3   :  { %v13772_v25 = vpop.f32.mrf.mxu3  ;;  %3717 = vmatmul.f32.gmra.mxu3 %v19879_v55  ;;  %v2328_v31 = vadd.f32 %v2327_v13, %v19886_v46 }
 0x3d4   :  { %19877 = vst [vmem:[#allocation12_spill] sm:$0xff] %v13772_v25  ;;  %3556 = vmatmul.f32.gmra.mxu2 %v19879_v55  ;;  %v19893_v55 = vld [vmem:[#allocation232_spill] sm:$0xff] }
 0x3d5   :  { %v13777_v21 = vpop.f32.mrf.mxu2  ;;  %v2316_v13 = vadd.f32 %v13719_v62, %v19893_v55  ;;  %v19899_v62 = vld [vmem:[#allocation19_spill] sm:$0xff]  ;;  %v2469_v55 = vadd.f32 %v13715_v3, %v13678_v48  ;;  %v19909_v3 = vld [vmem:[#allocation196_spill] sm:$0xff] }
 0x3d6   :  { %19880 = vst [vmem:[#allocation47_spill] sm:$0xff] %v13777_v21  ;;  %v20077_v21 = vld [vmem:[#allocation110_spill] sm:$0xff] }
 0x3d7   :  { %v2477_v6 = vadd.f32 %v2476_v27, %v2316_v13  ;;  %v19903_v27 = vld [vmem:[#allocation216_spill] sm:$0xff] }
 0x3d9   :  { %v2484_v35 = vpop.f32.mrf.mxu1  ;;  %3323 = vmatmul.f32.gmra.mxu1 %v19882_v52 }
 0x3da   :  { %v2331_v7 = vpop.f32.mrf.mxu0  ;;  %3123 = vmatmul.f32.gmra.mxu0 %v19881_v20  ;;  %v2485_v24 = vadd.f32 %v2484_v35, %v2324_v18  ;;  %v2481_v20 = vadd.f32 %v2480_v9, %v2320_v34  ;;  %v19900_v9 = vld [vmem:[#allocation210_spill] sm:$0xff] }
 0x3db   :  { %3721 = vmatmul.f32.gmra.mxu3 %v19883_v50  ;;  %v13785_v17 = vpop.f32.mrf.mxu3  ;;  %v19902_v34 = vld [vmem:[#allocation6_spill] sm:$0xff] }
 0x3dc   :  { %3560 = vmatmul.f32.gmra.mxu2 %v19883_v50  ;;  %19885 = vst [vmem:[#allocation11_spill] sm:$0xff] %v13785_v17  ;;  %v19895_v50 = vld [vmem:[#allocation253_spill] sm:$0xff] }
 0x3dd   :  { %v13783_v61 = vpop.f32.mrf.mxu2  ;;  %v2332_v46 = vadd.f32 %v2331_v7, %v19895_v50  ;;  %v19901_v7 = vld [vmem:[#allocation27_spill] sm:$0xff] }
 0x3de   :  { %19884 = vst [vmem:[#allocation56_spill] sm:$0xff] %v13783_v61  ;;  %v20068_v61 = vld [vmem:[#allocation24_spill] sm:$0xff] }
 0x3e1   :  { %v2488_v22 = vpop.f32.mrf.mxu1  ;;  %3329 = vmatmul.f32.gmra.mxu1 %v19889_v30 }
 0x3e2   :  { %v2335_v5 = vpop.f32.mrf.mxu0  ;;  %3128 = vmatmul.f32.gmra.mxu0 %v19888_v53  ;;  %v2489_v49 = vadd.f32 %v2488_v22, %v2328_v31  ;;  %v19896_v31 = vld [vmem:[#allocation227_spill] sm:$0xff]  ;;  %v3857_v53 = vmax.f32 %v2485_v24, 1e-10  ;;  %v2304_v24 = vadd.f32 %v13639_v42, %v19903_v27 }
 0x3e3   :  { %3725 = vmatmul.f32.gmra.mxu3 %v19890_v26  ;;  %v13798_v39 = vpop.f32.mrf.mxu3  ;;  %v2312_v22 = vadd.f32 %v13696_v45, %v19896_v31  ;;  %v19916_v27 = vld [vmem:[#allocation191_spill] sm:$0xff] }
 0x3e4   :  { %3564 = vmatmul.f32.gmra.mxu2 %v19890_v26  ;;  %v3859_v52 = vmax.f32 %v2489_v49, 1e-10  ;;  %19894 = vst [vmem:[#allocation53_spill] sm:$0xff] %v13798_v39  ;;  %v3855_v26 = vmax.f32 %v2481_v20, 1e-10  ;;  %v2300_v49 = vadd.f32 %v13587_v59, %v19900_v9  ;;  %v13817_v13 = vmul.f32 10.0, %v3857_v53 }
 0x3e5   :  { %v13794_v23 = vpop.f32.mrf.mxu2  ;;  %v2473_v30 = vadd.f32 %v13737_v56, %v2312_v22  ;;  %v3853_v56 = vmax.f32 %v2477_v6, 1e-10  ;;  %v2465_v31 = vadd.f32 %v13692_v19, %v2304_v24  ;;  %v2288_v6 = vadd.f32 %v13247_v54, %v19909_v3  ;;  %v19910_v53 = vld [vmem:[#allocation200_spill] sm:$0xff] }
 0x3e6   :  { %19892 = vst [vmem:[#allocation32_spill] sm:$0xff] %v13794_v23  ;;  %v13806_v32 = vmul.f32 10.0, %v3859_v52  ;;  %v19906_v52 = vld [vmem:[#allocation206_spill] sm:$0xff]  ;;  %v2461_v50 = vadd.f32 %v13668_v14, %v2300_v49  ;;  %v13828_v22 = vmul.f32 10.0, %v3855_v26  ;;  %v3849_v9 = vmax.f32 %v2469_v55, 1e-10 }
 0x3e7   :  { %19904 = vst [vmem:[#allocation48_spill] sm:$0xff] %v13817_v13  ;;  %v2296_v59 = vadd.f32 %v13483_v43, %v19906_v52  ;;  %v3851_v42 = vmax.f32 %v2473_v30, 1e-10  ;;  %v13838_v49 = vmul.f32 10.0, %v3853_v56  ;;  %v4847_v19 = vmul.f32 1.442695, %v13817_v13 }
 0x3e8   :  { %19898 = vst [vmem:[#allocation28_spill] sm:$0xff] %v13806_v32  ;;  %v4851_v48 = vmul.f32 1.442695, %v13806_v32  ;;  %v3845_v54 = vmax.f32 %v2461_v50, 1e-10  ;;  %v2284_v24 = vadd.f32 %v13141_v47, %v19916_v27  ;;  %v2449_v55 = vadd.f32 %v13464_v4, %v2288_v6  ;;  %v19917_v56 = vld [vmem:[#allocation21_spill] sm:$0xff] }
 0x3e9   :  { %v2492_v15 = vpop.f32.mrf.mxu1  ;;  %3335 = vmatmul.f32.gmra.mxu1 %v19901_v7  ;;  %19908 = vst [vmem:[#allocation36_spill] sm:$0xff] %v13828_v22  ;;  %v2457_v14 = vadd.f32 %v13628_v40, %v2296_v59  ;;  %v19915_v40 = vld [vmem:[#allocation14_spill] sm:$0xff]  ;;  %v19918_v52 = vld [vmem:[#allocation5_spill] sm:$0xff]  ;;  %v19921_v47 = vld [vmem:[#allocation171_spill] sm:$0xff] }
 0x3ea   :  { %v2493_v35 = vadd.f32 %v2492_v15, %v2332_v46  ;;  %v13803_v18 = vpop.f32.mrf.mxu0  ;;  %3133 = vmatmul.f32.gmra.mxu0 %v19899_v62  ;;  %v2292_v15 = vadd.f32 %v13364_v58, %v19910_v53  ;;  %19912 = vst [vmem:[#allocation8_spill] sm:$0xff] %v13838_v49  ;;  %v3847_v58 = vmax.f32 %v2465_v31, 1e-10  ;;  %v13855_v31 = vmul.f32 10.0, %v3849_v9  ;;  %v19925_v3 = vld [vmem:[#allocation188_spill] sm:$0xff]  ;;  %v20010_v13 = vld [vmem:[#allocation247_spill] sm:$0xff] }
 0x3eb   :  { %19897 = vst [vmem:[#allocation10_spill] sm:$0xff] %v13803_v18  ;;  %3729 = vmatmul.f32.gmra.mxu3 %v19902_v34  ;;  %v13841_v26 = vpop.f32.mrf.mxu3  ;;  %v3843_v50 = vmax.f32 %v2457_v14, 1e-10  ;;  %vm19922_vm0 = vcmp.eq.f32.partialorder %v19921_v47, %v12816_v41  ;;  %v2280_v6 = vadd.f32 %v13059_v38, %v19925_v3  ;;  %v2445_v53 = vadd.f32 %v13343_v33, %v2284_v24  ;;  %v19933_v33 = vld [vmem:[#allocation161_spill] sm:$0xff]  ;;  %v19952_v4 = vld [vmem:[#allocation156_spill] sm:$0xff]  ;;  %v20048_v23 = vld [vmem:[#allocation202_spill] sm:$0xff] }
 0x3ec   :  { %v3861_v45 = vmax.f32 %v2493_v35, 1e-10  ;;  %3568 = vmatmul.f32.gmra.mxu2 %v19902_v34  ;;  %v19911_v35 = vld [vmem:[#allocation260_spill] sm:$0xff]  ;;  %19913 = vst [vmem:[#allocation246_spill] sm:$0xff] %v13841_v26  ;;  %v2453_v7 = vadd.f32 %v13572_v16, %v2292_v15  ;;  %vm13865_vm8 = vmxor %vm19922_vm0, %vm19295_vm13  ;;  %v13872_v15 = vmul.f32 10.0, %v3845_v54  ;;  %v13884_v14 = vmul.f32 10.0, %v3847_v58 }
 0x3ed   :  { %v13820_v20 = vpop.f32.mrf.mxu2  ;;  %v2336_v62 = vadd.f32 %v2335_v5, %v19911_v35  ;;  %v4843_v5 = vmul.f32 1.442695, %v13828_v22  ;;  %19919 = vst [vmem:[#allocation22_spill] sm:$0xff] %v13855_v31  ;;  %vm19934_vm6 = vcmp.eq.f32.partialorder %v19933_v33, %v12356_v44  ;;  %v3839_v58 = vmax.f32 %v2449_v55, 1e-10 }
 0x3ee   :  { %19905 = vst [vmem:[#allocation9_spill] sm:$0xff] %v13820_v20  ;;  %v13825_v46 = vmul.f32 10.0, %v3861_v45  ;;  %v13844_v45 = vmul.f32 10.0, %v3851_v42  ;;  %v4839_v42 = vmul.f32 1.442695, %v13838_v49  ;;  %vm13891_vm11 = vmxor %vm19934_vm6, %vm19295_vm13  ;;  %v20041_v20 = vld [vmem:[#allocation195_spill] sm:$0xff] }
 0x3ef   :  { %19926 = vst [vmem:[#allocation7_spill] sm:$0xff] %v13872_v15  ;;  %v3841_v41 = vmax.f32 %v2453_v7, 1e-10  ;;  %v19941_v7 = vld [vmem:[#allocation181_spill] sm:$0xff]  ;;  %v4831_v27 = vmul.f32 1.442695, %v13855_v31 }
 0x3f0   :  { %19907 = vst [vmem:[#allocation25_spill] sm:$0xff] %v13825_v46  ;;  %v4855_v43 = vmul.f32 1.442695, %v13825_v46  ;;  %v4835_v9 = vmul.f32 1.442695, %v13844_v45  ;;  %v2276_v54 = vadd.f32 %v13028_v2, %v19941_v7  ;;  %v19946_v2 = vld [vmem:[#allocation165_spill] sm:$0xff] }
 0x3f1   :  { %v2496_v30 = vpop.f32.mrf.mxu1  ;;  %19914 = vst [vmem:[#allocation242_spill] sm:$0xff] %v13844_v45  ;;  %3341 = vmatmul.f32.gmra.mxu1 %v19917_v56  ;;  %v19951_v56 = vld [vmem:[#allocation77_spill] sm:$0xff]  ;;  %v13940_v33 = vmul.f32 10.0, %v3841_v41  ;;  %v19967_v41 = vld [vmem:[#allocation18_spill] sm:$0xff]  ;;  %v20026_v46 = vld [vmem:[#allocation219_spill] sm:$0xff] }
 0x3f2   :  { %8908 = vpow2.f32 %v4855_v43  ;;  %v2497_v34 = vadd.f32 %v2496_v30, %v2336_v62  ;;  %3138 = vmatmul.f32.gmra.mxu0 %v19915_v40  ;;  %v13853_v59 = vpop.f32.mrf.mxu0  ;;  %v19928_v62 = vld [vmem:[#allocation167_spill] sm:$0xff]  ;;  %19932 = vst [vmem:[#allocation232_spill] sm:$0xff] %v13884_v14  ;;  %v19942_v40 = vld [vmem:[#allocation38_spill] sm:$0xff]  ;;  %v20004_v45 = vld [vmem:[#allocation29_spill] sm:$0xff] }
 0x3f3   :  { %8910 = vpow2.f32 %v4851_v48  ;;  %3733 = vmatmul.f32.gmra.mxu3 %v19918_v52  ;;  %vm19929_vm9 = vcmp.eq.f32.partialorder %v19928_v62, %v12634_v29  ;;  %v19937_v29 = vld [vmem:[#allocation169_spill] sm:$0xff]  ;;  %vm19943_vm0 = vcmp.eq.s32.totalorder %v19942_v40, %v11539_v28  ;;  %v3837_v62 = vmax.f32 %v2445_v53, 1e-10  ;;  %19959 = vst [vmem:[#allocation19_spill] sm:$0xff] %v13940_v33  ;;  %v13944_v7 = vpop.f32.mrf.mxu3 }
 0x3f4   :  { %v3863_v16 = vmax.f32 %v2497_v34, 1e-10  ;;  %8912 = vpow2.f32 %v4847_v19  ;;  %3572 = vmatmul.f32.gmra.mxu2 %v19918_v52  ;;  %vm13880_vm12 = vmxor %vm19929_vm9, %vm19295_vm13  ;;  %vm19938_vm14 = vcmp.eq.f32.partialorder %v19937_v29, %v12718_v1  ;;  %v2441_v34 = vadd.f32 %v13226_v11, %v2280_v6  ;;  %v19947_v11 = vld [vmem:[#allocation280_spill] sm:$0xff]  ;;  %v19960_v29 = vld [vmem:[#allocation127_spill] sm:$0xff]  ;;  %19961 = vst [vmem:[#allocation210_spill] sm:$0xff] %v13944_v7 }
 0x3f5   :  { %v13859_v48 = vpop.f32.mrf.mxu2  ;;  %8914 = vpow2.f32 %v4843_v5  ;;  %vm13899_vm4 = vmxor %vm19938_vm14, %vm19295_vm13  ;;  %v13912_v1 = vmul.f32 10.0, %v3843_v50  ;;  %vm19948_vm6 = vcmp.eq.f32.partialorder %v19946_v2, %v19947_v11  ;;  %v2437_v52 = vadd.f32 %v19951_v56, %v2276_v54  ;;  %v19957_v6 = vld [vmem:[#allocation296_spill] sm:$0xff]  ;;  %v19968_v2 = vld [vmem:[#allocation122_spill] sm:$0xff] }
 0x3f6   :  { %19920 = vst [vmem:[#allocation30_spill] sm:$0xff] %v13859_v48  ;;  %v13874_v35 = vmul.f32 10.0, %v3863_v16  ;;  %vm4731_vm9 = vmand %vm13865_vm8, %vm19943_vm0  ;;  %8916 = vpow2.f32 %v4839_v42  ;;  %v4823_v16 = vmul.f32 1.442695, %v13872_v15  ;;  %v19953_v42 = vld [vmem:[#allocation231_spill] sm:$0xff]  ;;  %v19962_v54 = vld [vmem:[#allocation288_spill] sm:$0xff] }
 0x3f7   :  { %19944 = vst [vmem:[#allocation253_spill] sm:$0xff] %v13912_v1  ;;  %vm13921_vm14 = vmxor %vm19948_vm6, %vm19295_vm13  ;;  %vm19954_vm8 = vcmp.eq.f32.partialorder %v19952_v4, %v19953_v42  ;;  %vm19958_vm6 = vcmp.eq.s32.totalorder %v19957_v6, %v11539_v28  ;;  %v3835_v30 = vmax.f32 %v2441_v34, 1e-10  ;;  %v13955_v53 = vmul.f32 10.0, %v3839_v58  ;;  %v19969_v56 = vld [vmem:[#allocation173_spill] sm:$0xff]  ;;  %v19970_v4 = vld [vmem:[#allocation314_spill] sm:$0xff] }
 0x3f8   :  { %19927 = vst [vmem:[#allocation236_spill] sm:$0xff] %v13874_v35  ;;  %v8909_v38 = vpop.eup %8908  ;;  %v4859_v44 = vmul.f32 1.442695, %v13874_v35  ;;  %vm13931_vm0 = vmxor %vm19954_vm8, %vm19295_vm13  ;;  %v4819_v43 = vmul.f32 1.442695, %v13912_v1  ;;  %v20135_v48 = vld [vmem:[#allocation93_spill] sm:$0xff] }
 0x3f9   :  { %v8911_v5 = vpop.eup %8910  ;;  %v13915_v24 = vpop.f32.mrf.mxu1  ;;  %v4923_v50 = vsel %vm4731_vm9, %v8909_v38, 0.0  ;;  %vm4729_vm1 = vmand %vm13899_vm4, %vm19958_vm6  ;;  %v4827_v38 = vmul.f32 1.442695, %v13884_v14  ;;  %vm19963_vm9 = vcmp.eq.s32.totalorder %v19962_v54, %v11539_v28  ;;  %19966 = vst [vmem:[#allocation27_spill] sm:$0xff] %v13955_v53  ;;  %3347 = vmatmul.f32.gmra.mxu1 %v19967_v41  ;;  %vm19971_vm4 = vcmp.eq.f32.partialorder %v19969_v56, %v19970_v4  ;;  %v19980_v56 = vld [vmem:[#allocation163_spill] sm:$0xff]  ;;  %v19981_v4 = vld [vmem:[#allocation269_spill] sm:$0xff] }
 0x3fa   :  { %19945 = vst [vmem:[#allocation227_spill] sm:$0xff] %v13915_v24  ;;  %8918 = vpow2.f32 %v4859_v44  ;;  %v8913_v47 = vpop.eup %8912  ;;  %3143 = vmatmul.f32.gmra.mxu0 %v19960_v29  ;;  %vm13951_vm8 = vmand %vm13880_vm12, %vm19963_vm9  ;;  %v13971_v58 = vand.u32 4294901760, %v4923_v50  ;;  %v19976_v29 = vld [vmem:[#allocation223_spill] sm:$0xff]  ;;  %vm19982_vm9 = vcmp.eq.f32.partialorder %v19980_v56, %v19981_v4  ;;  %v13989_v40 = vpop.f32.mrf.mxu0  ;;  %v13998_v54 = vmul.f32 10.0, %v3837_v62  ;;  %v19991_v62 = vld [vmem:[#allocation128_spill] sm:$0xff] }
 0x3fb   :  { %8920 = vpow2.f32 %v4835_v9  ;;  %3737 = vmatmul.f32.gmra.mxu3 %v19968_v2  ;;  %v4921_v9 = vsel %vm4729_vm1, %v8911_v5, 0.0  ;;  %v8915_v11 = vpop.eup %8914  ;;  %vm13963_vm6 = vmxor %vm19971_vm4, %vm19295_vm13  ;;  %v19975_v5 = vld [vmem:[#allocation155_spill] sm:$0xff]  ;;  %v4919_v6 = vsel %vm13951_vm8, %v8913_v47, 0.0  ;;  %v4815_v56 = vmul.f32 1.442695, %v13940_v33  ;;  %v20144_v24 = vld [vmem:[#allocation34_spill] sm:$0xff] }
 0x3fc   :  { %8922 = vpow2.f32 %v4831_v27  ;;  %3576 = vmatmul.f32.gmra.mxu2 %v19968_v2  ;;  %vm19977_vm1 = vcmp.eq.f32.partialorder %v19975_v5, %v19976_v29  ;;  %vm13985_vm4 = vmxor %vm19982_vm9, %vm19295_vm13  ;;  %v3833_v2 = vmax.f32 %v2437_v52, 1e-10  ;;  %v8917_v5 = vpop.eup %8916  ;;  %v19985_v29 = vld [vmem:[#allocation277_spill] sm:$0xff]  ;;  %19987 = vst [vmem:[#allocation216_spill] sm:$0xff] %v13998_v54  ;;  %v14001_v4 = vand.u32 4294901760, %v4921_v9 }
 0x3fd   :  { %v13969_v34 = vpop.f32.mrf.mxu2  ;;  %vm13977_vm12 = vmxor %vm19977_vm1, %vm19295_vm13  ;;  %8924 = vpow2.f32 %v4823_v16  ;;  %vm19986_vm1 = vcmp.eq.s32.totalorder %v19985_v29, %v11539_v28  ;;  %v19988_v16 = vld [vmem:[#allocation313_spill] sm:$0xff]  ;;  %v14008_v47 = vmul.f32 10.0, %v3835_v30  ;;  %v4811_v44 = vmul.f32 1.442695, %v13955_v53  ;;  %v19994_v30 = vld [vmem:[#allocation159_spill] sm:$0xff] }
 0x3fe   :  { %19974 = vst [vmem:[#allocation6_spill] sm:$0xff] %v13969_v34  ;;  %vm4725_vm7 = vmand %vm13921_vm14, %vm19986_vm1  ;;  %8926 = vpow2.f32 %v4827_v38  ;;  %vm19989_vm9 = vcmp.eq.s32.totalorder %v19988_v16, %v11539_v28  ;;  %vm19992_vm14 = vcmp.eq.s32.totalorder %v19991_v62, %v11539_v28  ;;  %v14018_v16 = vand.u32 4294901760, %v4919_v6  ;;  %v19995_v53 = vld [vmem:[#allocation250_spill] sm:$0xff] }
 0x3ff   :  { %vm4733_vm8 = vmand %vm13963_vm6, %vm19989_vm9  ;;  %19990 = vst [vmem:[#allocation206_spill] sm:$0xff] %v14008_v47  ;;  %v4917_v55 = vsel %vm4725_vm7, %v8915_v11, 0.0  ;;  %8928 = vpow2.f32 %v4819_v43  ;;  %v14021_v42 = vsub.f32 %v4923_v50, %v13971_v58  ;;  %vm19996_vm7 = vcmp.eq.f32.partialorder %v19994_v30, %v19995_v53  ;;  %v20002_v53 = vld [vmem:[#allocation125_spill] sm:$0xff]  ;;  %v20139_v34 = vld [vmem:[#allocation46_spill] sm:$0xff] }
 0x400   :  { %v8919_v52 = vpop.eup %8918  ;;  %vm4723_vm1 = vmand %vm13985_vm4, %vm19992_vm14  ;;  %v14031_v62 = vmul.f32 10.0, %v3833_v2  ;;  %v4807_v50 = vmul.f32 1.442695, %v13998_v54  ;;  %8930 = vpow2.f32 %v4815_v56  ;;  %v14042_v30 = vand.u32 4294901760, %v4917_v55  ;;  %v20008_v54 = vld [vmem:[#allocation129_spill] sm:$0xff]  ;;  %v20009_v56 = vld [vmem:[#allocation118_spill] sm:$0xff] }
 0x401   :  { %v8921_v29 = vpop.eup %8920  ;;  %v14016_v38 = vpop.f32.mrf.mxu1  ;;  %v4925_v33 = vsel %vm4733_vm8, %v8919_v52, 0.0  ;;  %vm14027_vm6 = vmxor %vm19996_vm7, %vm19295_vm13  ;;  %v4915_v43 = vsel %vm4723_vm1, %v8917_v5, 0.0  ;;  %v20000_v52 = vld [vmem:[#allocation256_spill] sm:$0xff]  ;;  %v14045_v2 = vsub.f32 %v4921_v9, %v14001_v4  ;;  %v20003_v5 = vld [vmem:[#allocation157_spill] sm:$0xff]  ;;  %v4803_v19 = vmul.f32 1.442695, %v14008_v47  ;;  %3353 = vmatmul.f32.gmra.mxu1 %v20008_v54 }
 0x402   :  { %19993 = vst [vmem:[#allocation196_spill] sm:$0xff] %v14016_v38  ;;  %v14033_v27 = vand.u32 4294901760, %v4925_v33  ;;  %v8923_v14 = vpop.eup %8922  ;;  %vm20001_vm4 = vcmp.eq.s32.totalorder %v20000_v52, %v11539_v28  ;;  %3148 = vmatmul.f32.gmra.mxu0 %v20002_v53  ;;  %vm20005_vm8 = vcmp.eq.f32.partialorder %v20003_v5, %v20004_v45  ;;  %8932 = vpow2.f32 %v4811_v44  ;;  %v14067_v45 = vpop.f32.mrf.mxu3  ;;  %v20017_v47 = vld [vmem:[#allocation238_spill] sm:$0xff] }
 0x403   :  { %19999 = vst [vmem:[#allocation200_spill] sm:$0xff] %v14031_v62  ;;  %vm4721_vm9 = vmand %vm13891_vm11, %vm20001_vm4  ;;  %v8925_v31 = vpop.eup %8924  ;;  %3741 = vmatmul.f32.gmra.mxu3 %v20009_v56  ;;  %vm20011_vm11 = vcmp.eq.s32.totalorder %v20010_v13, %v11539_v28  ;;  %v14069_v5 = vand.u32 4294901760, %v4915_v43  ;;  %v4799_v44 = vmul.f32 1.442695, %v14031_v62  ;;  %8934 = vpow2.f32 %v4807_v50  ;;  %v3079_v52 = vpop.f32.mrf.mxu0  ;;  %v20035_v62 = vld [vmem:[#allocation211_spill] sm:$0xff] }
 0x404   :  { %vm14051_vm14 = vmxor %vm20005_vm8, %vm19295_vm13  ;;  %v14059_v53 = vsub.f32 %v4925_v33, %v14033_v27  ;;  %v4913_v9 = vsel %vm4721_vm9, %v8921_v29, 0.0  ;;  %v8927_v15 = vpop.eup %8926  ;;  %3580 = vmatmul.f32.gmra.mxu2 %v20009_v56  ;;  %20012 = vst [vmem:[#allocation260_spill] sm:$0xff] %v14067_v45  ;;  %v14073_v33 = vsub.f32 %v4919_v6, %v14018_v16  ;;  %v20013_v29 = vld [vmem:[#allocation44_spill] sm:$0xff]  ;;  %v14098_v22 = vsub.f32 %v4917_v55, %v14042_v30  ;;  %v20020_v56 = vld [vmem:[#allocation154_spill] sm:$0xff] }
 0x405   :  { %vm4719_vm1 = vmand %vm14027_vm6, %vm20011_vm11  ;;  %vm20014_vm7 = vcmp.eq.s32.totalorder %v20013_v29, %v11539_v28  ;;  %5256 = vmatpush.msra.mxu2 %v14033_v27  ;;  %v8929_v54 = vpop.eup %8928  ;;  %vm20018_vm6 = vcmp.eq.s32.totalorder %v20017_v47, %v11539_v28  ;;  %v14092_v3 = vpop.f32.mrf.mxu2  ;;  %v14094_v6 = vand.u32 4294901760, %v4913_v9  ;;  %8936 = vpow2.f32 %v4803_v19 }
 0x406   :  { %vm14080_vm4 = vmand %vm13931_vm0, %vm20014_vm7  ;;  %v4911_v13 = vsel %vm4719_vm1, %v8923_v14, 0.0  ;;  %20019 = vst [vmem:[#allocation14_spill] sm:$0xff] %v14092_v3  ;;  %v20021_v14 = vld [vmem:[#allocation214_spill] sm:$0xff]  ;;  %v20025_v50 = vand.u32 4294901760, %v14059_v53  ;;  %v8931_v35 = vpop.eup %8930  ;;  %v20028_v19 = vand.u32 4294901760, %v14021_v42  ;;  %v14128_v11 = vsub.f32 %v4915_v43, %v14069_v5  ;;  %v20037_v43 = vld [vmem:[#allocation121_spill] sm:$0xff] }
 0x407   :  { %vm4717_vm9 = vmand %vm14051_vm14, %vm20018_vm6  ;;  %vm20022_vm0 = vcmp.eq.f32.partialorder %v20020_v56, %v20021_v14  ;;  %5258 = vmatpush.msra.mxu2 %v13971_v58  ;;  %v4907_v55 = vsel %vm14080_vm4, %v8925_v31, 0.0  ;;  %vm20027_vm14 = vcmp.eq.s32.totalorder %v20026_v46, %v11539_v28  ;;  %v14124_v49 = vand.u32 4294901760, %v4911_v13  ;;  %v20030_v31 = vld [vmem:[#allocation152_spill] sm:$0xff] }
 0x408   :  { %vm14104_vm8 = vmxor %vm20022_vm0, %vm19295_vm13  ;;  %v5294_v47 = vsub.f32 %v14059_v53, %v20025_v50  ;;  %v4909_v29 = vsel %vm4717_vm9, %v8927_v15, 0.0  ;;  %v5300_v14 = vsub.f32 %v14021_v42, %v20028_v19  ;;  %v20031_v50 = vld [vmem:[#allocation69_spill] sm:$0xff]  ;;  %v8933_v19 = vpop.eup %8932  ;;  %v20038_v15 = vand.u32 4294901760, %v14045_v2  ;;  %v20143_v3 = vld [vmem:[#allocation100_spill] sm:$0xff] }
 0x409   :  { %vm4713_vm11 = vmand %vm13977_vm12, %vm20027_vm14  ;;  %v14119_v56 = vpop.f32.mrf.mxu1  ;;  %20029 = vst [vmem:[#allocation191_spill] sm:$0xff] %v14124_v49  ;;  %vm20032_vm1 = vcmp.eq.f32.partialorder %v20030_v31, %v20031_v50  ;;  %5260 = vmatpush.msra.mxu2 %v14001_v4  ;;  %vm20036_vm12 = vcmp.eq.s32.totalorder %v20035_v62, %v11539_v28  ;;  %v14148_v50 = vand.u32 4294901760, %v4909_v29  ;;  %8938 = vpow2.f32 %v4799_v44  ;;  %v20046_v62 = vld [vmem:[#allocation115_spill] sm:$0xff]  ;;  %v8935_v39 = vpop.eup %8934 }
 0x40a   :  { %vm14134_vm7 = vmxor %vm20032_vm1, %vm19295_vm13  ;;  %v5295_v46 = vand.u32 4294901760, %v5294_v47  ;;  %v4905_v1 = vsel %vm4713_vm11, %v8929_v54, 0.0  ;;  %3153 = vmatmul.f32.gmra.mxu0 %v20037_v43  ;;  %v5306_v31 = vsub.f32 %v14045_v2, %v20038_v15  ;;  %v14152_v47 = vsub.f32 %v4913_v9, %v14094_v6  ;;  %v20040_v54 = vld [vmem:[#allocation149_spill] sm:$0xff]  ;;  %v20045_v43 = vld [vmem:[#allocation126_spill] sm:$0xff] }
 0x40b   :  { %vm4711_vm4 = vmand %vm14104_vm8, %vm20036_vm12  ;;  %20039 = vst [vmem:[#allocation21_spill] sm:$0xff] %v14148_v50  ;;  %vm20042_vm6 = vcmp.eq.f32.partialorder %v20040_v54, %v20041_v20  ;;  %3359 = vmatmul.f32.gmra.mxu1 %v20045_v43  ;;  %3745 = vmatmul.f32.gmra.mxu3 %v20046_v62  ;;  %v14164_v15 = vand.u32 4294901760, %v4907_v55  ;;  %vm20049_vm0 = vcmp.eq.s32.totalorder %v20048_v23, %v11539_v28  ;;  %v5301_v20 = vand.u32 4294901760, %v5300_v14  ;;  %v20052_v23 = vld [vmem:[#allocation183_spill] sm:$0xff] }
 0x40c   :  { %vm14158_vm9 = vmxor %vm20042_vm6, %vm19295_vm13  ;;  %v4903_v17 = vsel %vm4711_vm4, %v8931_v35, 0.0  ;;  %3584 = vmatmul.f32.gmra.mxu2 %v20046_v62  ;;  %5296 = vmatpush.msra.mxu3 %v5295_v46  ;;  %v20050_v9 = vand.u32 4294901760, %v14073_v33  ;;  %v14177_v43 = vsub.f32 %v4911_v13, %v14124_v49  ;;  %v8937_v35 = vpop.eup %8936  ;;  %vm20053_vm14 = vcmp.eq.f32.partialorder %v20051_v51, %v20052_v23  ;;  %v20057_v14 = vld [vmem:[#allocation79_spill] sm:$0xff]  ;;  %v3686_v13 = vpop.f32.mrf.mxu3 }
 0x40d   :  { %20047 = vst [vmem:[#allocation5_spill] sm:$0xff] %v14164_v15  ;;  %vm4709_vm8 = vmand %vm14134_vm7, %vm20049_vm0  ;;  %5262 = vmatpush.msra.mxu2 %v14018_v16  ;;  %v14188_v46 = vand.u32 4294901760, %v4905_v1  ;;  %vm20058_vm1 = vcmp.eq.s32.totalorder %v20057_v14, %v11539_v28  ;;  %v20059_v51 = vand.u32 4294901760, %v14098_v22  ;;  %v14200_v8 = vsub.f32 %v4909_v29, %v14148_v50 }
 0x40e   :  { %v5312_v44 = vsub.f32 %v14073_v33, %v20050_v9  ;;  %vm14183_vm11 = vmxor %vm20053_vm14, %vm19295_vm13  ;;  %v4901_v62 = vsel %vm4709_vm8, %v8933_v19, 0.0  ;;  %5302 = vmatpush.msra.mxu3 %v5301_v20  ;;  %v5307_v9 = vand.u32 4294901760, %v5306_v31  ;;  %v14203_v19 = vand.u32 4294901760, %v4903_v17  ;;  %v20063_v20 = vld [vmem:[#allocation180_spill] sm:$0xff]  ;;  %v20065_v31 = vld [vmem:[#allocation275_spill] sm:$0xff]  ;;  %v3525_v54 = vpop.f32.mrf.mxu2 }
 0x40f   :  { %20056 = vst [vmem:[#allocation171_spill] sm:$0xff] %v14188_v46  ;;  %vm4707_vm7 = vmand %vm14158_vm9, %vm20058_vm1  ;;  %v5318_v23 = vsub.f32 %v14098_v22, %v20059_v51  ;;  %5264 = vmatpush.msra.mxu2 %v14042_v30  ;;  %v14206_v32 = vsub.f32 %v4907_v55, %v14164_v15  ;;  %vm20064_vm12 = vcmp.eq.s32.totalorder %v20063_v20, %v11539_v28  ;;  %v20066_v63 = vand.u32 4294901760, %v14128_v11  ;;  %v8939_v25 = vpop.eup %8938  ;;  %v20067_v55 = vld [vmem:[#allocation145_spill] sm:$0xff] }
 0x410   :  { %20060 = vst [vmem:[#allocation188_spill] sm:$0xff] %v14200_v8  ;;  %v4899_v14 = vsel %vm4707_vm7, %v8935_v39, 0.0  ;;  %vm4705_vm4 = vmand %vm14183_vm11, %vm20064_vm12  ;;  %v3080_v51 = vadd.f32 %v3079_v52, %v20065_v31  ;;  %5308 = vmatpush.msra.mxu3 %v5307_v9  ;;  %v5313_v29 = vand.u32 4294901760, %v5312_v44  ;;  %vm20069_vm6 = vcmp.eq.f32.partialorder %v20067_v55, %v20068_v61  ;;  %v20074_v31 = vld [vmem:[#allocation114_spill] sm:$0xff] }
 0x411   :  { %20061 = vst [vmem:[#allocation167_spill] sm:$0xff] %v14203_v19  ;;  %v5324_v60 = vsub.f32 %v14128_v11, %v20066_v63  ;;  %vm14222_vm9 = vmxor %vm20069_vm6, %vm19295_vm13  ;;  %5266 = vmatpush.msra.mxu2 %v14069_v5  ;;  %v3084_v52 = vpop.f32.mrf.mxu0  ;;  %v14227_v44 = vand.u32 4294901760, %v4901_v62  ;;  %v4897_v9 = vsel %vm4705_vm4, %v8937_v35, 0.0  ;;  %v14230_v63 = vsub.f32 %v4905_v1, %v14188_v46  ;;  %v20080_v35 = vld [vmem:[#allocation176_spill] sm:$0xff] }
 0x412   :  { %20062 = vst [vmem:[#allocation161_spill] sm:$0xff] %v14206_v32  ;;  %v3276_v41 = vpop.f32.mrf.mxu1  ;;  %3158 = vmatmul.f32.gmra.mxu0 %v20074_v31  ;;  %5314 = vmatpush.msra.mxu3 %v5313_v29  ;;  %v5319_v57 = vand.u32 4294901760, %v5318_v23  ;;  %v20075_v61 = vand.u32 4294901760, %v14152_v47  ;;  %v18721_v0 = vand.u32 4294901760, %v14200_v8  ;;  %v14239_v36 = vand.u32 4294901760, %v4899_v14 }
 0x413   :  { %20072 = vst [vmem:[#allocation169_spill] sm:$0xff] %v14227_v44  ;;  %v3277_v39 = vadd.f32 %v3276_v41, %v3080_v51  ;;  %3365 = vmatmul.f32.gmra.mxu1 %v20076_v37  ;;  %3749 = vmatmul.f32.gmra.mxu3 %v20077_v21  ;;  %v14242_v1 = vsub.f32 %v4903_v17, %v14203_v19  ;;  %v5325_v51 = vand.u32 4294901760, %v5324_v60  ;;  %v20082_v37 = vand.u32 4294901760, %v14177_v43 }
 0x414   :  { %20073 = vst [vmem:[#allocation181_spill] sm:$0xff] %v14230_v63  ;;  %v5330_v55 = vsub.f32 %v14152_v47, %v20075_v61  ;;  %vm20081_vm0 = vcmp.eq.s32.totalorder %v20080_v35, %v11539_v28  ;;  %3588 = vmatmul.f32.gmra.mxu2 %v20077_v21  ;;  %5320 = vmatpush.msra.mxu3 %v5319_v57  ;;  %v18720_v41 = vand.u32 4294901760, %v14206_v32  ;;  %v14255_v17 = vand.u32 4294901760, %v4897_v9 }
 0x415   :  { %20078 = vst [vmem:[#allocation165_spill] sm:$0xff] %v14239_v36  ;;  %vm4703_vm8 = vmand %vm14222_vm9, %vm20081_vm0  ;;  %v3526_v23 = vadd.f32 %v3525_v54, %v3277_v39  ;;  %v5336_v29 = vsub.f32 %v14177_v43, %v20082_v37  ;;  %5268 = vmatpush.msra.mxu2 %v14094_v6  ;;  %v14258_v28 = vsub.f32 %v4901_v62, %v14227_v44  ;;  %v18722_v60 = vand.u32 4294901760, %v14230_v63  ;;  %v20090_v37 = vld [vmem:[#allocation113_spill] sm:$0xff]  ;;  %v20092_v62 = vld [vmem:[#allocation107_spill] sm:$0xff] }
 0x416   :  { %20079 = vst [vmem:[#allocation280_spill] sm:$0xff] %v14242_v1  ;;  %v4895_v31 = vsel %vm4703_vm8, %v8939_v25, 0.0  ;;  %5326 = vmatpush.msra.mxu3 %v5325_v51  ;;  %v5331_v21 = vand.u32 4294901760, %v5330_v55  ;;  %v5342_v57 = vsub.f32 %v14200_v8, %v18721_v0  ;;  %v5348_v25 = vsub.f32 %v14206_v32, %v18720_v41  ;;  %v20091_v0 = vld [vmem:[#allocation120_spill] sm:$0xff]  ;;  %v20142_v32 = vld [vmem:[#allocation321_spill] sm:$0xff] }
 0x417   :  { %20083 = vst [vmem:[#allocation77_spill] sm:$0xff] %v14255_v17  ;;  %v14260_v20 = vadd.f32 %v3686_v13, %v3526_v23  ;;  %5270 = vmatpush.msra.mxu2 %v14124_v49  ;;  %v5337_v39 = vand.u32 4294901760, %v5336_v29  ;;  %v14272_v13 = vsub.f32 %v4899_v14, %v14239_v36  ;;  %v14275_v61 = vand.u32 4294901760, %v4895_v31  ;;  %v20089_v23 = vld [vmem:[#allocation282_spill] sm:$0xff] }
 0x418   :  { %20084 = vst [vmem:[#allocation156_spill] sm:$0xff] %v14258_v28  ;;  %v3690_v54 = vpop.f32.mrf.mxu3  ;;  %5332 = vmatpush.msra.mxu3 %v5331_v21  ;;  %v14278_v55 = vsub.f32 %v4897_v9, %v14255_v17  ;;  %v3085_v51 = vadd.f32 %v3084_v52, %v20089_v23  ;;  %v5343_v21 = vand.u32 4294901760, %v5342_v57  ;;  %v5354_v41 = vsub.f32 %v14230_v63, %v18722_v60  ;;  %v20138_v63 = vld [vmem:[#allocation325_spill] sm:$0xff] }
 0x419   :  { %20085 = vst [vmem:[#allocation231_spill] sm:$0xff] %v14260_v20  ;;  %5272 = vmatpush.msra.mxu2 %v14148_v50  ;;  %v5349_v23 = vand.u32 4294901760, %v5348_v25  ;;  %v14295_v60 = vsub.f32 %v4895_v31, %v14275_v61  ;;  %v20095_v12 = vand.u32 4294901760, %v14258_v28  ;;  %v20131_v20 = vld [vmem:[#allocation71_spill] sm:$0xff]  ;;  %v20145_v50 = vld [vmem:[#allocation174_spill] sm:$0xff] }
 0x41a   :  { %20086 = vst [vmem:[#allocation127_spill] sm:$0xff] %v14272_v13  ;;  %3163 = vmatmul.f32.gmra.mxu0 %v20090_v37  ;;  %5338 = vmatpush.msra.mxu3 %v5337_v39  ;;  %v20093_v39 = vand.u32 4294901760, %v14242_v1  ;;  %v18725_v37 = vand.u32 4294901760, %v14272_v13  ;;  %v5355_v14 = vand.u32 4294901760, %v5354_v41  ;;  %v18723_v25 = vand.u32 4294901760, %v14278_v55 }
 0x41b   :  { %20087 = vst [vmem:[#allocation18_spill] sm:$0xff] %v14275_v61  ;;  %v3529_v29 = vpop.f32.mrf.mxu2  ;;  %3371 = vmatmul.f32.gmra.mxu1 %v20091_v0  ;;  %3753 = vmatmul.f32.gmra.mxu3 %v20092_v62  ;;  %v3089_v35 = vpop.f32.mrf.mxu0 }
 0x41c   :  { %20088 = vst [vmem:[#allocation122_spill] sm:$0xff] %v14278_v55  ;;  %v3282_v9 = vpop.f32.mrf.mxu1  ;;  %3592 = vmatmul.f32.gmra.mxu2 %v20092_v62  ;;  %5344 = vmatpush.msra.mxu3 %v5343_v21  ;;  %v5360_v57 = vsub.f32 %v14242_v1, %v20093_v39  ;;  %v5366_v62 = vsub.f32 %v14258_v28, %v20095_v12 }
 0x41d   :  { %v3283_v52 = vadd.f32 %v3282_v9, %v3085_v51  ;;  %5274 = vmatpush.msra.mxu2 %v14164_v15  ;;  %20094 = vst [vmem:[#allocation173_spill] sm:$0xff] %v14295_v60  ;;  %v5372_v31 = vsub.f32 %v14272_v13, %v18725_v37  ;;  %v5378_v12 = vsub.f32 %v14278_v55, %v18723_v25  ;;  %v20127_v55 = vld [vmem:[#allocation49_spill] sm:$0xff] }
 0x41e   :  { %5350 = vmatpush.msra.mxu3 %v5349_v23  ;;  %v5361_v21 = vand.u32 4294901760, %v5360_v57  ;;  %v5367_v9 = vand.u32 4294901760, %v5366_v62  ;;  %v20100_v23 = vld [vmem:[#allocation287_spill] sm:$0xff]  ;;  %v2939_v15 = vadd.f32 %v20139_v34, %v20138_v63 }
 0x41f   :  { %v3530_v0 = vadd.f32 %v3529_v29, %v3283_v52  ;;  %5276 = vmatpush.msra.mxu2 %v14188_v46  ;;  %v20097_v29 = vld [vmem:[#allocation35_spill] sm:$0xff]  ;;  %v20098_v52 = vld [vmem:[#allocation117_spill] sm:$0xff]  ;;  %v3090_v39 = vadd.f32 %v3089_v35, %v20100_v23  ;;  %v5379_v25 = vand.u32 4294901760, %v5378_v12 }
 0x420   :  { %5356 = vmatpush.msra.mxu3 %v5355_v14  ;;  %v20099_v14 = vld [vmem:[#allocation40_spill] sm:$0xff]  ;;  %v20136_v46 = vld [vmem:[#allocation99_spill] sm:$0xff] }
 0x421   :  { %v14302_v51 = vadd.f32 %v3690_v54, %v3530_v0  ;;  %5278 = vmatpush.msra.mxu2 %v14203_v19  ;;  %v18724_v54 = vand.u32 4294901760, %v14295_v60  ;;  %v5373_v0 = vand.u32 4294901760, %v5372_v31  ;;  %v20102_v31 = vld [vmem:[#allocation106_spill] sm:$0xff]  ;;  %v20132_v19 = vld [vmem:[#allocation83_spill] sm:$0xff] }
 0x422   :  { %3168 = vmatmul.f32.gmra.mxu0 %v20097_v29  ;;  %v3694_v41 = vpop.f32.mrf.mxu3  ;;  %5362 = vmatpush.msra.mxu3 %v5361_v21 }
 0x423   :  { %20096 = vst [vmem:[#allocation314_spill] sm:$0xff] %v14302_v51  ;;  %3377 = vmatmul.f32.gmra.mxu1 %v20098_v52  ;;  %3757 = vmatmul.f32.gmra.mxu3 %v20099_v14  ;;  %v5384_v52 = vsub.f32 %v14295_v60, %v18724_v54  ;;  %v20134_v51 = vld [vmem:[#allocation59_spill] sm:$0xff] }
 0x424   :  { %5280 = vmatpush.msra.mxu2 %v14227_v44  ;;  %5368 = vmatpush.msra.mxu3 %v5367_v9  ;;  %v20130_v44 = vld [vmem:[#allocation97_spill] sm:$0xff] }
 0x425   :  { %v3533_v57 = vpop.f32.mrf.mxu2  ;;  %3596 = vmatmul.f32.gmra.mxu2 %v20099_v14  ;;  %v5385_v9 = vand.u32 4294901760, %v5384_v52  ;;  %v20103_v14 = vld [vmem:[#allocation111_spill] sm:$0xff]  ;;  %v20108_v52 = vld [vmem:[#allocation109_spill] sm:$0xff] }
 0x426   :  { %v3094_v62 = vpop.f32.mrf.mxu0  ;;  %v3288_v21 = vpop.f32.mrf.mxu1  ;;  %5282 = vmatpush.msra.mxu2 %v14239_v36  ;;  %5374 = vmatpush.msra.mxu3 %v5373_v0  ;;  %v20105_v0 = vld [vmem:[#allocation293_spill] sm:$0xff]  ;;  %v20128_v36 = vld [vmem:[#allocation76_spill] sm:$0xff] }
 0x427   :  { %v3289_v29 = vadd.f32 %v3288_v21, %v3090_v39  ;;  %v20104_v39 = vld [vmem:[#allocation42_spill] sm:$0xff]  ;;  %v3095_v21 = vadd.f32 %v3094_v62, %v20105_v0 }
 0x428   :  { %5284 = vmatpush.msra.mxu2 %v14255_v17  ;;  %5380 = vmatpush.msra.mxu3 %v5379_v25  ;;  %v20126_v17 = vld [vmem:[#allocation92_spill] sm:$0xff] }
 0x429   :  { %v3534_v35 = vadd.f32 %v3533_v57, %v3289_v29 }
 0x42a   :  { %5286 = vmatpush.msra.mxu2 %v14275_v61  ;;  %3173 = vmatmul.f32.gmra.mxu0 %v20102_v31  ;;  %v20109_v31 = vld [vmem:[#allocation39_spill] sm:$0xff] }
 0x42b   :  { %v14323_v23 = vadd.f32 %v3694_v41, %v3534_v35  ;;  %3383 = vmatmul.f32.gmra.mxu1 %v20103_v14  ;;  %3761 = vmatmul.f32.gmra.mxu3 %v20104_v39  ;;  %v20106_v35 = vld [vmem:[#allocation104_spill] sm:$0xff]  ;;  %v20110_v14 = vld [vmem:[#allocation298_spill] sm:$0xff] }
 0x42c   :  { %5386 = vmatpush.msra.mxu3 %v5385_v9 }
 0x42d   :  { %20101 = vst [vmem:[#allocation155_spill] sm:$0xff] %v14323_v23  ;;  %v3698_v12 = vpop.f32.mrf.mxu3  ;;  %3600 = vmatmul.f32.gmra.mxu2 %v20104_v39  ;;  %v2943_v23 = vadd.f32 %v20136_v46, %v20135_v48 }
 0x42e   :  { %v3294_v57 = vpop.f32.mrf.mxu1 }
 0x42f   :  { %v3099_v54 = vpop.f32.mrf.mxu0  ;;  %v3295_v25 = vadd.f32 %v3294_v57, %v3095_v21  ;;  %v3537_v41 = vpop.f32.mrf.mxu2  ;;  %v20111_v57 = vld [vmem:[#allocation101_spill] sm:$0xff] }
 0x430   :  { %v3100_v62 = vadd.f32 %v3099_v54, %v20110_v14 }
 0x431   :  { %v3538_v29 = vadd.f32 %v3537_v41, %v3295_v25  ;;  %v20112_v25 = vld [vmem:[#allocation105_spill] sm:$0xff] }
 0x432   :  { %3178 = vmatmul.f32.gmra.mxu0 %v20106_v35  ;;  %v20115_v35 = vld [vmem:[#allocation302_spill] sm:$0xff] }
 0x433   :  { %v14332_v37 = vadd.f32 %v3698_v12, %v3538_v29  ;;  %3389 = vmatmul.f32.gmra.mxu1 %v20108_v52  ;;  %3765 = vmatmul.f32.gmra.mxu3 %v20109_v31  ;;  %v20113_v12 = vld [vmem:[#allocation50_spill] sm:$0xff] }
 0x435   :  { %20107 = vst [vmem:[#allocation223_spill] sm:$0xff] %v14332_v37  ;;  %3604 = vmatmul.f32.gmra.mxu2 %v20109_v31 }
 0x436   :  { %v3702_v9 = vpop.f32.mrf.mxu3  ;;  %v3300_v39 = vpop.f32.mrf.mxu1 }
 0x437   :  { %v3104_v0 = vpop.f32.mrf.mxu0  ;;  %v3541_v10 = vpop.f32.mrf.mxu2  ;;  %v3301_v61 = vadd.f32 %v3300_v39, %v3100_v62  ;;  %v20118_v39 = vld [vmem:[#allocation43_spill] sm:$0xff] }
 0x438   :  { %v3105_v52 = vadd.f32 %v3104_v0, %v20115_v35  ;;  %v20122_v35 = vld [vmem:[#allocation95_spill] sm:$0xff] }
 0x439   :  { %v3542_v21 = vadd.f32 %v3541_v10, %v3301_v61  ;;  %v20116_v10 = vld [vmem:[#allocation41_spill] sm:$0xff]  ;;  %v20117_v61 = vld [vmem:[#allocation103_spill] sm:$0xff] }
 0x43a   :  { %3183 = vmatmul.f32.gmra.mxu0 %v20111_v57 }
 0x43b   :  { %3395 = vmatmul.f32.gmra.mxu1 %v20112_v25  ;;  %3769 = vmatmul.f32.gmra.mxu3 %v20113_v12  ;;  %v14341_v41 = vadd.f32 %v3702_v9, %v3542_v21 }
 0x43d   :  { %20114 = vst [vmem:[#allocation163_spill] sm:$0xff] %v14341_v41  ;;  %3608 = vmatmul.f32.gmra.mxu2 %v20113_v12  ;;  %v20120_v12 = vld [vmem:[#allocation57_spill] sm:$0xff] }
 0x43e   :  { %v3706_v29 = vpop.f32.mrf.mxu3  ;;  %v3306_v54 = vpop.f32.mrf.mxu1 }
 0x43f   :  { %v14345_v31 = vpop.f32.mrf.mxu0  ;;  %v3307_v14 = vadd.f32 %v3306_v54, %v3105_v52  ;;  %v3545_v60 = vpop.f32.mrf.mxu2 }
 0x441   :  { %v3546_v62 = vadd.f32 %v3545_v60, %v3307_v14  ;;  %v20121_v60 = vld [vmem:[#allocation45_spill] sm:$0xff] }
 0x442   :  { %3188 = vmatmul.f32.gmra.mxu0 %v20116_v10  ;;  %v20124_v10 = vld [vmem:[#allocation37_spill] sm:$0xff] }
 0x443   :  { %3401 = vmatmul.f32.gmra.mxu1 %v20117_v61  ;;  %3773 = vmatmul.f32.gmra.mxu3 %v20118_v39  ;;  %v14350_v57 = vadd.f32 %v3706_v29, %v3546_v62  ;;  %v20123_v62 = vld [vmem:[#allocation98_spill] sm:$0xff]  ;;  %v20125_v61 = vld [vmem:[#allocation91_spill] sm:$0xff] }
 0x445   :  { %20119 = vst [vmem:[#allocation269_spill] sm:$0xff] %v14350_v57  ;;  %3612 = vmatmul.f32.gmra.mxu2 %v20118_v39  ;;  %v2947_v57 = vadd.f32 %v20145_v50, %v20144_v24  ;;  %v18760_v50 = vmov 0.0  }
 0x446   :  { %v14353_v9 = vpop.f32.mrf.mxu3  ;;  %v14357_v0 = vpop.f32.mrf.mxu1 }
 0x447   :  { %v14355_v21 = vpop.f32.mrf.mxu0  ;;  %v14359_v25 = vpop.f32.mrf.mxu2 }
 0x44a   :  { %3193 = vmatmul.f32.gmra.mxu0 %v20120_v12 }
 0x44b   :  { %3407 = vmatmul.f32.gmra.mxu1 %v20121_v60  ;;  %3777 = vmatmul.f32.gmra.mxu3 %v20122_v35 }
 0x44d   :  { %3616 = vmatmul.f32.gmra.mxu2 %v20122_v35 }
 0x44e   :  { %v14365_v29 = vpop.f32.mrf.mxu3  ;;  %v14367_v54 = vpop.f32.mrf.mxu1 }
 0x44f   :  { %v3119_v52 = vpop.f32.mrf.mxu0  ;;  %v14369_v14 = vpop.f32.mrf.mxu2 }
 0x452   :  { %3198 = vmatmul.f32.gmra.mxu0 %v20123_v62 }
 0x453   :  { %3413 = vmatmul.f32.gmra.mxu1 %v20124_v10  ;;  %3781 = vmatmul.f32.gmra.mxu3 %v20125_v61 }
 0x455   :  { %3620 = vmatmul.f32.gmra.mxu2 %v20125_v61  ;;  %v20129_v61 = vld [vmem:[#allocation86_spill] sm:$0xff] }
 0x456   :  { %v14375_v39 = vpop.f32.mrf.mxu3  ;;  %v3324_v60 = vpop.f32.mrf.mxu1 }
 0x457   :  { %v3124_v12 = vpop.f32.mrf.mxu0  ;;  %v14377_v35 = vpop.f32.mrf.mxu2 }
 0x45a   :  { %3203 = vmatmul.f32.gmra.mxu0 %v20126_v17 }
 0x45b   :  { %3419 = vmatmul.f32.gmra.mxu1 %v20127_v55  ;;  %3785 = vmatmul.f32.gmra.mxu3 %v20128_v36 }
 0x45d   :  { %3624 = vmatmul.f32.gmra.mxu2 %v20128_v36  ;;  %v20133_v36 = vld [vmem:[#allocation89_spill] sm:$0xff] }
 0x45e   :  { %v14383_v62 = vpop.f32.mrf.mxu3  ;;  %v3330_v13 = vpop.f32.mrf.mxu1 }
 0x45f   :  { %v3129_v10 = vpop.f32.mrf.mxu0  ;;  %v3561_v26 = vpop.f32.mrf.mxu2 }
 0x460   :  { %v3130_v8 = vadd.f32 %v3129_v10, %v2939_v15 }
 0x462   :  { %3208 = vmatmul.f32.gmra.mxu0 %v20129_v61 }
 0x463   :  { %3425 = vmatmul.f32.gmra.mxu1 %v20130_v44  ;;  %3789 = vmatmul.f32.gmra.mxu3 %v20131_v20 }
 0x465   :  { %3628 = vmatmul.f32.gmra.mxu2 %v20131_v20  ;;  %v20137_v20 = vld [vmem:[#allocation80_spill] sm:$0xff] }
 0x466   :  { %v3726_v17 = vpop.f32.mrf.mxu3  ;;  %v3336_v55 = vpop.f32.mrf.mxu1 }
 0x467   :  { %v3134_v28 = vpop.f32.mrf.mxu0  ;;  %v3565_v7 = vpop.f32.mrf.mxu2 }
 0x468   :  { %v3135_v37 = vadd.f32 %v3134_v28, %v2943_v23  ;;  %v20146_v23 = vld [vmem:[#allocation317_spill] sm:$0xff] }
 0x46a   :  { %3213 = vmatmul.f32.gmra.mxu0 %v20132_v19  ;;  %v20140_v19 = vld [vmem:[#allocation87_spill] sm:$0xff] }
 0x46b   :  { %3431 = vmatmul.f32.gmra.mxu1 %v20133_v36  ;;  %3793 = vmatmul.f32.gmra.mxu3 %v20134_v51  ;;  %v20141_v36 = vld [vmem:[#allocation58_spill] sm:$0xff] }
 0x46d   :  { %3632 = vmatmul.f32.gmra.mxu2 %v20134_v51  ;;  %v2935_v51 = vadd.f32 %v20143_v3, %v20142_v32  ;;  %v20147_v32 = vld [vmem:[#allocation310_spill] sm:$0xff] }
 0x46e   :  { %v3730_v1 = vpop.f32.mrf.mxu3  ;;  %v3342_v45 = vpop.f32.mrf.mxu1  ;;  %v3115_v24 = vadd.f32 %v14355_v21, %v20147_v32 }
 0x46f   :  { %v3139_v61 = vpop.f32.mrf.mxu0  ;;  %v3569_v44 = vpop.f32.mrf.mxu2  ;;  %v3343_v41 = vadd.f32 %v3342_v45, %v3135_v37  ;;  %v3125_v46 = vadd.f32 %v3124_v12, %v2935_v51 }
 0x470   :  { %v3140_v38 = vadd.f32 %v3139_v61, %v2947_v57  ;;  %v20149_v57 = vld [vmem:[#allocation306_spill] sm:$0xff] }
 0x471   :  { %v3331_v18 = vadd.f32 %v3330_v13, %v3125_v46  ;;  %v3570_v49 = vadd.f32 %v3569_v44, %v3343_v41  ;;  %v3110_v12 = vadd.f32 %v14345_v31, %v20149_v57  ;;  %v20159_v46 = vand.u32 4294901760, %v14098_v22  ;;  %v20170_v57 = vld [vmem:[#allocation196_spill] sm:$0xff] }
 0x472   :  { %3218 = vmatmul.f32.gmra.mxu0 %v20137_v20  ;;  %v3337_v20 = vadd.f32 %v3336_v55, %v3130_v8  ;;  %v20148_v8 = vld [vmem:[#allocation82_spill] sm:$0xff] }
 0x473   :  { %3437 = vmatmul.f32.gmra.mxu1 %v20140_v19  ;;  %3797 = vmatmul.f32.gmra.mxu3 %v20141_v36  ;;  %v3120_v19 = vadd.f32 %v3119_v52, %v20146_v23  ;;  %v3562_v13 = vadd.f32 %v3561_v26, %v3331_v18  ;;  %v3731_v41 = vadd.f32 %v3730_v1, %v3570_v49  ;;  %v20152_v49 = vand.u32 4294901760, %v14021_v42 }
 0x474   :  { %v3566_v15 = vadd.f32 %v3565_v7, %v3337_v20  ;;  %v20150_v7 = vand.u32 4294901760, %v14059_v53  ;;  %v3313_v31 = vadd.f32 %v14357_v0, %v3110_v12  ;;  %v20160_v20 = vld [vmem:[#allocation270_spill] sm:$0xff]  ;;  %v20171_v12 = vld [vmem:[#allocation163_spill] sm:$0xff] }
 0x475   :  { %3636 = vmatmul.f32.gmra.mxu2 %v20141_v36  ;;  %v3325_v45 = vadd.f32 %v3324_v60, %v3120_v19  ;;  %v3723_v0 = vadd.f32 %v14383_v62, %v3562_v13  ;;  %v20163_v19 = vand.u32 4294901760, %v14128_v11  ;;  %v20172_v13 = vld [vmem:[#allocation188_spill] sm:$0xff] }
 0x476   :  { %v3734_v48 = vpop.f32.mrf.mxu3  ;;  %v3348_v63 = vpop.f32.mrf.mxu1  ;;  %v3727_v10 = vadd.f32 %v3726_v17, %v3566_v15  ;;  %v3550_v17 = vadd.f32 %v14359_v25, %v3313_v31  ;;  %v20156_v25 = vand.u32 4294901760, %v14073_v33  ;;  %v20167_v15 = vld [vmem:[#allocation191_spill] sm:$0xff]  ;;  %v20176_v31 = vld [vmem:[#allocation21_spill] sm:$0xff] }
 0x477   :  { %v14405_v34 = vpop.f32.mrf.mxu0  ;;  %v3573_v28 = vpop.f32.mrf.mxu2  ;;  %v3349_v3 = vadd.f32 %v3348_v63, %v3140_v38  ;;  %v3319_v38 = vadd.f32 %v14367_v54, %v3115_v24  ;;  %v3558_v60 = vadd.f32 %v14377_v35, %v3325_v45  ;;  %v3830_v54 = vmax.f32 %v3731_v41, 1e-10 }
 0x478   :  { %v20153_v35 = vand.u32 4294901760, %v14045_v2  ;;  %v3828_v61 = vmax.f32 %v3727_v10, 1e-10  ;;  %v3711_v51 = vadd.f32 %v14353_v9, %v3550_v17  ;;  %v3075_v63 = vadd.f32 %v13989_v40, %v20160_v20 }
 0x479   :  { %v3574_v37 = vadd.f32 %v3573_v28, %v3349_v3  ;;  %v3554_v1 = vadd.f32 %v14369_v14, %v3319_v38  ;;  %v18762_v14 = vmov 1.0   ;;  %v14451_v36 = vmul.f32 10.0, %v3830_v54  ;;  %v20164_v3 = vld [vmem:[#allocation265_spill] sm:$0xff] }
 0x47a   :  { %4959 = vmatmul.f32.vlgmr.msrb.gmra.mxu0 %v18760_v50  ;;  %v3070_v40 = vadd.f32 %v13853_v59, %v20164_v3  ;;  %v3271_v32 = vadd.f32 %v14119_v56, %v3075_v63  ;;  %v3816_v38 = vmax.f32 %v20171_v12, 1e-10  ;;  %v20207_v12 = vld [vmem:[#allocation312_spill] sm:$0xff] }
 0x47b   :  { %3443 = vmatmul.f32.gmra.mxu1 %v20148_v8  ;;  %5147 = vmatmul.f32.vlgmr.msrb.gmra.mxu3 %v18760_v50  ;;  %v3735_v21 = vadd.f32 %v3734_v48, %v3574_v37  ;;  %v3715_v62 = vadd.f32 %v14365_v29, %v3554_v1  ;;  %20155 = vst [vmem:[#allocation125_spill] sm:$0xff] %v14451_v36  ;;  %v20168_v37 = vld [vmem:[#allocation259_spill] sm:$0xff]  ;;  %v20169_v8 = vld [vmem:[#allocation10_spill] sm:$0xff]  ;;  %v20179_v1 = vld [vmem:[#allocation161_spill] sm:$0xff] }
 0x47c   :  { %5393 = vmatpush.msrb.mxu0 %v14059_v53  ;;  %5548 = vmatpush.msrb.mxu3 %v14033_v27  ;;  %v3065_v59 = vadd.f32 %v20169_v8, %v20168_v37  ;;  %v3265_v56 = vadd.f32 %v20170_v57, %v3070_v40  ;;  %v20197_v40 = vand.u32 4294901760, %v20179_v1  ;;  %v20205_v8 = vld [vmem:[#allocation260_spill] sm:$0xff] }
 0x47d   :  { %5111 = vmatmul.f32.vlgmr.msrb.gmra.mxu2 %v18760_v50  ;;  %v3832_v55 = vmax.f32 %v3735_v21, 1e-10  ;;  %v3822_v28 = vmax.f32 %v3715_v62, 1e-10  ;;  %v20185_v62 = vld [vmem:[#allocation151_spill] sm:$0xff]  ;;  %v20206_v57 = vld [vmem:[#allocation280_spill] sm:$0xff] }
 0x47e   :  { %5396 = vmatpush.msrb.mxu0 %v14021_v42  ;;  %5482 = vmatpush.msrb.mxu2 %v20150_v7  ;;  %v14422_v52 = vpop.f32.mrf.mxu3  ;;  %v14432_v26 = vpop.f32.mrf.mxu1  ;;  %v3719_v42 = vadd.f32 %v14375_v39, %v3558_v60  ;;  %v20175_v7 = vand.u32 4294901760, %v14177_v43  ;;  %v20177_v60 = vld [vmem:[#allocation227_spill] sm:$0xff] }
 0x47f   :  { %20151 = vst [vmem:[#allocation159_spill] sm:$0xff] %v14422_v52  ;;  %5550 = vmatpush.msrb.mxu3 %v13971_v58  ;;  %v14427_v18 = vpop.f32.mrf.mxu0  ;;  %v14434_v53 = vpop.f32.mrf.mxu2  ;;  %v14444_v44 = vmul.f32 10.0, %v3832_v55  ;;  %v14501_v21 = vmul.f32 10.0, %v3822_v28  ;;  %v3259_v10 = vadd.f32 %v20177_v60, %v3065_v59  ;;  %v20178_v55 = vld [vmem:[#allocation14_spill] sm:$0xff]  ;;  %v20195_v28 = vld [vmem:[#allocation155_spill] sm:$0xff] }
 0x480   :  { %5399 = vmatpush.msrb.mxu0 %v14045_v2  ;;  %5486 = vmatpush.msrb.mxu2 %v20152_v49  ;;  %v3826_v2 = vmax.f32 %v3723_v0, 1e-10  ;;  %v3824_v48 = vmax.f32 %v3719_v42, 1e-10  ;;  %v3522_v49 = vadd.f32 %v20178_v55, %v3271_v32  ;;  %v20181_v0 = vld [vmem:[#allocation223_spill] sm:$0xff]  ;;  %v20184_v42 = vld [vmem:[#allocation5_spill] sm:$0xff] }
 0x481   :  { %5552 = vmatpush.msrb.mxu3 %v14001_v4  ;;  %20154 = vst [vmem:[#allocation250_spill] sm:$0xff] %v14444_v44  ;;  %v4797_v29 = vmul.f32 1.442695, %v14444_v44  ;;  %v3814_v54 = vmax.f32 %v20181_v0, 1e-10  ;;  %v20198_v32 = vld [vmem:[#allocation171_spill] sm:$0xff] }
 0x482   :  { %5402 = vmatpush.msrb.mxu0 %v14073_v33  ;;  %5490 = vmatpush.msrb.mxu2 %v20153_v35  ;;  %v14477_v23 = vmul.f32 10.0, %v3826_v2  ;;  %v14488_v24 = vmul.f32 10.0, %v3824_v48  ;;  %20174 = vst [vmem:[#allocation214_spill] sm:$0xff] %v14501_v21  ;;  %v20186_v2 = vld [vmem:[#allocation319_spill] sm:$0xff]  ;;  %v14531_v48 = vmul.f32 10.0, %v3816_v38  ;;  %v3683_v59 = vadd.f32 %v20205_v8, %v3522_v49  ;;  %v20208_v38 = vld [vmem:[#allocation94_spill] sm:$0xff] }
 0x483   :  { %5554 = vmatpush.msrb.mxu3 %v14018_v16  ;;  %5059 = vmatmul.f32.vlgmr.msrb.gmra.mxu1 %v18762_v14  ;;  %8940 = vpow2.f32 %v4797_v29  ;;  %vm20187_vm14 = vcmp.eq.f32.partialorder %v20185_v62, %v20186_v2  ;;  %v20192_v29 = vld [vmem:[#allocation181_spill] sm:$0xff]  ;;  %v4777_v3 = vmul.f32 1.442695, %v14501_v21  ;;  %vm20209_vm12 = vcmp.eq.s32.totalorder %v20207_v12, %v20208_v38  ;;  %v20213_v60 = vld [vmem:[#allocation167_spill] sm:$0xff]  ;;  %v20219_v49 = vld [vmem:[#allocation210_spill] sm:$0xff] }
 0x484   :  { %5405 = vmatpush.msrb.mxu0 %v14098_v22  ;;  %5444 = vmatpush.msrb.mxu1 %v14033_v27  ;;  %v14461_v27 = vmul.f32 10.0, %v3828_v61  ;;  %20162 = vst [vmem:[#allocation118_spill] sm:$0xff] %v14477_v23  ;;  %v4793_v22 = vmul.f32 1.442695, %v14451_v36  ;;  %v4781_v17 = vmul.f32 1.442695, %v14488_v24  ;;  %vm14526_vm11 = vmxor %vm20187_vm14, %vm19295_vm13 }
 0x485   :  { %5494 = vmatpush.msrb.mxu2 %v20156_v25  ;;  %5556 = vmatpush.msrb.mxu3 %v14042_v30  ;;  %20165 = vst [vmem:[#allocation154_spill] sm:$0xff] %v14488_v24  ;;  %v20190_v25 = vld [vmem:[#allocation6_spill] sm:$0xff]  ;;  %vm4702_vm4 = vmand %vm14526_vm11, %vm20209_vm12  ;;  %v4765_v0 = vmul.f32 1.442695, %v14531_v48  ;;  %v20221_v62 = vld [vmem:[#allocation140_spill] sm:$0xff]  ;;  %v20315_v44 = vmov 0.0  }
 0x486   :  { %5408 = vmatpush.msrb.mxu0 %v14128_v11  ;;  %5446 = vmatpush.msrb.mxu1 %v13971_v58  ;;  %v14458_v39 = vpop.f32.mrf.mxu3  ;;  %20158 = vst [vmem:[#allocation29_spill] sm:$0xff] %v14461_v27  ;;  %v4789_v45 = vmul.f32 1.442695, %v14461_v27  ;;  %v20166_v11 = vand.u32 4294901760, %v14152_v47  ;;  %8942 = vpow2.f32 %v4793_v22  ;;  %v3812_v22 = vmax.f32 %v20195_v28, 1e-10 }
 0x487   :  { %20157 = vst [vmem:[#allocation157_spill] sm:$0xff] %v14458_v39  ;;  %5498 = vmatpush.msrb.mxu2 %v20159_v46  ;;  %5558 = vmatpush.msrb.mxu3 %v14069_v5  ;;  %v14467_v33 = vpop.f32.mrf.mxu0  ;;  %v14475_v9 = vpop.f32.mrf.mxu2  ;;  %v20222_v2 = vld [vmem:[#allocation245_spill] sm:$0xff]  ;;  %v20247_v55 = vld [vmem:[#allocation138_spill] sm:$0xff]  ;;  %v20337_v39 = vld [vmem:[#allocation136_spill] sm:$0xff] }
 0x488   :  { %5411 = vmatpush.msrb.mxu0 %v14152_v47  ;;  %5448 = vmatpush.msrb.mxu1 %v14001_v4  ;;  %v14473_v58 = vpop.f32.mrf.mxu1  ;;  %20161 = vst [vmem:[#allocation129_spill] sm:$0xff] %v14475_v9  ;;  %v3820_v4 = vmax.f32 %v3711_v51, 1e-10  ;;  %v4785_v47 = vmul.f32 1.442695, %v14477_v23  ;;  %8944 = vpow2.f32 %v4789_v45  ;;  %v3518_v51 = vadd.f32 %v20190_v25, %v3265_v56  ;;  %v20226_v25 = vld [vmem:[#allocation304_spill] sm:$0xff] }
 0x489   :  { %5502 = vmatpush.msrb.mxu2 %v20163_v19  ;;  %5560 = vmatpush.msrb.mxu3 %v14094_v6  ;;  %20191 = vst [vmem:[#allocation121_spill] sm:$0xff] %v14531_v48  ;;  %v8941_v63 = vpop.eup %8940  ;;  %vm20223_vm0 = vcmp.eq.f32.partialorder %v20221_v62, %v20222_v2  ;;  %vm20227_vm14 = vcmp.eq.s32.totalorder %v20226_v25, %v20208_v38  ;;  %v14596_v28 = vmul.f32 10.0, %v3812_v22  ;;  %v20237_v45 = vld [vmem:[#allocation246_spill] sm:$0xff]  ;;  %v3806_v22 = vmax.f32 %v3683_v59, 1e-10  ;;  %v20246_v59 = vld [vmem:[#allocation165_spill] sm:$0xff] }
 0x48a   :  { %5414 = vmatpush.msrb.mxu0 %v14177_v43  ;;  %5450 = vmatpush.msrb.mxu1 %v14018_v16  ;;  %v20173_v16 = vld [vmem:[#allocation269_spill] sm:$0xff]  ;;  %v14514_v35 = vmul.f32 10.0, %v3820_v4  ;;  %v20183_v43 = vand.u32 4294901760, %v20172_v13  ;;  %8946 = vpow2.f32 %v4785_v47  ;;  %v20199_v4 = vld [vmem:[#allocation147_spill] sm:$0xff]  ;;  %vm14586_vm8 = vmxor %vm20223_vm0, %vm19295_vm13 }
 0x48b   :  { %5506 = vmatpush.msrb.mxu2 %v20166_v11  ;;  %5562 = vmatpush.msrb.mxu3 %v20167_v15  ;;  %v3818_v41 = vmax.f32 %v20173_v16, 1e-10  ;;  %v20204_v11 = vld [vmem:[#allocation30_spill] sm:$0xff]  ;;  %8948 = vpow2.f32 %v4781_v17  ;;  %v4894_v17 = vsel %vm4702_vm4, %v8941_v63, 0.0  ;;  %20229 = vst [vmem:[#allocation148_spill] sm:$0xff] %v14596_v28  ;;  %v20230_v63 = vand.u32 4294901760, %v20206_v57 }
 0x48c   :  { %5417 = vmatpush.msrb.mxu0 %v20172_v13  ;;  %5452 = vmatpush.msrb.mxu1 %v14042_v30  ;;  %20182 = vst [vmem:[#allocation69_spill] sm:$0xff] %v14514_v35  ;;  %v3514_v37 = vadd.f32 %v20204_v11, %v3259_v10  ;;  %v8943_v56 = vpop.eup %8942  ;;  %v20210_v13 = vld [vmem:[#allocation314_spill] sm:$0xff]  ;;  %v4773_v47 = vmul.f32 1.442695, %v14514_v35  ;;  %v20215_v10 = vld [vmem:[#allocation300_spill] sm:$0xff]  ;;  %8950 = vpow2.f32 %v4777_v3  ;;  %v14632_v62 = vand.u32 4294901760, %v4894_v17 }
 0x48d   :  { %5510 = vmatpush.msrb.mxu2 %v20175_v7  ;;  %5564 = vmatpush.msrb.mxu3 %v20176_v31  ;;  %v14540_v19 = vmul.f32 10.0, %v3818_v41  ;;  %v3810_v16 = vmax.f32 %v20210_v13, 1e-10  ;;  %v14564_v41 = vmul.f32 10.0, %v3814_v54  ;;  %v20212_v7 = vand.u32 4294901760, %v20192_v29  ;;  %v20220_v54 = vld [vmem:[#allocation156_spill] sm:$0xff] }
 0x48e   :  { %5420 = vmatpush.msrb.mxu0 %v20179_v1  ;;  %5454 = vmatpush.msrb.mxu1 %v14069_v5  ;;  %v14511_v30 = vpop.f32.mrf.mxu3  ;;  %v3679_v1 = vadd.f32 %v20219_v49, %v3518_v51  ;;  %v20228_v51 = vld [vmem:[#allocation231_spill] sm:$0xff]  ;;  %v3675_v8 = vadd.f32 %v20237_v45, %v3514_v37  ;;  %8952 = vpow2.f32 %v4773_v47  ;;  %v20253_v47 = vld [vmem:[#allocation285_spill] sm:$0xff]  ;;  %v14679_v11 = vmul.f32 10.0, %v3806_v22  ;;  %v20282_v25 = vld [vmem:[#allocation268_spill] sm:$0xff] }
 0x48f   :  { %20180 = vst [vmem:[#allocation152_spill] sm:$0xff] %v14511_v30  ;;  %5514 = vmatpush.msrb.mxu2 %v20183_v43  ;;  %5566 = vmatpush.msrb.mxu3 %v20184_v42  ;;  %v14520_v61 = vpop.f32.mrf.mxu0  ;;  %v14537_v20 = vpop.f32.mrf.mxu2  ;;  %v20238_v13 = vld [vmem:[#allocation127_spill] sm:$0xff]  ;;  %v14624_v49 = vmul.f32 10.0, %v3810_v16  ;;  %v4761_v37 = vmul.f32 1.442695, %v14564_v41  ;;  %v20252_v16 = vld [vmem:[#allocation142_spill] sm:$0xff]  ;;  %8954 = vpow2.f32 %v4765_v0  ;;  %v14692_v22 = vsub.f32 %v4894_v17, %v14632_v62 }
 0x490   :  { %5423 = vmatpush.msrb.mxu0 %v20192_v29  ;;  %5456 = vmatpush.msrb.mxu1 %v14094_v6  ;;  %v14535_v46 = vpop.f32.mrf.mxu1  ;;  %20194 = vst [vmem:[#allocation195_spill] sm:$0xff] %v14537_v20  ;;  %v20200_v6 = vld [vmem:[#allocation309_spill] sm:$0xff]  ;;  %v8945_v43 = vpop.eup %8944  ;;  %v3808_v29 = vmax.f32 %v20228_v51, 1e-10  ;;  %v20248_v2 = vld [vmem:[#allocation235_spill] sm:$0xff]  ;;  %vm20254_vm0 = vcmp.eq.f32.partialorder %v20252_v16, %v20253_v47  ;;  %v20263_v16 = vand.u32 4294901760, %v20238_v13 }
 0x491   :  { %20193 = vst [vmem:[#allocation149_spill] sm:$0xff] %v14535_v46  ;;  %5518 = vmatpush.msrb.mxu2 %v20197_v40  ;;  %5568 = vmatpush.msrb.mxu3 %v20198_v32  ;;  %vm20201_vm1 = vcmp.eq.f32.partialorder %v20199_v4, %v20200_v6  ;;  %v20231_v40 = vld [vmem:[#allocation169_spill] sm:$0xff]  ;;  %v20232_v4 = vld [vmem:[#allocation144_spill] sm:$0xff]  ;;  %v20233_v6 = vld [vmem:[#allocation295_spill] sm:$0xff]  ;;  %v4757_v0 = vmul.f32 1.442695, %v14596_v28 }
 0x492   :  { %20196 = vst [vmem:[#allocation126_spill] sm:$0xff] %v14540_v19  ;;  %vm14550_vm7 = vmxor %vm20201_vm1, %vm19295_vm13  ;;  %5426 = vmatpush.msrb.mxu0 %v20206_v57  ;;  %5458 = vmatpush.msrb.mxu1 %v20167_v15  ;;  %v20214_v15 = vld [vmem:[#allocation146_spill] sm:$0xff]  ;;  %vm20234_vm1 = vcmp.eq.f32.partialorder %v20232_v4, %v20233_v6  ;;  %v20270_v14 = vld [vmem:[#allocation77_spill] sm:$0xff] }
 0x493   :  { %20211 = vst [vmem:[#allocation115_spill] sm:$0xff] %v14564_v41  ;;  %5522 = vmatpush.msrb.mxu2 %v20212_v7  ;;  %5570 = vmatpush.msrb.mxu3 %v20213_v60  ;;  %vm20216_vm6 = vcmp.eq.f32.partialorder %v20214_v15, %v20215_v10  ;;  %vm4700_vm11 = vmand %vm14550_vm7, %vm20227_vm14  ;;  %v8947_v7 = vpop.eup %8946  ;;  %v20240_v15 = vld [vmem:[#allocation164_spill] sm:$0xff]  ;;  %v20257_v4 = vld [vmem:[#allocation122_spill] sm:$0xff] }
 0x494   :  { %vm14574_vm9 = vmxor %vm20216_vm6, %vm19295_vm13  ;;  %5429 = vmatpush.msrb.mxu0 %v20220_v54  ;;  %5460 = vmatpush.msrb.mxu1 %v20176_v31  ;;  %v4769_v31 = vmul.f32 1.442695, %v14540_v19  ;;  %v4892_v57 = vsel %vm4700_vm11, %v8943_v56, 0.0  ;;  %vm20241_vm7 = vcmp.eq.s32.totalorder %v20240_v15, %v20208_v38  ;;  %20244 = vst [vmem:[#allocation275_spill] sm:$0xff] %v14624_v49  ;;  %vm20249_vm6 = vcmp.eq.f32.partialorder %v20247_v55, %v20248_v2  ;;  %v8949_v55 = vpop.eup %8948  ;;  %v20260_v2 = vld [vmem:[#allocation290_spill] sm:$0xff]  ;;  %v20295_v35 = vld [vmem:[#allocation240_spill] sm:$0xff] }
 0x495   :  { %5526 = vmatpush.msrb.mxu2 %v20230_v63  ;;  %5572 = vmatpush.msrb.mxu3 %v20231_v40  ;;  %vm14606_vm12 = vmxor %vm20234_vm1, %vm19295_vm13  ;;  %v3804_v63 = vmax.f32 %v3679_v1, 1e-10  ;;  %vm20261_vm11 = vcmp.eq.s32.totalorder %v20260_v2, %v20208_v38  ;;  %v14663_v1 = vmul.f32 10.0, %v3808_v29  ;;  %v14669_v47 = vand.u32 4294901760, %v4892_v57  ;;  %v20265_v10 = vld [vmem:[#allocation274_spill] sm:$0xff]  ;;  %20269 = vst [vmem:[#allocation124_spill] sm:$0xff] %v14679_v11 }
 0x496   :  { %5432 = vmatpush.msrb.mxu0 %v20238_v13  ;;  %5462 = vmatpush.msrb.mxu1 %v20184_v42  ;;  %v14613_v3 = vpop.f32.mrf.mxu3  ;;  %vm14620_vm4 = vmand %vm14574_vm9, %vm20241_vm7  ;;  %v20245_v42 = vand.u32 4294901760, %v20220_v54  ;;  %8956 = vpow2.f32 %v4769_v31  ;;  %v3802_v29 = vmax.f32 %v3675_v8, 1e-10  ;;  %v20271_v31 = vmov 1.0   ;;  %v8951_v13 = vpop.eup %8950  ;;  %v20274_v8 = vld [vmem:[#allocation173_spill] sm:$0xff]  ;;  %v20276_v2 = vld [vmem:[#allocation264_spill] sm:$0xff] }
 0x497   :  { %20239 = vst [vmem:[#allocation183_spill] sm:$0xff] %v14613_v3  ;;  %5574 = vmatpush.msrb.mxu3 %v20246_v59  ;;  %v14630_v56 = vpop.f32.mrf.mxu0  ;;  %vm14638_vm9 = vmxor %vm20249_vm6, %vm19295_vm13  ;;  %5287 = vmatmul.f32.vlgmr.msra.gmra.mxu2 %v18760_v50  ;;  %v14654_v45 = vpop.f32.mrf.mxu2  ;;  %8958 = vpow2.f32 %v4761_v37  ;;  %v14704_v54 = vmul.f32 10.0, %v3804_v63  ;;  %v20281_v37 = vand.u32 4294901760, %v20257_v4  ;;  %v20292_v27 = vld [vmem:[#allocation258_spill] sm:$0xff]  ;;  %v20316_v48 = vld [vmem:[#allocation221_spill] sm:$0xff] }
 0x498   :  { %5530 = vmatpush.msrb.mxu2 %v20245_v42  ;;  %vm14646_vm14 = vmxor %vm20254_vm0, %vm19295_vm13  ;;  %5435 = vmatpush.msrb.mxu0 %v20257_v4  ;;  %v14652_v6 = vpop.f32.mrf.mxu1  ;;  %20259 = vst [vmem:[#allocation24_spill] sm:$0xff] %v14654_v45  ;;  %v4890_v42 = vsel %vm14620_vm4, %v8945_v43, 0.0  ;;  %v20264_v43 = vld [vmem:[#allocation143_spill] sm:$0xff]  ;;  %v8953_v17 = vpop.eup %8952  ;;  %8960 = vpow2.f32 %v4757_v0  ;;  %v4745_v0 = vmul.f32 1.442695, %v14679_v11  ;;  %v20303_v19 = vld [vmem:[#allocation226_spill] sm:$0xff] }
 0x499   :  { %20258 = vst [vmem:[#allocation145_spill] sm:$0xff] %v14652_v6  ;;  %vm4696_vm1 = vmand %vm14606_vm12, %vm20261_vm11  ;;  %5464 = vmatpush.msrb.mxu1 %v20198_v32  ;;  %vm20266_vm7 = vcmp.eq.f32.partialorder %v20264_v43, %v20265_v10  ;;  %5576 = vmatpush.msrb.mxu3 %v20270_v14  ;;  %v4753_v43 = vmul.f32 1.442695, %v14624_v49  ;;  %v14694_v10 = vand.u32 4294901760, %v4890_v42  ;;  %v8955_v4 = vpop.eup %8954  ;;  %v20325_v28 = vld [vmem:[#allocation213_spill] sm:$0xff]  ;;  %v20328_v51 = vld [vmem:[#allocation134_spill] sm:$0xff] }
 0x49a   :  { %20262 = vst [vmem:[#allocation114_spill] sm:$0xff] %v14663_v1  ;;  %5534 = vmatpush.msrb.mxu2 %v20263_v16  ;;  %vm14675_vm4 = vmxor %vm20266_vm7, %vm19295_vm13  ;;  %5215 = vmatmul.f32.vlgmr.msra.gmra.mxu0 %v20271_v31  ;;  %v4888_v32 = vsel %vm4696_vm1, %v8947_v7, 0.0  ;;  %v20272_v16 = vld [vmem:[#allocation279_spill] sm:$0xff]  ;;  %v20275_v7 = vld [vmem:[#allocation141_spill] sm:$0xff] }
 0x49b   :  { %vm20273_vm12 = vcmp.eq.s32.totalorder %v20272_v16, %v20208_v38  ;;  %5387 = vmatmul.f32.vlgmr.msra.gmra.mxu3 %v20271_v31  ;;  %5438 = vmatpush.msrb.mxu0 %v20274_v8  ;;  %vm20277_vm0 = vcmp.eq.f32.partialorder %v20275_v7, %v20276_v2  ;;  %20280 = vst [vmem:[#allocation110_spill] sm:$0xff] %v14704_v54  ;;  %v4749_v2 = vmul.f32 1.442695, %v14663_v1  ;;  %v20284_v7 = vld [vmem:[#allocation18_spill] sm:$0xff]  ;;  %v14720_v63 = vand.u32 4294901760, %v4888_v32  ;;  %v20319_v16 = vld [vmem:[#allocation133_spill] sm:$0xff] }
 0x49c   :  { %vm4694_vm6 = vmand %vm14646_vm14, %vm20273_vm12  ;;  %5466 = vmatpush.msrb.mxu1 %v20213_v60  ;;  %5538 = vmatpush.msrb.mxu2 %v20281_v37  ;;  %vm20283_vm14 = vcmp.eq.s32.totalorder %v20282_v25, %v20208_v38  ;;  %v14718_v60 = vsub.f32 %v4892_v57, %v14669_v47  ;;  %v20286_v37 = vld [vmem:[#allocation255_spill] sm:$0xff]  ;;  %v14730_v25 = vmul.f32 10.0, %v3802_v29  ;;  %v8957_v23 = vpop.eup %8956  ;;  %8962 = vpow2.f32 %v4753_v43  ;;  %v20346_v30 = vld [vmem:[#allocation184_spill] sm:$0xff] }
 0x49d   :  { %vm14700_vm11 = vmxor %vm20277_vm0, %vm19295_vm13  ;;  %v4886_v15 = vsel %vm4694_vm6, %v8949_v55, 0.0  ;;  %5578 = vmatpush.msrb.mxu3 %v20284_v7  ;;  %5251 = vmatmul.f32.vlgmr.msra.gmra.mxu1 %v20271_v31  ;;  %v20285_v55 = vld [vmem:[#allocation139_spill] sm:$0xff]  ;;  %v20294_v29 = vand.u32 4294901760, %v20274_v8  ;;  %vm20296_vm0 = vcmp.eq.s32.totalorder %v20295_v35, %v20208_v38  ;;  %8964 = vpow2.f32 %v4749_v2  ;;  %v20366_v6 = vld [vmem:[#allocation16_spill] sm:$0xff] }
 0x49e   :  { %vm4692_vm1 = vmand %vm14675_vm4, %vm20283_vm14  ;;  %vm20287_vm7 = vcmp.eq.f32.partialorder %v20285_v55, %v20286_v37  ;;  %20290 = vst [vmem:[#allocation282_spill] sm:$0xff] %v14730_v25  ;;  %5584 = vmatpush.msra.mxu0 %v14632_v62  ;;  %v14735_v57 = vpop.f32.mrf.mxu3  ;;  %vm20293_vm4 = vcmp.eq.s32.totalorder %v20292_v27, %v20208_v38  ;;  %5468 = vmatpush.msrb.mxu1 %v20231_v40  ;;  %v14750_v21 = vand.u32 4294901760, %v4886_v15  ;;  %v4741_v40 = vmul.f32 1.442695, %v14704_v54  ;;  %v20307_v27 = vld [vmem:[#allocation230_spill] sm:$0xff]  ;;  %v20329_v11 = vld [vmem:[#allocation199_spill] sm:$0xff] }
 0x49f   :  { %vm14726_vm12 = vmxor %vm20287_vm7, %vm19295_vm13  ;;  %5772 = vmatpush.msra.mxu3 %v14632_v62  ;;  %20291 = vst [vmem:[#allocation113_spill] sm:$0xff] %v14735_v57  ;;  %v4884_v12 = vsel %vm4692_vm1, %v8951_v13, 0.0  ;;  %5542 = vmatpush.msrb.mxu2 %v20294_v29  ;;  %v14745_v55 = vpop.f32.mrf.mxu0  ;;  %v14748_v37 = vsub.f32 %v4890_v42, %v14694_v10  ;;  %v14767_v43 = vpop.f32.mrf.mxu2  ;;  %v20300_v13 = vld [vmem:[#allocation249_spill] sm:$0xff]  ;;  %v14777_v5 = vsub.f32 %v4888_v32, %v14720_v63  ;;  %v4737_v2 = vmul.f32 1.442695, %v14730_v25  ;;  %v20334_v54 = vld [vmem:[#allocation204_spill] sm:$0xff] }
 0x4a0   :  { %vm4690_vm6 = vmand %vm14700_vm11, %vm20293_vm4  ;;  %5586 = vmatpush.msra.mxu0 %v14669_v47  ;;  %v14765_v42 = vpop.f32.mrf.mxu1  ;;  %20299 = vst [vmem:[#allocation120_spill] sm:$0xff] %v14767_v43  ;;  %v8959_v29 = vpop.eup %8958  ;;  %vm20301_vm14 = vcmp.eq.s32.totalorder %v20300_v13, %v20208_v38  ;;  %5470 = vmatpush.msrb.mxu1 %v20246_v59  ;;  %v14779_v35 = vand.u32 4294901760, %v4884_v12  ;;  %8966 = vpow2.f32 %v4745_v0  ;;  %v20359_v57 = vld [vmem:[#allocation60_spill] sm:$0xff] }
 0x4a1   :  { %vm14758_vm11 = vmand %vm14586_vm8, %vm20296_vm0  ;;  %5721 = vmatpush.msra.mxu2 %v14692_v22  ;;  %v4882_v8 = vsel %vm4690_vm6, %v8953_v17, 0.0  ;;  %5774 = vmatpush.msra.mxu3 %v14669_v47  ;;  %v20302_v17 = vld [vmem:[#allocation137_spill] sm:$0xff]  ;;  %v8961_v50 = vpop.eup %8960  ;;  %8968 = vpow2.f32 %v4741_v40  ;;  %vm20317_vm0 = vcmp.eq.s32.totalorder %v20316_v48, %v20208_v38 }
 0x4a2   :  { %vm4688_vm8 = vmand %vm14726_vm12, %vm20301_vm14  ;;  %vm20304_vm1 = vcmp.eq.f32.partialorder %v20302_v17, %v20303_v19  ;;  %5543 = vmatmul.f32.vlgmr.msrb.gmra.mxu2 %v20271_v31  ;;  %5588 = vmatpush.msra.mxu0 %v14694_v10  ;;  %v14795_v32 = vsel %vm14758_vm11, %v8955_v4, 0.0  ;;  %vm20308_vm12 = vcmp.eq.s32.totalorder %v20307_v27, %v20208_v38  ;;  %v20309_v19 = vand.u32 4294901760, %v14692_v22  ;;  %v20310_v17 = vld [vmem:[#allocation135_spill] sm:$0xff]  ;;  %v20311_v27 = vld [vmem:[#allocation218_spill] sm:$0xff] }
 0x4a3   :  { %vm14786_vm7 = vmxor %vm20304_vm1, %vm19295_vm13  ;;  %v4880_v59 = vsel %vm4688_vm8, %v8957_v23, 0.0  ;;  %5724 = vmatpush.msra.mxu2 %v14718_v60  ;;  %5776 = vmatpush.msra.mxu3 %v14694_v10  ;;  %v14808_v23 = vsub.f32 %v4886_v15, %v14750_v21  ;;  %v14810_v4 = vand.u32 4294901760, %v4882_v8  ;;  %vm20312_vm6 = vcmp.eq.f32.partialorder %v20310_v17, %v20311_v27  ;;  %v8963_v15 = vpop.eup %8962  ;;  %v20320_v48 = vld [vmem:[#allocation209_spill] sm:$0xff] }
 0x4a4   :  { %vm4684_vm4 = vmand %vm14638_vm9, %vm20308_vm12  ;;  %v5622_v0 = vsub.f32 %v14692_v22, %v20309_v19  ;;  %5472 = vmatpush.msrb.mxu1 %v20270_v14  ;;  %5439 = vmatmul.f32.vlgmr.msrb.gmra.mxu0 %v20315_v44  ;;  %v20318_v27 = vand.u32 4294901760, %v14718_v60  ;;  %v14836_v14 = vsub.f32 %v4884_v12, %v14779_v35  ;;  %vm20321_vm14 = vcmp.eq.f32.partialorder %v20319_v16, %v20320_v48  ;;  %v8965_v17 = vpop.eup %8964 }
 0x4a5   :  { %vm14817_vm9 = vmxor %vm20312_vm6, %vm19295_vm13  ;;  %v14823_v19 = vsel %vm4684_vm4, %v8959_v29, 0.0  ;;  %5579 = vmatmul.f32.vlgmr.msrb.gmra.mxu3 %v20271_v31  ;;  %5590 = vmatpush.msra.mxu0 %v14720_v63  ;;  %v14838_v29 = vand.u32 4294901760, %v4880_v59  ;;  %8970 = vpow2.f32 %v4737_v2  ;;  %v14854_v12 = vand.u32 4294901760, %v14795_v32 }
 0x4a6   :  { %vm4682_vm11 = vmand %vm14786_vm7, %vm20317_vm0  ;;  %v5628_v40 = vsub.f32 %v14718_v60, %v20318_v27  ;;  %5727 = vmatpush.msra.mxu2 %v14748_v37  ;;  %5778 = vmatpush.msra.mxu3 %v14720_v63  ;;  %v14851_v27 = vpop.f32.mrf.mxu3  ;;  %vm20326_vm1 = vcmp.eq.s32.totalorder %v20325_v28, %v20208_v38  ;;  %v5623_v48 = vand.u32 4294901760, %v5622_v0  ;;  %v20327_v2 = vand.u32 4294901760, %v14748_v37  ;;  %v8967_v28 = vpop.eup %8966 }
 0x4a7   :  { %vm14845_vm8 = vmxor %vm20321_vm14, %vm19295_vm13  ;;  %20324 = vst [vmem:[#allocation107_spill] sm:$0xff] %v14851_v27  ;;  %v4874_v41 = vsel %vm4682_vm11, %v8961_v50, 0.0  ;;  %5474 = vmatpush.msrb.mxu1 %v20284_v7  ;;  %5592 = vmatpush.msra.mxu0 %v14750_v21  ;;  %v14866_v49 = vpop.f32.mrf.mxu0  ;;  %v14869_v50 = vsub.f32 %v4882_v8, %v14810_v4  ;;  %vm20330_vm12 = vcmp.eq.f32.partialorder %v20328_v51, %v20329_v11  ;;  %v14887_v8 = vand.u32 4294901760, %v14823_v19  ;;  %v20360_v27 = vld [vmem:[#allocation63_spill] sm:$0xff] }
 0x4a8   :  { %vm4680_vm7 = vmand %vm14817_vm9, %vm20326_vm1  ;;  %v5634_v16 = vsub.f32 %v14748_v37, %v20327_v2  ;;  %5475 = vmatmul.f32.vlgmr.msrb.gmra.mxu1 %v20315_v44  ;;  %5730 = vmatpush.msra.mxu2 %v14777_v5  ;;  %v14882_v0 = vpop.f32.mrf.mxu1  ;;  %v14884_v2 = vpop.f32.mrf.mxu2  ;;  %vm20335_vm6 = vcmp.eq.s32.totalorder %v20334_v54, %v20208_v38  ;;  %v5629_v11 = vand.u32 4294901760, %v5628_v40  ;;  %v20336_v51 = vand.u32 4294901760, %v14777_v5  ;;  %v20338_v54 = vld [vmem:[#allocation190_spill] sm:$0xff] }
 0x4a9   :  { %vm14876_vm4 = vmxor %vm20330_vm12, %vm19295_vm13  ;;  %20333 = vst [vmem:[#allocation35_spill] sm:$0xff] %v14884_v2  ;;  %v4872_v1 = vsel %vm4680_vm7, %v8963_v15, 0.0  ;;  %5624 = vmatpush.msra.mxu1 %v5623_v48  ;;  %5780 = vmatpush.msra.mxu3 %v14750_v21  ;;  %v14899_v24 = vsub.f32 %v4880_v59, %v14838_v29  ;;  %v8969_v15 = vpop.eup %8968  ;;  %vm20339_vm0 = vcmp.eq.f32.partialorder %v20337_v39, %v20338_v54  ;;  %v14912_v40 = vand.u32 4294901760, %v4874_v41  ;;  %v20342_v59 = vld [vmem:[#allocation194_spill] sm:$0xff] }
 0x4aa   :  { %vm4678_vm9 = vmand %vm14845_vm8, %vm20335_vm6  ;;  %v5640_v25 = vsub.f32 %v14777_v5, %v20336_v51  ;;  %5594 = vmatpush.msra.mxu0 %v14779_v35  ;;  %5733 = vmatpush.msra.mxu2 %v14808_v23  ;;  %vm20343_vm14 = vcmp.eq.s32.totalorder %v20342_v59, %v20208_v38  ;;  %v5635_v39 = vand.u32 4294901760, %v5634_v16  ;;  %v20344_v54 = vand.u32 4294901760, %v14808_v23  ;;  %v20345_v59 = vld [vmem:[#allocation132_spill] sm:$0xff] }
 0x4ab   :  { %vm14906_vm11 = vmxor %vm20339_vm0, %vm19295_vm13  ;;  %v4870_v48 = vsel %vm4678_vm9, %v8965_v17, 0.0  ;;  %5630 = vmatpush.msra.mxu1 %v5629_v11  ;;  %5782 = vmatpush.msra.mxu3 %v14779_v35  ;;  %v14925_v36 = vsub.f32 %v14795_v32, %v14854_v12  ;;  %v8971_v52 = vpop.eup %8970  ;;  %vm20347_vm1 = vcmp.eq.f32.partialorder %v20345_v59, %v20346_v30  ;;  %v14938_v16 = vand.u32 4294901760, %v4872_v1  ;;  %v20350_v32 = vld [vmem:[#allocation182_spill] sm:$0xff] }
 0x4ac   :  { %vm4676_vm8 = vmand %vm14876_vm4, %vm20343_vm14  ;;  %v5646_v51 = vsub.f32 %v14808_v23, %v20344_v54  ;;  %5596 = vmatpush.msra.mxu0 %v14810_v4  ;;  %5736 = vmatpush.msra.mxu2 %v14836_v14  ;;  %vm20351_vm12 = vcmp.eq.s32.totalorder %v20350_v32, %v20208_v38  ;;  %v5641_v30 = vand.u32 4294901760, %v5640_v25  ;;  %v20352_v59 = vand.u32 4294901760, %v14836_v14  ;;  %v20354_v25 = vld [vmem:[#allocation178_spill] sm:$0xff] }
 0x4ad   :  { %vm14932_vm7 = vmxor %vm20347_vm1, %vm19295_vm13  ;;  %v4868_v11 = vsel %vm4676_vm8, %v8967_v28, 0.0  ;;  %5636 = vmatpush.msra.mxu1 %v5635_v39  ;;  %5784 = vmatpush.msra.mxu3 %v14810_v4  ;;  %v14951_v17 = vsub.f32 %v14823_v19, %v14887_v8  ;;  %v14958_v39 = vand.u32 4294901760, %v4870_v48  ;;  %vm20355_vm13 = vcmp.eq.s32.totalorder %v20354_v25, %v20208_v38 }
 0x4ae   :  { %vm4674_vm4 = vmand %vm14906_vm11, %vm20351_vm12  ;;  %v5652_v54 = vsub.f32 %v14836_v14, %v20352_v59  ;;  %5598 = vmatpush.msra.mxu0 %v14838_v29  ;;  %5739 = vmatpush.msra.mxu2 %v14869_v50  ;;  %v14956_v13 = vpop.f32.mrf.mxu3  ;;  %v5647_v19 = vand.u32 4294901760, %v5646_v51  ;;  %v20356_v59 = vand.u32 4294901760, %v14869_v50  ;;  %v14970_v9 = vsub.f32 %v4874_v41, %v14912_v40 }
 0x4af   :  { %20353 = vst [vmem:[#allocation117_spill] sm:$0xff] %v14956_v13  ;;  %v4866_v32 = vsel %vm4674_vm4, %v8969_v15, 0.0  ;;  %vm4672_vm6 = vmand %vm14932_vm7, %vm20355_vm13  ;;  %5642 = vmatpush.msra.mxu1 %v5641_v30  ;;  %5786 = vmatpush.msra.mxu3 %v14838_v29  ;;  %v3179_v3 = vpop.f32.mrf.mxu0  ;;  %v14979_v30 = vand.u32 4294901760, %v4868_v11  ;;  %v20357_v41 = vand.u32 4294901760, %v14899_v24  ;;  %v14986_v15 = vsub.f32 %v4872_v1, %v14938_v16 }
 0x4b0   :  { %v5658_v28 = vsub.f32 %v14869_v50, %v20356_v59  ;;  %5600 = vmatpush.msra.mxu0 %v14854_v12  ;;  %5742 = vmatpush.msra.mxu2 %v14899_v24  ;;  %v14975_v38 = vpop.f32.mrf.mxu1  ;;  %v14977_v7 = vpop.f32.mrf.mxu2  ;;  %v4864_v51 = vsel %vm4672_vm6, %v8971_v52, 0.0  ;;  %v5653_v59 = vand.u32 4294901760, %v5652_v54  ;;  %v14991_v20 = vand.u32 4294901760, %v4866_v32 }
 0x4b1   :  { %5648 = vmatpush.msra.mxu1 %v5647_v19  ;;  %5788 = vmatpush.msra.mxu3 %v14854_v12  ;;  %v5664_v25 = vsub.f32 %v14899_v24, %v20357_v41  ;;  %v20358_v54 = vand.u32 4294901760, %v14925_v36  ;;  %v14998_v41 = vsub.f32 %v4870_v48, %v14958_v39  ;;  %v2979_v45 = vadd.f32 %v20360_v27, %v20359_v57 }
 0x4b2   :  { %5602 = vmatpush.msra.mxu0 %v14887_v8  ;;  %5745 = vmatpush.msra.mxu2 %v14925_v36  ;;  %v5659_v52 = vand.u32 4294901760, %v5658_v28  ;;  %v15012_v13 = vsub.f32 %v4868_v11, %v14979_v30  ;;  %v15018_v27 = vsub.f32 %v4866_v32, %v14991_v20 }
 0x4b3   :  { %5654 = vmatpush.msra.mxu1 %v5653_v59  ;;  %5790 = vmatpush.msra.mxu3 %v14887_v8  ;;  %v5670_v19 = vsub.f32 %v14925_v36, %v20358_v54  ;;  %v15005_v59 = vand.u32 4294901760, %v4864_v51  ;;  %v5665_v28 = vand.u32 4294901760, %v5664_v25  ;;  %v20361_v54 = vand.u32 4294901760, %v14951_v17 }
 0x4b4   :  { %5604 = vmatpush.msra.mxu0 %v14912_v40  ;;  %5748 = vmatpush.msra.mxu2 %v14951_v17 }
 0x4b5   :  { %5660 = vmatpush.msra.mxu1 %v5659_v52  ;;  %5792 = vmatpush.msra.mxu3 %v14912_v40  ;;  %v5676_v48 = vsub.f32 %v14951_v17, %v20361_v54  ;;  %v3180_v52 = vadd.f32 %v3179_v3, %v2979_v45  ;;  %v5671_v25 = vand.u32 4294901760, %v5670_v19  ;;  %v20362_v54 = vand.u32 4294901760, %v14970_v9 }
 0x4b6   :  { %5606 = vmatpush.msra.mxu0 %v14938_v16  ;;  %5751 = vmatpush.msra.mxu2 %v14970_v9  ;;  %v3766_v57 = vpop.f32.mrf.mxu3  ;;  %v15028_v32 = vsub.f32 %v4864_v51, %v15005_v59  ;;  %v20363_v19 = vand.u32 4294901760, %v14986_v15 }
 0x4b7   :  { %5666 = vmatpush.msra.mxu1 %v5665_v28  ;;  %5794 = vmatpush.msra.mxu3 %v14938_v16  ;;  %v5682_v11 = vsub.f32 %v14970_v9, %v20362_v54  ;;  %v3184_v43 = vpop.f32.mrf.mxu0  ;;  %v5677_v3 = vand.u32 4294901760, %v5676_v48  ;;  %v18780_v54 = vand.u32 4294901760, %v15012_v13 }
 0x4b8   :  { %5608 = vmatpush.msra.mxu0 %v14958_v39  ;;  %5754 = vmatpush.msra.mxu2 %v14986_v15  ;;  %v3396_v46 = vpop.f32.mrf.mxu1  ;;  %v3605_v2 = vpop.f32.mrf.mxu2  ;;  %v5688_v28 = vsub.f32 %v14986_v15, %v20363_v19 }
 0x4b9   :  { %5672 = vmatpush.msra.mxu1 %v5671_v25  ;;  %5796 = vmatpush.msra.mxu3 %v14958_v39  ;;  %v3397_v45 = vadd.f32 %v3396_v46, %v3180_v52  ;;  %v5683_v51 = vand.u32 4294901760, %v5682_v11  ;;  %v20364_v25 = vand.u32 4294901760, %v14998_v41  ;;  %v5705_v46 = vand.u32 4294901760, %v15018_v27  ;;  %v20365_v52 = vld [vmem:[#allocation15_spill] sm:$0xff] }
 0x4ba   :  { %5610 = vmatpush.msra.mxu0 %v14979_v30  ;;  %5757 = vmatpush.msra.mxu2 %v14998_v41  ;;  %v2983_v19 = vadd.f32 %v20366_v6, %v20365_v52  ;;  %v5689_v11 = vand.u32 4294901760, %v5688_v28  ;;  %v20367_v28 = vand.u32 4294901760, %v14692_v22 }
 0x4bb   :  { %5678 = vmatpush.msra.mxu1 %v5677_v3  ;;  %5798 = vmatpush.msra.mxu3 %v14979_v30  ;;  %v3606_v1 = vadd.f32 %v3605_v2, %v3397_v45  ;;  %v5694_v48 = vsub.f32 %v14998_v41, %v20364_v25  ;;  %v5700_v2 = vsub.f32 %v15012_v13, %v18780_v54 }
 0x4bc   :  { %5612 = vmatpush.msra.mxu0 %v14991_v20  ;;  %5760 = vmatpush.msra.mxu2 %v15012_v13  ;;  %v3185_v25 = vadd.f32 %v3184_v43, %v2983_v19  ;;  %v20368_v19 = vand.u32 4294901760, %v15028_v32 }
 0x4bd   :  { %5684 = vmatpush.msra.mxu1 %v5683_v51  ;;  %5800 = vmatpush.msra.mxu3 %v14991_v20  ;;  %v15047_v3 = vadd.f32 %v3766_v57, %v3606_v1  ;;  %v5695_v51 = vand.u32 4294901760, %v5694_v48  ;;  %v5706_v1 = vsub.f32 %v15018_v27, %v5705_v46  ;;  %v5701_v45 = vand.u32 4294901760, %v5700_v2 }
 0x4be   :  { %5614 = vmatpush.msra.mxu0 %v15005_v59  ;;  %5763 = vmatpush.msra.mxu2 %v15018_v27  ;;  %v3770_v6 = vpop.f32.mrf.mxu3  ;;  %v5712_v48 = vsub.f32 %v15028_v32, %v20368_v19 }
 0x4bf   :  { %5690 = vmatpush.msra.mxu1 %v5689_v11  ;;  %5802 = vmatpush.msra.mxu3 %v15005_v59  ;;  %v15059_v57 = vpop.f32.mrf.mxu0  ;;  %v20369_v11 = vand.u32 4294901760, %v14718_v60  ;;  %v5707_v22 = vand.u32 4294901760, %v5706_v1 }
 0x4c0   :  { %5810 = vmatpush.msrb.mxu0 %v20367_v28  ;;  %5766 = vmatpush.msra.mxu2 %v15028_v32  ;;  %v3402_v52 = vpop.f32.mrf.mxu1  ;;  %v3609_v54 = vpop.f32.mrf.mxu2 }
 0x4c1   :  { %5696 = vmatpush.msra.mxu1 %v5695_v51  ;;  %v3403_v43 = vadd.f32 %v3402_v52, %v3185_v25  ;;  %5615 = vmatmul.f32.vlgmr.msra.gmra.mxu0 %v20315_v44  ;;  %v20370_v51 = vand.u32 4294901760, %v14748_v37  ;;  %v5713_v25 = vand.u32 4294901760, %v5712_v48  ;;  %v20371_v52 = vand.u32 4294901760, %v14777_v5  ;;  %v20387_v48 = vld [vmem:[#allocation56_spill] sm:$0xff] }
 0x4c2   :  { %5814 = vmatpush.msrb.mxu0 %v20369_v11  ;;  %5767 = vmatmul.f32.vlgmr.msra.gmra.mxu2 %v20315_v44  ;;  %v20374_v5 = vand.u32 4294901760, %v14869_v50  ;;  %v20377_v50 = vand.u32 4294901760, %v14951_v17 }
 0x4c3   :  { %5702 = vmatpush.msra.mxu1 %v5701_v45  ;;  %v3610_v28 = vadd.f32 %v3609_v54, %v3403_v43  ;;  %5803 = vmatmul.f32.vlgmr.msra.gmra.mxu3 %v20315_v44  ;;  %v20372_v45 = vand.u32 4294901760, %v14808_v23  ;;  %v20375_v23 = vand.u32 4294901760, %v14899_v24  ;;  %v20376_v43 = vand.u32 4294901760, %v14925_v36 }
 0x4c4   :  { %5818 = vmatpush.msrb.mxu0 %v20370_v51  ;;  %v20378_v24 = vand.u32 4294901760, %v14970_v9  ;;  %v20381_v9 = vand.u32 4294901760, %v15012_v13 }
 0x4c5   :  { %5708 = vmatpush.msra.mxu1 %v5707_v22  ;;  %v15074_v2 = vadd.f32 %v3770_v6, %v3610_v28  ;;  %v20373_v6 = vand.u32 4294901760, %v14836_v14  ;;  %v20389_v28 = vld [vmem:[#allocation13_spill] sm:$0xff] }
 0x4c6   :  { %5822 = vmatpush.msrb.mxu0 %v20371_v52  ;;  %v15078_v19 = vpop.f32.mrf.mxu3 }
 0x4c7   :  { %5714 = vmatpush.msra.mxu1 %v5713_v25  ;;  %v3194_v60 = vpop.f32.mrf.mxu0 }
 0x4c8   :  { %5826 = vmatpush.msrb.mxu0 %v20372_v45  ;;  %v15083_v54 = vpop.f32.mrf.mxu1  ;;  %v15085_v37 = vpop.f32.mrf.mxu2  ;;  %5715 = vmatmul.f32.vlgmr.msra.gmra.mxu1 %v20271_v31 }
 0x4c9   :  { %5876 = vmatpush.msrb.mxu1 %v14632_v62 }
 0x4ca   :  { %5830 = vmatpush.msrb.mxu0 %v20373_v6  ;;  %v20391_v6 = vld [vmem:[#allocation54_spill] sm:$0xff] }
 0x4cb   :  { %5878 = vmatpush.msrb.mxu1 %v14669_v47 }
 0x4cc   :  { %5834 = vmatpush.msrb.mxu0 %v20374_v5 }
 0x4cd   :  { %5880 = vmatpush.msrb.mxu1 %v14694_v10  ;;  %v20379_v10 = vand.u32 4294901760, %v14986_v15 }
 0x4ce   :  { %5838 = vmatpush.msrb.mxu0 %v20375_v23  ;;  %v15097_v62 = vpop.f32.mrf.mxu3 }
 0x4cf   :  { %5882 = vmatpush.msrb.mxu1 %v14720_v63  ;;  %v3199_v1 = vpop.f32.mrf.mxu0  ;;  %v20380_v63 = vand.u32 4294901760, %v14998_v41  ;;  %v20384_v41 = vld [vmem:[#allocation52_spill] sm:$0xff] }
 0x4d0   :  { %5842 = vmatpush.msrb.mxu0 %v20376_v43  ;;  %v3414_v14 = vpop.f32.mrf.mxu1  ;;  %v3617_v47 = vpop.f32.mrf.mxu2 }
 0x4d1   :  { %5884 = vmatpush.msrb.mxu1 %v14750_v21 }
 0x4d2   :  { %5846 = vmatpush.msrb.mxu0 %v20377_v50 }
 0x4d3   :  { %5886 = vmatpush.msrb.mxu1 %v14779_v35 }
 0x4d4   :  { %5850 = vmatpush.msrb.mxu0 %v20378_v24 }
 0x4d5   :  { %5888 = vmatpush.msrb.mxu1 %v14810_v4  ;;  %v20382_v4 = vand.u32 4294901760, %v15028_v32  ;;  %v20386_v32 = vld [vmem:[#allocation65_spill] sm:$0xff] }
 0x4d6   :  { %5854 = vmatpush.msrb.mxu0 %v20379_v10  ;;  %v15111_v36 = vpop.f32.mrf.mxu3 }
 0x4d7   :  { %5890 = vmatpush.msrb.mxu1 %v14838_v29  ;;  %v3204_v21 = vpop.f32.mrf.mxu0 }
 0x4d8   :  { %5858 = vmatpush.msrb.mxu0 %v20380_v63  ;;  %v3420_v17 = vpop.f32.mrf.mxu1  ;;  %v3621_v35 = vpop.f32.mrf.mxu2  ;;  %v20394_v63 = vld [vmem:[#allocation170_spill] sm:$0xff] }
 0x4d9   :  { %5892 = vmatpush.msrb.mxu1 %v14854_v12 }
 0x4da   :  { %5862 = vmatpush.msrb.mxu0 %v20381_v9 }
 0x4db   :  { %5894 = vmatpush.msrb.mxu1 %v14887_v8  ;;  %v20383_v8 = vld [vmem:[#allocation47_spill] sm:$0xff] }
 0x4dc   :  { %5866 = vmatpush.msrb.mxu0 %v5705_v46  ;;  %v2999_v27 = vadd.f32 %v20384_v41, %v20383_v8 }
 0x4dd   :  { %5896 = vmatpush.msrb.mxu1 %v14912_v40  ;;  %v20385_v40 = vld [vmem:[#allocation62_spill] sm:$0xff] }
 0x4de   :  { %5870 = vmatpush.msrb.mxu0 %v20382_v4  ;;  %v3786_v29 = vpop.f32.mrf.mxu3  ;;  %v2995_v46 = vadd.f32 %v20386_v32, %v20385_v40  ;;  %v3205_v22 = vadd.f32 %v3204_v21, %v2999_v27  ;;  %v20393_v21 = vld [vmem:[#allocation177_spill] sm:$0xff]  ;;  %v20395_v27 = vld [vmem:[#allocation68_spill] sm:$0xff]  ;;  %v20396_v40 = vld [vmem:[#allocation74_spill] sm:$0xff] }
 0x4df   :  { %5898 = vmatpush.msrb.mxu1 %v14938_v16  ;;  %v3209_v15 = vpop.f32.mrf.mxu0  ;;  %5871 = vmatmul.f32.vlgmr.msrb.gmra.mxu0 %v20271_v31  ;;  %v20388_v16 = vld [vmem:[#allocation12_spill] sm:$0xff]  ;;  %v2975_v32 = vadd.f32 %v20396_v40, %v20395_v27 }
 0x4e0   :  { %v3426_v12 = vpop.f32.mrf.mxu1  ;;  %v3625_v13 = vpop.f32.mrf.mxu2  ;;  %v3003_v11 = vadd.f32 %v20388_v16, %v20387_v48  ;;  %v3200_v25 = vadd.f32 %v3199_v1, %v2995_v46  ;;  %v20397_v46 = vld [vmem:[#allocation32_spill] sm:$0xff] }
 0x4e1   :  { %5900 = vmatpush.msrb.mxu1 %v14958_v39  ;;  %v20390_v39 = vld [vmem:[#allocation222_spill] sm:$0xff] }
 0x4e2   :  { %v2991_v51 = vadd.f32 %v20390_v39, %v20389_v28  ;;  %v3210_v52 = vadd.f32 %v3209_v15, %v3003_v11  ;;  %v3421_v24 = vadd.f32 %v3420_v17, %v3200_v25  ;;  %v20399_v11 = vld [vmem:[#allocation78_spill] sm:$0xff]  ;;  %v20402_v39 = vld [vmem:[#allocation119_spill] sm:$0xff] }
 0x4e3   :  { %5902 = vmatpush.msrb.mxu1 %v14979_v30  ;;  %v3427_v30 = vadd.f32 %v3426_v12, %v3205_v22  ;;  %v20400_v22 = vld [vmem:[#allocation75_spill] sm:$0xff] }
 0x4e4   :  { %v3195_v50 = vadd.f32 %v3194_v60, %v2991_v51  ;;  %v20398_v60 = vld [vmem:[#allocation11_spill] sm:$0xff]  ;;  %v3622_v48 = vadd.f32 %v3621_v35, %v3421_v24  ;;  %v2955_v28 = vadd.f32 %v20400_v22, %v20399_v11  ;;  %v20415_v22 = vld [vmem:[#allocation149_spill] sm:$0xff] }
 0x4e5   :  { %5904 = vmatpush.msrb.mxu1 %v14991_v20  ;;  %v20392_v20 = vld [vmem:[#allocation67_spill] sm:$0xff]  ;;  %v3626_v15 = vadd.f32 %v3625_v13, %v3427_v30  ;;  %v3007_v17 = vadd.f32 %v20398_v60, %v20397_v46  ;;  %v20403_v13 = vld [vmem:[#allocation17_spill] sm:$0xff] }
 0x4e6   :  { %v3790_v45 = vpop.f32.mrf.mxu3  ;;  %v2987_v5 = vadd.f32 %v20392_v20, %v20391_v6  ;;  %v3415_v1 = vadd.f32 %v3414_v14, %v3195_v50  ;;  %v20404_v51 = vld [vmem:[#allocation327_spill] sm:$0xff]  ;;  %v20405_v20 = vld [vmem:[#allocation66_spill] sm:$0xff] }
 0x4e7   :  { %5906 = vmatpush.msrb.mxu1 %v15005_v59  ;;  %v2951_v59 = vadd.f32 %v20394_v63, %v20393_v21  ;;  %v3214_v4 = vpop.f32.mrf.mxu0  ;;  %v2971_v25 = vadd.f32 %v20404_v51, %v20403_v13  ;;  %v3787_v30 = vadd.f32 %v3786_v29, %v3626_v15  ;;  %v20408_v21 = vld [vmem:[#allocation150_spill] sm:$0xff]  ;;  %v20409_v29 = vld [vmem:[#allocation9_spill] sm:$0xff] }
 0x4e8   :  { %5907 = vmatmul.f32.vlgmr.msrb.gmra.mxu1 %v20271_v31  ;;  %v3432_v23 = vpop.f32.mrf.mxu1  ;;  %v3629_v43 = vpop.f32.mrf.mxu2  ;;  %v3190_v9 = vadd.f32 %v15059_v57, %v2987_v5  ;;  %v20401_v57 = vld [vmem:[#allocation20_spill] sm:$0xff]  ;;  %v3215_v6 = vadd.f32 %v3214_v4, %v3007_v17  ;;  %v20406_v5 = vld [vmem:[#allocation326_spill] sm:$0xff]  ;;  %v3150_v4 = vadd.f32 %v14427_v18, %v2955_v28  ;;  %v20413_v17 = vld [vmem:[#allocation35_spill] sm:$0xff] }
 0x4e9   :  { %v3433_v10 = vadd.f32 %v3432_v23, %v3210_v52  ;;  %v3145_v8 = vadd.f32 %v14405_v34, %v2951_v59  ;;  %v2959_v14 = vadd.f32 %v20402_v39, %v20401_v57  ;;  %v3618_v52 = vadd.f32 %v3617_v47, %v3415_v1  ;;  %v20410_v59 = vld [vmem:[#allocation53_spill] sm:$0xff] }
 0x4ea   :  { %v3409_v41 = vadd.f32 %v15083_v54, %v3190_v9  ;;  %v3175_v54 = vadd.f32 %v14866_v49, %v2975_v32  ;;  %v2967_v35 = vadd.f32 %v20406_v5, %v20405_v20  ;;  %v3783_v49 = vadd.f32 %v15111_v36, %v3622_v48 }
 0x4eb   :  { %v3630_v12 = vadd.f32 %v3629_v43, %v3433_v10  ;;  %v3355_v34 = vadd.f32 %v14432_v26, %v3145_v8  ;;  %v20407_v10 = vld [vmem:[#allocation81_spill] sm:$0xff]  ;;  %v3011_v9 = vadd.f32 %v20410_v59, %v20409_v29  ;;  %v3858_v8 = vmax.f32 %v3787_v30, 1e-10 }
 0x4ec   :  { %v3614_v23 = vadd.f32 %v15085_v37, %v3409_v41  ;;  %v2963_v63 = vadd.f32 %v20408_v21, %v20407_v10  ;;  %v3391_v26 = vadd.f32 %v14975_v38, %v3175_v54  ;;  %v3856_v32 = vmax.f32 %v3783_v49, 1e-10  ;;  %v20425_v10 = vld [vmem:[#allocation113_spill] sm:$0xff] }
 0x4ed   :  { %v3791_v16 = vadd.f32 %v3790_v45, %v3630_v12  ;;  %v3170_v45 = vadd.f32 %v14745_v55, %v2971_v25  ;;  %v3165_v55 = vadd.f32 %v14630_v56, %v2967_v35  ;;  %v15172_v15 = vadd.f32 %v14434_v53, %v3355_v34  ;;  %v20420_v34 = vld [vmem:[#allocation24_spill] sm:$0xff]  ;;  %v20427_v29 = vld [vmem:[#allocation129_spill] sm:$0xff] }
 0x4ee   :  { %v3794_v1 = vpop.f32.mrf.mxu3  ;;  %v3779_v12 = vadd.f32 %v15097_v62, %v3618_v52  ;;  %v3160_v36 = vadd.f32 %v14520_v61, %v2963_v63  ;;  %v3775_v27 = vadd.f32 %v15078_v19, %v3614_v23  ;;  %v3155_v56 = vadd.f32 %v14467_v33, %v2959_v14  ;;  %v20412_v62 = vld [vmem:[#allocation145_spill] sm:$0xff]  ;;  %v20416_v33 = vld [vmem:[#allocation120_spill] sm:$0xff]  ;;  %v20421_v52 = vld [vmem:[#allocation107_spill] sm:$0xff] }
 0x4ef   :  { %v3860_v43 = vmax.f32 %v3791_v16, 1e-10  ;;  %v3385_v37 = vadd.f32 %v14882_v0, %v3170_v45  ;;  %v3379_v41 = vadd.f32 %v14765_v42, %v3165_v55  ;;  %v3219_v18 = vpop.f32.mrf.mxu0  ;;  %v3602_v0 = vadd.f32 %v14977_v7, %v3391_v26 }
 0x4f0   :  { %v3438_v50 = vpop.f32.mrf.mxu1  ;;  %v3633_v24 = vpop.f32.mrf.mxu2  ;;  %v3361_v46 = vadd.f32 %v14473_v58, %v3150_v4  ;;  %v3373_v60 = vadd.f32 %v20412_v62, %v3160_v36  ;;  %v3850_v61 = vmax.f32 %v15074_v2, 1e-10  ;;  %v3854_v42 = vmax.f32 %v3779_v12, 1e-10  ;;  %v20417_v58 = vld [vmem:[#allocation117_spill] sm:$0xff] }
 0x4f1   :  { %v3439_v47 = vadd.f32 %v3438_v50, %v3215_v6  ;;  %v15178_v40 = vmul.f32 10.0, %v3860_v43  ;;  %v3598_v48 = vadd.f32 %v20413_v17, %v3385_v37  ;;  %v15186_v16 = vmul.f32 10.0, %v3858_v8  ;;  %v20424_v50 = vld [vmem:[#allocation195_spill] sm:$0xff] }
 0x4f2   :  { %v3220_v19 = vadd.f32 %v3219_v18, %v3011_v9  ;;  %v3367_v28 = vadd.f32 %v20415_v22, %v3155_v56  ;;  %v3594_v57 = vadd.f32 %v20416_v33, %v3379_v41  ;;  %v3852_v7 = vmax.f32 %v3775_v27, 1e-10  ;;  %v20428_v9 = vld [vmem:[#allocation183_spill] sm:$0xff] }
 0x4f3   :  { %v3634_v38 = vadd.f32 %v3633_v24, %v3439_v47  ;;  %20411 = vst [vmem:[#allocation40_spill] sm:$0xff] %v15178_v40  ;;  %v4853_v39 = vmul.f32 1.442695, %v15178_v40  ;;  %v3763_v13 = vadd.f32 %v20417_v58, %v3602_v0  ;;  %v15192_v51 = vmul.f32 10.0, %v3856_v32  ;;  %v20433_v32 = vld [vmem:[#allocation159_spill] sm:$0xff]  ;;  %v20563_v40 = vld [vmem:[#allocation318_spill] sm:$0xff] }
 0x4f4   :  { %20414 = vst [vmem:[#allocation287_spill] sm:$0xff] %v15186_v16  ;;  %v3590_v54 = vadd.f32 %v20420_v34, %v3373_v60  ;;  %v3759_v30 = vadd.f32 %v20421_v52, %v3598_v48  ;;  %v3848_v6 = vmax.f32 %v15047_v3, 1e-10  ;;  %v15199_v20 = vmul.f32 10.0, %v3850_v61 }
 0x4f5   :  { %v3795_v53 = vadd.f32 %v3794_v1, %v3634_v38  ;;  %20418 = vst [vmem:[#allocation106_spill] sm:$0xff] %v15192_v51  ;;  %v15201_v35 = vmul.f32 10.0, %v3854_v42  ;;  %v4849_v45 = vmul.f32 1.442695, %v15186_v16  ;;  %v3586_v24 = vadd.f32 %v20424_v50, %v3367_v28  ;;  %v20430_v38 = vld [vmem:[#allocation152_spill] sm:$0xff] }
 0x4f6   :  { %20422 = vst [vmem:[#allocation42_spill] sm:$0xff] %v15199_v20  ;;  %v3755_v21 = vadd.f32 %v20425_v10, %v3594_v57  ;;  %v15207_v63 = vmul.f32 10.0, %v3852_v7  ;;  %8972 = vpow2.f32 %v4853_v39  ;;  %v3798_v26 = vpop.f32.mrf.mxu3  ;;  %v3846_v49 = vmax.f32 %v3763_v13, 1e-10 }
 0x4f7   :  { %v3862_v11 = vmax.f32 %v3795_v53, 1e-10  ;;  %20423 = vst [vmem:[#allocation293_spill] sm:$0xff] %v15201_v35  ;;  %v4845_v3 = vmul.f32 1.442695, %v15192_v51  ;;  %v3582_v59 = vadd.f32 %v20427_v29, %v3361_v46  ;;  %v3751_v4 = vadd.f32 %v20428_v9, %v3590_v54  ;;  %v20434_v46 = vld [vmem:[#allocation157_spill] sm:$0xff] }
 0x4f8   :  { %v3444_v14 = vpop.f32.mrf.mxu1  ;;  %v3637_v5 = vpop.f32.mrf.mxu2  ;;  %20426 = vst [vmem:[#allocation104_spill] sm:$0xff] %v15207_v63  ;;  %v3844_v55 = vmax.f32 %v3759_v30, 1e-10  ;;  %v4833_v37 = vmul.f32 1.442695, %v15199_v20  ;;  %v15213_v1 = vmul.f32 10.0, %v3848_v6  ;;  %v3747_v36 = vadd.f32 %v20430_v38, %v3586_v24 }
 0x4f9   :  { %v15194_v25 = vmul.f32 10.0, %v3862_v11  ;;  %v3445_v2 = vadd.f32 %v3444_v14, %v3220_v19  ;;  %v4841_v12 = vmul.f32 1.442695, %v15201_v35  ;;  %v4837_v41 = vmul.f32 1.442695, %v15207_v63 }
 0x4fa   :  { %20429 = vst [vmem:[#allocation109_spill] sm:$0xff] %v15213_v1  ;;  %v3842_v27 = vmax.f32 %v3755_v21, 1e-10  ;;  %v15218_v18 = vmul.f32 10.0, %v3846_v49  ;;  %v3739_v53 = vadd.f32 %v20433_v32, %v15172_v15  ;;  %v3743_v62 = vadd.f32 %v20434_v46, %v3582_v59 }
 0x4fb   :  { %20419 = vst [vmem:[#allocation111_spill] sm:$0xff] %v15194_v25  ;;  %v4857_v23 = vmul.f32 1.442695, %v15194_v25  ;;  %v3638_v43 = vadd.f32 %v3637_v5, %v3445_v2  ;;  %v3840_v60 = vmax.f32 %v3751_v4, 1e-10  ;;  %v15225_v48 = vmul.f32 10.0, %v3844_v55 }
 0x4fc   :  { %20431 = vst [vmem:[#allocation39_spill] sm:$0xff] %v15218_v18  ;;  %v8973_v0 = vpop.eup %8972  ;;  %v4829_v61 = vmul.f32 1.442695, %v15213_v1  ;;  %v3838_v19 = vmax.f32 %v3747_v36, 1e-10  ;;  %v15231_v33 = vmul.f32 10.0, %v3842_v27 }
 0x4fd   :  { %8974 = vpow2.f32 %v4857_v23  ;;  %v3799_v47 = vadd.f32 %v3798_v26, %v3638_v43  ;;  %20435 = vst [vmem:[#allocation101_spill] sm:$0xff] %v15225_v48  ;;  %v4825_v15 = vmul.f32 1.442695, %v15218_v18  ;;  %v3836_v57 = vmax.f32 %v3743_v62, 1e-10  ;;  %v20450_v62 = vld [vmem:[#allocation262_spill] sm:$0xff] }
 0x4fe   :  { %8976 = vpow2.f32 %v4849_v45  ;;  %20437 = vst [vmem:[#allocation105_spill] sm:$0xff] %v15231_v33  ;;  %v15234_v7 = vmul.f32 10.0, %v3840_v60  ;;  %v4922_v14 = vsel %vm12841_vm3, %v8973_v0, 0.0  ;;  %v3834_v13 = vmax.f32 %v3739_v53, 1e-10  ;;  %v20448_v53 = vld [vmem:[#allocation271_spill] sm:$0xff] }
 0x4ff   :  { %v3864_v8 = vmax.f32 %v3799_v47, 1e-10  ;;  %8978 = vpow2.f32 %v4845_v3  ;;  %v4821_v2 = vmul.f32 1.442695, %v15225_v48  ;;  %v15241_v52 = vmul.f32 10.0, %v3838_v19  ;;  %v4960_v47 = vpop.f32.mrf.mxu0  ;;  %v20588_v1 = vld [vmem:[#allocation242_spill] sm:$0xff] }
 0x500   :  { %8980 = vpow2.f32 %v4833_v37  ;;  %20438 = vst [vmem:[#allocation50_spill] sm:$0xff] %v15234_v7  ;;  %v4817_v45 = vmul.f32 1.442695, %v15231_v33  ;;  %v5060_v23 = vpop.f32.mrf.mxu1  ;;  %v15246_v43 = vand.u32 4294901760, %v4922_v14  ;;  %v15248_v24 = vmul.f32 10.0, %v3836_v57  ;;  %v20594_v48 = vld [vmem:[#allocation22_spill] sm:$0xff] }
 0x501   :  { %v15220_v56 = vmul.f32 10.0, %v3864_v8  ;;  %8982 = vpow2.f32 %v4841_v12  ;;  %20440 = vst [vmem:[#allocation302_spill] sm:$0xff] %v15241_v52  ;;  %v4813_v10 = vmul.f32 1.442695, %v15234_v7  ;;  %v15253_v3 = vmul.f32 10.0, %v3834_v13  ;;  %v20446_v12 = vld [vmem:[#allocation281_spill] sm:$0xff] }
 0x502   :  { %8984 = vpow2.f32 %v4837_v41  ;;  %20442 = vst [vmem:[#allocation41_spill] sm:$0xff] %v15248_v24  ;;  %v4809_v9 = vmul.f32 1.442695, %v15241_v52  ;;  %v5061_v4 = vadd.f32 %v5060_v23, %v4960_v47  ;;  %vm20447_vm3 = vnez %v20446_v12  ;;  %v5112_v41 = vpop.f32.mrf.mxu2 }
 0x503   :  { %20432 = vst [vmem:[#allocation298_spill] sm:$0xff] %v15220_v56  ;;  %v8975_v17 = vpop.eup %8974  ;;  %v4861_v42 = vmul.f32 1.442695, %v15220_v56  ;;  %v15268_v27 = vsub.f32 %v4922_v14, %v15246_v43  ;;  %v4805_v32 = vmul.f32 1.442695, %v15248_v24  ;;  %v5148_v14 = vpop.f32.mrf.mxu3  ;;  %v20565_v56 = vld [vmem:[#allocation48_spill] sm:$0xff] }
 0x504   :  { %v4924_v22 = vsel %vm12932_vm15, %v8975_v17, 0.0  ;;  %v8977_v28 = vpop.eup %8976  ;;  %20444 = vst [vmem:[#allocation103_spill] sm:$0xff] %v15253_v3  ;;  %vm20449_vm15 = vnez %v20448_v53 }
 0x505   :  { %8986 = vpow2.f32 %v4861_v42  ;;  %v8979_v58 = vpop.eup %8978  ;;  %v15239_v34 = vand.u32 4294901760, %v4924_v22  ;;  %v4920_v6 = vsel %vm12745_vm2, %v8977_v28, 0.0  ;;  %v5113_v28 = vadd.f32 %v5112_v41, %v5061_v4 }
 0x506   :  { %8988 = vpow2.f32 %v4829_v61  ;;  %v8981_v54 = vpop.eup %8980  ;;  %v4918_v26 = vsel %vm12646_vm10, %v8979_v58, 0.0  ;;  %v15258_v59 = vand.u32 4294901760, %v4920_v6  ;;  %vm20451_vm10 = vnez %v20450_v62 }
 0x507   :  { %v8983_v5 = vpop.eup %8982  ;;  %8990 = vpow2.f32 %v4825_v15  ;;  %v15256_v29 = vsub.f32 %v4924_v22, %v15239_v34  ;;  %v15270_v0 = vand.u32 4294901760, %v4918_v26  ;;  %v4912_v60 = vsel %vm20451_vm10, %v8981_v54, 0.0  ;;  %v20452_v15 = vld [vmem:[#allocation251_spill] sm:$0xff] }
 0x508   :  { %v8985_v50 = vpop.eup %8984  ;;  %8992 = vpow2.f32 %v4821_v2  ;;  %v4916_v8 = vsel %vm20447_vm3, %v8983_v5, 0.0  ;;  %v15283_v42 = vsub.f32 %v4920_v6, %v15258_v59  ;;  %v4801_v22 = vmul.f32 1.442695, %v15253_v3  ;;  %v20454_v6 = vld [vmem:[#allocation241_spill] sm:$0xff] }
 0x509   :  { %8994 = vpow2.f32 %v4817_v45  ;;  %v4914_v46 = vsel %vm20449_vm15, %v8985_v50, 0.0  ;;  %v15285_v19 = vand.u32 4294901760, %v4916_v8  ;;  %v18786_v11 = vand.u32 4294901760, %v15256_v29 }
 0x50a   :  { %8996 = vpow2.f32 %v4813_v10  ;;  %vm20453_vm2 = vnez %v20452_v15  ;;  %v15295_v13 = vsub.f32 %v4918_v26, %v15270_v0  ;;  %v15297_v2 = vand.u32 4294901760, %v4914_v46 }
 0x50b   :  { %v8987_v49 = vpop.eup %8986  ;;  %8998 = vpow2.f32 %v4809_v9  ;;  %v18784_v54 = vand.u32 4294901760, %v15268_v27  ;;  %v15301_v30 = vand.u32 4294901760, %v4912_v60  ;;  %v5956_v50 = vsub.f32 %v15256_v29, %v18786_v11  ;;  %v20456_v9 = vld [vmem:[#allocation233_spill] sm:$0xff] }
 0x50c   :  { %v4926_v37 = vsel %vm13003_vm5, %v8987_v49, 0.0  ;;  %v8989_v38 = vpop.eup %8988  ;;  %9000 = vpow2.f32 %v4805_v32  ;;  %vm20455_vm5 = vnez %v20454_v6  ;;  %v15314_v10 = vsub.f32 %v4916_v8, %v15285_v19  ;;  %v20458_v32 = vld [vmem:[#allocation224_spill] sm:$0xff]  ;;  %v20460_v6 = vld [vmem:[#allocation61_spill] sm:$0xff] }
 0x50d   :  { %v15265_v36 = vand.u32 4294901760, %v4926_v37  ;;  %v8991_v17 = vpop.eup %8990  ;;  %v4910_v57 = vsel %vm20453_vm2, %v8989_v38, 0.0  ;;  %v18782_v21 = vand.u32 4294901760, %v15283_v42  ;;  %9002 = vpow2.f32 %v4801_v22 }
 0x50e   :  { %v8993_v39 = vpop.eup %8992  ;;  %v4908_v5 = vsel %vm20455_vm5, %v8991_v17, 0.0  ;;  %v5149_v49 = vadd.f32 %v5148_v14, %v5113_v28  ;;  %v15318_v47 = vand.u32 4294901760, %v4910_v57  ;;  %vm20457_vm9 = vnez %v20456_v9 }
 0x50f   :  { %5912 = vmatpush.msrb.mxu2 %v15265_v36  ;;  %6100 = vmatpush.msra.mxu1 %v15265_v36  ;;  %v15280_v61 = vsub.f32 %v4926_v37, %v15265_v36  ;;  %v8995_v45 = vpop.eup %8994  ;;  %v4906_v4 = vsel %vm20457_vm9, %v8993_v39, 0.0  ;;  %v5962_v37 = vsub.f32 %v15268_v27, %v18784_v54  ;;  %v15328_v12 = vsub.f32 %v4914_v46, %v15297_v2 }
 0x510   :  { %v8997_v26 = vpop.eup %8996  ;;  %v18781_v8 = vand.u32 4294901760, %v15295_v13  ;;  %v15332_v41 = vand.u32 4294901760, %v4908_v5  ;;  %vm20459_vm0 = vnez %v20458_v32  ;;  %v5957_v17 = vand.u32 4294901760, %v5956_v50 }
 0x511   :  { %5914 = vmatpush.msrb.mxu2 %v15239_v34  ;;  %6049 = vmatpush.msra.mxu0 %v15280_v61  ;;  %v18790_v58 = vand.u32 4294901760, %v15280_v61  ;;  %v8999_v38 = vpop.eup %8998  ;;  %v4904_v53 = vsel %vm20459_vm0, %v8995_v45, 0.0  ;;  %v5968_v46 = vsub.f32 %v15283_v42, %v18782_v21  ;;  %v15341_v22 = vsub.f32 %v4912_v60, %v15301_v30 }
 0x512   :  { %6102 = vmatpush.msra.mxu1 %v15239_v34  ;;  %v18783_v28 = vand.u32 4294901760, %v15314_v10  ;;  %v9001_v15 = vpop.eup %9000  ;;  %v15346_v14 = vand.u32 4294901760, %v4906_v4  ;;  %vm20461_vm11 = vnez %v20460_v6  ;;  %v5974_v60 = vsub.f32 %v15295_v13, %v18781_v8 }
 0x513   :  { %5916 = vmatpush.msrb.mxu2 %v15246_v43  ;;  %6052 = vmatpush.msra.mxu0 %v15256_v29  ;;  %v5950_v23 = vsub.f32 %v15280_v61, %v18790_v58  ;;  %v4902_v45 = vsel %vm20461_vm11, %v8997_v26, 0.0  ;;  %v15355_v50 = vsub.f32 %v4910_v57, %v15318_v47  ;;  %v9003_v9 = vpop.eup %9002  ;;  %v15361_v26 = vsub.f32 %v4908_v5, %v15332_v41 }
 0x514   :  { %6104 = vmatpush.msra.mxu1 %v15246_v43  ;;  %v15363_v32 = vand.u32 4294901760, %v4904_v53  ;;  %v5969_v57 = vand.u32 4294901760, %v5968_v46  ;;  %v5980_v8 = vsub.f32 %v15314_v10, %v18783_v28  ;;  %v18789_v21 = vand.u32 4294901760, %v15341_v22 }
 0x515   :  { %5918 = vmatpush.msrb.mxu2 %v15258_v59  ;;  %6055 = vmatpush.msra.mxu0 %v15268_v27  ;;  %v5951_v55 = vand.u32 4294901760, %v5950_v23  ;;  %v5963_v23 = vand.u32 4294901760, %v5962_v37  ;;  %v20462_v37 = vld [vmem:[#allocation205_spill] sm:$0xff]  ;;  %v15375_v5 = vsub.f32 %v4906_v4, %v15346_v14  ;;  %v5975_v46 = vand.u32 4294901760, %v5974_v60 }
 0x516   :  { %6106 = vmatpush.msra.mxu1 %v15258_v59  ;;  %vm20463_vm14 = vnez %v20462_v37  ;;  %v18787_v28 = vand.u32 4294901760, %v15355_v50  ;;  %v15389_v4 = vsub.f32 %v4904_v53, %v15363_v32 }
 0x517   :  { %v5216_v62 = vpop.f32.mrf.mxu0  ;;  %5920 = vmatpush.msrb.mxu2 %v15270_v0  ;;  %5952 = vmatpush.msrb.mxu3 %v5951_v55 }
 0x518   :  { %v5217_v39 = vadd.f32 %v5216_v62, %v5149_v49  ;;  %6058 = vmatpush.msra.mxu0 %v15283_v42  ;;  %6108 = vmatpush.msra.mxu1 %v15270_v0  ;;  %v18785_v49 = vand.u32 4294901760, %v15328_v12  ;;  %v4900_v62 = vsel %vm20463_vm14, %v8999_v38, 0.0  ;;  %v15377_v38 = vand.u32 4294901760, %v4902_v45 }
 0x519   :  { %5922 = vmatpush.msrb.mxu2 %v15285_v19  ;;  %5958 = vmatpush.msrb.mxu3 %v5957_v17 }
 0x51a   :  { %v5252_v55 = vpop.f32.mrf.mxu1  ;;  %6061 = vmatpush.msra.mxu0 %v15295_v13  ;;  %6110 = vmatpush.msra.mxu1 %v15285_v19  ;;  %v5288_v6 = vpop.f32.mrf.mxu2  ;;  %v5986_v37 = vsub.f32 %v15328_v12, %v18785_v49  ;;  %v18788_v49 = vand.u32 4294901760, %v15361_v26 }
 0x51b   :  { %v5253_v17 = vadd.f32 %v5252_v55, %v5217_v39  ;;  %5924 = vmatpush.msrb.mxu2 %v15297_v2  ;;  %5964 = vmatpush.msrb.mxu3 %v5963_v23  ;;  %v20464_v39 = vld [vmem:[#allocation197_spill] sm:$0xff] }
 0x51c   :  { %6064 = vmatpush.msra.mxu0 %v15314_v10  ;;  %6112 = vmatpush.msra.mxu1 %v15297_v2  ;;  %vm20465_vm8 = vnez %v20464_v39  ;;  %v5992_v39 = vsub.f32 %v15341_v22, %v18789_v21 }
 0x51d   :  { %v4898_v55 = vsel %vm20465_vm8, %v9001_v15, 0.0  ;;  %v5289_v23 = vadd.f32 %v5288_v6, %v5253_v17  ;;  %5926 = vmatpush.msrb.mxu2 %v15301_v30  ;;  %5970 = vmatpush.msrb.mxu3 %v5969_v57  ;;  %v15391_v15 = vand.u32 4294901760, %v4900_v62  ;;  %v20466_v17 = vld [vmem:[#allocation88_spill] sm:$0xff]  ;;  %v5981_v57 = vand.u32 4294901760, %v5980_v8 }
 0x51e   :  { %v5388_v54 = vpop.f32.mrf.mxu3  ;;  %6067 = vmatpush.msra.mxu0 %v15328_v12  ;;  %6114 = vmatpush.msra.mxu1 %v15301_v30  ;;  %vm20467_vm1 = vnez %v20466_v17  ;;  %v15402_v53 = vand.u32 4294901760, %v4898_v55  ;;  %v5998_v8 = vsub.f32 %v15355_v50, %v18787_v28  ;;  %v6015_v28 = vand.u32 4294901760, %v15389_v4 }
 0x51f   :  { %v4896_v6 = vsel %vm20467_vm1, %v9003_v9, 0.0  ;;  %v5389_v60 = vadd.f32 %v5388_v54, %v5289_v23  ;;  %5928 = vmatpush.msrb.mxu2 %v15318_v47  ;;  %5976 = vmatpush.msrb.mxu3 %v5975_v46  ;;  %v5987_v54 = vand.u32 4294901760, %v5986_v37  ;;  %v15409_v9 = vsub.f32 %v4902_v45, %v15377_v38 }
 0x520   :  { %6070 = vmatpush.msra.mxu0 %v15341_v22  ;;  %6116 = vmatpush.msra.mxu1 %v15318_v47  ;;  %v18791_v23 = vand.u32 4294901760, %v15375_v5  ;;  %v15414_v17 = vand.u32 4294901760, %v4896_v6  ;;  %v5993_v37 = vand.u32 4294901760, %v5992_v39  ;;  %v15421_v45 = vsub.f32 %v4900_v62, %v15391_v15 }
 0x521   :  { %v5440_v11 = vpop.f32.mrf.mxu0  ;;  %5930 = vmatpush.msrb.mxu2 %v15332_v41  ;;  %5982 = vmatpush.msrb.mxu3 %v5981_v57  ;;  %v6004_v57 = vsub.f32 %v15361_v26, %v18788_v49  ;;  %v15431_v49 = vsub.f32 %v4898_v55, %v15402_v53 }
 0x522   :  { %v5441_v46 = vadd.f32 %v5440_v11, %v5389_v60  ;;  %6073 = vmatpush.msra.mxu0 %v15355_v50  ;;  %6118 = vmatpush.msra.mxu1 %v15332_v41  ;;  %v6010_v39 = vsub.f32 %v15375_v5, %v18791_v23  ;;  %v6027_v55 = vand.u32 4294901760, %v15421_v45 }
 0x523   :  { %5932 = vmatpush.msrb.mxu2 %v15346_v14  ;;  %5988 = vmatpush.msrb.mxu3 %v5987_v54  ;;  %v5999_v54 = vand.u32 4294901760, %v5998_v8  ;;  %v6005_v58 = vand.u32 4294901760, %v6004_v57  ;;  %v6016_v8 = vsub.f32 %v15389_v4, %v6015_v28  ;;  %v20468_v57 = vand.u32 4294901760, %v15409_v9 }
 0x524   :  { %6076 = vmatpush.msra.mxu0 %v15361_v26  ;;  %6120 = vmatpush.msra.mxu1 %v15346_v14 }
 0x525   :  { %v5476_v11 = vpop.f32.mrf.mxu1  ;;  %v5544_v60 = vpop.f32.mrf.mxu2  ;;  %5934 = vmatpush.msrb.mxu2 %v15363_v32  ;;  %5994 = vmatpush.msrb.mxu3 %v5993_v37  ;;  %v15441_v37 = vsub.f32 %v4896_v6, %v15414_v17  ;;  %v6017_v6 = vand.u32 4294901760, %v6016_v8  ;;  %v20469_v8 = vand.u32 4294901760, %v15280_v61  ;;  %v20471_v61 = vand.u32 4294901760, %v15268_v27 }
 0x526   :  { %v5477_v21 = vadd.f32 %v5476_v11, %v5441_v46  ;;  %6079 = vmatpush.msra.mxu0 %v15375_v5  ;;  %6122 = vmatpush.msra.mxu1 %v15363_v32  ;;  %v6011_v46 = vand.u32 4294901760, %v6010_v39  ;;  %v6022_v11 = vsub.f32 %v15409_v9, %v20468_v57  ;;  %v20475_v27 = vand.u32 4294901760, %v15328_v12 }
 0x527   :  { %5936 = vmatpush.msrb.mxu2 %v15377_v38  ;;  %6000 = vmatpush.msrb.mxu3 %v5999_v54  ;;  %v6033_v54 = vand.u32 4294901760, %v15431_v49 }
 0x528   :  { %v5545_v23 = vadd.f32 %v5544_v60, %v5477_v21  ;;  %v5580_v62 = vpop.f32.mrf.mxu3  ;;  %6082 = vmatpush.msra.mxu0 %v15389_v4  ;;  %6124 = vmatpush.msra.mxu1 %v15377_v38  ;;  %v6039_v60 = vand.u32 4294901760, %v15441_v37  ;;  %v6023_v39 = vand.u32 4294901760, %v6022_v11  ;;  %v20470_v11 = vand.u32 4294901760, %v15256_v29  ;;  %v20486_v4 = vld [vmem:[#allocation168_spill] sm:$0xff] }
 0x529   :  { %5938 = vmatpush.msrb.mxu2 %v15391_v15  ;;  %6006 = vmatpush.msrb.mxu3 %v6005_v58  ;;  %v6028_v58 = vsub.f32 %v15421_v45, %v6027_v55  ;;  %v20473_v29 = vand.u32 4294901760, %v15295_v13  ;;  %v20477_v13 = vand.u32 4294901760, %v15355_v50 }
 0x52a   :  { %6085 = vmatpush.msra.mxu0 %v15409_v9  ;;  %6126 = vmatpush.msra.mxu1 %v15391_v15  ;;  %v5581_v21 = vadd.f32 %v5580_v62, %v5545_v23  ;;  %v6034_v23 = vsub.f32 %v15431_v49, %v6033_v54  ;;  %v6040_v57 = vsub.f32 %v15441_v37, %v6039_v60 }
 0x52b   :  { %5940 = vmatpush.msrb.mxu2 %v15402_v53  ;;  %6012 = vmatpush.msrb.mxu3 %v6011_v46  ;;  %v6029_v46 = vand.u32 4294901760, %v6028_v58  ;;  %v20472_v58 = vand.u32 4294901760, %v15283_v42 }
 0x52c   :  { %6088 = vmatpush.msra.mxu0 %v15421_v45  ;;  %6128 = vmatpush.msra.mxu1 %v15402_v53  ;;  %v6239_v62 = vmax.f32 %v5581_v21, 1e-10  ;;  %v6041_v21 = vand.u32 4294901760, %v6040_v57  ;;  %v20489_v57 = vld [vmem:[#allocation263_spill] sm:$0xff]  ;;  %v20493_v45 = vld [vmem:[#allocation158_spill] sm:$0xff] }
 0x52d   :  { %5942 = vmatpush.msrb.mxu2 %v15414_v17  ;;  %6018 = vmatpush.msrb.mxu3 %v6017_v6  ;;  %v6035_v6 = vand.u32 4294901760, %v6034_v23  ;;  %v20474_v23 = vand.u32 4294901760, %v15314_v10  ;;  %v20479_v10 = vand.u32 4294901760, %v15375_v5  ;;  %v20484_v5 = vand.u32 4294901760, %v15409_v9  ;;  %v20488_v9 = vld [vmem:[#allocation200_spill] sm:$0xff] }
 0x52e   :  { %6091 = vmatpush.msra.mxu0 %v15431_v49  ;;  %6130 = vmatpush.msra.mxu1 %v15414_v17  ;;  %9004 = vlog2.f32 %v6239_v62  ;;  %v20485_v62 = vld [vmem:[#allocation172_spill] sm:$0xff]  ;;  %vm20490_vm6 = vnez %v20489_v57  ;;  %v20501_v49 = vld [vmem:[#allocation85_spill] sm:$0xff] }
 0x52f   :  { %6138 = vmatpush.msra.mxu2 %v20469_v8  ;;  %6024 = vmatpush.msrb.mxu3 %v6023_v39 }
 0x530   :  { %6094 = vmatpush.msra.mxu0 %v15441_v37  ;;  %5943 = vmatmul.f32.vlgmr.msrb.gmra.mxu2 %v20315_v44  ;;  %v20506_v37 = vld [vmem:[#allocation73_spill] sm:$0xff] }
 0x531   :  { %6142 = vmatpush.msra.mxu2 %v20470_v11  ;;  %6030 = vmatpush.msrb.mxu3 %v6029_v46  ;;  %v20494_v11 = vld [vmem:[#allocation273_spill] sm:$0xff] }
 0x532   :  { %6095 = vmatmul.f32.vlgmr.msra.gmra.mxu0 %v20315_v44  ;;  %6131 = vmatmul.f32.vlgmr.msra.gmra.mxu1 %v20315_v44  ;;  %vm20495_vm10 = vnez %v20494_v11 }
 0x533   :  { %6146 = vmatpush.msra.mxu2 %v20471_v61  ;;  %6036 = vmatpush.msrb.mxu3 %v6035_v6  ;;  %v20498_v6 = vld [vmem:[#allocation70_spill] sm:$0xff] }
 0x534   :  { %v9005_v39 = vpop.eup %9004 }
 0x535   :  { %6150 = vmatpush.msra.mxu2 %v20472_v58  ;;  %6042 = vmatpush.msrb.mxu3 %v6041_v21  ;;  %v6242_v42 = vmul.f32 0.6931472, %v9005_v39  ;;  %v20499_v21 = vld [vmem:[#allocation284_spill] sm:$0xff]  ;;  %v20502_v58 = vld [vmem:[#allocation261_spill] sm:$0xff] }
 0x536   :  { %6043 = vmatmul.f32.vlgmr.msrb.gmra.mxu3 %v20271_v31  ;;  %vm20500_vm9 = vnez %v20499_v21 }
 0x537   :  { %6204 = vmatpush.msra.mxu3 %v15265_v36  ;;  %6154 = vmatpush.msra.mxu2 %v20473_v29  ;;  %v20476_v36 = vand.u32 4294901760, %v15341_v22 }
 0x539   :  { %6206 = vmatpush.msra.mxu3 %v15239_v34  ;;  %6158 = vmatpush.msra.mxu2 %v20474_v23  ;;  %v15497_v34 = vperm.slane %v6242_v42, 0  ;;  %v20504_v23 = vld [vmem:[#allocation294_spill] sm:$0xff] }
 0x53a   :  { %vm20505_vm14 = vnez %v20504_v23 }
 0x53b   :  { %6208 = vmatpush.msra.mxu3 %v15246_v43  ;;  %6162 = vmatpush.msra.mxu2 %v20475_v27  ;;  %v20478_v43 = vand.u32 4294901760, %v15361_v26  ;;  %v6279_v46 = vsub.f32 %v20488_v9, %v15497_v34  ;;  %v15550_v61 = vsub.f32 %v20498_v6, %v15497_v34  ;;  %v15562_v29 = vsub.f32 %v20502_v58, %v15497_v34  ;;  %v20507_v27 = vld [vmem:[#allocation301_spill] sm:$0xff]  ;;  %v20518_v9 = vld [vmem:[#allocation31_spill] sm:$0xff] }
 0x53c   :  { %v15830_v16 = vsub.f32 %v20565_v56, %v15497_v34 }
 0x53d   :  { %6210 = vmatpush.msra.mxu3 %v15258_v59  ;;  %6166 = vmatpush.msra.mxu2 %v20476_v36  ;;  %v20480_v59 = vld [vmem:[#allocation162_spill] sm:$0xff]  ;;  %vm6343_vm1 = vcmp.ge.f32.partialorder %v6279_v46, -23.02585 }
 0x53e   :  { %v6265_v12 = vsub.f32 %v20480_v59, %v15497_v34 }
 0x53f   :  { %6212 = vmatpush.msra.mxu3 %v15270_v0  ;;  %6170 = vmatpush.msra.mxu2 %v20477_v13  ;;  %v20481_v0 = vld [vmem:[#allocation166_spill] sm:$0xff]  ;;  %v20509_v13 = vld [vmem:[#allocation153_spill] sm:$0xff] }
 0x540   :  { %v6267_v22 = vsub.f32 %v20481_v0, %v15497_v34  ;;  %vm6329_vm7 = vcmp.ge.f32.partialorder %v6265_v12, -23.02585 }
 0x541   :  { %6214 = vmatpush.msra.mxu3 %v15285_v19  ;;  %6174 = vmatpush.msra.mxu2 %v20478_v43  ;;  %v20482_v19 = vld [vmem:[#allocation90_spill] sm:$0xff]  ;;  %vm15533_vm3 = vmand %vm20490_vm6, %vm6329_vm7  ;;  %vm20508_vm7 = vnez %v20507_v27  ;;  %v15580_v43 = vsub.f32 %v20509_v13, %v15497_v34 }
 0x542   :  { %v6269_v50 = vsub.f32 %v20482_v19, %v15497_v34  ;;  %vm6331_vm12 = vcmp.ge.f32.partialorder %v6267_v22, -23.02585  ;;  %v20513_v19 = vld [vmem:[#allocation320_spill] sm:$0xff]  ;;  %v6457_v57 = vsel %vm15533_vm3, %v6265_v12, 0.0 }
 0x543   :  { %6216 = vmatpush.msra.mxu3 %v15297_v2  ;;  %6178 = vmatpush.msra.mxu2 %v20479_v10  ;;  %v20483_v2 = vld [vmem:[#allocation175_spill] sm:$0xff]  ;;  %vm15543_vm2 = vmand %vm20495_vm10, %vm6331_vm12  ;;  %v20524_v12 = vld [vmem:[#allocation244_spill] sm:$0xff] }
 0x544   :  { %v6271_v26 = vsub.f32 %v20483_v2, %v15497_v34  ;;  %vm6333_vm4 = vcmp.ge.f32.partialorder %v6269_v50, -23.02585  ;;  %v20510_v10 = vld [vmem:[#allocation123_spill] sm:$0xff] }
 0x545   :  { %6218 = vmatpush.msra.mxu3 %v15301_v30  ;;  %6182 = vmatpush.msra.mxu2 %v6015_v28  ;;  %v6273_v30 = vsub.f32 %v20485_v62, %v15497_v34  ;;  %v6275_v28 = vsub.f32 %v20486_v4, %v15497_v34  ;;  %vm6397_vm0 = vmand %vm20500_vm9, %vm6333_vm4  ;;  %v6259_v59 = vsub.f32 %v20510_v10, %v15497_v34  ;;  %v20515_v62 = vld [vmem:[#allocation179_spill] sm:$0xff]  ;;  %v20530_v10 = vld [vmem:[#allocation33_spill] sm:$0xff] }
 0x546   :  { %vm6335_vm13 = vcmp.ge.f32.partialorder %v6271_v26, -23.02585  ;;  %v6461_v42 = vsel %vm6397_vm0, %v6269_v50, 0.0  ;;  %v6459_v50 = vsel %vm15543_vm2, %v6267_v22, 0.0  ;;  %vm20516_vm0 = vnez %v20515_v62  ;;  %v20519_v22 = vld [vmem:[#allocation254_spill] sm:$0xff] }
 0x547   :  { %6220 = vmatpush.msra.mxu3 %v15318_v47  ;;  %6186 = vmatpush.msra.mxu2 %v20484_v5  ;;  %v20487_v47 = vld [vmem:[#allocation160_spill] sm:$0xff]  ;;  %vm6337_vm15 = vcmp.ge.f32.partialorder %v6273_v30, -23.02585  ;;  %vm6339_vm5 = vcmp.ge.f32.partialorder %v6275_v28, -23.02585  ;;  %vm6399_vm8 = vmand %vm20505_vm14, %vm6335_vm13  ;;  %v15627_v6 = vand.u32 4294901760, %v6459_v50 }
 0x548   :  { %v6277_v8 = vsub.f32 %v20487_v47, %v15497_v34  ;;  %vm6401_vm12 = vmand %vm20508_vm7, %vm6337_vm15  ;;  %v6463_v36 = vsel %vm6399_vm8, %v6271_v26, 0.0  ;;  %vm20514_vm15 = vnez %v20513_v19  ;;  %v20517_v47 = vld [vmem:[#allocation84_spill] sm:$0xff]  ;;  %vm6323_vm8 = vcmp.ge.f32.partialorder %v6259_v59, -23.02585 }
 0x549   :  { %6222 = vmatpush.msra.mxu3 %v15332_v41  ;;  %6190 = vmatpush.msra.mxu2 %v6027_v55  ;;  %v6263_v55 = vsub.f32 %v20493_v45, %v15497_v34  ;;  %v6465_v0 = vsel %vm6401_vm12, %v6273_v30, 0.0  ;;  %v15595_v5 = vand.u32 4294901760, %v6463_v36  ;;  %vm4415_vm2 = vcmp.ne.s32.totalorder %v20518_v9, %v20517_v47  ;;  %v20553_v9 = vld [vmem:[#allocation72_spill] sm:$0xff] }
 0x54a   :  { %vm6341_vm11 = vcmp.ge.f32.partialorder %v6277_v8, -23.02585  ;;  %v15593_v26 = vand.u32 4294901760, %v6465_v0  ;;  %vm20525_vm7 = vnez %v20524_v12  ;;  %v20540_v12 = vld [vmem:[#allocation225_spill] sm:$0xff] }
 0x54b   :  { %6224 = vmatpush.msra.mxu3 %v15346_v14  ;;  %6194 = vmatpush.msra.mxu2 %v6033_v54  ;;  %v15558_v54 = vsub.f32 %v20501_v49, %v15497_v34  ;;  %vm6327_vm4 = vcmp.ge.f32.partialorder %v6263_v55, -23.02585  ;;  %vm6405_vm10 = vmand %vm20514_vm15, %vm6341_vm11  ;;  %vm20520_vm11 = vnez %v20519_v22  ;;  %v15647_v49 = vsub.f32 %v6463_v36, %v15595_v5  ;;  %v20529_v36 = vld [vmem:[#allocation8_spill] sm:$0xff] }
 0x54c   :  { %v6469_v30 = vsel %vm6405_vm10, %v6277_v8, 0.0  ;;  %vm15610_vm14 = vmand %vm20520_vm11, %vm6327_vm4  ;;  %v15621_v11 = vsub.f32 %v6465_v0, %v15593_v26  ;;  %v15665_v13 = vsub.f32 %v20529_v36, %v15497_v34  ;;  %vm20531_vm4 = vnez %v20530_v10  ;;  %v20534_v0 = vld [vmem:[#allocation25_spill] sm:$0xff] }
 0x54d   :  { %6226 = vmatpush.msra.mxu3 %v15363_v32  ;;  %6198 = vmatpush.msra.mxu2 %v6039_v60  ;;  %v20503_v32 = vld [vmem:[#allocation116_spill] sm:$0xff]  ;;  %v15573_v60 = vsub.f32 %v20506_v37, %v15497_v34  ;;  %v15618_v45 = vand.u32 4294901760, %v6469_v30  ;;  %v20528_v37 = vld [vmem:[#allocation253_spill] sm:$0xff]  ;;  %v15680_v19 = vsub.f32 %v20534_v0, %v15497_v34  ;;  %vm20541_vm10 = vnez %v20540_v12 }
 0x54e   :  { %v6261_v39 = vsub.f32 %v20503_v32, %v15497_v34  ;;  %6199 = vmatmul.f32.vlgmr.msra.gmra.mxu2 %v20271_v31  ;;  %v15653_v32 = vand.u32 4294901760, %v6457_v57  ;;  %v15661_v27 = vsub.f32 %v20528_v37, %v15497_v34  ;;  %v18795_v36 = vand.u32 4294901760, %v15647_v49 }
 0x54f   :  { %6228 = vmatpush.msra.mxu3 %v15377_v38  ;;  %v20511_v38 = vld [vmem:[#allocation102_spill] sm:$0xff]  ;;  %vm6319_vm3 = vcmp.ge.f32.partialorder %v15573_v60, -23.02585  ;;  %6504 = vmatpush.msrb.mxu0 %v15618_v45  ;;  %v15644_v41 = vsub.f32 %v6469_v30, %v15618_v45  ;;  %v20536_v30 = vld [vmem:[#allocation217_spill] sm:$0xff]  ;;  %vm6315_vm11 = vcmp.ge.f32.partialorder %v15562_v29, -23.02585 }
 0x550   :  { %vm20512_vm13 = vnez %v20511_v38  ;;  %vm6325_vm9 = vcmp.ge.f32.partialorder %v6261_v39, -23.02585  ;;  %v18793_v38 = vand.u32 4294901760, %v15621_v11 }
 0x551   :  { %vm6403_vm6 = vmand %vm20512_vm13, %vm6339_vm5  ;;  %6230 = vmatpush.msra.mxu3 %v15391_v15  ;;  %v15602_v15 = vand.u32 4294901760, %v6461_v42  ;;  %6641 = vmatpush.msrb.mxu2 %v15644_v41 }
 0x552   :  { %v6467_v2 = vsel %vm6403_vm6, %v6275_v28, 0.0  ;;  %vm6407_vm5 = vmand %vm20516_vm0, %vm6343_vm1  ;;  %vm6321_vm1 = vcmp.ge.f32.partialorder %v15580_v43, -23.02585  ;;  %vm20537_vm6 = vnez %v20536_v30  ;;  %v6554_v12 = vsub.f32 %v15621_v11, %v18793_v38 }
 0x553   :  { %v15600_v4 = vand.u32 4294901760, %v6467_v2  ;;  %6232 = vmatpush.msra.mxu3 %v15402_v53  ;;  %v15616_v8 = vsel %vm6407_vm5, %v6279_v46, 0.0  ;;  %v20523_v53 = vld [vmem:[#allocation23_spill] sm:$0xff]  ;;  %vm15638_vm12 = vmand %vm20525_vm7, %vm6325_vm9  ;;  %v15656_v23 = vsub.f32 %v6461_v42, %v15602_v15  ;;  %v18794_v42 = vand.u32 4294901760, %v15644_v41 }
 0x554   :  { %v15625_v14 = vsub.f32 %v20523_v53, %v15497_v34  ;;  %vm15670_vm13 = vmand %vm20531_vm4, %vm6323_vm8  ;;  %v6453_v28 = vsel %vm15638_vm12, %v6261_v39, 0.0  ;;  %v15697_v53 = vsub.f32 %v6459_v50, %v15627_v6  ;;  %vm6313_vm5 = vcmp.ge.f32.partialorder %v15558_v54, -23.02585 }
 0x555   :  { %v15630_v21 = vsub.f32 %v6467_v2, %v15600_v4  ;;  %6234 = vmatpush.msra.mxu3 %v15414_v17  ;;  %v6455_v17 = vsel %vm15610_vm14, %v6263_v55, 0.0  ;;  %6506 = vmatpush.msrb.mxu0 %v15600_v4  ;;  %v20535_v2 = vld [vmem:[#allocation236_spill] sm:$0xff]  ;;  %vm15690_vm15 = vmand %vm20537_vm6, %vm6319_vm3  ;;  %v6542_v46 = vsub.f32 %v15644_v41, %v18794_v42  ;;  %v6451_v10 = vsel %vm15670_vm13, %v6259_v59, 0.0  ;;  %v20557_v55 = vld [vmem:[#allocation186_spill] sm:$0xff] }
 0x556   :  { %6235 = vmatmul.f32.vlgmr.msra.gmra.mxu3 %v20271_v31  ;;  %v15684_v62 = vsub.f32 %v20535_v2, %v15497_v34  ;;  %vm15704_vm9 = vmand %vm20541_vm10, %vm6321_vm1  ;;  %v15715_v50 = vand.u32 4294901760, %v6455_v17  ;;  %vm6317_vm0 = vcmp.ge.f32.partialorder %v15625_v14, -23.02585  ;;  %v18796_v0 = vand.u32 4294901760, %v15656_v23 }
 0x557   :  { %v18792_v58 = vand.u32 4294901760, %v15630_v21  ;;  %6692 = vmatpush.msrb.mxu3 %v15618_v45  ;;  %6508 = vmatpush.msrb.mxu0 %v15593_v26  ;;  %v15724_v2 = vsub.f32 %v6457_v57, %v15653_v32  ;;  %v6543_v30 = vand.u32 4294901760, %v6542_v46  ;;  %v6447_v59 = vsel %vm15690_vm15, %v15573_v60, 0.0  ;;  %v20544_v46 = vld [vmem:[#allocation208_spill] sm:$0xff] }
 0x558   :  { %6644 = vmatpush.msrb.mxu2 %v15630_v21  ;;  %v6449_v57 = vsel %vm15704_vm9, %v15580_v43, 0.0  ;;  %vm20545_vm14 = vnez %v20544_v46  ;;  %v6560_v43 = vsub.f32 %v15647_v49, %v18795_v36  ;;  %v15756_v22 = vand.u32 4294901760, %v6451_v10  ;;  %v20548_v46 = vld [vmem:[#allocation96_spill] sm:$0xff] }
 0x559   :  { %6694 = vmatpush.msrb.mxu3 %v15600_v4  ;;  %v6548_v39 = vsub.f32 %v15630_v21, %v18792_v58  ;;  %6510 = vmatpush.msrb.mxu0 %v15595_v5  ;;  %v15732_v58 = vand.u32 4294901760, %v6453_v28  ;;  %vm15748_vm8 = vmand %vm20545_vm14, %vm6317_vm0  ;;  %v15759_v37 = vsub.f32 %v6455_v17, %v15715_v50  ;;  %vm20549_vm3 = vnez %v20548_v46 }
 0x55a   :  { %6647 = vmatpush.msrb.mxu2 %v15621_v11  ;;  %6544 = vmatpush.msrb.mxu1 %v6543_v30  ;;  %vm15766_vm1 = vmand %vm20549_vm3, %vm4415_vm2  ;;  %vm6373_vm7 = vcmp.ge.f32.partialorder %v15684_v62, -23.02585  ;;  %v6566_v17 = vsub.f32 %v15656_v23, %v18796_v0  ;;  %vm6371_vm2 = vcmp.ge.f32.partialorder %v15680_v19, -23.02585  ;;  %vm20554_vm12 = vnez %v20553_v9 }
 0x55b   :  { %6696 = vmatpush.msrb.mxu3 %v15593_v26  ;;  %6512 = vmatpush.msrb.mxu0 %v15602_v15  ;;  %v6549_v60 = vand.u32 4294901760, %v6548_v39  ;;  %v20552_v39 = vld [vmem:[#allocation28_spill] sm:$0xff]  ;;  %vm15786_vm4 = vmand %vm20554_vm12, %vm6315_vm11  ;;  %v15791_v0 = vand.u32 4294901760, %v6449_v57  ;;  %v15794_v36 = vsub.f32 %v6453_v28, %v15732_v58  ;;  %vm6311_vm13 = vcmp.ge.f32.partialorder %v15550_v61, -23.02585 }
 0x55c   :  { %v15772_v30 = vsub.f32 %v20552_v39, %v15497_v34  ;;  %6650 = vmatpush.msrb.mxu2 %v15647_v49  ;;  %v6555_v39 = vand.u32 4294901760, %v6554_v12  ;;  %vm20558_vm6 = vnez %v20557_v55  ;;  %v20561_v12 = vand.u32 4294901760, %v15697_v53  ;;  %v20562_v55 = vld [vmem:[#allocation36_spill] sm:$0xff]  ;;  %vm15852_vm11 = vmand %vm15766_vm1, %vm6311_vm13 }
 0x55d   :  { %6698 = vmatpush.msrb.mxu3 %v15595_v5  ;;  %6514 = vmatpush.msrb.mxu0 %v15627_v6  ;;  %vm15801_vm15 = vmand %vm20558_vm6, %vm6313_vm5  ;;  %v15811_v28 = vand.u32 4294901760, %v6447_v59  ;;  %v15817_v25 = vsub.f32 %v20562_v55, %v15497_v34  ;;  %vm20564_vm10 = vnez %v20563_v40  ;;  %v20566_v55 = vld [vmem:[#allocation308_spill] sm:$0xff] }
 0x55e   :  { %6550 = vmatpush.msrb.mxu1 %v6549_v60  ;;  %v6445_v60 = vsel %vm15748_vm8, %v15625_v14, 0.0  ;;  %v6572_v47 = vsub.f32 %v15697_v53, %v20561_v12  ;;  %6653 = vmatpush.msrb.mxu2 %v15656_v23  ;;  %vm6437_vm9 = vmand %vm20564_vm10, %vm6373_vm7  ;;  %v6561_v14 = vand.u32 4294901760, %v6560_v43  ;;  %v15826_v12 = vsub.f32 %v6451_v10, %v15756_v22  ;;  %v20576_v40 = vld [vmem:[#allocation108_spill] sm:$0xff] }
 0x55f   :  { %6700 = vmatpush.msrb.mxu3 %v15602_v15  ;;  %6516 = vmatpush.msrb.mxu0 %v15653_v32  ;;  %vm20567_vm0 = vnez %v20566_v55  ;;  %v6443_v43 = vsel %vm15786_vm4, %v15562_v29, 0.0  ;;  %v20570_v10 = vand.u32 4294901760, %v15724_v2  ;;  %v6501_v46 = vsel %vm6437_vm9, %v15684_v62, 0.0 }
 0x560   :  { %6556 = vmatpush.msrb.mxu1 %v6555_v39  ;;  %vm15836_vm5 = vmand %vm20567_vm0, %vm6371_vm2  ;;  %v6567_v39 = vand.u32 4294901760, %v6566_v17  ;;  %6656 = vmatpush.msrb.mxu2 %v15697_v53  ;;  %v15858_v29 = vand.u32 4294901760, %v6445_v60  ;;  %v18804_v17 = vand.u32 4294901760, %v15794_v36  ;;  %v15862_v55 = vsub.f32 %v6449_v57, %v15791_v0 }
 0x561   :  { %6702 = vmatpush.msrb.mxu3 %v15627_v6  ;;  %v6578_v38 = vsub.f32 %v15724_v2, %v20570_v10  ;;  %6518 = vmatpush.msrb.mxu0 %v15715_v50  ;;  %vm6369_vm14 = vcmp.ge.f32.partialorder %v15772_v30, -23.02585  ;;  %v6441_v42 = vsel %vm15801_vm15, %v15558_v54, 0.0  ;;  %v6573_v10 = vand.u32 4294901760, %v6572_v47 }
 0x562   :  { %6562 = vmatpush.msrb.mxu1 %v6561_v14  ;;  %v15869_v51 = vsub.f32 %v6447_v59, %v15811_v28  ;;  %6659 = vmatpush.msrb.mxu2 %v15724_v2  ;;  %v6499_v62 = vsel %vm15836_vm5, %v15680_v19, 0.0  ;;  %v20573_v57 = vand.u32 4294901760, %v15759_v37  ;;  %v15880_v54 = vand.u32 4294901760, %v6443_v43 }
 0x563   :  { %6704 = vmatpush.msrb.mxu3 %v15653_v32  ;;  %6520 = vmatpush.msrb.mxu0 %v15732_v58  ;;  %vm6367_vm8 = vcmp.ge.f32.partialorder %v15830_v16, -23.02585  ;;  %v6439_v59 = vsel %vm15852_vm11, %v15550_v61, 0.0  ;;  %v6579_v14 = vand.u32 4294901760, %v6578_v38  ;;  %v15889_v19 = vand.u32 4294901760, %v6501_v46 }
 0x564   :  { %6568 = vmatpush.msrb.mxu1 %v6567_v39  ;;  %v6584_v9 = vsub.f32 %v15759_v37, %v20573_v57  ;;  %20574 = vst [vmem:[#allocation43_spill] sm:$0xff] %v15880_v54  ;;  %6662 = vmatpush.msrb.mxu2 %v15759_v37  ;;  %vm20577_vm3 = vnez %v20576_v40  ;;  %v6590_v61 = vsub.f32 %v15794_v36, %v18804_v17  ;;  %v15903_v38 = vand.u32 4294901760, %v6441_v42  ;;  %v20581_v40 = vld [vmem:[#allocation7_spill] sm:$0xff]  ;;  %v20582_v17 = vld [vmem:[#allocation292_spill] sm:$0xff] }
 0x565   :  { %6706 = vmatpush.msrb.mxu3 %v15715_v50  ;;  %20575 = vst [vmem:[#allocation57_spill] sm:$0xff] %v15889_v19  ;;  %vm15895_vm1 = vmand %vm20577_vm3, %vm6369_vm14  ;;  %6522 = vmatpush.msrb.mxu0 %v15756_v22  ;;  %v15907_v57 = vsub.f32 %v6445_v60, %v15858_v29  ;;  %v15911_v47 = vsub.f32 %v20581_v40, %v15497_v34  ;;  %vm6365_vm7 = vcmp.ge.f32.partialorder %v15817_v25, -23.02585  ;;  %vm20583_vm2 = vnez %v20582_v17 }
 0x566   :  { %6574 = vmatpush.msrb.mxu1 %v6573_v10  ;;  %20580 = vst [vmem:[#allocation45_spill] sm:$0xff] %v15903_v38  ;;  %6665 = vmatpush.msrb.mxu2 %v15794_v36  ;;  %v15917_v10 = vand.u32 4294901760, %v6499_v62  ;;  %vm15923_vm12 = vmand %vm20583_vm2, %vm6367_vm8  ;;  %v6585_v40 = vand.u32 4294901760, %v6584_v9  ;;  %v20586_v35 = vand.u32 4294901760, %v15826_v12  ;;  %v15931_v63 = vand.u32 4294901760, %v6439_v59 }
 0x567   :  { %6708 = vmatpush.msrb.mxu3 %v15732_v58  ;;  %6524 = vmatpush.msrb.mxu0 %v15791_v0  ;;  %v15934_v20 = vsub.f32 %v6443_v43, %v15880_v54  ;;  %v15938_v17 = vsub.f32 %v20588_v1, %v15497_v34  ;;  %vm6363_vm4 = vcmp.ge.f32.partialorder %v15665_v13, -23.02585  ;;  %v20589_v43 = vld [vmem:[#allocation283_spill] sm:$0xff]  ;;  %v6591_v9 = vand.u32 4294901760, %v6590_v61 }
 0x568   :  { %6580 = vmatpush.msrb.mxu1 %v6579_v14  ;;  %v6596_v56 = vsub.f32 %v15826_v12, %v20586_v35  ;;  %20587 = vst [vmem:[#allocation95_spill] sm:$0xff] %v15931_v63  ;;  %v6497_v14 = vsel %vm15895_vm1, %v15772_v30, 0.0  ;;  %6668 = vmatpush.msrb.mxu2 %v15826_v12  ;;  %v15947_v35 = vsub.f32 %v6501_v46, %v15889_v19  ;;  %vm20590_vm13 = vnez %v20589_v43 }
 0x569   :  { %6710 = vmatpush.msrb.mxu3 %v15756_v22  ;;  %vm15953_vm6 = vmand %vm20590_vm13, %vm6365_vm7  ;;  %6526 = vmatpush.msrb.mxu0 %v15811_v28  ;;  %v20593_v30 = vand.u32 4294901760, %v15862_v55  ;;  %v15963_v46 = vsub.f32 %v6441_v42, %v15903_v38  ;;  %v15967_v43 = vsub.f32 %v20594_v48, %v15497_v34  ;;  %v6495_v33 = vsel %vm15923_vm12, %v15830_v16, 0.0  ;;  %v20597_v42 = vld [vmem:[#allocation272_spill] sm:$0xff] }
 0x56a   :  { %6586 = vmatpush.msrb.mxu1 %v6585_v40  ;;  %v20595_v40 = vand.u32 4294901760, %v15869_v51  ;;  %6671 = vmatpush.msrb.mxu2 %v15862_v55  ;;  %vm20598_vm15 = vnez %v20597_v42  ;;  %v6597_v16 = vand.u32 4294901760, %v6596_v56  ;;  %v15993_v18 = vand.u32 4294901760, %v6497_v14 }
 0x56b   :  { %6712 = vmatpush.msrb.mxu3 %v15791_v0  ;;  %v6602_v39 = vsub.f32 %v15862_v55, %v20593_v30  ;;  %v15978_v30 = vsub.f32 %v6499_v62, %v15917_v10  ;;  %vm15984_vm10 = vmand %vm20598_vm15, %vm6363_vm4  ;;  %6528 = vmatpush.msrb.mxu0 %v15858_v29  ;;  %v20601_v62 = vld [vmem:[#allocation232_spill] sm:$0xff]  ;;  %vm6361_vm9 = vcmp.ge.f32.partialorder %v15938_v17, -23.02585  ;;  %v6493_v42 = vsel %vm15953_vm6, %v15817_v25, 0.0 }
 0x56c   :  { %v6608_v61 = vsub.f32 %v15869_v51, %v20595_v40  ;;  %6592 = vmatpush.msrb.mxu1 %v6591_v9  ;;  %v15991_v40 = vsub.f32 %v6439_v59, %v15931_v63  ;;  %v15997_v7 = vsub.f32 %v20601_v62, %v15497_v34  ;;  %6674 = vmatpush.msrb.mxu2 %v15869_v51  ;;  %v18815_v56 = vand.u32 4294901760, %v15947_v35 }
 0x56d   :  { %6714 = vmatpush.msrb.mxu3 %v15811_v28  ;;  %20596 = vst [vmem:[#allocation98_spill] sm:$0xff] %v15978_v30  ;;  %6530 = vmatpush.msrb.mxu0 %v15880_v54  ;;  %v6603_v59 = vand.u32 4294901760, %v6602_v39  ;;  %v20602_v9 = vand.u32 4294901760, %v15907_v57  ;;  %v16011_v52 = vand.u32 4294901760, %v6495_v33  ;;  %vm6359_vm0 = vcmp.ge.f32.partialorder %v15967_v43, -23.02585 }
 0x56e   :  { %6598 = vmatpush.msrb.mxu1 %v6597_v16  ;;  %v6491_v25 = vsel %vm15984_vm10, %v15665_v13, 0.0  ;;  %v6609_v1 = vand.u32 4294901760, %v6608_v61  ;;  %6677 = vmatpush.msrb.mxu2 %v15907_v57  ;;  %v20603_v16 = vld [vmem:[#allocation130_spill] sm:$0xff]  ;;  %v20607_v13 = vand.u32 4294901760, %v15934_v20  ;;  %v16033_v60 = vand.u32 4294901760, %v6493_v42 }
 0x56f   :  { %6716 = vmatpush.msrb.mxu3 %v15858_v29  ;;  %v6614_v62 = vsub.f32 %v15907_v57, %v20602_v9  ;;  %vm20604_vm5 = vnez %v20603_v16  ;;  %6532 = vmatpush.msrb.mxu0 %v15903_v38  ;;  %v16036_v39 = vsub.f32 %v6497_v14, %v15993_v18  ;;  %vm6353_vm14 = vcmp.ge.f32.partialorder %v15661_v27, -23.02585  ;;  %v20608_v16 = vld [vmem:[#allocation252_spill] sm:$0xff] }
 0x570   :  { %vm16024_vm11 = vmand %vm20604_vm5, %vm6361_vm9  ;;  %6604 = vmatpush.msrb.mxu1 %v6603_v59  ;;  %v6620_v61 = vsub.f32 %v15934_v20, %v20607_v13  ;;  %vm6357_vm8 = vcmp.ge.f32.partialorder %v15997_v7, -23.02585  ;;  %6680 = vmatpush.msrb.mxu2 %v15934_v20  ;;  %v6870_v59 = vsub.f32 %v15947_v35, %v18815_v56  ;;  %vm20609_vm3 = vnez %v20608_v16 }
 0x571   :  { %6718 = vmatpush.msrb.mxu3 %v15880_v54  ;;  %vm16049_vm1 = vmand %vm20609_vm3, %vm6359_vm0  ;;  %6534 = vmatpush.msrb.mxu0 %v15931_v63  ;;  %v6615_v14 = vand.u32 4294901760, %v6614_v62  ;;  %v20612_v48 = vand.u32 4294901760, %v15963_v46  ;;  %v16057_v3 = vand.u32 4294901760, %v6491_v25  ;;  %v16060_v56 = vsub.f32 %v6495_v33, %v16011_v52  ;;  %v20616_v33 = vld [vmem:[#allocation243_spill] sm:$0xff] }
 0x572   :  { %6610 = vmatpush.msrb.mxu1 %v6609_v1  ;;  %vm6355_vm7 = vcmp.ge.f32.partialorder %v15911_v47, -23.02585  ;;  %v6489_v54 = vsel %vm16024_vm11, %v15938_v17, 0.0  ;;  %v20614_v62 = vand.u32 4294901760, %v15644_v41  ;;  %6683 = vmatpush.msrb.mxu2 %v15963_v46  ;;  %v20615_v1 = vand.u32 4294901760, %v15978_v30 }
 0x573   :  { %6720 = vmatpush.msrb.mxu3 %v15903_v38  ;;  %v6626_v24 = vsub.f32 %v15963_v46, %v20612_v48  ;;  %v20613_v38 = vld [vmem:[#allocation19_spill] sm:$0xff]  ;;  %vm20617_vm2 = vnez %v20616_v33  ;;  %v6621_v9 = vand.u32 4294901760, %v6620_v61  ;;  %v20620_v17 = vand.u32 4294901760, %v15991_v40  ;;  %6535 = vmatmul.f32.vlgmr.msrb.gmra.mxu0 %v20315_v44 }
 0x574   :  { %v6287_v16 = vsub.f32 %v20613_v38, %v15497_v34  ;;  %6730 = vmatpush.msra.mxu0 %v20614_v62  ;;  %v6876_v48 = vsub.f32 %v15978_v30, %v20615_v1  ;;  %vm16078_vm12 = vmand %vm20617_vm2, %vm6357_vm8  ;;  %6616 = vmatpush.msrb.mxu1 %v6615_v14  ;;  %v16088_v1 = vsub.f32 %v6493_v42, %v16033_v60  ;;  %v20621_v33 = vld [vmem:[#allocation51_spill] sm:$0xff]  ;;  %v6487_v61 = vsel %vm16049_vm1, %v15967_v43, 0.0  ;;  %v20626_v42 = vld [vmem:[#allocation234_spill] sm:$0xff] }
 0x575   :  { %v6632_v41 = vsub.f32 %v15991_v40, %v20620_v17  ;;  %6722 = vmatpush.msrb.mxu3 %v15931_v63  ;;  %vm20622_vm4 = vnez %v20621_v33  ;;  %v20625_v14 = vand.u32 4294901760, %v15630_v21  ;;  %6686 = vmatpush.msrb.mxu2 %v15991_v40  ;;  %v6871_v17 = vand.u32 4294901760, %v6870_v59  ;;  %v20630_v59 = vld [vmem:[#allocation27_spill] sm:$0xff]  ;;  %v20633_v38 = vld [vmem:[#allocation216_spill] sm:$0xff] }
 0x576   :  { %vm16094_vm13 = vmand %vm20622_vm4, %vm6353_vm14  ;;  %vm20627_vm6 = vnez %v20626_v42  ;;  %6622 = vmatpush.msrb.mxu1 %v6621_v9  ;;  %v6627_v62 = vand.u32 4294901760, %v6626_v24  ;;  %v16113_v13 = vand.u32 4294901760, %v6489_v54  ;;  %v16117_v43 = vsub.f32 %v6491_v25, %v16057_v3  ;;  %6687 = vmatmul.f32.vlgmr.msrb.gmra.mxu2 %v20315_v44 }
 0x577   :  { %6734 = vmatpush.msra.mxu0 %v20625_v14  ;;  %vm16108_vm15 = vmand %vm20627_vm6, %vm6355_vm7  ;;  %6832 = vmatpush.msra.mxu2 %v15889_v19  ;;  %v6285_v14 = vsub.f32 %v20630_v59, %v15497_v34  ;;  %vm6351_vm10 = vcmp.ge.f32.partialorder %v6287_v16, -23.02585  ;;  %v6485_v42 = vsel %vm16078_vm12, %v15997_v7, 0.0  ;;  %v20631_v9 = vand.u32 4294901760, %v15621_v11 }
 0x578   :  { %6872 = vmatpush.msra.mxu3 %v6871_v17  ;;  %v6877_v24 = vand.u32 4294901760, %v6876_v48  ;;  %6628 = vmatpush.msrb.mxu1 %v6627_v62  ;;  %v6633_v19 = vand.u32 4294901760, %v6632_v41  ;;  %v20632_v25 = vand.u32 4294901760, %v16036_v39  ;;  %v16130_v63 = vand.u32 4294901760, %v6487_v61  ;;  %v20635_v62 = vld [vmem:[#allocation215_spill] sm:$0xff] }
 0x579   :  { %6738 = vmatpush.msra.mxu0 %v20631_v9  ;;  %6834 = vmatpush.msra.mxu2 %v15917_v10  ;;  %v6893_v59 = vand.u32 4294901760, %v16088_v1  ;;  %v6283_v7 = vsub.f32 %v20633_v38, %v15497_v34  ;;  %v6481_v11 = vsel %vm16094_vm13, %v15661_v27, 0.0  ;;  %v6483_v48 = vsel %vm16108_vm15, %v15911_v47, 0.0  ;;  %v20640_v9 = vld [vmem:[#allocation206_spill] sm:$0xff] }
 0x57a   :  { %v6882_v21 = vsub.f32 %v16036_v39, %v20632_v25  ;;  %v20634_v41 = vand.u32 4294901760, %v15647_v49  ;;  %6878 = vmatpush.msra.mxu3 %v6877_v24  ;;  %vm20636_vm9 = vnez %v20635_v62  ;;  %6634 = vmatpush.msrb.mxu1 %v6633_v19  ;;  %v20639_v27 = vand.u32 4294901760, %v16060_v56 }
 0x57b   :  { %vm16146_vm0 = vmand %vm20636_vm9, %vm6351_vm10  ;;  %6836 = vmatpush.msra.mxu2 %v15993_v18  ;;  %v16154_v33 = vand.u32 4294901760, %v6485_v42  ;;  %v6899_v49 = vand.u32 4294901760, %v16117_v43  ;;  %v16158_v47 = vsub.f32 %v6489_v54, %v16113_v13  ;;  %v6281_v24 = vsub.f32 %v20640_v9, %v15497_v34  ;;  %6635 = vmatmul.f32.vlgmr.msrb.gmra.mxu1 %v20271_v31 }
 0x57c   :  { %6742 = vmatpush.msra.mxu0 %v20634_v41  ;;  %v6888_v30 = vsub.f32 %v16060_v56, %v20639_v27  ;;  %vm6349_vm5 = vcmp.ge.f32.partialorder %v6285_v14, -23.02585  ;;  %v20641_v25 = vand.u32 4294901760, %v15656_v23  ;;  %6796 = vmatpush.msra.mxu1 %v15618_v45  ;;  %v6883_v19 = vand.u32 4294901760, %v6882_v21  ;;  %v20643_v21 = vld [vmem:[#allocation207_spill] sm:$0xff] }
 0x57d   :  { %6838 = vmatpush.msra.mxu2 %v16011_v52  ;;  %v6894_v38 = vsub.f32 %v16088_v1, %v6893_v59  ;;  %v16170_v54 = vand.u32 4294901760, %v6483_v48  ;;  %v16173_v41 = vsub.f32 %v6487_v61, %v16130_v63  ;;  %vm6347_vm11 = vcmp.ge.f32.partialorder %v6283_v7, -23.02585  ;;  %6723 = vmatmul.f32.vlgmr.msrb.gmra.mxu3 %v20315_v44 }
 0x57e   :  { %6746 = vmatpush.msra.mxu0 %v20641_v25  ;;  %v6479_v34 = vsel %vm16146_vm0, %v6287_v16, 0.0  ;;  %v20642_v45 = vand.u32 4294901760, %v15697_v53  ;;  %6798 = vmatpush.msra.mxu1 %v15600_v4  ;;  %v16180_v23 = vand.u32 4294901760, %v6481_v11  ;;  %vm20644_vm14 = vnez %v20643_v21  ;;  %v20648_v25 = vld [vmem:[#allocation198_spill] sm:$0xff] }
 0x57f   :  { %vm16184_vm8 = vmand %vm20644_vm14, %vm6349_vm5  ;;  %6840 = vmatpush.msra.mxu2 %v16033_v60  ;;  %6884 = vmatpush.msra.mxu3 %v6883_v19  ;;  %v6889_v61 = vand.u32 4294901760, %v6888_v30  ;;  %v6900_v16 = vsub.f32 %v16117_v43, %v6899_v49  ;;  %v6905_v53 = vand.u32 4294901760, %v16158_v47  ;;  %v16194_v4 = vsub.f32 %v6485_v42, %v16154_v33 }
 0x580   :  { %6750 = vmatpush.msra.mxu0 %v20642_v45  ;;  %v20647_v17 = vand.u32 4294901760, %v15724_v2  ;;  %6800 = vmatpush.msra.mxu1 %v15593_v26  ;;  %vm6345_vm3 = vcmp.ge.f32.partialorder %v6281_v24, -23.02585  ;;  %v6895_v27 = vand.u32 4294901760, %v6894_v38  ;;  %v6911_v30 = vand.u32 4294901760, %v16173_v41 }
 0x581   :  { %6842 = vmatpush.msra.mxu2 %v16057_v3  ;;  %6890 = vmatpush.msra.mxu3 %v6889_v61  ;;  %v16202_v9 = vsub.f32 %v6483_v48, %v16170_v54  ;;  %vm20649_vm1 = vnez %v20648_v25  ;;  %v6477_v2 = vsel %vm16184_vm8, %v6285_v14, 0.0  ;;  %v20650_v42 = vand.u32 4294901760, %v15759_v37  ;;  %v20651_v37 = vld [vmem:[#allocation185_spill] sm:$0xff] }
 0x582   :  { %6754 = vmatpush.msra.mxu0 %v20647_v17  ;;  %vm6411_vm7 = vmand %vm20649_vm1, %vm6347_vm11  ;;  %6802 = vmatpush.msra.mxu1 %v15595_v5  ;;  %v16212_v26 = vand.u32 4294901760, %v6479_v34  ;;  %v6901_v19 = vand.u32 4294901760, %v6900_v16  ;;  %v6906_v48 = vsub.f32 %v16158_v47, %v6905_v53  ;;  %v6917_v38 = vand.u32 4294901760, %v16194_v4 }
 0x583   :  { %6844 = vmatpush.msra.mxu2 %v16113_v13  ;;  %6896 = vmatpush.msra.mxu3 %v6895_v27  ;;  %v16220_v45 = vsub.f32 %v6481_v11, %v16180_v23  ;;  %vm20652_vm2 = vnez %v20651_v37  ;;  %v20653_v5 = vand.u32 4294901760, %v15794_v36  ;;  %v6475_v14 = vsel %vm6411_vm7, %v6283_v7, 0.0 }
 0x584   :  { %6758 = vmatpush.msra.mxu0 %v20650_v42  ;;  %vm6409_vm12 = vmand %vm20652_vm2, %vm6345_vm3  ;;  %6804 = vmatpush.msra.mxu1 %v15602_v15  ;;  %v6912_v21 = vsub.f32 %v16173_v41, %v6911_v30  ;;  %v6923_v11 = vand.u32 4294901760, %v16202_v9  ;;  %v20654_v62 = vand.u32 4294901760, %v15826_v12  ;;  %v16236_v61 = vand.u32 4294901760, %v6477_v2 }
 0x585   :  { %6846 = vmatpush.msra.mxu2 %v16130_v63  ;;  %6902 = vmatpush.msra.mxu3 %v6901_v19  ;;  %v16239_v36 = vsub.f32 %v6479_v34, %v16212_v26  ;;  %v6473_v15 = vsel %vm6409_vm12, %v6281_v24, 0.0  ;;  %v6907_v7 = vand.u32 4294901760, %v6906_v48  ;;  %v6918_v16 = vsub.f32 %v16194_v4, %v6917_v38 }
 0x586   :  { %6762 = vmatpush.msra.mxu0 %v20653_v5  ;;  %6806 = vmatpush.msra.mxu1 %v15627_v6  ;;  %v6929_v12 = vand.u32 4294901760, %v16220_v45  ;;  %v20655_v17 = vand.u32 4294901760, %v15862_v55  ;;  %v16250_v6 = vand.u32 4294901760, %v6475_v14  ;;  %v6913_v24 = vand.u32 4294901760, %v6912_v21 }
 0x587   :  { %6848 = vmatpush.msra.mxu2 %v16154_v33  ;;  %6908 = vmatpush.msra.mxu3 %v6907_v7  ;;  %v6924_v34 = vsub.f32 %v16202_v9, %v6923_v11  ;;  %v20656_v27 = vand.u32 4294901760, %v15869_v51  ;;  %v16259_v25 = vand.u32 4294901760, %v6473_v15  ;;  %v6935_v55 = vand.u32 4294901760, %v16239_v36  ;;  %v20662_v7 = vld [vmem:[#allocation43_spill] sm:$0xff] }
 0x588   :  { %6766 = vmatpush.msra.mxu0 %v20654_v62  ;;  %6808 = vmatpush.msra.mxu1 %v15653_v32  ;;  %v16263_v32 = vsub.f32 %v6477_v2, %v16236_v61  ;;  %v6919_v42 = vand.u32 4294901760, %v6918_v16  ;;  %v6930_v19 = vsub.f32 %v16220_v45, %v6929_v12  ;;  %v20657_v51 = vand.u32 4294901760, %v15907_v57 }
 0x589   :  { %6850 = vmatpush.msra.mxu2 %v16170_v54  ;;  %6914 = vmatpush.msra.mxu3 %v6913_v24  ;;  %v16276_v48 = vsub.f32 %v6475_v14, %v16250_v6  ;;  %v6925_v2 = vand.u32 4294901760, %v6924_v34  ;;  %v20658_v37 = vand.u32 4294901760, %v15934_v20  ;;  %v6936_v57 = vsub.f32 %v16239_v36, %v6935_v55  ;;  %v20664_v24 = vld [vmem:[#allocation45_spill] sm:$0xff] }
 0x58a   :  { %6770 = vmatpush.msra.mxu0 %v20655_v17  ;;  %6810 = vmatpush.msra.mxu1 %v15715_v50  ;;  %v16273_v50 = vand.u32 4294901760, %v15616_v8  ;;  %v16287_v5 = vsub.f32 %v6473_v15, %v16259_v25  ;;  %v6931_v14 = vand.u32 4294901760, %v6930_v19  ;;  %v20659_v21 = vand.u32 4294901760, %v15963_v46  ;;  %v20666_v19 = vld [vmem:[#allocation95_spill] sm:$0xff] }
 0x58b   :  { %6852 = vmatpush.msra.mxu2 %v16180_v23  ;;  %6920 = vmatpush.msra.mxu3 %v6919_v42  ;;  %v6947_v20 = vand.u32 4294901760, %v16276_v48  ;;  %v20660_v62 = vand.u32 4294901760, %v15991_v40  ;;  %v6937_v15 = vand.u32 4294901760, %v6936_v57  ;;  %v20661_v40 = vld [vmem:[#allocation98_spill] sm:$0xff]  ;;  %v20663_v17 = vand.u32 4294901760, %v15947_v35 }
 0x58c   :  { %6774 = vmatpush.msra.mxu0 %v20656_v27  ;;  %6812 = vmatpush.msra.mxu1 %v15732_v58  ;;  %v6941_v58 = vand.u32 4294901760, %v16263_v32  ;;  %v20665_v42 = vand.u32 4294901760, %v20661_v40  ;;  %v20669_v57 = vand.u32 4294901760, %v16060_v56 }
 0x58d   :  { %6854 = vmatpush.msra.mxu2 %v16212_v26  ;;  %6926 = vmatpush.msra.mxu3 %v6925_v2  ;;  %v20668_v2 = vand.u32 4294901760, %v16036_v39 }
 0x58e   :  { %6778 = vmatpush.msra.mxu0 %v20657_v51  ;;  %6814 = vmatpush.msra.mxu1 %v15756_v22  ;;  %v16296_v22 = vsub.f32 %v15616_v8, %v16273_v50  ;;  %v6942_v46 = vsub.f32 %v16263_v32, %v6941_v58  ;;  %v6948_v8 = vsub.f32 %v16276_v48, %v6947_v20 }
 0x58f   :  { %6856 = vmatpush.msra.mxu2 %v16236_v61  ;;  %6932 = vmatpush.msra.mxu3 %v6931_v14 }
 0x590   :  { %6782 = vmatpush.msra.mxu0 %v20658_v37  ;;  %6816 = vmatpush.msra.mxu1 %v15791_v0  ;;  %v6953_v0 = vand.u32 4294901760, %v16287_v5  ;;  %v6943_v16 = vand.u32 4294901760, %v6942_v46  ;;  %v6949_v34 = vand.u32 4294901760, %v6948_v8 }
 0x591   :  { %6858 = vmatpush.msra.mxu2 %v16250_v6  ;;  %6938 = vmatpush.msra.mxu3 %v6937_v15  ;;  %v20679_v15 = vld [vmem:[#allocation148_spill] sm:$0xff] }
 0x592   :  { %6786 = vmatpush.msra.mxu0 %v20659_v21  ;;  %6818 = vmatpush.msra.mxu1 %v15811_v28  ;;  %v6959_v28 = vand.u32 4294901760, %v16296_v22  ;;  %v20677_v21 = vld [vmem:[#allocation114_spill] sm:$0xff] }
 0x593   :  { %6860 = vmatpush.msra.mxu2 %v16259_v25  ;;  %6944 = vmatpush.msra.mxu3 %v6943_v16 }
 0x594   :  { %6790 = vmatpush.msra.mxu0 %v20660_v62  ;;  %6820 = vmatpush.msra.mxu1 %v15858_v29  ;;  %v6954_v29 = vsub.f32 %v16287_v5, %v6953_v0  ;;  %v6960_v27 = vsub.f32 %v16296_v22, %v6959_v28 }
 0x595   :  { %6862 = vmatpush.msra.mxu2 %v16273_v50  ;;  %6950 = vmatpush.msra.mxu3 %v6949_v34  ;;  %v20684_v34 = vld [vmem:[#allocation69_spill] sm:$0xff] }
 0x596   :  { %6969 = vmatpush.msrb.mxu0 %v15947_v35  ;;  %6822 = vmatpush.msra.mxu1 %v20662_v7  ;;  %v6955_v51 = vand.u32 4294901760, %v6954_v29  ;;  %v20667_v35 = vld [vmem:[#allocation57_spill] sm:$0xff]  ;;  %v6961_v37 = vand.u32 4294901760, %v6960_v27  ;;  %v20682_v7 = vld [vmem:[#allocation250_spill] sm:$0xff] }
 0x597   :  { %7058 = vmatpush.msrb.mxu2 %v20663_v17  ;;  %6791 = vmatmul.f32.vlgmr.msra.gmra.mxu0 %v20271_v31  ;;  %v20683_v17 = vld [vmem:[#allocation126_spill] sm:$0xff] }
 0x598   :  { %6972 = vmatpush.msrb.mxu0 %v20661_v40  ;;  %6824 = vmatpush.msra.mxu1 %v20664_v24 }
 0x599   :  { %7062 = vmatpush.msrb.mxu2 %v20665_v42  ;;  %6956 = vmatpush.msra.mxu3 %v6955_v51  ;;  %v20685_v42 = vld [vmem:[#allocation214_spill] sm:$0xff]  ;;  %v20686_v51 = vld [vmem:[#allocation29_spill] sm:$0xff] }
 0x59a   :  { %6975 = vmatpush.msrb.mxu0 %v16036_v39  ;;  %6826 = vmatpush.msra.mxu1 %v20666_v19 }
 0x59b   :  { %7066 = vmatpush.msrb.mxu2 %v20668_v2  ;;  %6962 = vmatpush.msra.mxu3 %v6961_v37  ;;  %v20687_v2 = vld [vmem:[#allocation118_spill] sm:$0xff] }
 0x59c   :  { %6978 = vmatpush.msrb.mxu0 %v16060_v56  ;;  %7020 = vmatpush.msrb.mxu1 %v20667_v35 }
 0x59d   :  { %7070 = vmatpush.msrb.mxu2 %v20669_v57  ;;  %7124 = vmatpush.msrb.mxu3 %v20667_v35  ;;  %v20688_v57 = vld [vmem:[#allocation103_spill] sm:$0xff] }
 0x59e   :  { %6981 = vmatpush.msrb.mxu0 %v16088_v1  ;;  %7022 = vmatpush.msrb.mxu1 %v15917_v10 }
 0x59f   :  { %7074 = vmatpush.msrb.mxu2 %v6893_v59  ;;  %7126 = vmatpush.msrb.mxu3 %v15917_v10 }
 0x5a0   :  { %6984 = vmatpush.msrb.mxu0 %v16117_v43  ;;  %7024 = vmatpush.msrb.mxu1 %v15993_v18 }
 0x5a1   :  { %7078 = vmatpush.msrb.mxu2 %v6899_v49  ;;  %7128 = vmatpush.msrb.mxu3 %v15993_v18  ;;  %v5616_v18 = vpop.f32.mrf.mxu0 }
 0x5a2   :  { %6987 = vmatpush.msrb.mxu0 %v16158_v47  ;;  %7026 = vmatpush.msrb.mxu1 %v16011_v52 }
 0x5a3   :  { %7082 = vmatpush.msrb.mxu2 %v6905_v53  ;;  %7130 = vmatpush.msrb.mxu3 %v16011_v52 }
 0x5a4   :  { %6990 = vmatpush.msrb.mxu0 %v16173_v41  ;;  %7028 = vmatpush.msrb.mxu1 %v16033_v60 }
 0x5a5   :  { %7086 = vmatpush.msrb.mxu2 %v6911_v30  ;;  %7132 = vmatpush.msrb.mxu3 %v16033_v60  ;;  %v5804_v60 = vpop.f32.mrf.mxu3 }
 0x5a6   :  { %6993 = vmatpush.msrb.mxu0 %v16194_v4  ;;  %7030 = vmatpush.msrb.mxu1 %v16057_v3 }
 0x5a7   :  { %7090 = vmatpush.msrb.mxu2 %v6917_v38  ;;  %7134 = vmatpush.msrb.mxu3 %v16057_v3  ;;  %v5768_v3 = vpop.f32.mrf.mxu2 }
 0x5a8   :  { %6996 = vmatpush.msrb.mxu0 %v16202_v9  ;;  %7032 = vmatpush.msrb.mxu1 %v16113_v13 }
 0x5a9   :  { %7094 = vmatpush.msrb.mxu2 %v6923_v11  ;;  %7136 = vmatpush.msrb.mxu3 %v16113_v13  ;;  %v5872_v39 = vpop.f32.mrf.mxu0 }
 0x5aa   :  { %6999 = vmatpush.msrb.mxu0 %v16220_v45  ;;  %7034 = vmatpush.msrb.mxu1 %v16130_v63 }
 0x5ab   :  { %7098 = vmatpush.msrb.mxu2 %v6929_v12  ;;  %7138 = vmatpush.msrb.mxu3 %v16130_v63  ;;  %v5716_v63 = vpop.f32.mrf.mxu1 }
 0x5ac   :  { %7002 = vmatpush.msrb.mxu0 %v16239_v36  ;;  %7036 = vmatpush.msrb.mxu1 %v16154_v33  ;;  %v5717_v52 = vadd.f32 %v5716_v63, %v5616_v18  ;;  %v20670_v36 = vld [vmem:[#allocation125_spill] sm:$0xff] }
 0x5ad   :  { %7102 = vmatpush.msrb.mxu2 %v6935_v55  ;;  %7140 = vmatpush.msrb.mxu3 %v16154_v33  ;;  %v20672_v55 = vld [vmem:[#allocation311_spill] sm:$0xff]  ;;  %v20689_v18 = vld [vmem:[#allocation41_spill] sm:$0xff] }
 0x5ae   :  { %7005 = vmatpush.msrb.mxu0 %v16263_v32  ;;  %7038 = vmatpush.msrb.mxu1 %v16170_v54  ;;  %v5769_v10 = vadd.f32 %v5768_v3, %v5717_v52  ;;  %vm20673_vm13 = vnez %v20672_v55  ;;  %v20674_v32 = vld [vmem:[#allocation282_spill] sm:$0xff] }
 0x5af   :  { %7106 = vmatpush.msrb.mxu2 %v6941_v58  ;;  %7142 = vmatpush.msrb.mxu3 %v16170_v54  ;;  %v20690_v3 = vld [vmem:[#allocation302_spill] sm:$0xff] }
 0x5b0   :  { %7008 = vmatpush.msrb.mxu0 %v16276_v48  ;;  %7040 = vmatpush.msrb.mxu1 %v16180_v23  ;;  %v5805_v56 = vadd.f32 %v5804_v60, %v5769_v10  ;;  %v20675_v48 = vld [vmem:[#allocation110_spill] sm:$0xff] }
 0x5b1   :  { %7110 = vmatpush.msrb.mxu2 %v6947_v20  ;;  %7144 = vmatpush.msrb.mxu3 %v16180_v23  ;;  %v6096_v54 = vpop.f32.mrf.mxu0  ;;  %v20691_v60 = vld [vmem:[#allocation286_spill] sm:$0xff] }
 0x5b2   :  { %7011 = vmatpush.msrb.mxu0 %v16287_v5  ;;  %7042 = vmatpush.msrb.mxu1 %v16212_v26  ;;  %v5873_v1 = vadd.f32 %v5872_v39, %v5805_v56  ;;  %v20676_v5 = vld [vmem:[#allocation124_spill] sm:$0xff]  ;;  %vm20692_vm10 = vnez %v20691_v60  ;;  %v20693_v56 = vld [vmem:[#allocation50_spill] sm:$0xff] }
 0x5b3   :  { %6863 = vmatmul.f32.vlgmr.msra.gmra.mxu2 %v20315_v44  ;;  %6963 = vmatmul.f32.vlgmr.msra.gmra.mxu3 %v20271_v31  ;;  %v5908_v13 = vpop.f32.mrf.mxu1  ;;  %v5944_v59 = vpop.f32.mrf.mxu2 }
 0x5b4   :  { %7014 = vmatpush.msrb.mxu0 %v16296_v22  ;;  %7044 = vmatpush.msrb.mxu1 %v16236_v61  ;;  %v5909_v43 = vadd.f32 %v5908_v13, %v5873_v1  ;;  %v20678_v22 = vld [vmem:[#allocation275_spill] sm:$0xff]  ;;  %v20694_v1 = vld [vmem:[#allocation105_spill] sm:$0xff] }
 0x5b5   :  { %7114 = vmatpush.msrb.mxu2 %v6953_v0  ;;  %7146 = vmatpush.msrb.mxu3 %v16212_v26  ;;  %v20680_v0 = vld [vmem:[#allocation115_spill] sm:$0xff] }
 0x5b6   :  { %7046 = vmatpush.msrb.mxu1 %v16250_v6  ;;  %7015 = vmatmul.f32.vlgmr.msrb.gmra.mxu0 %v20315_v44  ;;  %v5945_v33 = vadd.f32 %v5944_v59, %v5909_v43  ;;  %v20695_v43 = vld [vmem:[#allocation101_spill] sm:$0xff] }
 0x5b7   :  { %7118 = vmatpush.msrb.mxu2 %v6959_v28  ;;  %6827 = vmatmul.f32.vlgmr.msra.gmra.mxu1 %v20271_v31  ;;  %v20681_v28 = vld [vmem:[#allocation121_spill] sm:$0xff] }
 0x5b8   :  { %7048 = vmatpush.msrb.mxu1 %v16259_v25  ;;  %7148 = vmatpush.msrb.mxu3 %v16236_v61 }
 0x5b9   :  { %v6044_v49 = vpop.f32.mrf.mxu3 }
 0x5ba   :  { %7050 = vmatpush.msrb.mxu1 %v16273_v50  ;;  %7150 = vmatpush.msrb.mxu3 %v16250_v6  ;;  %v6045_v47 = vadd.f32 %v6044_v49, %v5945_v33  ;;  %v20671_v6 = vld [vmem:[#allocation154_spill] sm:$0xff]  ;;  %v20696_v49 = vld [vmem:[#allocation39_spill] sm:$0xff] }
 0x5bb   :  { %7119 = vmatmul.f32.vlgmr.msrb.gmra.mxu2 %v20271_v31  ;;  %v6132_v23 = vpop.f32.mrf.mxu1 }
 0x5bc   :  { %7152 = vmatpush.msrb.mxu3 %v16259_v25  ;;  %v6097_v41 = vadd.f32 %v6096_v54, %v6045_v47  ;;  %v20697_v54 = vld [vmem:[#allocation109_spill] sm:$0xff] }
 0x5be   :  { %7154 = vmatpush.msrb.mxu3 %v16273_v50  ;;  %v6133_v4 = vadd.f32 %v6132_v23, %v6097_v41  ;;  %v20698_v23 = vld [vmem:[#allocation42_spill] sm:$0xff] }
 0x5bf   :  { %7051 = vmatmul.f32.vlgmr.msrb.gmra.mxu1 %v20315_v44  ;;  %7155 = vmatmul.f32.vlgmr.msrb.gmra.mxu3 %v20271_v31 }
 0x5d1   :  { %v6200_v53 = vpop.f32.mrf.mxu2 }
 0x5d2   :  { %v6201_v9 = vadd.f32 %v6200_v53, %v6133_v4  ;;  %v20699_v4 = vld [vmem:[#allocation104_spill] sm:$0xff] }
 0x5d9   :  { %v6236_v30 = vpop.f32.mrf.mxu3 }
 0x5da   :  { %v6237_v26 = vadd.f32 %v6236_v30, %v6201_v9  ;;  %v20700_v9 = vld [vmem:[#allocation293_spill] sm:$0xff] }
 0x5dc   :  { %v6240_v38 = vmax.f32 %v6237_v26, 1e-10 }
 0x5de   :  { %9006 = vlog2.f32 %v6240_v38 }
 0x5e4   :  { %v9007_v45 = vpop.eup %9006 }
 0x5e5   :  { %v6244_v11 = vmul.f32 0.6931472, %v9007_v45  ;;  %v20701_v45 = vld [vmem:[#allocation106_spill] sm:$0xff] }
 0x5e7   :  { %v6246_v61 = vperm.slane %v6244_v11, 0 }
 0x5e9   :  { %v6276_v12 = vsub.f32 %v20670_v36, %v6246_v61  ;;  %v6270_v25 = vsub.f32 %v20671_v6, %v6246_v61  ;;  %v16417_v50 = vsub.f32 %v20674_v32, %v6246_v61  ;;  %v16420_v58 = vsub.f32 %v20675_v48, %v6246_v61  ;;  %v20702_v36 = vld [vmem:[#allocation287_spill] sm:$0xff]  ;;  %v20703_v6 = vld [vmem:[#allocation298_spill] sm:$0xff]  ;;  %v20704_v32 = vld [vmem:[#allocation40_spill] sm:$0xff] }
 0x5ea   :  { %v16423_v14 = vsub.f32 %v20676_v5, %v6246_v61  ;;  %v16426_v20 = vsub.f32 %v20677_v21, %v6246_v61  ;;  %v16429_v62 = vsub.f32 %v20678_v22, %v6246_v61  ;;  %v16432_v46 = vsub.f32 %v20679_v15, %v6246_v61  ;;  %v20705_v5 = vld [vmem:[#allocation111_spill] sm:$0xff]  ;;  %v20706_v22 = vld [vmem:[#allocation322_spill] sm:$0xff] }
 0x5eb   :  { %vm6340_vm4 = vcmp.ge.f32.partialorder %v6276_v12, -23.02585  ;;  %vm6334_vm15 = vcmp.ge.f32.partialorder %v6270_v25, -23.02585  ;;  %v16435_v8 = vsub.f32 %v20680_v0, %v6246_v61  ;;  %v16438_v40 = vsub.f32 %v20681_v28, %v6246_v61  ;;  %v20708_v0 = vld [vmem:[#allocation303_spill] sm:$0xff] }
 0x5ec   :  { %vm6404_vm6 = vmand %vm20673_vm13, %vm6340_vm4  ;;  %v6278_v16 = vsub.f32 %v20682_v7, %v6246_v61  ;;  %v6264_v24 = vsub.f32 %v20683_v17, %v6246_v61  ;;  %v6266_v27 = vsub.f32 %v20684_v34, %v6246_v61  ;;  %v6268_v19 = vsub.f32 %v20685_v42, %v6246_v61  ;;  %v20710_v17 = vld [vmem:[#allocation112_spill] sm:$0xff] }
 0x5ed   :  { %v6468_v29 = vsel %vm6404_vm6, %v6276_v12, 0.0  ;;  %v6274_v35 = vsub.f32 %v20686_v51, %v6246_v61  ;;  %v6272_v37 = vsub.f32 %v20687_v2, %v6246_v61  ;;  %v16447_v63 = vsub.f32 %v20688_v57, %v6246_v61  ;;  %vm6398_vm9 = vmand %vm20692_vm10, %vm6334_vm15  ;;  %v20712_v34 = vld [vmem:[#allocation276_spill] sm:$0xff]  ;;  %v20714_v57 = vld [vmem:[#allocation266_spill] sm:$0xff] }
 0x5ee   :  { %v16450_v52 = vsub.f32 %v20689_v18, %v6246_v61  ;;  %v16453_v10 = vsub.f32 %v20690_v3, %v6246_v61  ;;  %v16458_v39 = vsub.f32 %v20693_v56, %v6246_v61  ;;  %v16461_v13 = vsub.f32 %v20694_v1, %v6246_v61  ;;  %v20716_v56 = vld [vmem:[#allocation131_spill] sm:$0xff] }
 0x5ef   :  { %v16464_v59 = vsub.f32 %v20695_v43, %v6246_v61  ;;  %v16466_v33 = vand.u32 4294901760, %v6468_v29  ;;  %v16469_v47 = vsub.f32 %v20696_v49, %v6246_v61  ;;  %v16472_v41 = vsub.f32 %v20697_v54, %v6246_v61  ;;  %v20718_v54 = vld [vmem:[#allocation26_spill] sm:$0xff] }
 0x5f0   :  { %v16475_v53 = vsub.f32 %v20698_v23, %v6246_v61  ;;  %vm6342_vm0 = vcmp.ge.f32.partialorder %v6278_v16, -23.02585  ;;  %v16478_v30 = vsub.f32 %v20699_v4, %v6246_v61  ;;  %v16481_v26 = vsub.f32 %v20700_v9, %v6246_v61  ;;  %v20720_v9 = vld [vmem:[#allocation237_spill] sm:$0xff] }
 0x5f1   :  { %vm6338_vm5 = vcmp.ge.f32.partialorder %v6274_v35, -23.02585  ;;  %v6462_v38 = vsel %vm6398_vm9, %v6270_v25, 0.0  ;;  %v16484_v11 = vsub.f32 %v20701_v45, %v6246_v61  ;;  %v16487_v12 = vsub.f32 %v20702_v36, %v6246_v61  ;;  %v20722_v36 = vld [vmem:[#allocation228_spill] sm:$0xff] }
 0x5f2   :  { %v16490_v55 = vsub.f32 %v20703_v6, %v6246_v61  ;;  %vm6336_vm11 = vcmp.ge.f32.partialorder %v6272_v37, -23.02585  ;;  %v16493_v48 = vsub.f32 %v20704_v32, %v6246_v61  ;;  %v16496_v21 = vsub.f32 %v20705_v5, %v6246_v61  ;;  %v20726_v32 = vld [vmem:[#allocation323_spill] sm:$0xff] }
 0x5f3   :  { %vm6332_vm14 = vcmp.ge.f32.partialorder %v6268_v19, -23.02585  ;;  %vm20707_vm8 = vnez %v20706_v22  ;;  %v16501_v25 = vsub.f32 %v6468_v29, %v16466_v33  ;;  %vm6322_vm1 = vcmp.ge.f32.partialorder %v16432_v46, -23.02585 }
 0x5f4   :  { %vm6406_vm3 = vmand %vm20707_vm8, %vm6342_vm0  ;;  %vm6330_vm7 = vcmp.ge.f32.partialorder %v6266_v27, -23.02585  ;;  %vm20709_vm2 = vnez %v20708_v0  ;;  %v16506_v28 = vand.u32 4294901760, %v6462_v38  ;;  %vm6324_vm4 = vcmp.ge.f32.partialorder %v16435_v8, -23.02585 }
 0x5f5   :  { %v6470_v15 = vsel %vm6406_vm3, %v6278_v16, 0.0  ;;  %vm6402_vm12 = vmand %vm20709_vm2, %vm6338_vm5  ;;  %vm6328_vm13 = vcmp.ge.f32.partialorder %v6264_v24, -23.02585  ;;  %vm20711_vm6 = vnez %v20710_v17  ;;  %vm6326_vm10 = vcmp.ge.f32.partialorder %v16438_v40, -23.02585 }
 0x5f6   :  { %v16509_v61 = vand.u32 4294901760, %v6470_v15  ;;  %v6466_v7 = vsel %vm6402_vm12, %v6274_v35, 0.0  ;;  %vm6400_vm15 = vmand %vm20711_vm6, %vm6336_vm11  ;;  %vm6374_vm9 = vcmp.ge.f32.partialorder %v16490_v55, -23.02585  ;;  %vm20713_vm0 = vnez %v20712_v34  ;;  %v20730_v34 = vld [vmem:[#allocation55_spill] sm:$0xff] }
 0x5f7   :  { %v16516_v16 = vand.u32 4294901760, %v6466_v7  ;;  %v6464_v29 = vsel %vm6400_vm15, %v6272_v37, 0.0  ;;  %vm6396_vm5 = vmand %vm20713_vm0, %vm6332_vm14  ;;  %v18828_v2 = vand.u32 4294901760, %v16501_v25  ;;  %vm20715_vm11 = vnez %v20714_v57 }
 0x5f8   :  { %7160 = vmatpush.msra.mxu0 %v16509_v61  ;;  %7348 = vmatpush.msra.mxu3 %v16509_v61  ;;  %v16524_v42 = vsub.f32 %v6470_v15, %v16509_v61  ;;  %v16526_v51 = vand.u32 4294901760, %v6464_v29  ;;  %v6460_v35 = vsel %vm6396_vm5, %v6268_v19, 0.0  ;;  %vm6394_vm8 = vmand %vm20715_vm11, %vm6330_vm7  ;;  %v16538_v3 = vsub.f32 %v6462_v38, %v16506_v28 }
 0x5f9   :  { %v16533_v37 = vsub.f32 %v6466_v7, %v16516_v16  ;;  %v16535_v18 = vand.u32 4294901760, %v6460_v35  ;;  %v6458_v60 = vsel %vm6394_vm8, %v6266_v27, 0.0  ;;  %vm20717_vm14 = vnez %v20716_v56 }
 0x5fa   :  { %vm6392_vm3 = vmand %vm20717_vm14, %vm6328_vm13  ;;  %7162 = vmatpush.msra.mxu0 %v16466_v33  ;;  %7297 = vmatpush.msra.mxu2 %v16524_v42  ;;  %v18830_v19 = vand.u32 4294901760, %v16524_v42  ;;  %v16547_v1 = vsub.f32 %v6464_v29, %v16526_v51  ;;  %v16549_v43 = vand.u32 4294901760, %v6458_v60  ;;  %vm20719_vm7 = vnez %v20718_v54 }
 0x5fb   :  { %v6456_v49 = vsel %vm6392_vm3, %v6264_v24, 0.0  ;;  %vm6390_vm2 = vmand %vm20719_vm7, %vm6326_vm10  ;;  %vm6320_vm12 = vcmp.ge.f32.partialorder %v16429_v62, -23.02585  ;;  %7350 = vmatpush.msra.mxu3 %v16466_v33  ;;  %v18827_v27 = vand.u32 4294901760, %v16533_v37  ;;  %v16559_v23 = vsub.f32 %v6460_v35, %v16535_v18 }
 0x5fc   :  { %v6454_v4 = vsel %vm6390_vm2, %v16438_v40, 0.0  ;;  %vm20721_vm13 = vnez %v20720_v9  ;;  %vm6312_vm15 = vcmp.ge.f32.partialorder %v16417_v50, -23.02585  ;;  %7164 = vmatpush.msra.mxu0 %v16516_v16  ;;  %7300 = vmatpush.msra.mxu2 %v16501_v25  ;;  %v7198_v24 = vsub.f32 %v16524_v42, %v18830_v19 }
 0x5fd   :  { %vm6388_vm6 = vmand %vm20721_vm13, %vm6324_vm4  ;;  %v7204_v38 = vsub.f32 %v16501_v25, %v18828_v2  ;;  %v16575_v40 = vand.u32 4294901760, %v6456_v49  ;;  %v18825_v45 = vand.u32 4294901760, %v16547_v1  ;;  %vm20723_vm4 = vnez %v20722_v36  ;;  %7352 = vmatpush.msra.mxu3 %v16516_v16 }
 0x5fe   :  { %vm16582_vm10 = vmand %vm20723_vm4, %vm6322_vm1  ;;  %vm6314_vm0 = vcmp.ge.f32.partialorder %v16420_v58, -23.02585  ;;  %vm6318_vm5 = vcmp.ge.f32.partialorder %v16426_v20, -23.02585  ;;  %vm20727_vm11 = vnez %v20726_v32  ;;  %v18824_v22 = vand.u32 4294901760, %v16538_v3  ;;  %7166 = vmatpush.msra.mxu0 %v16526_v51  ;;  %7303 = vmatpush.msra.mxu2 %v16533_v37 }
 0x5ff   :  { %vm16592_vm8 = vmand %vm20727_vm11, %vm6374_vm9  ;;  %v6452_v15 = vsel %vm6388_vm6, %v16435_v8, 0.0  ;;  %v7199_v0 = vand.u32 4294901760, %v7198_v24  ;;  %v7210_v7 = vsub.f32 %v16533_v37, %v18827_v27  ;;  %v16605_v17 = vsub.f32 %v6458_v60, %v16549_v43  ;;  %7354 = vmatpush.msra.mxu3 %v16526_v51 }
 0x600   :  { %v16607_v29 = vand.u32 4294901760, %v6454_v4  ;;  %vm20731_vm1 = vnez %v20730_v34  ;;  %vm6372_vm14 = vcmp.ge.f32.partialorder %v16496_v21, -23.02585  ;;  %v7216_v35 = vsub.f32 %v16547_v1, %v18825_v45  ;;  %7168 = vmatpush.msra.mxu0 %v16506_v28  ;;  %7306 = vmatpush.msra.mxu2 %v16547_v1 }
 0x601   :  { %vm16613_vm9 = vmand %vm20731_vm1, %vm6320_vm12  ;;  %v18823_v57 = vand.u32 4294901760, %v16559_v23  ;;  %v6450_v60 = vsel %vm16582_vm10, %v16432_v46, 0.0  ;;  %vm6316_vm3 = vcmp.ge.f32.partialorder %v16423_v14, -23.02585  ;;  %7200 = vmatpush.msra.mxu1 %v7199_v0  ;;  %v7205_v56 = vand.u32 4294901760, %v7204_v38  ;;  %7356 = vmatpush.msra.mxu3 %v16506_v28  ;;  %v20734_v38 = vld [vmem:[#allocation64_spill] sm:$0xff] }
 0x602   :  { %v16629_v54 = vsub.f32 %v6456_v49, %v16575_v40  ;;  %v16631_v9 = vand.u32 4294901760, %v6452_v15  ;;  %vm6370_vm7 = vcmp.ge.f32.partialorder %v16493_v48, -23.02585  ;;  %v6502_v24 = vsel %vm16592_vm8, %v16490_v55, 0.0  ;;  %v20738_v55 = vld [vmem:[#allocation315_spill] sm:$0xff]  ;;  %7170 = vmatpush.msra.mxu0 %v16535_v18  ;;  %7309 = vmatpush.msra.mxu2 %v16538_v3 }
 0x603   :  { %v7222_v46 = vsub.f32 %v16538_v3, %v18824_v22  ;;  %v6448_v49 = vsel %vm16613_vm9, %v16429_v62, 0.0  ;;  %vm20735_vm2 = vnez %v20734_v38  ;;  %vm6360_vm13 = vcmp.ge.f32.partialorder %v16475_v53, -23.02585  ;;  %7206 = vmatpush.msra.mxu1 %v7205_v56  ;;  %7358 = vmatpush.msra.mxu3 %v16535_v18  ;;  %v20747_v56 = vld [vmem:[#allocation305_spill] sm:$0xff] }
 0x604   :  { %vm16649_vm12 = vmand %vm20735_vm2, %vm6318_vm5  ;;  %vm20739_vm6 = vnez %v20738_v55  ;;  %v7211_v62 = vand.u32 4294901760, %v7210_v7  ;;  %v16664_v32 = vsub.f32 %v6454_v4, %v16607_v29  ;;  %v16666_v5 = vand.u32 4294901760, %v6450_v60  ;;  %v20743_v4 = vld [vmem:[#allocation201_spill] sm:$0xff]  ;;  %7172 = vmatpush.msra.mxu0 %v16549_v43  ;;  %7312 = vmatpush.msra.mxu2 %v16559_v23 }
 0x605   :  { %vm16658_vm4 = vmand %vm20739_vm6, %vm6372_vm14  ;;  %v18826_v0 = vand.u32 4294901760, %v16605_v17  ;;  %vm6362_vm10 = vcmp.ge.f32.partialorder %v16478_v30, -23.02585  ;;  %vm6368_vm5 = vcmp.ge.f32.partialorder %v16487_v12, -23.02585  ;;  %v7217_v34 = vand.u32 4294901760, %v7216_v35  ;;  %7360 = vmatpush.msra.mxu3 %v16549_v43 }
 0x606   :  { %20742 = vst [vmem:[#allocation37_spill] sm:$0xff] %v16666_v5  ;;  %v7228_v7 = vsub.f32 %v16559_v23, %v18823_v57  ;;  %vm20744_vm11 = vnez %v20743_v4  ;;  %vm6358_vm1 = vcmp.ge.f32.partialorder %v16472_v41, -23.02585  ;;  %vm20748_vm9 = vnez %v20747_v56  ;;  %7212 = vmatpush.msra.mxu1 %v7211_v62  ;;  %v20752_v62 = vld [vmem:[#allocation192_spill] sm:$0xff]  ;;  %7174 = vmatpush.msra.mxu0 %v16575_v40 }
 0x607   :  { %vm16680_vm8 = vmand %vm20744_vm11, %vm6316_vm3  ;;  %v16695_v38 = vsub.f32 %v6452_v15, %v16631_v9  ;;  %v16697_v55 = vand.u32 4294901760, %v6448_v49  ;;  %v18829_v4 = vand.u32 4294901760, %v16629_v54  ;;  %v6446_v57 = vsel %vm16649_vm12, %v16426_v20, 0.0  ;;  %v20756_v20 = vld [vmem:[#allocation297_spill] sm:$0xff]  ;;  %7315 = vmatpush.msra.mxu2 %v16605_v17  ;;  %7362 = vmatpush.msra.mxu3 %v16575_v40 }
 0x608   :  { %vm16689_vm14 = vmand %vm20748_vm9, %vm6370_vm7  ;;  %vm6366_vm3 = vcmp.ge.f32.partialorder %v16484_v11, -23.02585  ;;  %v6500_v56 = vsel %vm16658_vm4, %v16496_v21, 0.0  ;;  %v16707_v22 = vand.u32 4294901760, %v6502_v24  ;;  %v7223_v15 = vand.u32 4294901760, %v7222_v46  ;;  %7218 = vmatpush.msra.mxu1 %v7217_v34  ;;  %7176 = vmatpush.msra.mxu0 %v16607_v29 }
 0x609   :  { %20751 = vst [vmem:[#allocation91_spill] sm:$0xff] %v16697_v55  ;;  %vm20753_vm7 = vnez %v20752_v62  ;;  %vm6356_vm12 = vcmp.ge.f32.partialorder %v16469_v47, -23.02585  ;;  %vm20757_vm6 = vnez %v20756_v20  ;;  %v7234_v46 = vsub.f32 %v16605_v17, %v18826_v0  ;;  %7318 = vmatpush.msra.mxu2 %v16629_v54  ;;  %7364 = vmatpush.msra.mxu3 %v16607_v29 }
 0x60a   :  { %vm16715_vm2 = vmand %vm20753_vm7, %vm6314_vm0  ;;  %v16733_v6 = vsub.f32 %v6450_v60, %v16666_v5  ;;  %v18831_v62 = vand.u32 4294901760, %v16664_v32  ;;  %v6444_v20 = vsel %vm16680_vm8, %v16423_v14, 0.0  ;;  %vm6364_vm0 = vcmp.ge.f32.partialorder %v16481_v26, -23.02585  ;;  %v20761_v60 = vld [vmem:[#allocation187_spill] sm:$0xff]  ;;  %v20765_v14 = vld [vmem:[#allocation289_spill] sm:$0xff]  ;;  %7224 = vmatpush.msra.mxu1 %v7223_v15  ;;  %7178 = vmatpush.msra.mxu0 %v16631_v9 }
 0x60b   :  { %vm16724_vm4 = vmand %vm20757_vm6, %vm6368_vm5  ;;  %v6498_v45 = vsel %vm16689_vm14, %v16493_v48, 0.0  ;;  %v7229_v34 = vand.u32 4294901760, %v7228_v7  ;;  %v16745_v0 = vand.u32 4294901760, %v6446_v57  ;;  %vm20762_vm5 = vnez %v20761_v60  ;;  %7321 = vmatpush.msra.mxu2 %v16664_v32  ;;  %7366 = vmatpush.msra.mxu3 %v16631_v9 }
 0x60c   :  { %vm16751_vm11 = vmand %vm20762_vm5, %vm6312_vm15  ;;  %vm6354_vm8 = vcmp.ge.f32.partialorder %v16464_v59, -23.02585  ;;  %vm20766_vm9 = vnez %v20765_v14  ;;  %v7240_v7 = vsub.f32 %v16629_v54, %v18829_v4  ;;  %v16769_v35 = vsub.f32 %v6448_v49, %v16697_v55  ;;  %7180 = vmatpush.msra.mxu0 %v16666_v5 }
 0x60d   :  { %20760 = vst [vmem:[#allocation92_spill] sm:$0xff] %v16745_v0  ;;  %vm16760_vm14 = vmand %vm20766_vm9, %vm6366_vm3  ;;  %v18833_v60 = vand.u32 4294901760, %v16695_v38  ;;  %v6442_v14 = vsel %vm16715_vm2, %v16420_v58, 0.0  ;;  %v6496_v27 = vsel %vm16724_vm4, %v16487_v12, 0.0  ;;  %v16778_v2 = vand.u32 4294901760, %v6500_v56  ;;  %v20771_v58 = vld [vmem:[#allocation267_spill] sm:$0xff]  ;;  %7230 = vmatpush.msra.mxu1 %v7229_v34  ;;  %7324 = vmatpush.msra.mxu2 %v16695_v38 }
 0x60e   :  { %v16781_v15 = vsub.f32 %v6502_v24, %v16707_v22  ;;  %v16785_v49 = vand.u32 4294901760, %v6444_v20  ;;  %vm6352_vm15 = vcmp.ge.f32.partialorder %v16461_v13, -23.02585  ;;  %vm20772_vm3 = vnez %v20771_v58  ;;  %v20775_v58 = vld [vmem:[#allocation278_spill] sm:$0xff]  ;;  %7368 = vmatpush.msra.mxu3 %v16666_v5  ;;  %7182 = vmatpush.msra.mxu0 %v16697_v55 }
 0x60f   :  { %vm16792_vm7 = vmand %vm20772_vm3, %vm6362_vm10  ;;  %v7235_v12 = vand.u32 4294901760, %v7234_v46  ;;  %v7246_v24 = vsub.f32 %v16664_v32, %v18831_v62  ;;  %v6440_v4 = vsel %vm16751_vm11, %v16417_v50, 0.0  ;;  %vm20776_vm10 = vnez %v20775_v58  ;;  %7327 = vmatpush.msra.mxu2 %v16733_v6 }
 0x610   :  { %20769 = vst [vmem:[#allocation49_spill] sm:$0xff] %v16781_v15  ;;  %vm16808_vm2 = vmand %vm20776_vm10, %vm6364_vm0  ;;  %v6494_v46 = vsel %vm16760_vm14, %v16484_v11, 0.0  ;;  %v16815_v34 = vand.u32 4294901760, %v6498_v45  ;;  %v16820_v50 = vsub.f32 %v6446_v57, %v16745_v0  ;;  %v16822_v8 = vand.u32 4294901760, %v6442_v14  ;;  %v20780_v57 = vld [vmem:[#allocation257_spill] sm:$0xff]  ;;  %7370 = vmatpush.msra.mxu3 %v16697_v55  ;;  %7184 = vmatpush.msra.mxu0 %v16745_v0 }
 0x611   :  { %20770 = vst [vmem:[#allocation76_spill] sm:$0xff] %v16785_v49  ;;  %vm6350_vm6 = vcmp.ge.f32.partialorder %v16458_v39, -23.02585  ;;  %v16825_v58 = vand.u32 4294901760, %v6496_v27  ;;  %7236 = vmatpush.msra.mxu1 %v7235_v12  ;;  %v7241_v48 = vand.u32 4294901760, %v7240_v7  ;;  %v7252_v11 = vsub.f32 %v16695_v38, %v18833_v60  ;;  %7330 = vmatpush.msra.mxu2 %v16769_v35 }
 0x612   :  { %20779 = vst [vmem:[#allocation86_spill] sm:$0xff] %v16822_v8  ;;  %vm20781_vm4 = vnez %v20780_v57  ;;  %v6490_v31 = vsel %vm16792_vm7, %v16478_v30, 0.0  ;;  %v16844_v7 = vsub.f32 %v6500_v56, %v16778_v2  ;;  %v16849_v12 = vsub.f32 %v6444_v20, %v16785_v49  ;;  %v20787_v20 = vld [vmem:[#allocation248_spill] sm:$0xff]  ;;  %7372 = vmatpush.msra.mxu3 %v16745_v0  ;;  %7186 = vmatpush.msra.mxu0 %v16785_v49 }
 0x613   :  { %vm16836_vm0 = vmand %vm20781_vm4, %vm6360_vm13  ;;  %v16851_v60 = vand.u32 4294901760, %v6440_v4  ;;  %vm6348_vm13 = vcmp.ge.f32.partialorder %v16453_v10, -23.02585  ;;  %v6492_v57 = vsel %vm16808_vm2, %v16481_v26, 0.0  ;;  %7242 = vmatpush.msra.mxu1 %v7241_v48  ;;  %v7247_v30 = vand.u32 4294901760, %v7246_v24  ;;  %v20793_v48 = vld [vmem:[#allocation239_spill] sm:$0xff]  ;;  %7333 = vmatpush.msra.mxu2 %v16820_v50 }
 0x614   :  { %20784 = vst [vmem:[#allocation97_spill] sm:$0xff] %v16844_v7  ;;  %v20786_v56 = vand.u32 4294901760, %v16733_v6  ;;  %vm20788_vm5 = vnez %v20787_v20  ;;  %v16870_v19 = vand.u32 4294901760, %v6494_v46  ;;  %v16873_v26 = vsub.f32 %v6498_v45, %v16815_v34  ;;  %7374 = vmatpush.msra.mxu3 %v16785_v49  ;;  %7188 = vmatpush.msra.mxu0 %v16822_v8 }
 0x615   :  { %20785 = vst [vmem:[#allocation71_spill] sm:$0xff] %v16851_v60  ;;  %vm16866_vm11 = vmand %vm20788_vm5, %vm6358_vm1  ;;  %v16878_v24 = vsub.f32 %v6442_v14, %v16822_v8  ;;  %vm6346_vm9 = vcmp.ge.f32.partialorder %v16450_v52, -23.02585  ;;  %v16886_v20 = vsub.f32 %v6496_v27, %v16825_v58  ;;  %7248 = vmatpush.msra.mxu1 %v7247_v30  ;;  %v7253_v45 = vand.u32 4294901760, %v7252_v11  ;;  %7336 = vmatpush.msra.mxu2 %v16849_v12 }
 0x616   :  { %v7258_v36 = vsub.f32 %v16733_v6, %v20786_v56  ;;  %v6488_v56 = vsel %vm16836_vm0, %v16475_v53, 0.0  ;;  %v20792_v62 = vand.u32 4294901760, %v16769_v35  ;;  %vm20794_vm1 = vnez %v20793_v48  ;;  %7376 = vmatpush.msra.mxu3 %v16822_v8  ;;  %7190 = vmatpush.msra.mxu0 %v16851_v60 }
 0x617   :  { %20791 = vst [vmem:[#allocation83_spill] sm:$0xff] %v16886_v20  ;;  %vm16896_vm14 = vmand %vm20794_vm1, %vm6356_vm12  ;;  %v16900_v53 = vand.u32 4294901760, %v6492_v57  ;;  %v16905_v27 = vsub.f32 %v6440_v4, %v16851_v60  ;;  %v6486_v11 = vsel %vm16866_vm11, %v16472_v41, 0.0  ;;  %v16912_v30 = vand.u32 4294901760, %v6490_v31  ;;  %7254 = vmatpush.msra.mxu1 %v7253_v45  ;;  %v20798_v4 = vld [vmem:[#allocation229_spill] sm:$0xff]  ;;  %7339 = vmatpush.msra.mxu2 %v16878_v24 }
 0x618   :  { %v7264_v14 = vsub.f32 %v16769_v35, %v20792_v62  ;;  %v7259_v48 = vand.u32 4294901760, %v7258_v36  ;;  %v20797_v5 = vand.u32 4294901760, %v16781_v15  ;;  %vm20799_vm12 = vnez %v20798_v4  ;;  %7378 = vmatpush.msra.mxu3 %v16851_v60 }
 0x619   :  { %vm16922_vm3 = vmand %vm20799_vm12, %vm6354_vm8  ;;  %v16927_v44 = vsub.f32 %v6494_v46, %v16870_v19  ;;  %v20802_v41 = vand.u32 4294901760, %v16820_v50  ;;  %v16939_v4 = vsel %vm16896_vm14, %v16469_v47, 0.0  ;;  %v16941_v21 = vand.u32 4294901760, %v6488_v56  ;;  %7342 = vmatpush.msra.mxu2 %v16905_v27 }
 0x61a   :  { %v7526_v0 = vsub.f32 %v16781_v15, %v20797_v5  ;;  %7260 = vmatpush.msra.mxu1 %v7259_v48  ;;  %v7265_v46 = vand.u32 4294901760, %v7264_v14  ;;  %v16954_v55 = vsub.f32 %v6492_v57, %v16900_v53  ;;  %v20807_v47 = vand.u32 4294901760, %v16844_v7 }
 0x61b   :  { %v7270_v36 = vsub.f32 %v16820_v50, %v20802_v41  ;;  %v20803_v41 = vld [vmem:[#allocation220_spill] sm:$0xff]  ;;  %v20808_v48 = vand.u32 4294901760, %v16849_v12  ;;  %v6482_v45 = vsel %vm16922_vm3, %v16464_v59, 0.0  ;;  %v16968_v57 = vand.u32 4294901760, %v6486_v11  ;;  %7488 = vmatpush.msrb.mxu2 %v16707_v22 }
 0x61c   :  { %vm20804_vm8 = vnez %v20803_v41  ;;  %v7532_v14 = vsub.f32 %v16844_v7, %v20807_v47  ;;  %v16971_v15 = vsub.f32 %v6490_v31, %v16912_v30  ;;  %7266 = vmatpush.msra.mxu1 %v7265_v46  ;;  %v7527_v8 = vand.u32 4294901760, %v7526_v0  ;;  %v20809_v47 = vld [vmem:[#allocation212_spill] sm:$0xff]  ;;  %v20817_v41 = vld [vmem:[#allocation203_spill] sm:$0xff] }
 0x61d   :  { %vm16949_vm7 = vmand %vm20804_vm8, %vm6352_vm15  ;;  %v7276_v49 = vsub.f32 %v16849_v12, %v20808_v48  ;;  %vm20810_vm15 = vnez %v20809_v47  ;;  %v7271_v59 = vand.u32 4294901760, %v7270_v36  ;;  %v20813_v31 = vand.u32 4294901760, %v16873_v26  ;;  %7490 = vmatpush.msrb.mxu2 %v16778_v2 }
 0x61e   :  { %vm16978_vm10 = vmand %vm20810_vm15, %vm6350_vm6  ;;  %v20814_v46 = vand.u32 4294901760, %v16878_v24  ;;  %v6480_v47 = vsel %vm16949_vm7, %v16461_v13, 0.0  ;;  %v16995_v7 = vand.u32 4294901760, %v16939_v4  ;;  %v16998_v60 = vsub.f32 %v6488_v56, %v16941_v21  ;;  %7528 = vmatpush.msrb.mxu3 %v7527_v8 }
 0x61f   :  { %v7538_v62 = vsub.f32 %v16873_v26, %v20813_v31  ;;  %v20815_v36 = vand.u32 4294901760, %v16524_v42  ;;  %v20816_v31 = vand.u32 4294901760, %v16886_v20  ;;  %vm20818_vm2 = vnez %v20817_v41  ;;  %7272 = vmatpush.msra.mxu1 %v7271_v59  ;;  %7492 = vmatpush.msrb.mxu2 %v16815_v34 }
 0x620   :  { %v7282_v0 = vsub.f32 %v16878_v24, %v20814_v46  ;;  %vm17009_vm6 = vmand %vm20818_vm2, %vm6348_vm13  ;;  %v7533_v56 = vand.u32 4294901760, %v7532_v14  ;;  %v7277_v5 = vand.u32 4294901760, %v7276_v49  ;;  %v20821_v42 = vand.u32 4294901760, %v16905_v27  ;;  %v20823_v49 = vld [vmem:[#allocation193_spill] sm:$0xff] }
 0x621   :  { %7386 = vmatpush.msrb.mxu0 %v20815_v36  ;;  %v7544_v46 = vsub.f32 %v16886_v20, %v20816_v31  ;;  %vm6344_vm4 = vcmp.ge.f32.partialorder %v16447_v63, -23.02585  ;;  %v6478_v41 = vsel %vm16978_vm10, %v16458_v39, 0.0  ;;  %v17022_v31 = vand.u32 4294901760, %v6482_v45  ;;  %7494 = vmatpush.msrb.mxu2 %v16825_v58 }
 0x622   :  { %v7288_v8 = vsub.f32 %v16905_v27, %v20821_v42  ;;  %v17025_v59 = vsub.f32 %v6486_v11, %v16968_v57  ;;  %v20822_v14 = vand.u32 4294901760, %v16501_v25  ;;  %vm20824_vm0 = vnez %v20823_v49  ;;  %7534 = vmatpush.msrb.mxu3 %v7533_v56  ;;  %7278 = vmatpush.msra.mxu1 %v7277_v5 }
 0x623   :  { %vm17034_vm13 = vmand %vm20824_vm0, %vm6346_vm9  ;;  %v7539_v39 = vand.u32 4294901760, %v7538_v62  ;;  %v7283_v48 = vand.u32 4294901760, %v7282_v0  ;;  %v20827_v11 = vand.u32 4294901760, %v16927_v44  ;;  %v7561_v25 = vand.u32 4294901760, %v16971_v15  ;;  %v20829_v62 = vld [vmem:[#allocation189_spill] sm:$0xff]  ;;  %7496 = vmatpush.msrb.mxu2 %v16870_v19 }
 0x624   :  { %7390 = vmatpush.msrb.mxu0 %v20822_v14  ;;  %v6476_v14 = vsel %vm17009_vm6, %v16453_v10, 0.0  ;;  %v17045_v20 = vand.u32 4294901760, %v6480_v47  ;;  %v20828_v49 = vand.u32 4294901760, %v16533_v37  ;;  %v7545_v56 = vand.u32 4294901760, %v7544_v46 }
 0x625   :  { %v7550_v36 = vsub.f32 %v16927_v44, %v20827_v11  ;;  %vm20830_vm5 = vnez %v20829_v62  ;;  %7540 = vmatpush.msrb.mxu3 %v7539_v39  ;;  %7284 = vmatpush.msra.mxu1 %v7283_v48  ;;  %v7289_v13 = vand.u32 4294901760, %v7288_v8  ;;  %v20833_v10 = vand.u32 4294901760, %v16954_v55 }
 0x626   :  { %7394 = vmatpush.msrb.mxu0 %v20828_v49  ;;  %vm17054_vm11 = vmand %vm20830_vm5, %vm6344_vm4  ;;  %v7567_v37 = vand.u32 4294901760, %v16998_v60  ;;  %v17064_v46 = vsub.f32 %v16939_v4, %v16995_v7  ;;  %v6474_v11 = vsel %vm17034_vm13, %v16450_v52, 0.0  ;;  %v17069_v49 = vand.u32 4294901760, %v6478_v41  ;;  %7498 = vmatpush.msrb.mxu2 %v16900_v53 }
 0x627   :  { %v7556_v5 = vsub.f32 %v16954_v55, %v20833_v10  ;;  %v20834_v39 = vand.u32 4294901760, %v16547_v1  ;;  %7546 = vmatpush.msrb.mxu3 %v7545_v56  ;;  %7290 = vmatpush.msra.mxu1 %v7289_v13  ;;  %v7551_v8 = vand.u32 4294901760, %v7550_v36  ;;  %v7562_v48 = vsub.f32 %v16971_v15, %v7561_v25 }
 0x628   :  { %v7573_v4 = vand.u32 4294901760, %v17025_v59  ;;  %v17079_v62 = vsub.f32 %v6482_v45, %v17022_v31  ;;  %v6472_v52 = vsel %vm17054_vm11, %v16447_v63, 0.0  ;;  %v17084_v1 = vand.u32 4294901760, %v6476_v14  ;;  %7500 = vmatpush.msrb.mxu2 %v16912_v30 }
 0x629   :  { %7398 = vmatpush.msrb.mxu0 %v20834_v39  ;;  %v20835_v42 = vand.u32 4294901760, %v16538_v3  ;;  %7452 = vmatpush.msrb.mxu1 %v16509_v61  ;;  %v7557_v36 = vand.u32 4294901760, %v7556_v5  ;;  %v7568_v45 = vsub.f32 %v16998_v60, %v7567_v37  ;;  %v7579_v56 = vand.u32 4294901760, %v17064_v46 }
 0x62a   :  { %7552 = vmatpush.msrb.mxu3 %v7551_v8  ;;  %v17095_v0 = vsub.f32 %v6480_v47, %v17045_v20  ;;  %v17097_v63 = vand.u32 4294901760, %v6474_v11  ;;  %v20836_v3 = vand.u32 4294901760, %v16559_v23  ;;  %v7563_v61 = vand.u32 4294901760, %v7562_v48  ;;  %7502 = vmatpush.msrb.mxu2 %v16941_v21 }
 0x62b   :  { %7402 = vmatpush.msrb.mxu0 %v20835_v42  ;;  %7454 = vmatpush.msrb.mxu1 %v16466_v33  ;;  %v7574_v13 = vsub.f32 %v17025_v59, %v7573_v4  ;;  %v7585_v10 = vand.u32 4294901760, %v17079_v62  ;;  %v17108_v47 = vsub.f32 %v6478_v41, %v17069_v49  ;;  %v17110_v5 = vand.u32 4294901760, %v6472_v52 }
 0x62c   :  { %7558 = vmatpush.msrb.mxu3 %v7557_v36  ;;  %v20837_v23 = vand.u32 4294901760, %v16605_v17  ;;  %v7569_v33 = vand.u32 4294901760, %v7568_v45  ;;  %v7580_v39 = vsub.f32 %v17064_v46, %v7579_v56  ;;  %v7591_v8 = vand.u32 4294901760, %v17095_v0  ;;  %7504 = vmatpush.msrb.mxu2 %v16968_v57 }
 0x62d   :  { %7406 = vmatpush.msrb.mxu0 %v20836_v3  ;;  %7456 = vmatpush.msrb.mxu1 %v16516_v16  ;;  %v17121_v41 = vsub.f32 %v6476_v14, %v17084_v1  ;;  %v20838_v48 = vand.u32 4294901760, %v16629_v54  ;;  %v7575_v16 = vand.u32 4294901760, %v7574_v13  ;;  %v7586_v17 = vsub.f32 %v17079_v62, %v7585_v10 }
 0x62e   :  { %7564 = vmatpush.msrb.mxu3 %v7563_v61  ;;  %v7597_v42 = vand.u32 4294901760, %v17108_v47  ;;  %v17132_v36 = vsub.f32 %v6474_v11, %v17097_v63  ;;  %v20839_v14 = vand.u32 4294901760, %v16664_v32  ;;  %v7592_v54 = vsub.f32 %v17095_v0, %v7591_v8  ;;  %7506 = vmatpush.msrb.mxu2 %v16995_v7 }
 0x62f   :  { %7410 = vmatpush.msrb.mxu0 %v20837_v23  ;;  %7458 = vmatpush.msrb.mxu1 %v16526_v51  ;;  %v7581_v51 = vand.u32 4294901760, %v7580_v39  ;;  %v7603_v45 = vand.u32 4294901760, %v17121_v41  ;;  %v17143_v3 = vsub.f32 %v6472_v52, %v17110_v5  ;;  %v20840_v11 = vand.u32 4294901760, %v16695_v38 }
 0x630   :  { %7570 = vmatpush.msrb.mxu3 %v7569_v33  ;;  %v7598_v32 = vsub.f32 %v17108_v47, %v7597_v42  ;;  %v7609_v61 = vand.u32 4294901760, %v17132_v36  ;;  %v20841_v13 = vand.u32 4294901760, %v16733_v6  ;;  %v7593_v38 = vand.u32 4294901760, %v7592_v54  ;;  %7508 = vmatpush.msrb.mxu2 %v17022_v31  ;;  %v20854_v54 = vld [vmem:[#allocation76_spill] sm:$0xff] }
 0x631   :  { %7414 = vmatpush.msrb.mxu0 %v20838_v48  ;;  %7460 = vmatpush.msrb.mxu1 %v16506_v28  ;;  %v7587_v28 = vand.u32 4294901760, %v7586_v17  ;;  %v7615_v52 = vand.u32 4294901760, %v17143_v3  ;;  %v20842_v23 = vand.u32 4294901760, %v16769_v35  ;;  %v20843_v33 = vand.u32 4294901760, %v16820_v50 }
 0x632   :  { %7576 = vmatpush.msrb.mxu3 %v7575_v16  ;;  %v7599_v6 = vand.u32 4294901760, %v7598_v32  ;;  %7510 = vmatpush.msrb.mxu2 %v17045_v20  ;;  %v20844_v39 = vand.u32 4294901760, %v16849_v12  ;;  %v20845_v48 = vand.u32 4294901760, %v16878_v24  ;;  %v20847_v17 = vand.u32 4294901760, %v16905_v27  ;;  %v20848_v12 = vld [vmem:[#allocation91_spill] sm:$0xff]  ;;  %v20850_v24 = vld [vmem:[#allocation49_spill] sm:$0xff] }
 0x633   :  { %7418 = vmatpush.msrb.mxu0 %v20839_v14  ;;  %7462 = vmatpush.msrb.mxu1 %v16535_v18  ;;  %v7604_v18 = vsub.f32 %v17121_v41, %v7603_v45  ;;  %v20851_v14 = vld [vmem:[#allocation92_spill] sm:$0xff]  ;;  %v20852_v27 = vld [vmem:[#allocation97_spill] sm:$0xff]  ;;  %v20857_v32 = vld [vmem:[#allocation83_spill] sm:$0xff] }
 0x634   :  { %7582 = vmatpush.msrb.mxu3 %v7581_v51  ;;  %7512 = vmatpush.msrb.mxu2 %v17069_v49  ;;  %v20853_v51 = vand.u32 4294901760, %v20850_v24 }
 0x635   :  { %7422 = vmatpush.msrb.mxu0 %v20840_v11  ;;  %7464 = vmatpush.msrb.mxu1 %v16549_v43  ;;  %v7610_v43 = vsub.f32 %v17132_v36, %v7609_v61  ;;  %v7605_v35 = vand.u32 4294901760, %v7604_v18  ;;  %v20855_v11 = vand.u32 4294901760, %v20852_v27  ;;  %v20859_v18 = vand.u32 4294901760, %v16873_v26 }
 0x636   :  { %7588 = vmatpush.msrb.mxu3 %v7587_v28  ;;  %7514 = vmatpush.msrb.mxu2 %v17084_v1  ;;  %v20856_v28 = vld [vmem:[#allocation86_spill] sm:$0xff] }
 0x637   :  { %7426 = vmatpush.msrb.mxu0 %v20841_v13  ;;  %7466 = vmatpush.msrb.mxu1 %v16575_v40  ;;  %v7616_v40 = vsub.f32 %v17143_v3, %v7615_v52  ;;  %v7611_v50 = vand.u32 4294901760, %v7610_v43  ;;  %v6636_v13 = vpop.f32.mrf.mxu1 }
 0x638   :  { %7594 = vmatpush.msrb.mxu3 %v7593_v38  ;;  %7516 = vmatpush.msrb.mxu2 %v17097_v63  ;;  %v20858_v38 = vmov 1.0  }
 0x639   :  { %7430 = vmatpush.msrb.mxu0 %v20842_v23  ;;  %7468 = vmatpush.msrb.mxu1 %v16607_v29  ;;  %v20846_v29 = vld [vmem:[#allocation37_spill] sm:$0xff]  ;;  %v7617_v16 = vand.u32 4294901760, %v7616_v40  ;;  %v6536_v23 = vpop.f32.mrf.mxu0 }
 0x63a   :  { %7600 = vmatpush.msrb.mxu3 %v7599_v6  ;;  %7518 = vmatpush.msrb.mxu2 %v17110_v5  ;;  %v20860_v6 = vld [vmem:[#allocation71_spill] sm:$0xff]  ;;  %v6637_v43 = vadd.f32 %v6636_v13, %v6536_v23 }
 0x63b   :  { %7434 = vmatpush.msrb.mxu0 %v20843_v33  ;;  %7470 = vmatpush.msrb.mxu1 %v16631_v9  ;;  %v20849_v9 = vmov 0.0   ;;  %v6688_v33 = vpop.f32.mrf.mxu2 }
 0x63c   :  { %7606 = vmatpush.msrb.mxu3 %v7605_v35  ;;  %7191 = vmatmul.f32.vlgmr.msra.gmra.mxu0 %v20849_v9  ;;  %v20861_v35 = vand.u32 4294901760, %v20857_v32  ;;  %v6689_v40 = vadd.f32 %v6688_v33, %v6637_v43 }
 0x63d   :  { %7438 = vmatpush.msrb.mxu0 %v20844_v39  ;;  %7472 = vmatpush.msrb.mxu1 %v20846_v29  ;;  %v20863_v39 = vand.u32 4294901760, %v16954_v55  ;;  %v20872_v29 = vld [vmem:[#allocation249_spill] sm:$0xff] }
 0x63e   :  { %7612 = vmatpush.msrb.mxu3 %v7611_v50  ;;  %7343 = vmatmul.f32.vlgmr.msra.gmra.mxu2 %v20849_v9 }
 0x63f   :  { %7442 = vmatpush.msrb.mxu0 %v20845_v48  ;;  %7474 = vmatpush.msrb.mxu1 %v20848_v12  ;;  %v20873_v12 = vld [vmem:[#allocation240_spill] sm:$0xff] }
 0x640   :  { %7618 = vmatpush.msrb.mxu3 %v7617_v16  ;;  %7714 = vmatpush.msra.mxu2 %v20853_v51 }
 0x641   :  { %7446 = vmatpush.msrb.mxu0 %v20847_v17  ;;  %7379 = vmatmul.f32.vlgmr.msra.gmra.mxu3 %v20849_v9 }
 0x642   :  { %7780 = vmatpush.msra.mxu3 %v16707_v22  ;;  %7476 = vmatpush.msrb.mxu1 %v20851_v14 }
 0x643   :  { %7625 = vmatpush.msra.mxu0 %v20850_v24  ;;  %7718 = vmatpush.msra.mxu2 %v20855_v11  ;;  %v20874_v11 = vld [vmem:[#allocation230_spill] sm:$0xff] }
 0x644   :  { %7782 = vmatpush.msra.mxu3 %v16778_v2  ;;  %7478 = vmatpush.msrb.mxu1 %v20854_v54 }
 0x645   :  { %7628 = vmatpush.msra.mxu0 %v20852_v27  ;;  %7291 = vmatmul.f32.vlgmr.msra.gmra.mxu1 %v20858_v38 }
 0x646   :  { %7784 = vmatpush.msra.mxu3 %v16815_v34  ;;  %7480 = vmatpush.msrb.mxu1 %v20856_v28 }
 0x647   :  { %7631 = vmatpush.msra.mxu0 %v16873_v26  ;;  %7722 = vmatpush.msra.mxu2 %v20859_v18  ;;  %v20862_v26 = vand.u32 4294901760, %v16927_v44 }
 0x648   :  { %7786 = vmatpush.msra.mxu3 %v16825_v58  ;;  %7482 = vmatpush.msrb.mxu1 %v20860_v6  ;;  %v20875_v6 = vld [vmem:[#allocation221_spill] sm:$0xff] }
 0x649   :  { %7634 = vmatpush.msra.mxu0 %v20857_v32  ;;  %7726 = vmatpush.msra.mxu2 %v20861_v35 }
 0x64a   :  { %7676 = vmatpush.msra.mxu1 %v16707_v22  ;;  %7788 = vmatpush.msra.mxu3 %v16870_v19  ;;  %v6724_v22 = vpop.f32.mrf.mxu3 }
 0x64b   :  { %7637 = vmatpush.msra.mxu0 %v16927_v44  ;;  %7519 = vmatmul.f32.vlgmr.msrb.gmra.mxu2 %v20849_v9  ;;  %v6792_v44 = vpop.f32.mrf.mxu0 }
 0x64c   :  { %7678 = vmatpush.msra.mxu1 %v16778_v2  ;;  %7730 = vmatpush.msra.mxu2 %v20862_v26  ;;  %v6725_v2 = vadd.f32 %v6724_v22, %v6689_v40 }
 0x64d   :  { %7640 = vmatpush.msra.mxu0 %v16954_v55  ;;  %7790 = vmatpush.msra.mxu3 %v16900_v53  ;;  %v20865_v55 = vld [vmem:[#allocation312_spill] sm:$0xff] }
 0x64e   :  { %7447 = vmatmul.f32.vlgmr.msrb.gmra.mxu0 %v20858_v38  ;;  %7619 = vmatmul.f32.vlgmr.msrb.gmra.mxu3 %v20858_v38 }
 0x64f   :  { %7643 = vmatpush.msra.mxu0 %v16971_v15  ;;  %7680 = vmatpush.msra.mxu1 %v16815_v34  ;;  %v6793_v34 = vadd.f32 %v6792_v44, %v6725_v2  ;;  %v20864_v15 = vld [vmem:[#allocation84_spill] sm:$0xff] }
 0x650   :  { %7734 = vmatpush.msra.mxu2 %v20863_v39  ;;  %7792 = vmatpush.msra.mxu3 %v16912_v30  ;;  %vm7830_vm9 = vcmp.eq.s32.totalorder %v20865_v55, %v20864_v15  ;;  %vm7823_vm15 = vcmp.eq.s32.totalorder %v20872_v29, %v20864_v15  ;;  %vm7822_vm10 = vcmp.eq.s32.totalorder %v20873_v12, %v20864_v15  ;;  %v20876_v39 = vld [vmem:[#allocation213_spill] sm:$0xff] }
 0x651   :  { %7483 = vmatmul.f32.vlgmr.msrb.gmra.mxu1 %v20858_v38  ;;  %7646 = vmatpush.msra.mxu0 %v16998_v60  ;;  %vm7821_vm2 = vcmp.eq.s32.totalorder %v20874_v11, %v20864_v15  ;;  %v8619_v32 = vsel %vm7822_vm10, 1.0, %v20849_v9  ;;  %vm7820_vm6 = vcmp.eq.s32.totalorder %v20875_v6, %v20864_v15  ;;  %vm18850_vm4 = vcmp.eq.s32.totalorder %v20876_v39, %v20864_v15 }
 0x652   :  { %7682 = vmatpush.msra.mxu1 %v16825_v58  ;;  %7738 = vmatpush.msra.mxu2 %v7561_v25  ;;  %v6828_v58 = vpop.f32.mrf.mxu1  ;;  %v8618_v33 = vsel %vm7821_vm2, 1.0, %v20849_v9  ;;  %v17420_v22 = vsub.f32 %v8619_v32, %v8619_v32  ;;  %v20880_v32 = vld [vmem:[#allocation178_spill] sm:$0xff] }
 0x653   :  { %7794 = vmatpush.msra.mxu3 %v16941_v21  ;;  %7649 = vmatpush.msra.mxu0 %v17025_v59  ;;  %v6829_v60 = vadd.f32 %v6828_v58, %v6793_v34  ;;  %v6864_v59 = vpop.f32.mrf.mxu2  ;;  %v8617_v34 = vsel %vm7820_vm6, 1.0, %v20849_v9  ;;  %vm18851_vm11 = vcmp.eq.s32.totalorder %v20880_v32, %v20864_v15 }
 0x654   :  { %7684 = vmatpush.msra.mxu1 %v16870_v19  ;;  %7742 = vmatpush.msra.mxu2 %v7567_v37  ;;  %v20866_v19 = vld [vmem:[#allocation304_spill] sm:$0xff] }
 0x655   :  { %7796 = vmatpush.msra.mxu3 %v16968_v57  ;;  %7652 = vmatpush.msra.mxu0 %v17064_v46  ;;  %vm7829_vm1 = vcmp.eq.s32.totalorder %v20866_v19, %v20864_v15  ;;  %v6865_v37 = vadd.f32 %v6864_v59, %v6829_v60  ;;  %v6964_v46 = vpop.f32.mrf.mxu3  ;;  %v17440_v60 = vsub.f32 %v8618_v33, %v8618_v33  ;;  %v20877_v59 = vld [vmem:[#allocation204_spill] sm:$0xff] }
 0x656   :  { %7686 = vmatpush.msra.mxu1 %v16900_v53  ;;  %7746 = vmatpush.msra.mxu2 %v7573_v4  ;;  %v8627_v53 = vsel %vm7830_vm9, 1.0, %v20849_v9  ;;  %v8626_v25 = vsel %vm7829_vm1, 1.0, %v20849_v9  ;;  %vm18849_vm0 = vcmp.eq.s32.totalorder %v20877_v59, %v20864_v15 }
 0x657   :  { %7798 = vmatpush.msra.mxu3 %v16995_v7  ;;  %7655 = vmatpush.msra.mxu0 %v17079_v62  ;;  %v17288_v62 = vsub.f32 %v8626_v25, %v8626_v25 }
 0x658   :  { %7688 = vmatpush.msra.mxu1 %v16912_v30  ;;  %7750 = vmatpush.msra.mxu2 %v7579_v56  ;;  %v17269_v30 = vsub.f32 %v8627_v53, %v8627_v53 }
 0x659   :  { %7800 = vmatpush.msra.mxu3 %v17022_v31  ;;  %7658 = vmatpush.msra.mxu0 %v17095_v0 }
 0x65a   :  { %7690 = vmatpush.msra.mxu1 %v16941_v21  ;;  %7754 = vmatpush.msra.mxu2 %v7585_v10  ;;  %v20867_v21 = vld [vmem:[#allocation164_spill] sm:$0xff]  ;;  %v7954_v56 = vand.u32 4294901760, %v17269_v30 }
 0x65b   :  { %7802 = vmatpush.msra.mxu3 %v17045_v20  ;;  %7661 = vmatpush.msra.mxu0 %v17108_v47  ;;  %vm7828_vm14 = vcmp.eq.s32.totalorder %v20867_v21, %v20864_v15  ;;  %v20870_v10 = vld [vmem:[#allocation268_spill] sm:$0xff]  ;;  %v7120_v28 = vpop.f32.mrf.mxu2 }
 0x65c   :  { %7692 = vmatpush.msra.mxu1 %v16968_v57  ;;  %7758 = vmatpush.msra.mxu2 %v7591_v8  ;;  %v20868_v57 = vld [vmem:[#allocation290_spill] sm:$0xff]  ;;  %v8625_v4 = vsel %vm7828_vm14, 1.0, %v20849_v9  ;;  %vm7825_vm8 = vcmp.eq.s32.totalorder %v20870_v10, %v20864_v15  ;;  %v7016_v8 = vpop.f32.mrf.mxu0  ;;  %v20886_v21 = vld [vmem:[#allocation128_spill] sm:$0xff] }
 0x65d   :  { %7804 = vmatpush.msra.mxu3 %v17069_v49  ;;  %7664 = vmatpush.msra.mxu0 %v17121_v41  ;;  %vm7827_vm12 = vcmp.eq.s32.totalorder %v20868_v57, %v20864_v15  ;;  %v17304_v47 = vsub.f32 %v8625_v4, %v8625_v4  ;;  %v7156_v2 = vpop.f32.mrf.mxu3 }
 0x65e   :  { %7694 = vmatpush.msra.mxu1 %v16995_v7  ;;  %7762 = vmatpush.msra.mxu2 %v7597_v42  ;;  %v20869_v7 = vld [vmem:[#allocation279_spill] sm:$0xff]  ;;  %v8624_v0 = vsel %vm7827_vm12, 1.0, %v20849_v9  ;;  %v20871_v42 = vld [vmem:[#allocation258_spill] sm:$0xff] }
 0x65f   :  { %7806 = vmatpush.msra.mxu3 %v17084_v1  ;;  %7667 = vmatpush.msra.mxu0 %v17132_v36  ;;  %vm7826_vm3 = vcmp.eq.s32.totalorder %v20869_v7, %v20864_v15  ;;  %vm7824_vm7 = vcmp.eq.s32.totalorder %v20871_v42, %v20864_v15  ;;  %v8622_v36 = vsel %vm7825_vm8, 1.0, %v20849_v9  ;;  %v7966_v48 = vand.u32 4294901760, %v17304_v47 }
 0x660   :  { %7696 = vmatpush.msra.mxu1 %v17022_v31  ;;  %7766 = vmatpush.msra.mxu2 %v7603_v45  ;;  %v6965_v31 = vadd.f32 %v6964_v46, %v6865_v37  ;;  %v8623_v41 = vsel %vm7826_vm3, 1.0, %v20849_v9  ;;  %v7960_v45 = vand.u32 4294901760, %v17288_v62  ;;  %v8616_v46 = vsel %vm18850_vm4, 1.0, %v20849_v9 }
 0x661   :  { %7808 = vmatpush.msra.mxu3 %v17097_v63  ;;  %7670 = vmatpush.msra.mxu0 %v17143_v3  ;;  %v17335_v50 = vsub.f32 %v8623_v41, %v8623_v41  ;;  %v8621_v3 = vsel %vm7824_vm7, 1.0, %v20849_v9  ;;  %v7967_v51 = vsub.f32 %v17304_v47, %v7966_v48 }
 0x662   :  { %7698 = vmatpush.msra.mxu1 %v17045_v20  ;;  %7770 = vmatpush.msra.mxu2 %v7609_v61  ;;  %v17317_v20 = vsub.f32 %v8624_v0, %v8624_v0  ;;  %v7017_v61 = vadd.f32 %v7016_v8, %v6965_v31  ;;  %v7961_v16 = vsub.f32 %v17288_v62, %v7960_v45  ;;  %v8002_v31 = vand.u32 4294901760, %v17420_v22  ;;  %v20878_v8 = vld [vmem:[#allocation194_spill] sm:$0xff] }
 0x663   :  { %7810 = vmatpush.msra.mxu3 %v17110_v5  ;;  %7671 = vmatmul.f32.vlgmr.msra.gmra.mxu0 %v20849_v9  ;;  %v17367_v24 = vsub.f32 %v8621_v3, %v8621_v3  ;;  %v7978_v54 = vand.u32 4294901760, %v17335_v50  ;;  %v7968_v26 = vand.u32 4294901760, %v7967_v51  ;;  %v17461_v0 = vsub.f32 %v8617_v34, %v8617_v34 }
 0x664   :  { %7700 = vmatpush.msra.mxu1 %v17069_v49  ;;  %8644 = vmatpush.msk.msrb.mxu0 %vm7830_vm9, %v20858_v38  ;;  %v7955_v49 = vsub.f32 %v17269_v30, %v7954_v56  ;;  %v7972_v17 = vand.u32 4294901760, %v17317_v20  ;;  %v7962_v13 = vand.u32 4294901760, %v7961_v16  ;;  %vm18848_vm13 = vcmp.eq.s32.totalorder %v20878_v8, %v20864_v15 }
 0x665   :  { %7774 = vmatpush.msra.mxu2 %v7615_v52  ;;  %v7052_v52 = vpop.f32.mrf.mxu1  ;;  %8660 = vmatpush.msk.msrb.mxu3 %vm7830_vm9, %v20858_v38  ;;  %v7990_v43 = vand.u32 4294901760, %v17367_v24  ;;  %v7979_v40 = vsub.f32 %v17335_v50, %v7978_v54  ;;  %v8008_v3 = vand.u32 4294901760, %v17440_v60 }
 0x666   :  { %7702 = vmatpush.msra.mxu1 %v17084_v1  ;;  %8645 = vmatpush.msk.msrb.mxu0 %vm7829_vm1, %v20858_v38  ;;  %v17352_v1 = vsub.f32 %v8622_v36, %v8622_v36  ;;  %v7053_v14 = vadd.f32 %v7052_v52, %v7017_v61  ;;  %v7956_v27 = vand.u32 4294901760, %v7955_v49  ;;  %v7973_v18 = vsub.f32 %v17317_v20, %v7972_v17  ;;  %v20879_v52 = vld [vmem:[#allocation182_spill] sm:$0xff] }
 0x667   :  { %8055 = vmatpush.msrb.mxu2 %v17269_v30  ;;  %8661 = vmatpush.msk.msrb.mxu3 %vm7829_vm1, %v20858_v38  ;;  %v7991_v25 = vsub.f32 %v17367_v24, %v7990_v43  ;;  %v7980_v4 = vand.u32 4294901760, %v7979_v40  ;;  %v8615_v36 = vsel %vm18849_vm0, 1.0, %v20849_v9  ;;  %v17482_v61 = vsub.f32 %v8616_v46, %v8616_v46  ;;  %v20882_v30 = vld [vmem:[#allocation296_spill] sm:$0xff] }
 0x668   :  { %7775 = vmatmul.f32.vlgmr.msra.gmra.mxu2 %v20858_v38  ;;  %7704 = vmatpush.msra.mxu1 %v17097_v63  ;;  %v8620_v63 = vsel %vm7823_vm15, 1.0, %v20849_v9  ;;  %v7121_v35 = vadd.f32 %v7120_v28, %v7053_v14  ;;  %v7974_v58 = vand.u32 4294901760, %v7973_v18  ;;  %vm18847_vm5 = vcmp.eq.s32.totalorder %v20879_v52, %v20864_v15 }
 0x669   :  { %8646 = vmatpush.msk.msrb.mxu0 %vm7828_vm14, %v20858_v38  ;;  %8058 = vmatpush.msrb.mxu2 %v17288_v62  ;;  %v17402_v23 = vsub.f32 %v8620_v63, %v8620_v63  ;;  %v7992_v16 = vand.u32 4294901760, %v7991_v25  ;;  %v8614_v14 = vsel %vm18848_vm13, 1.0, %v20849_v9  ;;  %v17505_v51 = vsub.f32 %v8615_v36, %v8615_v36  ;;  %v20885_v62 = vld [vmem:[#allocation277_spill] sm:$0xff] }
 0x66a   :  { %7706 = vmatpush.msra.mxu1 %v17110_v5  ;;  %7811 = vmatmul.f32.vlgmr.msra.gmra.mxu3 %v20858_v38  ;;  %v7984_v5 = vand.u32 4294901760, %v17352_v1  ;;  %v7157_v37 = vadd.f32 %v7156_v2, %v7121_v35  ;;  %v8014_v28 = vand.u32 4294901760, %v17461_v0  ;;  %v8009_v33 = vsub.f32 %v17440_v60, %v8008_v3 }
 0x66b   :  { %8647 = vmatpush.msk.msrb.mxu0 %vm7827_vm12, %v20858_v38  ;;  %8061 = vmatpush.msrb.mxu2 %v17304_v47  ;;  %v7996_v53 = vand.u32 4294901760, %v17402_v23  ;;  %v17526_v35 = vsub.f32 %v8614_v14, %v8614_v14  ;;  %v8612_v2 = vsel %vm18851_vm11, 1.0, %v20849_v9  ;;  %v8026_v25 = vand.u32 4294901760, %v17505_v51 }
 0x66c   :  { %8662 = vmatpush.msk.msrb.mxu3 %vm7828_vm14, %v20858_v38  ;;  %7707 = vmatmul.f32.vlgmr.msra.gmra.mxu1 %v20849_v9  ;;  %v7985_v44 = vsub.f32 %v17352_v1, %v7984_v5  ;;  %v17495_v63 = vand.u32 4294901760, %v7157_v37  ;;  %v8015_v34 = vsub.f32 %v17461_v0, %v8014_v28 }
 0x66d   :  { %8648 = vmatpush.msk.msrb.mxu0 %vm7826_vm3, %v20858_v38  ;;  %7957 = vmatpush.msrb.mxu1 %v7956_v27  ;;  %v7997_v49 = vsub.f32 %v17402_v23, %v7996_v53  ;;  %v8003_v27 = vsub.f32 %v17420_v22, %v8002_v31 }
 0x66e   :  { %8064 = vmatpush.msrb.mxu2 %v17317_v20  ;;  %8663 = vmatpush.msk.msrb.mxu3 %vm7827_vm12, %v20858_v38  ;;  %v7986_v41 = vand.u32 4294901760, %v7985_v44  ;;  %v7944_v40 = vsub.f32 %v7157_v37, %v17495_v63  ;;  %v8010_v37 = vand.u32 4294901760, %v8009_v33 }
 0x66f   :  { %8649 = vmatpush.msk.msrb.mxu0 %vm7825_vm8, %v20858_v38  ;;  %7963 = vmatpush.msrb.mxu1 %v7962_v13  ;;  %v8613_v13 = vsel %vm18847_vm5, 1.0, %v20849_v9  ;;  %v7998_v18 = vand.u32 4294901760, %v7997_v49  ;;  %v8004_v44 = vand.u32 4294901760, %v8003_v27  ;;  %v8016_v49 = vand.u32 4294901760, %v8015_v34 }
 0x670   :  { %8067 = vmatpush.msrb.mxu2 %v17335_v50  ;;  %8664 = vmatpush.msk.msrb.mxu3 %vm7826_vm3, %v20858_v38  ;;  %v7945_v36 = vand.u32 4294901760, %v7944_v40 }
 0x671   :  { %8650 = vmatpush.msk.msrb.mxu0 %vm7824_vm7, %v20858_v38  ;;  %7969 = vmatpush.msrb.mxu1 %v7968_v26  ;;  %v8020_v26 = vand.u32 4294901760, %v17482_v61 }
 0x672   :  { %8070 = vmatpush.msrb.mxu2 %v17352_v1  ;;  %8665 = vmatpush.msk.msrb.mxu3 %vm7825_vm8, %v20858_v38  ;;  %v7946_v33 = vsub.f32 %v7944_v40, %v7945_v36 }
 0x673   :  { %8651 = vmatpush.msk.msrb.mxu0 %vm7823_vm15, %v20858_v38  ;;  %7975 = vmatpush.msrb.mxu1 %v7974_v58  ;;  %v17546_v58 = vsub.f32 %v8613_v13, %v8613_v13  ;;  %v8021_v46 = vsub.f32 %v17482_v61, %v8020_v26 }
 0x674   :  { %8073 = vmatpush.msrb.mxu2 %v17367_v24  ;;  %8666 = vmatpush.msk.msrb.mxu3 %vm7824_vm7, %v20858_v38 }
 0x675   :  { %8652 = vmatpush.msk.msrb.mxu0 %vm7822_vm10, %v20858_v38  ;;  %7981 = vmatpush.msrb.mxu1 %v7980_v4  ;;  %v17561_v4 = vsub.f32 %v8612_v2, %v8612_v2  ;;  %v8038_v14 = vand.u32 4294901760, %v17546_v58  ;;  %v8022_v27 = vand.u32 4294901760, %v8021_v46  ;;  %v7947_v46 = vand.u32 4294901760, %v7946_v33 }
 0x676   :  { %8076 = vmatpush.msrb.mxu2 %v17402_v23  ;;  %8667 = vmatpush.msk.msrb.mxu3 %vm7823_vm15, %v20858_v38 }
 0x677   :  { %8653 = vmatpush.msk.msrb.mxu0 %vm7821_vm2, %v20858_v38  ;;  %7987 = vmatpush.msrb.mxu1 %v7986_v41  ;;  %v8032_v41 = vand.u32 4294901760, %v17526_v35 }
 0x678   :  { %8079 = vmatpush.msrb.mxu2 %v17420_v22  ;;  %8668 = vmatpush.msk.msrb.mxu3 %vm7822_vm10, %v20858_v38  ;;  %v20889_v22 = vld [vmem:[#allocation238_spill] sm:$0xff] }
 0x679   :  { %8654 = vmatpush.msk.msrb.mxu0 %vm7820_vm6, %v20858_v38  ;;  %7993 = vmatpush.msrb.mxu1 %v7992_v16  ;;  %v8027_v16 = vsub.f32 %v17505_v51, %v8026_v25  ;;  %v8033_v13 = vsub.f32 %v17526_v35, %v8032_v41 }
 0x67a   :  { %8082 = vmatpush.msrb.mxu2 %v17440_v60  ;;  %8669 = vmatpush.msk.msrb.mxu3 %vm7821_vm2, %v20858_v38  ;;  %v20890_v60 = vld [vmem:[#allocation44_spill] sm:$0xff] }
 0x67b   :  { %8655 = vmatpush.msk.msrb.mxu0 %vm18850_vm4, %v20858_v38  ;;  %7999 = vmatpush.msrb.mxu1 %v7998_v18  ;;  %v8044_v18 = vand.u32 4294901760, %v17561_v4  ;;  %v8028_v2 = vand.u32 4294901760, %v8027_v16  ;;  %v8034_v34 = vand.u32 4294901760, %v8033_v13 }
 0x67c   :  { %8085 = vmatpush.msrb.mxu2 %v17461_v0  ;;  %8670 = vmatpush.msk.msrb.mxu3 %vm7820_vm6, %v20858_v38  ;;  %v20891_v0 = vld [vmem:[#allocation219_spill] sm:$0xff] }
 0x67d   :  { %8656 = vmatpush.msk.msrb.mxu0 %vm18849_vm0, %v20858_v38  ;;  %8005 = vmatpush.msrb.mxu1 %v8004_v44  ;;  %v8039_v44 = vsub.f32 %v17546_v58, %v8038_v14 }
 0x67e   :  { %8088 = vmatpush.msrb.mxu2 %v17482_v61  ;;  %8671 = vmatpush.msk.msrb.mxu3 %vm18850_vm4, %v20858_v38  ;;  %v20893_v61 = vld [vmem:[#allocation202_spill] sm:$0xff] }
 0x67f   :  { %8657 = vmatpush.msk.msrb.mxu0 %vm18848_vm13, %v20858_v38  ;;  %8011 = vmatpush.msrb.mxu1 %v8010_v37  ;;  %v8045_v37 = vsub.f32 %v17561_v4, %v8044_v18 }
 0x680   :  { %8091 = vmatpush.msrb.mxu2 %v17505_v51  ;;  %8672 = vmatpush.msk.msrb.mxu3 %vm18849_vm0, %v20858_v38  ;;  %v20896_v51 = vld [vmem:[#allocation180_spill] sm:$0xff] }
 0x681   :  { %8658 = vmatpush.msk.msrb.mxu0 %vm18847_vm5, %v20858_v38  ;;  %8017 = vmatpush.msrb.mxu1 %v8016_v49  ;;  %v8040_v49 = vand.u32 4294901760, %v8039_v44  ;;  %v8046_v16 = vand.u32 4294901760, %v8045_v37 }
 0x682   :  { %8094 = vmatpush.msrb.mxu2 %v17526_v35  ;;  %8673 = vmatpush.msk.msrb.mxu3 %vm18848_vm13, %v20858_v38  ;;  %vm7844_vm13 = vcmp.eq.s32.totalorder %v20882_v30, %v20864_v15  ;;  %v20898_v35 = vld [vmem:[#allocation176_spill] sm:$0xff] }
 0x683   :  { %8659 = vmatpush.msk.msrb.mxu0 %vm18851_vm11, %v20858_v38  ;;  %8023 = vmatpush.msrb.mxu1 %v8022_v27  ;;  %v20881_v27 = vld [vmem:[#allocation288_spill] sm:$0xff] }
 0x684   :  { %8097 = vmatpush.msrb.mxu2 %v17546_v58  ;;  %8674 = vmatpush.msk.msrb.mxu3 %vm18847_vm5, %v20858_v38  ;;  %vm7843_vm5 = vcmp.eq.s32.totalorder %v20881_v27, %v20864_v15 }
 0x685   :  { %8149 = vmatpush.msra.mxu0 %v7954_v56  ;;  %8029 = vmatpush.msrb.mxu1 %v8028_v2  ;;  %v20883_v56 = vld [vmem:[#allocation38_spill] sm:$0xff]  ;;  %v8640_v20 = vsel %vm7843_vm5, 1.0, %v20849_v9 }
 0x686   :  { %8100 = vmatpush.msrb.mxu2 %v17561_v4  ;;  %8675 = vmatpush.msk.msrb.mxu3 %vm18851_vm11, %v20858_v38  ;;  %vm7845_vm0 = vcmp.eq.s32.totalorder %v20883_v56, %v20864_v15  ;;  %vm7842_vm11 = vcmp.eq.s32.totalorder %v20885_v62, %v20864_v15  ;;  %v17682_v2 = vsub.f32 %v8640_v20, %v8640_v20 }
 0x687   :  { %8103 = vmatmul.f32.vlgmr.msrb.gmra.mxu2 %v7944_v40  ;;  %8153 = vmatpush.msra.mxu0 %v7960_v45  ;;  %v20884_v40 = vld [vmem:[#allocation313_spill] sm:$0xff]  ;;  %v8642_v45 = vsel %vm7845_vm0, 1.0, %v20849_v9  ;;  %v8639_v33 = vsel %vm7842_vm11, 1.0, %v20849_v9 }
 0x688   :  { %8035 = vmatpush.msrb.mxu1 %v8034_v34  ;;  %8142 = vmatmul.f32.vlgmr.msrb.gmra.mxu3 %v7945_v36  ;;  %vm7846_vm4 = vcmp.eq.s32.totalorder %v20884_v40, %v20864_v15  ;;  %v17674_v36 = vsub.f32 %v8642_v45, %v8642_v45  ;;  %v17684_v50 = vsub.f32 %v8639_v33, %v8639_v33  ;;  %v8313_v34 = vand.u32 4294901760, %v17682_v2 }
 0x689   :  { %7948 = vmatmul.f32.vlgmr.msrb.gmra.mxu0 %v7947_v46  ;;  %8692 = vmatpush.msk.msra.mxu2 %vm7846_vm4, %v20858_v38  ;;  %v8643_v47 = vsel %vm7846_vm4, 1.0, %v20849_v9 }
 0x68a   :  { %8157 = vmatpush.msra.mxu0 %v7966_v48  ;;  %8041 = vmatpush.msrb.mxu1 %v8040_v49  ;;  %v8641_v48 = vsel %vm7844_vm13, 1.0, %v20849_v9  ;;  %v8319_v24 = vand.u32 4294901760, %v17684_v50  ;;  %v8314_v46 = vsub.f32 %v17682_v2, %v8313_v34  ;;  %v20887_v49 = vld [vmem:[#allocation256_spill] sm:$0xff] }
 0x68b   :  { %8693 = vmatpush.msk.msra.mxu2 %vm7845_vm0, %v20858_v38  ;;  %v17676_v13 = vsub.f32 %v8641_v48, %v8641_v48 }
 0x68c   :  { %8161 = vmatpush.msra.mxu0 %v7972_v17  ;;  %8047 = vmatpush.msrb.mxu1 %v8046_v16  ;;  %v17672_v17 = vsub.f32 %v8643_v47, %v8643_v47  ;;  %v8320_v23 = vsub.f32 %v17684_v50, %v8319_v24  ;;  %v8315_v7 = vand.u32 4294901760, %v8314_v46 }
 0x68d   :  { %8049 = vmatmul.f32.vlgmr.msrb.gmra.mxu1 %v17495_v63  ;;  %8694 = vmatpush.msk.msra.mxu2 %vm7844_vm13, %v20858_v38  ;;  %v8307_v44 = vand.u32 4294901760, %v17676_v13 }
 0x68e   :  { %8165 = vmatpush.msra.mxu0 %v7978_v54  ;;  %8676 = vmatpush.msk.msra.mxu1 %vm7830_vm9, %v20858_v38  ;;  %v8295_v55 = vand.u32 4294901760, %v17672_v17  ;;  %v8301_v54 = vand.u32 4294901760, %v17674_v36  ;;  %vm18852_vm9 = vcmp.eq.s32.totalorder %v20886_v21, %v20864_v15  ;;  %v8321_v10 = vand.u32 4294901760, %v8320_v23 }
 0x68f   :  { %8695 = vmatpush.msk.msra.mxu2 %vm7843_vm5, %v20858_v38  ;;  %v8638_v42 = vsel %vm18852_vm9, 1.0, %v20849_v9 }
 0x690   :  { %8169 = vmatpush.msra.mxu0 %v7984_v5  ;;  %8677 = vmatpush.msk.msra.mxu1 %vm7829_vm1, %v20858_v38  ;;  %v8296_v19 = vsub.f32 %v17672_v17, %v8295_v55  ;;  %v8302_v1 = vsub.f32 %v17674_v36, %v8301_v54  ;;  %v8308_v5 = vsub.f32 %v17676_v13, %v8307_v44 }
 0x691   :  { %8696 = vmatpush.msk.msra.mxu2 %vm7842_vm11, %v20858_v38  ;;  %vm7840_vm1 = vcmp.eq.s32.totalorder %v20887_v49, %v20864_v15  ;;  %v17802_v29 = vsub.f32 %v8638_v42, %v8638_v42 }
 0x692   :  { %8173 = vmatpush.msra.mxu0 %v7990_v43  ;;  %8678 = vmatpush.msk.msra.mxu1 %vm7828_vm14, %v20858_v38  ;;  %v8297_v43 = vand.u32 4294901760, %v8296_v19  ;;  %v8303_v37 = vand.u32 4294901760, %v8302_v1  ;;  %v8309_v57 = vand.u32 4294901760, %v8308_v5 }
 0x693   :  { %8697 = vmatpush.msk.msra.mxu2 %vm18852_vm9, %v20858_v38  ;;  %v8325_v12 = vand.u32 4294901760, %v17802_v29  ;;  %vm20897_vm9 = vcmp.eq.s32.totalorder %v20877_v59, %v20864_v15 }
 0x694   :  { %8177 = vmatpush.msra.mxu0 %v7996_v53  ;;  %8679 = vmatpush.msk.msra.mxu1 %vm7827_vm12, %v20858_v38  ;;  %v20888_v53 = vld [vmem:[#allocation247_spill] sm:$0xff]  ;;  %vm7838_vm12 = vcmp.eq.s32.totalorder %v20889_v22, %v20864_v15 }
 0x695   :  { %8298 = vmatpush.msra.mxu3 %v8297_v43  ;;  %8698 = vmatpush.msk.msra.mxu2 %vm7840_vm1, %v20858_v38  ;;  %vm7839_vm14 = vcmp.eq.s32.totalorder %v20888_v53, %v20864_v15  ;;  %v8326_v11 = vsub.f32 %v17802_v29, %v8325_v12 }
 0x696   :  { %8181 = vmatpush.msra.mxu0 %v8002_v31  ;;  %8680 = vmatpush.msk.msra.mxu1 %vm7826_vm3, %v20858_v38  ;;  %vm7837_vm3 = vcmp.eq.s32.totalorder %v20890_v60, %v20864_v15  ;;  %v20892_v31 = vld [vmem:[#allocation211_spill] sm:$0xff]  ;;  %v8636_v59 = vsel %vm7839_vm14, 1.0, %v20849_v9 }
 0x697   :  { %8304 = vmatpush.msra.mxu3 %v8303_v37  ;;  %8699 = vmatpush.msk.msra.mxu2 %vm7839_vm14, %v20858_v38  ;;  %v8327_v6 = vand.u32 4294901760, %v8326_v11  ;;  %v17877_v58 = vsub.f32 %v8636_v59, %v8636_v59 }
 0x698   :  { %8185 = vmatpush.msra.mxu0 %v8008_v3  ;;  %8681 = vmatpush.msk.msra.mxu1 %vm7825_vm8, %v20858_v38  ;;  %vm7836_vm8 = vcmp.eq.s32.totalorder %v20891_v0, %v20864_v15  ;;  %v20894_v3 = vld [vmem:[#allocation79_spill] sm:$0xff] }
 0x699   :  { %8310 = vmatpush.msra.mxu3 %v8309_v57  ;;  %8700 = vmatpush.msk.msra.mxu2 %vm7838_vm12, %v20858_v38  ;;  %v8337_v4 = vand.u32 4294901760, %v17877_v58  ;;  %v8633_v48 = vsel %vm7836_vm8, 1.0, %v20849_v9 }
 0x69a   :  { %8189 = vmatpush.msra.mxu0 %v8014_v28  ;;  %8682 = vmatpush.msk.msra.mxu1 %vm7824_vm7, %v20858_v38  ;;  %vm7835_vm7 = vcmp.eq.s32.totalorder %v20892_v31, %v20864_v15  ;;  %v8354_v20 = vsub.f32 %v8633_v48, %v8633_v48 }
 0x69b   :  { %8316 = vmatpush.msra.mxu3 %v8315_v7  ;;  %8701 = vmatpush.msk.msra.mxu2 %vm7837_vm3, %v20858_v38 }
 0x69c   :  { %8193 = vmatpush.msra.mxu0 %v8020_v26  ;;  %8683 = vmatpush.msk.msra.mxu1 %vm7823_vm15, %v20858_v38  ;;  %vm7834_vm15 = vcmp.eq.s32.totalorder %v20893_v61, %v20864_v15  ;;  %v8355_v33 = vand.u32 4294901760, %v8354_v20 }
 0x69d   :  { %8322 = vmatpush.msra.mxu3 %v8321_v10  ;;  %8702 = vmatpush.msk.msra.mxu2 %vm7836_vm8, %v20858_v38 }
 0x69e   :  { %8197 = vmatpush.msra.mxu0 %v8026_v25  ;;  %8684 = vmatpush.msk.msra.mxu1 %vm7822_vm10, %v20858_v38  ;;  %vm7833_vm10 = vcmp.eq.s32.totalorder %v20894_v3, %v20864_v15 }
 0x69f   :  { %8703 = vmatpush.msk.msra.mxu2 %vm7835_vm7, %v20858_v38  ;;  %8328 = vmatpush.msra.mxu3 %v8327_v6 }
 0x6a0   :  { %8201 = vmatpush.msra.mxu0 %v8032_v41  ;;  %8685 = vmatpush.msk.msra.mxu1 %vm7821_vm2, %v20858_v38  ;;  %vm20895_vm2 = vcmp.eq.s32.totalorder %v20876_v39, %v20864_v15  ;;  %v8637_v39 = vsel %vm7840_vm1, 1.0, %v20849_v9 }
 0x6a1   :  { %8704 = vmatpush.msk.msra.mxu2 %vm7834_vm15, %v20858_v38  ;;  %v17859_v28 = vsub.f32 %v8637_v39, %v8637_v39 }
 0x6a2   :  { %8205 = vmatpush.msra.mxu0 %v8038_v14  ;;  %8686 = vmatpush.msk.msra.mxu1 %vm7820_vm6, %v20858_v38  ;;  %vm7832_vm6 = vcmp.eq.s32.totalorder %v20896_v51, %v20864_v15 }
 0x6a3   :  { %8705 = vmatpush.msk.msra.mxu2 %vm7833_vm10, %v20858_v38  ;;  %v8331_v26 = vand.u32 4294901760, %v17859_v28 }
 0x6a4   :  { %8209 = vmatpush.msra.mxu0 %v8044_v18  ;;  %8687 = vmatpush.msk.msra.mxu1 %vm20895_vm2, %v20858_v38  ;;  %vm7831_vm2 = vcmp.eq.s32.totalorder %v20898_v35, %v20864_v15  ;;  %v8338_v18 = vsub.f32 %v17877_v58, %v8337_v4 }
 0x6a5   :  { %8211 = vmatmul.f32.vlgmr.msra.gmra.mxu0 %v17495_v63  ;;  %8706 = vmatpush.msk.msra.mxu2 %vm7832_vm6, %v20858_v38  ;;  %v8332_v25 = vsub.f32 %v17859_v28, %v8331_v26  ;;  %v8628_v43 = vsel %vm7831_vm2, 1.0, %v20849_v9 }
 0x6a6   :  { %8688 = vmatpush.msk.msra.mxu1 %vm20897_vm9, %v20858_v38  ;;  %8396 = vmatpush.msrb.mxu0 %v17672_v17  ;;  %vm20899_vm9 = vcmp.eq.s32.totalorder %v20878_v8, %v20864_v15  ;;  %v8635_v8 = vsel %vm7838_vm12, 1.0, %v20849_v9  ;;  %v8384_v10 = vsub.f32 %v8628_v43, %v8628_v43 }
 0x6a7   :  { %8707 = vmatpush.msk.msra.mxu2 %vm7831_vm2, %v20858_v38  ;;  %v17896_v41 = vsub.f32 %v8635_v8, %v8635_v8  ;;  %v8333_v14 = vand.u32 4294901760, %v8332_v25 }
 0x6a8   :  { %8689 = vmatpush.msk.msra.mxu1 %vm20899_vm9, %v20858_v38  ;;  %8399 = vmatpush.msrb.mxu0 %v17674_v36  ;;  %vm20900_vm9 = vcmp.eq.s32.totalorder %v20879_v52, %v20864_v15  ;;  %v8634_v52 = vsel %vm7837_vm3, 1.0, %v20849_v9  ;;  %v8385_v11 = vand.u32 4294901760, %v8384_v10 }
 0x6a9   :  { %8490 = vmatpush.msrb.mxu2 %v8295_v55  ;;  %v8343_v16 = vand.u32 4294901760, %v17896_v41  ;;  %v17914_v47 = vsub.f32 %v8634_v52, %v8634_v52  ;;  %8334 = vmatpush.msra.mxu3 %v8333_v14 }
 0x6aa   :  { %8690 = vmatpush.msk.msra.mxu1 %vm20900_vm9, %v20858_v38  ;;  %8402 = vmatpush.msrb.mxu0 %v17676_v13  ;;  %vm20901_vm9 = vcmp.eq.s32.totalorder %v20880_v32, %v20864_v15  ;;  %v8632_v13 = vsel %vm7835_vm7, 1.0, %v20849_v9 }
 0x6ab   :  { %8494 = vmatpush.msrb.mxu2 %v8301_v54  ;;  %v8344_v32 = vsub.f32 %v17896_v41, %v8343_v16  ;;  %v8349_v45 = vand.u32 4294901760, %v17914_v47  ;;  %v8360_v55 = vsub.f32 %v8632_v13, %v8632_v13  ;;  %v8631_v54 = vsel %vm7834_vm15, 1.0, %v20849_v9 }
 0x6ac   :  { %8691 = vmatpush.msk.msra.mxu1 %vm20901_vm9, %v20858_v38  ;;  %8405 = vmatpush.msrb.mxu0 %v17682_v2  ;;  %v8366_v1 = vsub.f32 %v8631_v54, %v8631_v54  ;;  %vm20902_vm9 = vcmp.eq.s32.totalorder %v20886_v21, %v20864_v15 }
 0x6ad   :  { %8248 = vmatmul.f32.vlgmr.msra.gmra.mxu1 %v17495_v63  ;;  %8498 = vmatpush.msrb.mxu2 %v8307_v44  ;;  %v8339_v63 = vand.u32 4294901760, %v8338_v18  ;;  %v8345_v17 = vand.u32 4294901760, %v8344_v32  ;;  %v8350_v36 = vsub.f32 %v17914_v47, %v8349_v45  ;;  %v8630_v44 = vsel %vm7833_vm10, 1.0, %v20849_v9 }
 0x6ae   :  { %8708 = vmatpush.msk.msrb.mxu1 %vm7846_vm4, %v20858_v38  ;;  %8408 = vmatpush.msrb.mxu0 %v17684_v50  ;;  %v8356_v50 = vsub.f32 %v8354_v20, %v8355_v33  ;;  %v8361_v19 = vand.u32 4294901760, %v8360_v55  ;;  %v8372_v5 = vsub.f32 %v8630_v44, %v8630_v44  ;;  %v8367_v57 = vand.u32 4294901760, %v8366_v1 }
 0x6af   :  { %8502 = vmatpush.msrb.mxu2 %v8313_v34  ;;  %8340 = vmatpush.msra.mxu3 %v8339_v63  ;;  %v8351_v2 = vand.u32 4294901760, %v8350_v36  ;;  %v8629_v34 = vsel %vm7832_vm6, 1.0, %v20849_v9 }
 0x6b0   :  { %8709 = vmatpush.msk.msrb.mxu1 %vm7845_vm0, %v20858_v38  ;;  %8411 = vmatpush.msrb.mxu0 %v17802_v29  ;;  %v8357_v37 = vand.u32 4294901760, %v8356_v50  ;;  %v8362_v46 = vsub.f32 %v8360_v55, %v8361_v19  ;;  %v8373_v23 = vand.u32 4294901760, %v8372_v5  ;;  %v8368_v29 = vsub.f32 %v8366_v1, %v8367_v57 }
 0x6b1   :  { %8506 = vmatpush.msrb.mxu2 %v8319_v24  ;;  %8346 = vmatpush.msra.mxu3 %v8345_v17  ;;  %v8378_v24 = vsub.f32 %v8629_v34, %v8629_v34 }
 0x6b2   :  { %8710 = vmatpush.msk.msrb.mxu1 %vm7844_vm13, %v20858_v38  ;;  %8414 = vmatpush.msrb.mxu0 %v17859_v28  ;;  %v8363_v42 = vand.u32 4294901760, %v8362_v46  ;;  %v8374_v9 = vsub.f32 %v8372_v5, %v8373_v23  ;;  %v8369_v6 = vand.u32 4294901760, %v8368_v29  ;;  %v8386_v28 = vsub.f32 %v8384_v10, %v8385_v11 }
 0x6b3   :  { %8510 = vmatpush.msrb.mxu2 %v8325_v12  ;;  %8352 = vmatpush.msra.mxu3 %v8351_v2  ;;  %v8379_v7 = vand.u32 4294901760, %v8378_v24 }
 0x6b4   :  { %8711 = vmatpush.msk.msrb.mxu1 %vm7843_vm5, %v20858_v38  ;;  %8417 = vmatpush.msrb.mxu0 %v17877_v58  ;;  %v8375_v39 = vand.u32 4294901760, %v8374_v9 }
 0x6b5   :  { %8514 = vmatpush.msrb.mxu2 %v8331_v26  ;;  %8358 = vmatpush.msra.mxu3 %v8357_v37  ;;  %v8380_v12 = vsub.f32 %v8378_v24, %v8379_v7  ;;  %v8387_v26 = vand.u32 4294901760, %v8386_v28 }
 0x6b6   :  { %8712 = vmatpush.msk.msrb.mxu1 %vm7842_vm11, %v20858_v38  ;;  %8420 = vmatpush.msrb.mxu0 %v17896_v41 }
 0x6b7   :  { %8518 = vmatpush.msrb.mxu2 %v8337_v4  ;;  %8364 = vmatpush.msra.mxu3 %v8363_v42  ;;  %v8381_v59 = vand.u32 4294901760, %v8380_v12 }
 0x6b8   :  { %8713 = vmatpush.msk.msrb.mxu1 %vm20902_vm9, %v20858_v38  ;;  %8423 = vmatpush.msrb.mxu0 %v17914_v47 }
 0x6b9   :  { %8522 = vmatpush.msrb.mxu2 %v8343_v16  ;;  %8370 = vmatpush.msra.mxu3 %v8369_v6  ;;  %v7192_v27 = vpop.f32.mrf.mxu0 }
 0x6ba   :  { %8714 = vmatpush.msk.msrb.mxu1 %vm7840_vm1, %v20858_v38  ;;  %8426 = vmatpush.msrb.mxu0 %v8354_v20 }
 0x6bb   :  { %8526 = vmatpush.msrb.mxu2 %v8349_v45  ;;  %8376 = vmatpush.msra.mxu3 %v8375_v39 }
 0x6bc   :  { %8715 = vmatpush.msk.msrb.mxu1 %vm7839_vm14, %v20858_v38  ;;  %8429 = vmatpush.msrb.mxu0 %v8360_v55 }
 0x6bd   :  { %8530 = vmatpush.msrb.mxu2 %v8355_v33  ;;  %8382 = vmatpush.msra.mxu3 %v8381_v59 }
 0x6be   :  { %8716 = vmatpush.msk.msrb.mxu1 %vm7838_vm12, %v20858_v38  ;;  %8432 = vmatpush.msrb.mxu0 %v8366_v1 }
 0x6bf   :  { %8534 = vmatpush.msrb.mxu2 %v8361_v19  ;;  %8388 = vmatpush.msra.mxu3 %v8387_v26 }
 0x6c0   :  { %8717 = vmatpush.msk.msrb.mxu1 %vm7837_vm3, %v20858_v38  ;;  %8435 = vmatpush.msrb.mxu0 %v8372_v5 }
 0x6c1   :  { %8724 = vmatpush.msk.msrb.mxu3 %vm7846_vm4, %v20858_v38  ;;  %8538 = vmatpush.msrb.mxu2 %v8367_v57  ;;  %vm20903_vm4 = vmmov %vm20902_vm9  ;;  %v7344_v40 = vpop.f32.mrf.mxu2 }
 0x6c2   :  { %8718 = vmatpush.msk.msrb.mxu1 %vm7836_vm8, %v20858_v38  ;;  %8438 = vmatpush.msrb.mxu0 %v8378_v24  ;;  %v7292_v30 = vpop.f32.mrf.mxu1 }
 0x6c3   :  { %8725 = vmatpush.msk.msrb.mxu3 %vm7845_vm0, %v20858_v38  ;;  %8542 = vmatpush.msrb.mxu2 %v8373_v23  ;;  %v7293_v56 = vadd.f32 %v7292_v30, %v7192_v27  ;;  %vm8594_vm0 = vcmask 253952  }
 0x6c4   :  { %8719 = vmatpush.msk.msrb.mxu1 %vm7835_vm7, %v20858_v38  ;;  %8441 = vmatpush.msrb.mxu0 %v8384_v10  ;;  %v7380_v21 = vpop.f32.mrf.mxu3 }
 0x6c5   :  { %8726 = vmatpush.msk.msrb.mxu3 %vm7844_vm13, %v20858_v38  ;;  %8546 = vmatpush.msrb.mxu2 %v8379_v7  ;;  %v7345_v62 = vadd.f32 %v7344_v40, %v7293_v56 }
 0x6c6   :  { %8720 = vmatpush.msk.msrb.mxu1 %vm7834_vm15, %v20858_v38 }
 0x6c7   :  { %8727 = vmatpush.msk.msrb.mxu3 %vm7843_vm5, %v20858_v38  ;;  %8550 = vmatpush.msrb.mxu2 %v8385_v11  ;;  %v7381_v49 = vadd.f32 %v7380_v21, %v7345_v62 }
 0x6c8   :  { %8721 = vmatpush.msk.msrb.mxu1 %vm7833_vm10, %v20858_v38 }
 0x6c9   :  { %8728 = vmatpush.msk.msrb.mxu3 %vm7842_vm11, %v20858_v38 }
 0x6ca   :  { %8722 = vmatpush.msk.msrb.mxu1 %vm7832_vm6, %v20858_v38 }
 0x6cb   :  { %8729 = vmatpush.msk.msrb.mxu3 %vm20903_vm4, %v20858_v38  ;;  %v7448_v53 = vpop.f32.mrf.mxu0 }
 0x6cc   :  { %8723 = vmatpush.msk.msrb.mxu1 %vm7831_vm2, %v20858_v38  ;;  %v7449_v22 = vadd.f32 %v7448_v53, %v7381_v49 }
 0x6cd   :  { %8730 = vmatpush.msk.msrb.mxu3 %vm7840_vm1, %v20858_v38 }
 0x6ce   :  { %v7484_v60 = vpop.f32.mrf.mxu1  ;;  %v7520_v31 = vpop.f32.mrf.mxu2 }
 0x6cf   :  { %8731 = vmatpush.msk.msrb.mxu3 %vm7839_vm14, %v20858_v38  ;;  %v7485_v0 = vadd.f32 %v7484_v60, %v7449_v22 }
 0x6d1   :  { %8732 = vmatpush.msk.msrb.mxu3 %vm7838_vm12, %v20858_v38  ;;  %v7521_v61 = vadd.f32 %v7520_v31, %v7485_v0  ;;  %v7620_v58 = vpop.f32.mrf.mxu3 }
 0x6d3   :  { %8733 = vmatpush.msk.msrb.mxu3 %vm7837_vm3, %v20858_v38  ;;  %v7621_v25 = vadd.f32 %v7620_v58, %v7521_v61 }
 0x6d5   :  { %8734 = vmatpush.msk.msrb.mxu3 %vm7836_vm8, %v20858_v38 }
 0x6d7   :  { %8735 = vmatpush.msk.msrb.mxu3 %vm7835_vm7, %v20858_v38 }
 0x6d9   :  { %8736 = vmatpush.msk.msrb.mxu3 %vm7834_vm15, %v20858_v38 }
 0x6db   :  { %8737 = vmatpush.msk.msrb.mxu3 %vm7833_vm10, %v20858_v38 }
 0x6dd   :  { %8738 = vmatpush.msk.msrb.mxu3 %vm7832_vm6, %v20858_v38 }
 0x6df   :  { %8739 = vmatpush.msk.msrb.mxu3 %vm7831_vm2, %v20858_v38 }
 0x6e0   :  { %v7672_v8 = vpop.f32.mrf.mxu0 }
 0x6e1   :  { %v7673_v4 = vadd.f32 %v7672_v8, %v7621_v25 }
 0x6e9   :  { %v7708_v41 = vpop.f32.mrf.mxu1 }
 0x6ea   :  { %v7709_v3 = vadd.f32 %v7708_v41, %v7673_v4 }
 0x6eb   :  { %v7776_v52 = vpop.f32.mrf.mxu2 }
 0x6ec   :  { %v7777_v14 = vadd.f32 %v7776_v52, %v7709_v3 }
 0x6ed   :  { %v7812_v18 = vpop.f32.mrf.mxu3 }
 0x6ee   :  { %v7813_v16 = vadd.f32 %v7812_v18, %v7777_v14 }
 0x6f0   :  { %v8284_v47 = vand.u32 4294901760, %v7813_v16 }
 0x6f2   :  { %v8285_v51 = vsub.f32 %v7813_v16, %v8284_v47  ;;  %8390 = vmatmul.f32.vlgmr.msra.gmra.mxu3 %v8284_v47 }
 0x6f4   :  { %v8286_v63 = vand.u32 4294901760, %v8285_v51  ;;  %8444 = vmatmul.f32.vlgmr.msrb.gmra.mxu0 %v8285_v51 }
 0x6f6   :  { %v8287_v32 = vsub.f32 %v8285_v51, %v8286_v63  ;;  %8483 = vmatmul.f32.vlgmr.msrb.gmra.mxu1 %v8286_v63 }
 0x6f8   :  { %v8288_v15 = vand.u32 4294901760, %v8287_v32 }
 0x6fa   :  { %8289 = vmatmul.f32.vlgmr.msra.gmra.mxu2 %v8288_v15  ;;  %8589 = vmatmul.f32.vlgmr.msrb.gmra.mxu3 %v8284_v47 }
 0x702   :  { %8552 = vmatmul.f32.vlgmr.msrb.gmra.mxu2 %v8284_v47 }
 0x706   :  { %v7949_v35 = vpop.f32.mrf.mxu0 }
 0x70a   :  { %v8050_v38 = vpop.f32.mrf.mxu1  ;;  %v8104_v48 = vpop.f32.mrf.mxu2 }
 0x70b   :  { %v8051_v45 = vadd.f32 %v8050_v38, %v7949_v35  ;;  %v8143_v17 = vpop.f32.mrf.mxu3 }
 0x70d   :  { %v8105_v20 = vadd.f32 %v8104_v48, %v8051_v45 }
 0x70f   :  { %v8144_v13 = vadd.f32 %v8143_v17, %v8105_v20 }
 0x722   :  { %v8212_v36 = vpop.f32.mrf.mxu0 }
 0x723   :  { %v8213_v55 = vadd.f32 %v8212_v36, %v8144_v13 }
 0x72a   :  { %v8249_v33 = vpop.f32.mrf.mxu1 }
 0x72b   :  { %v8250_v2 = vadd.f32 %v8249_v33, %v8213_v55 }
 0x771   :  { %v8445_v19 = vpop.f32.mrf.mxu0 }
 0x773   :  { %v8484_v5 = vpop.f32.mrf.mxu1 }
 0x775   :  { %v8391_v54 = vpop.f32.mrf.mxu3 }
 0x77d   :  { %v8290_v44 = vpop.f32.mrf.mxu2  ;;  %v8590_v46 = vpop.f32.mrf.mxu3 }
 0x77e   :  { %v8291_v34 = vadd.f32 %v8290_v44, %v8250_v2 }
 0x780   :  { %v8392_v50 = vadd.f32 %v8391_v54, %v8291_v34 }
 0x782   :  { %v8446_v1 = vadd.f32 %v8445_v19, %v8392_v50 }
 0x784   :  { %v8485_v24 = vadd.f32 %v8484_v5, %v8446_v1 }
 0x785   :  { %v8553_v43 = vpop.f32.mrf.mxu2 }
 0x786   :  { %v8554_v37 = vadd.f32 %v8553_v43, %v8485_v24 }
 0x788   :  { %v8591_v57 = vadd.f32 %v8590_v46, %v8554_v37 }
 0x78a   :  { %v8593_v23 = vmul.f32 -0.125, %v8591_v57 }
 0x78c   :  { %8595 = vst.msk [vmem:[#allocation2] sm:$0x1] %vm8594_vm0, %v8593_v23 }
 0x78d   :  { %8606 = dma.vmem_to_hbm [thread:$0]  %s8602_s14, 16, %s8604_s17, [#allocation3]  }
 0x78e   :  { %9055 = dma.done.wait [#allocation3], 16  }
 0x78f   :  { %9056 = vsyncadd [#allocation3], 4294967280 }
 0x790   :  { %8611 = vsyncpa [#allocation3], 1 }

</bundles_post_ra>
